<compile_context>
chip_gen: v6e
topology: v6e:2x2x1
jax: 0.10.0
libtpu: 0.0.40
codegen_flags: <defaults>
</compile_context>

<pallas_src>
import functools
import math

import jax
import jax.numpy as jnp
from jax import lax
from jax.experimental import pallas as pl
from jax.experimental.pallas import tpu as pltpu


_VMEM_LIMIT = 32 * 1024 * 1024


def _elu(x):
    # ELU(alpha=1) on the f32 accumulator (exp is the guaranteed EUP lowering).
    return jnp.where(x > 0.0, x, jnp.exp(x) - 1.0)


# -----------------------------------------------------------------------------
# Kernel 1: fused head — Linear + Unflatten + ConvTranspose2d(1024,128,5,2) on a
# 1x1 spatial input (a pure matmul) + ELU, tiled over the k*k*Cout output.
# -----------------------------------------------------------------------------
def _head_kernel(x_ref, wl_ref, bl_ref, wc_ref, bc_ref, o_ref):
    # x:(B,Din) bf16, wl:(Din,1024) bf16, bl:(1,1024) f32,
    # wc:(1024,tn) bf16 tile, bc:(1,tn) f32 tile, o:(B,tn) bf16 tile.
    h = jnp.dot(x_ref[...], wl_ref[...], preferred_element_type=jnp.float32)
    h = h + bl_ref[...]
    acc = jnp.dot(h.astype(jnp.bfloat16), wc_ref[...],
                  preferred_element_type=jnp.float32)
    acc = acc + bc_ref[...]
    o_ref[...] = _elu(acc).astype(o_ref.dtype)


def _pallas_head(x, w_lin, b_lin, w_ct1, b_ct1, *, tn=640):
    B, Din = x.shape
    Cmid = w_lin.shape[0]                               # 1024
    Cin, Cout, k, _ = w_ct1.shape                       # (1024, 128, 5, 5)
    Nout = k * k * Cout                                 # 3200, cols (kh,kw,co)
    assert Nout % tn == 0 and tn % 128 == 0
    wl = jnp.transpose(w_lin).astype(jnp.bfloat16)                      # (Din,1024)
    bl = b_lin.reshape(1, Cmid).astype(jnp.float32)
    wc = jnp.transpose(w_ct1, (0, 2, 3, 1)).reshape(Cin, Nout).astype(jnp.bfloat16)
    bc = jnp.tile(b_ct1, k * k).reshape(1, Nout).astype(jnp.float32)
    out = pl.pallas_call(
        _head_kernel,
        out_shape=jax.ShapeDtypeStruct((B, Nout), jnp.bfloat16),
        grid_spec=pltpu.PrefetchScalarGridSpec(
            num_scalar_prefetch=0,
            grid=(Nout // tn,),
            in_specs=[
                pl.BlockSpec((B, Din), lambda j: (0, 0)),
                pl.BlockSpec((Din, Cmid), lambda j: (0, 0)),
                pl.BlockSpec((1, Cmid), lambda j: (0, 0)),
                pl.BlockSpec((Cin, tn), lambda j: (0, j)),   # weight stream
                pl.BlockSpec((1, tn), lambda j: (0, j)),
            ],
            out_specs=pl.BlockSpec((B, tn), lambda j: (0, j)),
        ),
        compiler_params=pltpu.CompilerParams(
            dimension_semantics=("parallel",),
            vmem_limit_bytes=_VMEM_LIMIT),
    )(x.astype(jnp.bfloat16), wl, bl, wc, bc)
    return out.reshape(B, k, k, Cout)                   # NHWC (B,5,5,128) bf16


# -----------------------------------------------------------------------------
# Kernel 2: fused (patches @ W) + bias (+ ELU) on one M-tile. bf16 operands,
# f32 accumulator / elementwise, bf16 (or f32 for the last layer) output.
# -----------------------------------------------------------------------------
def _mm_bias_act_kernel(x_ref, w_ref, b_ref, o_ref, *, apply_elu):
    acc = jnp.dot(x_ref[...], w_ref[...], preferred_element_type=jnp.float32)
    acc = acc + b_ref[...]
    if apply_elu:
        acc = _elu(acc)
    o_ref[...] = acc.astype(o_ref.dtype)


def _round_up8(n):
    return (n + 7) // 8 * 8


def _choose_tm(M, cap=2048):
    """Single block for tiny M; otherwise an even number of blocks (v7x has
    two TensorCores), tile a multiple of 8, capped at `cap` rows."""
    if M <= 16:
        return M
    half = _round_up8((M + 1) // 2)
    if half <= cap:
        return half                       # grid == 2
    g = -(-M // cap)
    g += g % 2                            # prefer an even grid
    return _round_up8(-(-M // g))


def _pallas_matmul_bias_act(patches, w2d, bias, *, apply_elu,
                            out_dtype=jnp.bfloat16):
    M, K = patches.shape
    _, N = w2d.shape
    tm = _choose_tm(M)
    grid = (pl.cdiv(M, tm),)              # partial last block is masked
    b2d = bias.reshape(1, N).astype(jnp.float32)
    kernel = functools.partial(_mm_bias_act_kernel, apply_elu=apply_elu)
    return pl.pallas_call(
        kernel,
        out_shape=jax.ShapeDtypeStruct((M, N), out_dtype),
        grid_spec=pltpu.PrefetchScalarGridSpec(
            num_scalar_prefetch=0,
            grid=grid,
            in_specs=[
                pl.BlockSpec((tm, K), lambda i: (i, 0)),   # patch tile (streamed)
                pl.BlockSpec((K, N), lambda i: (0, 0)),    # weight, VMEM-resident
                pl.BlockSpec((1, N), lambda i: (0, 0)),    # bias row
            ],
            out_specs=pl.BlockSpec((tm, N), lambda i: (i, 0)),
        ),
        compiler_params=pltpu.CompilerParams(
            dimension_semantics=("parallel",),
            vmem_limit_bytes=_VMEM_LIMIT),
    )(patches.astype(jnp.bfloat16), w2d.astype(jnp.bfloat16), b2d)


# -----------------------------------------------------------------------------
# Glue: stride-2 ConvTranspose2d via 4-parity (pixel-shuffle) decomposition on
# the UNDILATED input — no structural zeros, one patch matrix per layer.
# -----------------------------------------------------------------------------
def _im2col_s1(x_nhwc, k):
    N, H, W, C = x_nhwc.shape
    OH, OW = H - k + 1, W - k + 1
    cols = [x_nhwc[:, kh:kh + OH, kw:kw + OW, :]
            for kh in range(k) for kw in range(k)]
    patches = jnp.stack(cols, axis=3)                    # (N,OH,OW,k*k,C)
    return patches.reshape(N * OH * OW, k * k * C), (N, OH, OW)


def conv_transpose2d_s2_act(x_nhwc, w_ct, bias, *, apply_elu,
                            out_dtype=jnp.bfloat16):
    """PyTorch ConvTranspose2d (weight (Cin,Cout,k,k), stride=2, padding=0)
    + optional ELU."""
    Cin, Cout, k, _ = w_ct.shape
    N, H, W, _ = x_nhwc.shape
    OH, OW = 2 * (H - 1) + k, 2 * (W - 1) + k
    # Zero-pad odd kernels to even size: identical output except one extra
    # (bias-only) last row/col, cropped below.  All four parities then share
    # the same kq x kq sub-kernel shape and a single patch matrix.
    if k % 2:
        w_ct = jnp.pad(w_ct, ((0, 0), (0, 0), (0, 1), (0, 1)))
        k += 1
    kq = k // 2
    # Per-parity flipped sub-kernels, rows (qy,qx,cin); concatenate the four
    # parities along the output dim -> columns ordered (py,px,cout).
    w_par = []
    for py in range(2):
        for px in range(2):
            wsub = w_ct[:, :, py::2, px::2][:, :, ::-1, ::-1]   # (Cin,Cout,kq,kq)
            w_par.append(jnp.transpose(wsub, (2, 3, 0, 1)).reshape(kq * kq * Cin, Cout))
    w_cat = jnp.concatenate(w_par, axis=1)                      # (kq*kq*Cin, 4*Cout)
    b_cat = jnp.tile(bias, 4)                                   # (4*Cout,)
    # "Full" padding of kq-1 on the undilated input (kept in bf16).
    xp = jnp.pad(x_nhwc, ((0, 0), (kq - 1, kq - 1), (kq - 1, kq - 1), (0, 0)))
    patches, (N, OA_h, OA_w) = _im2col_s1(xp, kq)
    out = _pallas_matmul_bias_act(patches, w_cat, b_cat,
                                  apply_elu=apply_elu, out_dtype=out_dtype)
    # Pixel-shuffle the four parities back together, crop the odd-k extra.
    out = out.reshape(N, OA_h, OA_w, 2, 2, Cout)
    out = out.transpose(0, 1, 3, 2, 4, 5).reshape(N, 2 * OA_h, 2 * OA_w, Cout)
    return out[:, :OH, :OW, :]


def conv_decoder_cat_forward(x, params):
    """ConvDecoderCat.forward. x: (B, in_dim) -> (B, 3, 64, 64) NCHW (f32)."""
    (w_lin, b_lin), (w1, b1), (w2, b2), (w3, b3), (w4, b4) = params
    h = _pallas_head(x, w_lin, b_lin, w1, b1)                 # (B,5,5,128) bf16
    h = conv_transpose2d_s2_act(h, w2, b2, apply_elu=True)    # (B,13,13,64) bf16
    h = conv_transpose2d_s2_act(h, w3, b3, apply_elu=True)    # (B,30,30,32) bf16
    h = conv_transpose2d_s2_act(h, w4, b4, apply_elu=False,
                                out_dtype=jnp.float32)        # (B,64,64,3) f32
    return h.transpose(0, 3, 1, 2)                            # NCHW


# -----------------------------------------------------------------------------
# Deterministic parameter init (PyTorch-style uniform bounds) and a pure-JAX/XLA
# reference with matched bf16 matmul operands for the correctness check.
# -----------------------------------------------------------------------------
def init_params(key, in_dim, out_channels=3, kernels=(5, 5, 6, 6)):
    chans = [1024, 128, 64, 32, out_channels]
    params = []
    key, ka, kb = jax.random.split(key, 3)
    bound = 1.0 / math.sqrt(in_dim)
    w_lin = jax.random.uniform(ka, (1024, in_dim), jnp.float32, -bound, bound)
    b_lin = jax.random.uniform(kb, (1024,), jnp.float32, -bound, bound)
    params.append((w_lin, b_lin))
    for i, k in enumerate(kernels):
        cin, cout = chans[i], chans[i + 1]
        key, kw_key, kb_key = jax.random.split(key, 3)
        bound = 1.0 / math.sqrt(cout * k * k)     # PyTorch fan_in for ConvTranspose2d
        w = jax.random.uniform(kw_key, (cin, cout, k, k), jnp.float32, -bound, bound)
        b = jax.random.uniform(kb_key, (cout,), jnp.float32, -bound, bound)
        params.append((w, b))
    return params


def ref_forward(x, params, stride=2):
    (w_lin, b_lin), conv_params = params[0], params[1:]
    h = jnp.dot(x.astype(jnp.bfloat16),
                jnp.transpose(w_lin).astype(jnp.bfloat16),
                preferred_element_type=jnp.float32) + b_lin
    h = h.reshape(x.shape[0], -1, 1, 1)                       # (B,1024,1,1) NCHW
    n_layers = len(conv_params)
    for idx, (w, b) in enumerate(conv_params):
        k = w.shape[2]
        w_conv = jnp.transpose(w[:, :, ::-1, ::-1], (1, 0, 2, 3))   # OIHW
        h = lax.conv_general_dilated(
            h.astype(jnp.bfloat16), w_conv.astype(jnp.bfloat16),
            window_strides=(1, 1),
            padding=[(k - 1, k - 1), (k - 1, k - 1)],
            lhs_dilation=(stride, stride),
            dimension_numbers=("NCHW", "OIHW", "NCHW"),
            preferred_element_type=jnp.float32)
        h = h + b.reshape(1, -1, 1, 1)
        if idx < n_layers - 1:
            h = jnp.where(h > 0.0, h, jnp.exp(h) - 1.0)       # ELU
    return h


if __name__ == "__main__":
    key = jax.random.PRNGKey(0)
    pkey, xkey = jax.random.split(key)

    batch, in_dim = 2, 32
    params = init_params(pkey, in_dim=in_dim)
    x = jax.random.normal(xkey, (batch, in_dim), jnp.float32)

    fwd = jax.jit(conv_decoder_cat_forward)   # glue + weight prep fuse into one program
    out = jax.block_until_ready(fwd(x, params))
    assert out.shape == (batch, 3, 64, 64), out.shape
    assert out.dtype == jnp.float32

    ref = jax.block_until_ready(ref_forward(x, params))
    max_err = float(jnp.max(jnp.abs(out - ref)))
    # bf16 intermediate activations: allow ~1 bf16 ulp of drift vs. the f32-held ref.
    assert jnp.allclose(out, ref, rtol=1e-2, atol=1e-2), max_err

    print("KERNEL_OK")
</pallas_src>

<mosaic_0001>
module attributes {stable_mosaic.version = 11 : i64} {
  func.func @_head_kernel(%arg0: i32, %arg1: memref<2x32xbf16, #tpu.memory_space<vmem>>, %arg2: memref<32x1024xbf16, #tpu.memory_space<vmem>>, %arg3: memref<1x1024xf32, #tpu.memory_space<vmem>>, %arg4: memref<1024x640xbf16, #tpu.memory_space<vmem>>, %arg5: memref<1x640xf32, #tpu.memory_space<vmem>>, %arg6: memref<2x640xbf16, #tpu.memory_space<vmem>>) attributes {dimension_semantics = [#tpu.dimension_semantics<parallel>], iteration_bounds = array<i64: 5>, scalar_prefetch = 0 : i64, scratch_operands = 0 : i64, tpu.core_type = #tpu.core_type<tc>, window_params = [{pipeline_mode = #tpu.pipeline_mode<synchronous>, transform_indices = @transform_0, window_bounds = array<i64: 2, 32>}, {pipeline_mode = #tpu.pipeline_mode<synchronous>, transform_indices = @transform_1, window_bounds = array<i64: 32, 1024>}, {pipeline_mode = #tpu.pipeline_mode<synchronous>, transform_indices = @transform_2, window_bounds = array<i64: 1, 1024>}, {transform_indices = @transform_3, window_bounds = array<i64: 1024, 640>}, {transform_indices = @transform_4, window_bounds = array<i64: 1, 640>}, {transform_indices = @transform_5, window_bounds = array<i64: 2, 640>}]} {
    %c0 = arith.constant 0 : index
    %c0_0 = arith.constant 0 : index
    %0 = vector.load %arg1[%c0, %c0_0] : memref<2x32xbf16, #tpu.memory_space<vmem>>, vector<2x32xbf16>
    %c0_1 = arith.constant 0 : index
    %c0_2 = arith.constant 0 : index
    %1 = vector.load %arg2[%c0_1, %c0_2] : memref<32x1024xbf16, #tpu.memory_space<vmem>>, vector<32x1024xbf16>
    %cst = arith.constant dense<0.000000e+00> : vector<2x1024xf32>
    %2 = tpu.matmul %0, %1, %cst {dimension_numbers = #tpu.dot_dimension_numbers<[1], [0], [0], [1], [0, 0, 1, 1], [], []>} : vector<2x32xbf16>, vector<32x1024xbf16>, vector<2x1024xf32> -> vector<2x1024xf32>
    %c0_3 = arith.constant 0 : index
    %c0_4 = arith.constant 0 : index
    %3 = vector.load %arg3[%c0_3, %c0_4] : memref<1x1024xf32, #tpu.memory_space<vmem>>, vector<1x1024xf32>
    %4 = vector.broadcast %3 : vector<1x1024xf32> to vector<2x1024xf32>
    %5 = arith.addf %2, %4 : vector<2x1024xf32>
    %6 = arith.truncf %5 : vector<2x1024xf32> to vector<2x1024xbf16>
    %c0_5 = arith.constant 0 : index
    %c0_6 = arith.constant 0 : index
    %7 = vector.load %arg4[%c0_5, %c0_6] : memref<1024x640xbf16, #tpu.memory_space<vmem>>, vector<1024x640xbf16>
    %cst_7 = arith.constant dense<0.000000e+00> : vector<2x640xf32>
    %8 = tpu.matmul %6, %7, %cst_7 {dimension_numbers = #tpu.dot_dimension_numbers<[1], [0], [0], [1], [0, 0, 1, 1], [], []>} : vector<2x1024xbf16>, vector<1024x640xbf16>, vector<2x640xf32> -> vector<2x640xf32>
    %c0_8 = arith.constant 0 : index
    %c0_9 = arith.constant 0 : index
    %9 = vector.load %arg5[%c0_8, %c0_9] : memref<1x640xf32, #tpu.memory_space<vmem>>, vector<1x640xf32>
    %10 = vector.broadcast %9 : vector<1x640xf32> to vector<2x640xf32>
    %11 = arith.addf %8, %10 : vector<2x640xf32>
    %cst_10 = arith.constant 0.000000e+00 : f32
    %12 = vector.broadcast %cst_10 : f32 to vector<2x640xf32>
    %13 = arith.cmpf ogt, %11, %12 : vector<2x640xf32>
    %14 = math.exp %11 : vector<2x640xf32>
    %cst_11 = arith.constant 1.000000e+00 : f32
    %15 = vector.broadcast %cst_11 : f32 to vector<2x640xf32>
    %16 = arith.subf %14, %15 : vector<2x640xf32>
    %17 = arith.select %13, %11, %16 : vector<2x640xi1>, vector<2x640xf32>
    %18 = arith.truncf %17 : vector<2x640xf32> to vector<2x640xbf16>
    %c0_12 = arith.constant 0 : index
    %c0_13 = arith.constant 0 : index
    %19 = vector.load %arg6[%c0_12, %c0_13] : memref<2x640xbf16, #tpu.memory_space<vmem>>, vector<2x640xbf16>
    tpu.vector_store %arg6[%c0_12, %c0_13], %18 {strides = array<i32>} : memref<2x640xbf16, #tpu.memory_space<vmem>>, vector<2x640xbf16>,
    return
  }
  func.func @transform_0(%arg0: i32) -> (i32, i32) {
    %c0_i32 = arith.constant 0 : i32
    %c0_i32_0 = arith.constant 0 : i32
    %c0_i32_1 = arith.constant 0 : i32
    return %c0_i32, %c0_i32_0 : i32, i32
  }
  func.func @transform_1(%arg0: i32) -> (i32, i32) {
    %c0_i32 = arith.constant 0 : i32
    %c0_i32_0 = arith.constant 0 : i32
    %c0_i32_1 = arith.constant 0 : i32
    return %c0_i32, %c0_i32_0 : i32, i32
  }
  func.func @transform_2(%arg0: i32) -> (i32, i32) {
    %c0_i32 = arith.constant 0 : i32
    %c0_i32_0 = arith.constant 0 : i32
    %c0_i32_1 = arith.constant 0 : i32
    return %c0_i32, %c0_i32_0 : i32, i32
  }
  func.func @transform_3(%arg0: i32) -> (i32, i32) {
    %c0_i32 = arith.constant 0 : i32
    %c0_i32_0 = arith.constant 0 : i32
    return %c0_i32, %arg0 : i32, i32
  }
  func.func @transform_4(%arg0: i32) -> (i32, i32) {
    %c0_i32 = arith.constant 0 : i32
    %c0_i32_0 = arith.constant 0 : i32
    return %c0_i32, %arg0 : i32, i32
  }
  func.func @transform_5(%arg0: i32) -> (i32, i32) {
    %c0_i32 = arith.constant 0 : i32
    %c0_i32_0 = arith.constant 0 : i32
    return %c0_i32, %arg0 : i32, i32
  }
}

module attributes {stable_mosaic.version = 11 : i64} {
  func.func @_mm_bias_act_kernel(%arg0: i32, %arg1: memref<56x1152xbf16, #tpu.memory_space<vmem>>, %arg2: memref<1152x256xbf16, #tpu.memory_space<vmem>>, %arg3: memref<1x256xf32, #tpu.memory_space<vmem>>, %arg4: memref<56x256xbf16, #tpu.memory_space<vmem>>) attributes {dimension_semantics = [#tpu.dimension_semantics<parallel>], iteration_bounds = array<i64: 2>, scalar_prefetch = 0 : i64, scratch_operands = 0 : i64, tpu.core_type = #tpu.core_type<tc>, window_params = [{transform_indices = @transform_0, window_bounds = array<i64: 56, 1152>}, {pipeline_mode = #tpu.pipeline_mode<synchronous>, transform_indices = @transform_1, window_bounds = array<i64: 1152, 256>}, {pipeline_mode = #tpu.pipeline_mode<synchronous>, transform_indices = @transform_2, window_bounds = array<i64: 1, 256>}, {transform_indices = @transform_3, window_bounds = array<i64: 56, 256>}]} {
    %c0 = arith.constant 0 : index
    %c0_0 = arith.constant 0 : index
    %0 = vector.load %arg1[%c0, %c0_0] : memref<56x1152xbf16, #tpu.memory_space<vmem>>, vector<56x1152xbf16>
    %c0_1 = arith.constant 0 : index
    %c0_2 = arith.constant 0 : index
    %1 = vector.load %arg2[%c0_1, %c0_2] : memref<1152x256xbf16, #tpu.memory_space<vmem>>, vector<1152x256xbf16>
    %cst = arith.constant dense<0.000000e+00> : vector<56x256xf32>
    %2 = tpu.matmul %0, %1, %cst {dimension_numbers = #tpu.dot_dimension_numbers<[1], [0], [0], [1], [0, 0, 1, 1], [], []>} : vector<56x1152xbf16>, vector<1152x256xbf16>, vector<56x256xf32> -> vector<56x256xf32>
    %c0_3 = arith.constant 0 : index
    %c0_4 = arith.constant 0 : index
    %3 = vector.load %arg3[%c0_3, %c0_4] : memref<1x256xf32, #tpu.memory_space<vmem>>, vector<1x256xf32>
    %4 = vector.broadcast %3 : vector<1x256xf32> to vector<56x256xf32>
    %5 = arith.addf %2, %4 : vector<56x256xf32>
    %cst_5 = arith.constant 0.000000e+00 : f32
    %6 = vector.broadcast %cst_5 : f32 to vector<56x256xf32>
    %7 = arith.cmpf ogt, %5, %6 : vector<56x256xf32>
    %8 = math.exp %5 : vector<56x256xf32>
    %cst_6 = arith.constant 1.000000e+00 : f32
    %9 = vector.broadcast %cst_6 : f32 to vector<56x256xf32>
    %10 = arith.subf %8, %9 : vector<56x256xf32>
    %11 = arith.select %7, %5, %10 : vector<56x256xi1>, vector<56x256xf32>
    %12 = arith.truncf %11 : vector<56x256xf32> to vector<56x256xbf16>
    %c0_7 = arith.constant 0 : index
    %c0_8 = arith.constant 0 : index
    %13 = vector.load %arg4[%c0_7, %c0_8] : memref<56x256xbf16, #tpu.memory_space<vmem>>, vector<56x256xbf16>
    tpu.vector_store %arg4[%c0_7, %c0_8], %12 {strides = array<i32>} : memref<56x256xbf16, #tpu.memory_space<vmem>>, vector<56x256xbf16>,
    return
  }
  func.func @transform_0(%arg0: i32) -> (i32, i32) {
    %c0_i32 = arith.constant 0 : i32
    %c0_i32_0 = arith.constant 0 : i32
    return %arg0, %c0_i32 : i32, i32
  }
  func.func @transform_1(%arg0: i32) -> (i32, i32) {
    %c0_i32 = arith.constant 0 : i32
    %c0_i32_0 = arith.constant 0 : i32
    %c0_i32_1 = arith.constant 0 : i32
    return %c0_i32, %c0_i32_0 : i32, i32
  }
  func.func @transform_2(%arg0: i32) -> (i32, i32) {
    %c0_i32 = arith.constant 0 : i32
    %c0_i32_0 = arith.constant 0 : i32
    %c0_i32_1 = arith.constant 0 : i32
    return %c0_i32, %c0_i32_0 : i32, i32
  }
  func.func @transform_3(%arg0: i32) -> (i32, i32) {
    %c0_i32 = arith.constant 0 : i32
    %c0_i32_0 = arith.constant 0 : i32
    return %arg0, %c0_i32 : i32, i32
  }
}

module attributes {stable_mosaic.version = 11 : i64} {
  func.func @_mm_bias_act_kernel(%arg0: i32, %arg1: memref<232x576xbf16, #tpu.memory_space<vmem>>, %arg2: memref<576x128xbf16, #tpu.memory_space<vmem>>, %arg3: memref<1x128xf32, #tpu.memory_space<vmem>>, %arg4: memref<232x128xbf16, #tpu.memory_space<vmem>>) attributes {dimension_semantics = [#tpu.dimension_semantics<parallel>], iteration_bounds = array<i64: 2>, scalar_prefetch = 0 : i64, scratch_operands = 0 : i64, tpu.core_type = #tpu.core_type<tc>, window_params = [{transform_indices = @transform_0, window_bounds = array<i64: 232, 576>}, {pipeline_mode = #tpu.pipeline_mode<synchronous>, transform_indices = @transform_1, window_bounds = array<i64: 576, 128>}, {pipeline_mode = #tpu.pipeline_mode<synchronous>, transform_indices = @transform_2, window_bounds = array<i64: 1, 128>}, {transform_indices = @transform_3, window_bounds = array<i64: 232, 128>}]} {
    %c0 = arith.constant 0 : index
    %c0_0 = arith.constant 0 : index
    %0 = vector.load %arg1[%c0, %c0_0] : memref<232x576xbf16, #tpu.memory_space<vmem>>, vector<232x576xbf16>
    %c0_1 = arith.constant 0 : index
    %c0_2 = arith.constant 0 : index
    %1 = vector.load %arg2[%c0_1, %c0_2] : memref<576x128xbf16, #tpu.memory_space<vmem>>, vector<576x128xbf16>
    %cst = arith.constant dense<0.000000e+00> : vector<232x128xf32>
    %2 = tpu.matmul %0, %1, %cst {dimension_numbers = #tpu.dot_dimension_numbers<[1], [0], [0], [1], [0, 0, 1, 1], [], []>} : vector<232x576xbf16>, vector<576x128xbf16>, vector<232x128xf32> -> vector<232x128xf32>
    %c0_3 = arith.constant 0 : index
    %c0_4 = arith.constant 0 : index
    %3 = vector.load %arg3[%c0_3, %c0_4] : memref<1x128xf32, #tpu.memory_space<vmem>>, vector<1x128xf32>
    %4 = vector.broadcast %3 : vector<1x128xf32> to vector<232x128xf32>
    %5 = arith.addf %2, %4 : vector<232x128xf32>
    %cst_5 = arith.constant 0.000000e+00 : f32
    %6 = vector.broadcast %cst_5 : f32 to vector<232x128xf32>
    %7 = arith.cmpf ogt, %5, %6 : vector<232x128xf32>
    %8 = math.exp %5 : vector<232x128xf32>
    %cst_6 = arith.constant 1.000000e+00 : f32
    %9 = vector.broadcast %cst_6 : f32 to vector<232x128xf32>
    %10 = arith.subf %8, %9 : vector<232x128xf32>
    %11 = arith.select %7, %5, %10 : vector<232x128xi1>, vector<232x128xf32>
    %12 = arith.truncf %11 : vector<232x128xf32> to vector<232x128xbf16>
    %c0_7 = arith.constant 0 : index
    %c0_8 = arith.constant 0 : index
    %13 = vector.load %arg4[%c0_7, %c0_8] : memref<232x128xbf16, #tpu.memory_space<vmem>>, vector<232x128xbf16>
    tpu.vector_store %arg4[%c0_7, %c0_8], %12 {strides = array<i32>} : memref<232x128xbf16, #tpu.memory_space<vmem>>, vector<232x128xbf16>,
    return
  }
  func.func @transform_0(%arg0: i32) -> (i32, i32) {
    %c0_i32 = arith.constant 0 : i32
    %c0_i32_0 = arith.constant 0 : i32
    return %arg0, %c0_i32 : i32, i32
  }
  func.func @transform_1(%arg0: i32) -> (i32, i32) {
    %c0_i32 = arith.constant 0 : i32
    %c0_i32_0 = arith.constant 0 : i32
    %c0_i32_1 = arith.constant 0 : i32
    return %c0_i32, %c0_i32_0 : i32, i32
  }
  func.func @transform_2(%arg0: i32) -> (i32, i32) {
    %c0_i32 = arith.constant 0 : i32
    %c0_i32_0 = arith.constant 0 : i32
    %c0_i32_1 = arith.constant 0 : i32
    return %c0_i32, %c0_i32_0 : i32, i32
  }
  func.func @transform_3(%arg0: i32) -> (i32, i32) {
    %c0_i32 = arith.constant 0 : i32
    %c0_i32_0 = arith.constant 0 : i32
    return %arg0, %c0_i32 : i32, i32
  }
}

module attributes {stable_mosaic.version = 11 : i64} {
  func.func @_mm_bias_act_kernel(%arg0: i32, %arg1: memref<1024x288xbf16, #tpu.memory_space<vmem>>, %arg2: memref<288x12xbf16, #tpu.memory_space<vmem>>, %arg3: memref<1x12xf32, #tpu.memory_space<vmem>>, %arg4: memref<1024x12xf32, #tpu.memory_space<vmem>>) attributes {dimension_semantics = [#tpu.dimension_semantics<parallel>], iteration_bounds = array<i64: 2>, scalar_prefetch = 0 : i64, scratch_operands = 0 : i64, tpu.core_type = #tpu.core_type<tc>, window_params = [{transform_indices = @transform_0, window_bounds = array<i64: 1024, 288>}, {pipeline_mode = #tpu.pipeline_mode<synchronous>, transform_indices = @transform_1, window_bounds = array<i64: 288, 12>}, {pipeline_mode = #tpu.pipeline_mode<synchronous>, transform_indices = @transform_2, window_bounds = array<i64: 1, 12>}, {transform_indices = @transform_3, window_bounds = array<i64: 1024, 12>}]} {
    %c0 = arith.constant 0 : index
    %c0_0 = arith.constant 0 : index
    %0 = vector.load %arg1[%c0, %c0_0] : memref<1024x288xbf16, #tpu.memory_space<vmem>>, vector<1024x288xbf16>
    %c0_1 = arith.constant 0 : index
    %c0_2 = arith.constant 0 : index
    %1 = vector.load %arg2[%c0_1, %c0_2] : memref<288x12xbf16, #tpu.memory_space<vmem>>, vector<288x12xbf16>
    %cst = arith.constant dense<0.000000e+00> : vector<1024x12xf32>
    %2 = tpu.matmul %0, %1, %cst {dimension_numbers = #tpu.dot_dimension_numbers<[1], [0], [0], [1], [0, 0, 1, 1], [], []>} : vector<1024x288xbf16>, vector<288x12xbf16>, vector<1024x12xf32> -> vector<1024x12xf32>
    %c0_3 = arith.constant 0 : index
    %c0_4 = arith.constant 0 : index
    %3 = vector.load %arg3[%c0_3, %c0_4] : memref<1x12xf32, #tpu.memory_space<vmem>>, vector<1x12xf32>
    %4 = vector.broadcast %3 : vector<1x12xf32> to vector<1024x12xf32>
    %5 = arith.addf %2, %4 : vector<1024x12xf32>
    %c0_5 = arith.constant 0 : index
    %c0_6 = arith.constant 0 : index
    %6 = vector.load %arg4[%c0_5, %c0_6] : memref<1024x12xf32, #tpu.memory_space<vmem>>, vector<1024x12xf32>
    tpu.vector_store %arg4[%c0_5, %c0_6], %5 {strides = array<i32>} : memref<1024x12xf32, #tpu.memory_space<vmem>>, vector<1024x12xf32>,
    return
  }
  func.func @transform_0(%arg0: i32) -> (i32, i32) {
    %c0_i32 = arith.constant 0 : i32
    %c0_i32_0 = arith.constant 0 : i32
    return %arg0, %c0_i32 : i32, i32
  }
  func.func @transform_1(%arg0: i32) -> (i32, i32) {
    %c0_i32 = arith.constant 0 : i32
    %c0_i32_0 = arith.constant 0 : i32
    %c0_i32_1 = arith.constant 0 : i32
    return %c0_i32, %c0_i32_0 : i32, i32
  }
  func.func @transform_2(%arg0: i32) -> (i32, i32) {
    %c0_i32 = arith.constant 0 : i32
    %c0_i32_0 = arith.constant 0 : i32
    %c0_i32_1 = arith.constant 0 : i32
    return %c0_i32, %c0_i32_0 : i32, i32
  }
  func.func @transform_3(%arg0: i32) -> (i32, i32) {
    %c0_i32 = arith.constant 0 : i32
    %c0_i32_0 = arith.constant 0 : i32
    return %arg0, %c0_i32 : i32, i32
  }
}

</mosaic_0001>

<bundles_post_ra>
// kernel: tile.28
= control target key start
LH: loop header
LB: loop body
LE: loop exit
PB: predicated region body
PF: predicated region fallthrough
CT: control target
= control target key end

     0   :  { %s22_s0 = inlined_call_operand.vmem [shape: f32[64], index: 0, kind: input, shape index: {}]   ;;  %s23_s1 = inlined_call_operand.vmem [shape: f32[4,64], index: 1, kind: output, shape index: {}]  }
   0x1   :  { %v4_v0 = vld [vmem:[%s22_s0] ss:$0 sm:$0xff] }
   0x2   :  { %5 = vst [vmem:[%s23_s1] sm:$0xf] %v4_v0 }

// kernel: tile.29
= control target key start
LH: loop header
LB: loop body
LE: loop exit
PB: predicated region body
PF: predicated region fallthrough
CT: control target
= control target key end

     0   :  { %s7_s8 = smov 3  ;;  %vm9_vm0 = vcmask 523264   ;;  %s34_s9 = smov 64   ;;  %vm16_vm1 = vcmask 1048064   ;;  %s54_s0 = inlined_call_operand.vmem [shape: f32[4,64], index: 0, kind: input, shape index: {}]   ;;  %s55_s1 = inlined_call_operand.vmem [shape: f32[1,256], index: 1, kind: output, shape index: {}]  }
   0x1   :  { %v5_v0 = vld [vmem:[%s54_s0] sm:$0xf]  ;;  %s12_s0 = smov 3 }
   0x2   :  { %6 = vst [vmem:[#allocation1] sm:$0xf] %v5_v0 }
   0x9   :  { %v13_v1 = vld [vmem:[#allocation1 + $0x1] ss:$2 sm:%s12_s0]   ;;  %v8_v2 = vld [vmem:[#allocation1] ss:$2 sm:%s7_s8]  }
   0xa   :  { %14 = vrot.lane.b32.xlu0 %v13_v1, %s34_s9  ;;  %10 = vst.msk [vmem:[#allocation0] ss:$8 sm:$0x3] %vm9_vm0, %v8_v2  }
  0x7c   :  { %v15_v3 = vpop.permute.xlu0 %14  }
  0x7d   :  { %17 = vst.msk [vmem:[#allocation0] ss:$8 sm:$0x3] %vm16_vm1, %v15_v3  }
  0x84   :  { %v22_v4 = vld [vmem:[#allocation0] sm:$0x1]  ;;  %v27_v5 = vld [vmem:[#allocation0 + $0x8] sm:$0x1] }
  0x85   :  { %25 = vst [vmem:[%s55_s1] sm:$0x1] %v22_v4  ;;  %32 = vst [vmem:[%s55_s1 + $0x1] sm:$0x1] %v27_v5 }

// kernel: conv_decoder_cat_forward.4
= control target key start
LH: loop header
LB: loop body
LE: loop exit
PB: predicated region body
PF: predicated region fallthrough
CT: control target
= control target key end

     0   :  { %s5306_s18 = smov 0   ;;  %s5308_s19 = smov 0   ;;  %s6617_s0 = inlined_call_operand.vmem [shape: bf16[2,32], index: 0, kind: input, shape index: {}]   ;;  %s6618_s1 = inlined_call_operand.vmem [shape: bf16[32,1024], index: 1, kind: input, shape index: {}]   ;;  %s6619_s2 = inlined_call_operand.vmem [shape: f32[1,1024], index: 2, kind: input, shape index: {}]   ;;  %s6620_s3 = inlined_call_operand.vmem [shape: bf16[1024,3200], index: 3, kind: input, shape index: {}]   ;;  %s6621_s4 = inlined_call_operand.vmem [shape: f32[1,3200], index: 4, kind: input, shape index: {}]   ;;  %s6622_s5 = inlined_call_operand.vmem [shape: bf16[2,3200], index: 5, kind: output, shape index: {}]  }
   0x1   :  { %s5310_s20 = smov 0  }
   0x2 LB: > { %s4064_s21 = sadd.s32 4294967295, %s5272_s20   ;;  %s5323_s22 = sadd.s32 1, %s5272_s20   ;;  %s5272_s20 = sphi %s5310_s20, %s6625_s20   ;;  %s5268_s19 = sphi %s5308_s19, %s6624_s19   ;;  %s5264_s18 = sphi %s5306_s18, %s6623_s18  }
   0x3   : > { %s82_s23 = ssub.s32 %s5272_s20, %s5323_s22  ;;  %s85_s24 = sadd.s32 1, %s5268_s19 }
   0x4   : > { %p83_p0 = scmp.eq.s32.totalorder %s82_s23, 0  ;;  %p92_p1 = scmp.ne.s32.totalorder %s5268_s19, %s5264_s18 }
   0x5   : > { %p93_p2 = scmp.eq.s32.totalorder %s5272_s20, 0  ;;  %p4067_p4 = scmp.ge.s32.totalorder %s5272_s20, 5 }
   0x6   : > { %s5332_s25 = scalar_select %p83_p0, %s5268_s19, %s85_s24  }
   0x7   : > { %p94_p3 = por %p93_p2, %p92_p1  ;;  %179 = sbr.rel (%p4067_p4) target bundleno = 230 (0xe6), region = 28 }
   0xc   : > { %182 = sbr.rel (!%p94_p3) target bundleno = 230 (0xe6), region = 32  ;;  %s184_s26 = sand.u32 (%p94_p3), 1, %s5268_s19  }
   0xd   : > { %s4675_s27 = smul.u32 (%p94_p3), 20, %s5272_s20 }
   0xe   : > { %s4764_s28 = smul.u32 (%p94_p3), 2560, %s184_s26 }
   0xf   : > { %s5340_s6 = scalar_lea.vmem (%p94_p3), %s6620_s3, %s4675_s27 }
  0x10   : > { %v204_v0 = vld [vmem:[%s5340_s6] sm:$0xff] (%p94_p3)  ;;  %v206_v1 = vld [vmem:[%s5340_s6 + $0x8] sm:$0xff] (%p94_p3)  ;;  %s5345_s7 = scalar_lea.vmem (%p94_p3), [#allocation2], %s4764_s28  ;;  %v214_v5 = vld [vmem:[%s5340_s6 + $0xd0] sm:$0xff] (%p94_p3) }
  0x11   : > { %v208_v2 = vld [vmem:[%s5340_s6 + $0x64] sm:$0xff]  ;;  %205 = vst [vmem:[%s5345_s7] sm:$0xff] %v204_v0  ;;  %207 = vst [vmem:[%s5345_s7 + $0x8] sm:$0xff] %v206_v1  ;;  %v210_v3 = vld [vmem:[%s5340_s6 + $0x6c] sm:$0xff] }
  0x12   : > { %209 = vst [vmem:[%s5345_s7 + $0x14] sm:$0xff] %v208_v2  ;;  %v212_v4 = vld [vmem:[%s5340_s6 + $0xc8] sm:$0xff]  ;;  %211 = vst [vmem:[%s5345_s7 + $0x1c] sm:$0xff] %v210_v3  ;;  %v218_v7 = vld [vmem:[%s5340_s6 + $0x134] sm:$0xff] }
  0x13   : > { %213 = vst [vmem:[%s5345_s7 + $0x28] sm:$0xff] %v212_v4  ;;  %215 = vst [vmem:[%s5345_s7 + $0x30] sm:$0xff] %v214_v5  ;;  %v216_v6 = vld [vmem:[%s5340_s6 + $0x12c] sm:$0xff]  ;;  %v222_v9 = vld [vmem:[%s5340_s6 + $0x198] sm:$0xff] }
  0x14   : > { %v220_v8 = vld [vmem:[%s5340_s6 + $0x190] sm:$0xff]  ;;  %217 = vst [vmem:[%s5345_s7 + $0x3c] sm:$0xff] %v216_v6  ;;  %219 = vst [vmem:[%s5345_s7 + $0x44] sm:$0xff] %v218_v7  ;;  %v226_v11 = vld [vmem:[%s5340_s6 + $0x1fc] sm:$0xff] }
  0x15   : > { %221 = vst [vmem:[%s5345_s7 + $0x50] sm:$0xff] %v220_v8  ;;  %v224_v10 = vld [vmem:[%s5340_s6 + $0x1f4] sm:$0xff]  ;;  %223 = vst [vmem:[%s5345_s7 + $0x58] sm:$0xff] %v222_v9  ;;  %v230_v13 = vld [vmem:[%s5340_s6 + $0x260] sm:$0xff] }
  0x16   : > { %225 = vst [vmem:[%s5345_s7 + $0x64] sm:$0xff] %v224_v10  ;;  %227 = vst [vmem:[%s5345_s7 + $0x6c] sm:$0xff] %v226_v11  ;;  %v228_v12 = vld [vmem:[%s5340_s6 + $0x258] sm:$0xff]  ;;  %v234_v15 = vld [vmem:[%s5340_s6 + $0x2c4] sm:$0xff] }
  0x17   : > { %v232_v14 = vld [vmem:[%s5340_s6 + $0x2bc] sm:$0xff]  ;;  %229 = vst [vmem:[%s5345_s7 + $0x78] sm:$0xff] %v228_v12  ;;  %231 = vst [vmem:[%s5345_s7 + $0x80] sm:$0xff] %v230_v13  ;;  %v238_v17 = vld [vmem:[%s5340_s6 + $0x328] sm:$0xff] }
  0x18   : > { %233 = vst [vmem:[%s5345_s7 + $0x8c] sm:$0xff] %v232_v14  ;;  %v236_v16 = vld [vmem:[%s5340_s6 + $0x320] sm:$0xff]  ;;  %235 = vst [vmem:[%s5345_s7 + $0x94] sm:$0xff] %v234_v15  ;;  %v242_v19 = vld [vmem:[%s5340_s6 + $0x38c] sm:$0xff] }
  0x19   : > { %237 = vst [vmem:[%s5345_s7 + $0xa0] sm:$0xff] %v236_v16  ;;  %239 = vst [vmem:[%s5345_s7 + $0xa8] sm:$0xff] %v238_v17  ;;  %v240_v18 = vld [vmem:[%s5340_s6 + $0x384] sm:$0xff]  ;;  %v246_v21 = vld [vmem:[%s5340_s6 + $0x3f0] sm:$0xff] }
  0x1a   : > { %v244_v20 = vld [vmem:[%s5340_s6 + $0x3e8] sm:$0xff]  ;;  %241 = vst [vmem:[%s5345_s7 + $0xb4] sm:$0xff] %v240_v18  ;;  %243 = vst [vmem:[%s5345_s7 + $0xbc] sm:$0xff] %v242_v19  ;;  %v250_v23 = vld [vmem:[%s5340_s6 + $0x454] sm:$0xff] }
  0x1b   : > { %245 = vst [vmem:[%s5345_s7 + $0xc8] sm:$0xff] %v244_v20  ;;  %v248_v22 = vld [vmem:[%s5340_s6 + $0x44c] sm:$0xff]  ;;  %247 = vst [vmem:[%s5345_s7 + $0xd0] sm:$0xff] %v246_v21  ;;  %v254_v25 = vld [vmem:[%s5340_s6 + $0x4b8] sm:$0xff] }
  0x1c   : > { %249 = vst [vmem:[%s5345_s7 + $0xdc] sm:$0xff] %v248_v22  ;;  %251 = vst [vmem:[%s5345_s7 + $0xe4] sm:$0xff] %v250_v23  ;;  %v252_v24 = vld [vmem:[%s5340_s6 + $0x4b0] sm:$0xff]  ;;  %v258_v27 = vld [vmem:[%s5340_s6 + $0x51c] sm:$0xff] }
  0x1d   : > { %v256_v26 = vld [vmem:[%s5340_s6 + $0x514] sm:$0xff]  ;;  %253 = vst [vmem:[%s5345_s7 + $0xf0] sm:$0xff] %v252_v24  ;;  %255 = vst [vmem:[%s5345_s7 + $0xf8] sm:$0xff] %v254_v25  ;;  %v262_v29 = vld [vmem:[%s5340_s6 + $0x580] sm:$0xff] }
  0x1e   : > { %257 = vst [vmem:[%s5345_s7 + $0x104] sm:$0xff] %v256_v26  ;;  %v260_v28 = vld [vmem:[%s5340_s6 + $0x578] sm:$0xff]  ;;  %259 = vst [vmem:[%s5345_s7 + $0x10c] sm:$0xff] %v258_v27  ;;  %v266_v31 = vld [vmem:[%s5340_s6 + $0x5e4] sm:$0xff] }
  0x1f   : > { %261 = vst [vmem:[%s5345_s7 + $0x118] sm:$0xff] %v260_v28  ;;  %263 = vst [vmem:[%s5345_s7 + $0x120] sm:$0xff] %v262_v29  ;;  %v264_v30 = vld [vmem:[%s5340_s6 + $0x5dc] sm:$0xff]  ;;  %v270_v33 = vld [vmem:[%s5340_s6 + $0x648] sm:$0xff] }
  0x20   : > { %v268_v32 = vld [vmem:[%s5340_s6 + $0x640] sm:$0xff]  ;;  %265 = vst [vmem:[%s5345_s7 + $0x12c] sm:$0xff] %v264_v30  ;;  %267 = vst [vmem:[%s5345_s7 + $0x134] sm:$0xff] %v266_v31  ;;  %v274_v35 = vld [vmem:[%s5340_s6 + $0x6ac] sm:$0xff] }
  0x21   : > { %269 = vst [vmem:[%s5345_s7 + $0x140] sm:$0xff] %v268_v32  ;;  %v272_v34 = vld [vmem:[%s5340_s6 + $0x6a4] sm:$0xff]  ;;  %271 = vst [vmem:[%s5345_s7 + $0x148] sm:$0xff] %v270_v33  ;;  %v278_v37 = vld [vmem:[%s5340_s6 + $0x710] sm:$0xff] }
  0x22   : > { %273 = vst [vmem:[%s5345_s7 + $0x154] sm:$0xff] %v272_v34  ;;  %275 = vst [vmem:[%s5345_s7 + $0x15c] sm:$0xff] %v274_v35  ;;  %v276_v36 = vld [vmem:[%s5340_s6 + $0x708] sm:$0xff]  ;;  %v282_v39 = vld [vmem:[%s5340_s6 + $0x774] sm:$0xff] }
  0x23   : > { %v280_v38 = vld [vmem:[%s5340_s6 + $0x76c] sm:$0xff]  ;;  %277 = vst [vmem:[%s5345_s7 + $0x168] sm:$0xff] %v276_v36  ;;  %279 = vst [vmem:[%s5345_s7 + $0x170] sm:$0xff] %v278_v37  ;;  %v286_v41 = vld [vmem:[%s5340_s6 + $0x7d8] sm:$0xff] }
  0x24   : > { %281 = vst [vmem:[%s5345_s7 + $0x17c] sm:$0xff] %v280_v38  ;;  %v284_v40 = vld [vmem:[%s5340_s6 + $0x7d0] sm:$0xff]  ;;  %283 = vst [vmem:[%s5345_s7 + $0x184] sm:$0xff] %v282_v39  ;;  %v290_v43 = vld [vmem:[%s5340_s6 + $0x83c] sm:$0xff] }
  0x25   : > { %285 = vst [vmem:[%s5345_s7 + $0x190] sm:$0xff] %v284_v40  ;;  %287 = vst [vmem:[%s5345_s7 + $0x198] sm:$0xff] %v286_v41  ;;  %v288_v42 = vld [vmem:[%s5340_s6 + $0x834] sm:$0xff]  ;;  %v294_v45 = vld [vmem:[%s5340_s6 + $0x8a0] sm:$0xff] }
  0x26   : > { %v292_v44 = vld [vmem:[%s5340_s6 + $0x898] sm:$0xff]  ;;  %289 = vst [vmem:[%s5345_s7 + $0x1a4] sm:$0xff] %v288_v42  ;;  %291 = vst [vmem:[%s5345_s7 + $0x1ac] sm:$0xff] %v290_v43  ;;  %v298_v47 = vld [vmem:[%s5340_s6 + $0x904] sm:$0xff] }
  0x27   : > { %293 = vst [vmem:[%s5345_s7 + $0x1b8] sm:$0xff] %v292_v44  ;;  %v296_v46 = vld [vmem:[%s5340_s6 + $0x8fc] sm:$0xff]  ;;  %295 = vst [vmem:[%s5345_s7 + $0x1c0] sm:$0xff] %v294_v45  ;;  %v302_v49 = vld [vmem:[%s5340_s6 + $0x968] sm:$0xff] }
  0x28   : > { %297 = vst [vmem:[%s5345_s7 + $0x1cc] sm:$0xff] %v296_v46  ;;  %299 = vst [vmem:[%s5345_s7 + $0x1d4] sm:$0xff] %v298_v47  ;;  %v300_v48 = vld [vmem:[%s5340_s6 + $0x960] sm:$0xff]  ;;  %v306_v51 = vld [vmem:[%s5340_s6 + $0x9cc] sm:$0xff] }
  0x29   : > { %v304_v50 = vld [vmem:[%s5340_s6 + $0x9c4] sm:$0xff]  ;;  %301 = vst [vmem:[%s5345_s7 + $0x1e0] sm:$0xff] %v300_v48  ;;  %303 = vst [vmem:[%s5345_s7 + $0x1e8] sm:$0xff] %v302_v49  ;;  %v310_v53 = vld [vmem:[%s5340_s6 + $0xa30] sm:$0xff] }
  0x2a   : > { %305 = vst [vmem:[%s5345_s7 + $0x1f4] sm:$0xff] %v304_v50  ;;  %v308_v52 = vld [vmem:[%s5340_s6 + $0xa28] sm:$0xff]  ;;  %307 = vst [vmem:[%s5345_s7 + $0x1fc] sm:$0xff] %v306_v51  ;;  %v314_v55 = vld [vmem:[%s5340_s6 + $0xa94] sm:$0xff] }
  0x2b   : > { %309 = vst [vmem:[%s5345_s7 + $0x208] sm:$0xff] %v308_v52  ;;  %311 = vst [vmem:[%s5345_s7 + $0x210] sm:$0xff] %v310_v53  ;;  %v312_v54 = vld [vmem:[%s5340_s6 + $0xa8c] sm:$0xff]  ;;  %v318_v57 = vld [vmem:[%s5340_s6 + $0xaf8] sm:$0xff] }
  0x2c   : > { %v316_v56 = vld [vmem:[%s5340_s6 + $0xaf0] sm:$0xff]  ;;  %313 = vst [vmem:[%s5345_s7 + $0x21c] sm:$0xff] %v312_v54  ;;  %315 = vst [vmem:[%s5345_s7 + $0x224] sm:$0xff] %v314_v55  ;;  %v322_v59 = vld [vmem:[%s5340_s6 + $0xb5c] sm:$0xff] }
  0x2d   : > { %317 = vst [vmem:[%s5345_s7 + $0x230] sm:$0xff] %v316_v56  ;;  %v320_v58 = vld [vmem:[%s5340_s6 + $0xb54] sm:$0xff]  ;;  %319 = vst [vmem:[%s5345_s7 + $0x238] sm:$0xff] %v318_v57  ;;  %v326_v61 = vld [vmem:[%s5340_s6 + $0xbc0] sm:$0xff] }
  0x2e   : > { %321 = vst [vmem:[%s5345_s7 + $0x244] sm:$0xff] %v320_v58  ;;  %323 = vst [vmem:[%s5345_s7 + $0x24c] sm:$0xff] %v322_v59  ;;  %v324_v60 = vld [vmem:[%s5340_s6 + $0xbb8] sm:$0xff]  ;;  %v330_v63 = vld [vmem:[%s5340_s6 + $0xc24] sm:$0xff] }
  0x2f   : > { %v328_v62 = vld [vmem:[%s5340_s6 + $0xc1c] sm:$0xff]  ;;  %325 = vst [vmem:[%s5345_s7 + $0x258] sm:$0xff] %v324_v60  ;;  %327 = vst [vmem:[%s5345_s7 + $0x260] sm:$0xff] %v326_v61  ;;  %v334_v1 = vld [vmem:[%s5340_s6 + $0xc88] sm:$0xff] }
  0x30   : > { %329 = vst [vmem:[%s5345_s7 + $0x26c] sm:$0xff] %v328_v62  ;;  %v332_v0 = vld [vmem:[%s5340_s6 + $0xc80] sm:$0xff]  ;;  %331 = vst [vmem:[%s5345_s7 + $0x274] sm:$0xff] %v330_v63  ;;  %v338_v3 = vld [vmem:[%s5340_s6 + $0xcec] sm:$0xff] }
  0x31   : > { %333 = vst [vmem:[%s5345_s7 + $0x280] sm:$0xff] %v332_v0  ;;  %335 = vst [vmem:[%s5345_s7 + $0x288] sm:$0xff] %v334_v1  ;;  %v336_v2 = vld [vmem:[%s5340_s6 + $0xce4] sm:$0xff]  ;;  %v342_v5 = vld [vmem:[%s5340_s6 + $0xd50] sm:$0xff] }
  0x32   : > { %v340_v4 = vld [vmem:[%s5340_s6 + $0xd48] sm:$0xff]  ;;  %337 = vst [vmem:[%s5345_s7 + $0x294] sm:$0xff] %v336_v2  ;;  %339 = vst [vmem:[%s5345_s7 + $0x29c] sm:$0xff] %v338_v3  ;;  %v346_v7 = vld [vmem:[%s5340_s6 + $0xdb4] sm:$0xff] }
  0x33   : > { %341 = vst [vmem:[%s5345_s7 + $0x2a8] sm:$0xff] %v340_v4  ;;  %v344_v6 = vld [vmem:[%s5340_s6 + $0xdac] sm:$0xff]  ;;  %343 = vst [vmem:[%s5345_s7 + $0x2b0] sm:$0xff] %v342_v5  ;;  %v350_v9 = vld [vmem:[%s5340_s6 + $0xe18] sm:$0xff] }
  0x34   : > { %345 = vst [vmem:[%s5345_s7 + $0x2bc] sm:$0xff] %v344_v6  ;;  %347 = vst [vmem:[%s5345_s7 + $0x2c4] sm:$0xff] %v346_v7  ;;  %v348_v8 = vld [vmem:[%s5340_s6 + $0xe10] sm:$0xff]  ;;  %v354_v11 = vld [vmem:[%s5340_s6 + $0xe7c] sm:$0xff] }
  0x35   : > { %v352_v10 = vld [vmem:[%s5340_s6 + $0xe74] sm:$0xff]  ;;  %349 = vst [vmem:[%s5345_s7 + $0x2d0] sm:$0xff] %v348_v8  ;;  %351 = vst [vmem:[%s5345_s7 + $0x2d8] sm:$0xff] %v350_v9  ;;  %v358_v13 = vld [vmem:[%s5340_s6 + $0xee0] sm:$0xff] }
  0x36   : > { %353 = vst [vmem:[%s5345_s7 + $0x2e4] sm:$0xff] %v352_v10  ;;  %v356_v12 = vld [vmem:[%s5340_s6 + $0xed8] sm:$0xff]  ;;  %355 = vst [vmem:[%s5345_s7 + $0x2ec] sm:$0xff] %v354_v11  ;;  %v362_v15 = vld [vmem:[%s5340_s6 + $0xf44] sm:$0xff] }
  0x37   : > { %357 = vst [vmem:[%s5345_s7 + $0x2f8] sm:$0xff] %v356_v12  ;;  %359 = vst [vmem:[%s5345_s7 + $0x300] sm:$0xff] %v358_v13  ;;  %v360_v14 = vld [vmem:[%s5340_s6 + $0xf3c] sm:$0xff]  ;;  %v366_v17 = vld [vmem:[%s5340_s6 + $0xfa8] sm:$0xff] }
  0x38   : > { %v364_v16 = vld [vmem:[%s5340_s6 + $0xfa0] sm:$0xff]  ;;  %361 = vst [vmem:[%s5345_s7 + $0x30c] sm:$0xff] %v360_v14  ;;  %363 = vst [vmem:[%s5345_s7 + $0x314] sm:$0xff] %v362_v15  ;;  %v370_v19 = vld [vmem:[%s5340_s6 + $0x100c] sm:$0xff] }
  0x39   : > { %365 = vst [vmem:[%s5345_s7 + $0x320] sm:$0xff] %v364_v16  ;;  %v368_v18 = vld [vmem:[%s5340_s6 + $0x1004] sm:$0xff]  ;;  %367 = vst [vmem:[%s5345_s7 + $0x328] sm:$0xff] %v366_v17  ;;  %v374_v21 = vld [vmem:[%s5340_s6 + $0x1070] sm:$0xff] }
  0x3a   : > { %369 = vst [vmem:[%s5345_s7 + $0x334] sm:$0xff] %v368_v18  ;;  %371 = vst [vmem:[%s5345_s7 + $0x33c] sm:$0xff] %v370_v19  ;;  %v372_v20 = vld [vmem:[%s5340_s6 + $0x1068] sm:$0xff]  ;;  %v378_v23 = vld [vmem:[%s5340_s6 + $0x10d4] sm:$0xff] }
  0x3b   : > { %v376_v22 = vld [vmem:[%s5340_s6 + $0x10cc] sm:$0xff]  ;;  %373 = vst [vmem:[%s5345_s7 + $0x348] sm:$0xff] %v372_v20  ;;  %375 = vst [vmem:[%s5345_s7 + $0x350] sm:$0xff] %v374_v21  ;;  %v382_v25 = vld [vmem:[%s5340_s6 + $0x1138] sm:$0xff] }
  0x3c   : > { %377 = vst [vmem:[%s5345_s7 + $0x35c] sm:$0xff] %v376_v22  ;;  %v380_v24 = vld [vmem:[%s5340_s6 + $0x1130] sm:$0xff]  ;;  %379 = vst [vmem:[%s5345_s7 + $0x364] sm:$0xff] %v378_v23  ;;  %v386_v27 = vld [vmem:[%s5340_s6 + $0x119c] sm:$0xff] }
  0x3d   : > { %381 = vst [vmem:[%s5345_s7 + $0x370] sm:$0xff] %v380_v24  ;;  %383 = vst [vmem:[%s5345_s7 + $0x378] sm:$0xff] %v382_v25  ;;  %v384_v26 = vld [vmem:[%s5340_s6 + $0x1194] sm:$0xff]  ;;  %v390_v29 = vld [vmem:[%s5340_s6 + $0x1200] sm:$0xff] }
  0x3e   : > { %v388_v28 = vld [vmem:[%s5340_s6 + $0x11f8] sm:$0xff]  ;;  %385 = vst [vmem:[%s5345_s7 + $0x384] sm:$0xff] %v384_v26  ;;  %387 = vst [vmem:[%s5345_s7 + $0x38c] sm:$0xff] %v386_v27  ;;  %v394_v31 = vld [vmem:[%s5340_s6 + $0x1264] sm:$0xff] }
  0x3f   : > { %389 = vst [vmem:[%s5345_s7 + $0x398] sm:$0xff] %v388_v28  ;;  %v392_v30 = vld [vmem:[%s5340_s6 + $0x125c] sm:$0xff]  ;;  %391 = vst [vmem:[%s5345_s7 + $0x3a0] sm:$0xff] %v390_v29  ;;  %v398_v33 = vld [vmem:[%s5340_s6 + $0x12c8] sm:$0xff] }
  0x40   : > { %393 = vst [vmem:[%s5345_s7 + $0x3ac] sm:$0xff] %v392_v30  ;;  %395 = vst [vmem:[%s5345_s7 + $0x3b4] sm:$0xff] %v394_v31  ;;  %v396_v32 = vld [vmem:[%s5340_s6 + $0x12c0] sm:$0xff]  ;;  %v402_v35 = vld [vmem:[%s5340_s6 + $0x132c] sm:$0xff] }
  0x41   : > { %v400_v34 = vld [vmem:[%s5340_s6 + $0x1324] sm:$0xff]  ;;  %397 = vst [vmem:[%s5345_s7 + $0x3c0] sm:$0xff] %v396_v32  ;;  %399 = vst [vmem:[%s5345_s7 + $0x3c8] sm:$0xff] %v398_v33  ;;  %v406_v37 = vld [vmem:[%s5340_s6 + $0x1390] sm:$0xff] }
  0x42   : > { %401 = vst [vmem:[%s5345_s7 + $0x3d4] sm:$0xff] %v400_v34  ;;  %v404_v36 = vld [vmem:[%s5340_s6 + $0x1388] sm:$0xff]  ;;  %403 = vst [vmem:[%s5345_s7 + $0x3dc] sm:$0xff] %v402_v35  ;;  %v410_v39 = vld [vmem:[%s5340_s6 + $0x13f4] sm:$0xff] }
  0x43   : > { %405 = vst [vmem:[%s5345_s7 + $0x3e8] sm:$0xff] %v404_v36  ;;  %407 = vst [vmem:[%s5345_s7 + $0x3f0] sm:$0xff] %v406_v37  ;;  %v408_v38 = vld [vmem:[%s5340_s6 + $0x13ec] sm:$0xff]  ;;  %v414_v41 = vld [vmem:[%s5340_s6 + $0x1458] sm:$0xff] }
  0x44   : > { %v412_v40 = vld [vmem:[%s5340_s6 + $0x1450] sm:$0xff]  ;;  %409 = vst [vmem:[%s5345_s7 + $0x3fc] sm:$0xff] %v408_v38  ;;  %411 = vst [vmem:[%s5345_s7 + $0x404] sm:$0xff] %v410_v39  ;;  %v418_v43 = vld [vmem:[%s5340_s6 + $0x14bc] sm:$0xff] }
  0x45   : > { %413 = vst [vmem:[%s5345_s7 + $0x410] sm:$0xff] %v412_v40  ;;  %v416_v42 = vld [vmem:[%s5340_s6 + $0x14b4] sm:$0xff]  ;;  %415 = vst [vmem:[%s5345_s7 + $0x418] sm:$0xff] %v414_v41  ;;  %v422_v45 = vld [vmem:[%s5340_s6 + $0x1520] sm:$0xff] }
  0x46   : > { %417 = vst [vmem:[%s5345_s7 + $0x424] sm:$0xff] %v416_v42  ;;  %419 = vst [vmem:[%s5345_s7 + $0x42c] sm:$0xff] %v418_v43  ;;  %v420_v44 = vld [vmem:[%s5340_s6 + $0x1518] sm:$0xff]  ;;  %v426_v47 = vld [vmem:[%s5340_s6 + $0x1584] sm:$0xff] }
  0x47   : > { %v424_v46 = vld [vmem:[%s5340_s6 + $0x157c] sm:$0xff]  ;;  %421 = vst [vmem:[%s5345_s7 + $0x438] sm:$0xff] %v420_v44  ;;  %423 = vst [vmem:[%s5345_s7 + $0x440] sm:$0xff] %v422_v45  ;;  %v430_v49 = vld [vmem:[%s5340_s6 + $0x15e8] sm:$0xff] }
  0x48   : > { %425 = vst [vmem:[%s5345_s7 + $0x44c] sm:$0xff] %v424_v46  ;;  %v428_v48 = vld [vmem:[%s5340_s6 + $0x15e0] sm:$0xff]  ;;  %427 = vst [vmem:[%s5345_s7 + $0x454] sm:$0xff] %v426_v47  ;;  %v434_v51 = vld [vmem:[%s5340_s6 + $0x164c] sm:$0xff] }
  0x49   : > { %429 = vst [vmem:[%s5345_s7 + $0x460] sm:$0xff] %v428_v48  ;;  %431 = vst [vmem:[%s5345_s7 + $0x468] sm:$0xff] %v430_v49  ;;  %v432_v50 = vld [vmem:[%s5340_s6 + $0x1644] sm:$0xff]  ;;  %v438_v53 = vld [vmem:[%s5340_s6 + $0x16b0] sm:$0xff] }
  0x4a   : > { %v436_v52 = vld [vmem:[%s5340_s6 + $0x16a8] sm:$0xff]  ;;  %433 = vst [vmem:[%s5345_s7 + $0x474] sm:$0xff] %v432_v50  ;;  %435 = vst [vmem:[%s5345_s7 + $0x47c] sm:$0xff] %v434_v51  ;;  %v442_v55 = vld [vmem:[%s5340_s6 + $0x1714] sm:$0xff] }
  0x4b   : > { %437 = vst [vmem:[%s5345_s7 + $0x488] sm:$0xff] %v436_v52  ;;  %v440_v54 = vld [vmem:[%s5340_s6 + $0x170c] sm:$0xff]  ;;  %439 = vst [vmem:[%s5345_s7 + $0x490] sm:$0xff] %v438_v53  ;;  %v446_v57 = vld [vmem:[%s5340_s6 + $0x1778] sm:$0xff] }
  0x4c   : > { %441 = vst [vmem:[%s5345_s7 + $0x49c] sm:$0xff] %v440_v54  ;;  %443 = vst [vmem:[%s5345_s7 + $0x4a4] sm:$0xff] %v442_v55  ;;  %v444_v56 = vld [vmem:[%s5340_s6 + $0x1770] sm:$0xff]  ;;  %v450_v59 = vld [vmem:[%s5340_s6 + $0x17dc] sm:$0xff] }
  0x4d   : > { %v448_v58 = vld [vmem:[%s5340_s6 + $0x17d4] sm:$0xff]  ;;  %445 = vst [vmem:[%s5345_s7 + $0x4b0] sm:$0xff] %v444_v56  ;;  %447 = vst [vmem:[%s5345_s7 + $0x4b8] sm:$0xff] %v446_v57  ;;  %v454_v61 = vld [vmem:[%s5340_s6 + $0x1840] sm:$0xff] }
  0x4e   : > { %449 = vst [vmem:[%s5345_s7 + $0x4c4] sm:$0xff] %v448_v58  ;;  %v452_v60 = vld [vmem:[%s5340_s6 + $0x1838] sm:$0xff]  ;;  %451 = vst [vmem:[%s5345_s7 + $0x4cc] sm:$0xff] %v450_v59  ;;  %v458_v63 = vld [vmem:[%s5340_s6 + $0x18a4] sm:$0xff] }
  0x4f   : > { %453 = vst [vmem:[%s5345_s7 + $0x4d8] sm:$0xff] %v452_v60  ;;  %455 = vst [vmem:[%s5345_s7 + $0x4e0] sm:$0xff] %v454_v61  ;;  %v456_v62 = vld [vmem:[%s5340_s6 + $0x189c] sm:$0xff]  ;;  %v462_v1 = vld [vmem:[%s5340_s6 + $0x1908] sm:$0xff] }
  0x50   : > { %v460_v0 = vld [vmem:[%s5340_s6 + $0x1900] sm:$0xff]  ;;  %457 = vst [vmem:[%s5345_s7 + $0x4ec] sm:$0xff] %v456_v62  ;;  %459 = vst [vmem:[%s5345_s7 + $0x4f4] sm:$0xff] %v458_v63  ;;  %v466_v3 = vld [vmem:[%s5340_s6 + $0x196c] sm:$0xff] }
  0x51   : > { %461 = vst [vmem:[%s5345_s7 + $0x500] sm:$0xff] %v460_v0  ;;  %v464_v2 = vld [vmem:[%s5340_s6 + $0x1964] sm:$0xff]  ;;  %463 = vst [vmem:[%s5345_s7 + $0x508] sm:$0xff] %v462_v1  ;;  %v470_v5 = vld [vmem:[%s5340_s6 + $0x19d0] sm:$0xff] }
  0x52   : > { %465 = vst [vmem:[%s5345_s7 + $0x514] sm:$0xff] %v464_v2  ;;  %467 = vst [vmem:[%s5345_s7 + $0x51c] sm:$0xff] %v466_v3  ;;  %v468_v4 = vld [vmem:[%s5340_s6 + $0x19c8] sm:$0xff]  ;;  %v474_v7 = vld [vmem:[%s5340_s6 + $0x1a34] sm:$0xff] }
  0x53   : > { %v472_v6 = vld [vmem:[%s5340_s6 + $0x1a2c] sm:$0xff]  ;;  %469 = vst [vmem:[%s5345_s7 + $0x528] sm:$0xff] %v468_v4  ;;  %471 = vst [vmem:[%s5345_s7 + $0x530] sm:$0xff] %v470_v5  ;;  %v478_v9 = vld [vmem:[%s5340_s6 + $0x1a98] sm:$0xff] }
  0x54   : > { %473 = vst [vmem:[%s5345_s7 + $0x53c] sm:$0xff] %v472_v6  ;;  %v476_v8 = vld [vmem:[%s5340_s6 + $0x1a90] sm:$0xff]  ;;  %475 = vst [vmem:[%s5345_s7 + $0x544] sm:$0xff] %v474_v7  ;;  %v482_v11 = vld [vmem:[%s5340_s6 + $0x1afc] sm:$0xff] }
  0x55   : > { %477 = vst [vmem:[%s5345_s7 + $0x550] sm:$0xff] %v476_v8  ;;  %479 = vst [vmem:[%s5345_s7 + $0x558] sm:$0xff] %v478_v9  ;;  %v480_v10 = vld [vmem:[%s5340_s6 + $0x1af4] sm:$0xff]  ;;  %v486_v13 = vld [vmem:[%s5340_s6 + $0x1b60] sm:$0xff] }
  0x56   : > { %v484_v12 = vld [vmem:[%s5340_s6 + $0x1b58] sm:$0xff]  ;;  %481 = vst [vmem:[%s5345_s7 + $0x564] sm:$0xff] %v480_v10  ;;  %483 = vst [vmem:[%s5345_s7 + $0x56c] sm:$0xff] %v482_v11  ;;  %v490_v15 = vld [vmem:[%s5340_s6 + $0x1bc4] sm:$0xff] }
  0x57   : > { %485 = vst [vmem:[%s5345_s7 + $0x578] sm:$0xff] %v484_v12  ;;  %v488_v14 = vld [vmem:[%s5340_s6 + $0x1bbc] sm:$0xff]  ;;  %487 = vst [vmem:[%s5345_s7 + $0x580] sm:$0xff] %v486_v13  ;;  %v494_v17 = vld [vmem:[%s5340_s6 + $0x1c28] sm:$0xff] }
  0x58   : > { %489 = vst [vmem:[%s5345_s7 + $0x58c] sm:$0xff] %v488_v14  ;;  %491 = vst [vmem:[%s5345_s7 + $0x594] sm:$0xff] %v490_v15  ;;  %v492_v16 = vld [vmem:[%s5340_s6 + $0x1c20] sm:$0xff]  ;;  %v498_v19 = vld [vmem:[%s5340_s6 + $0x1c8c] sm:$0xff] }
  0x59   : > { %v496_v18 = vld [vmem:[%s5340_s6 + $0x1c84] sm:$0xff]  ;;  %493 = vst [vmem:[%s5345_s7 + $0x5a0] sm:$0xff] %v492_v16  ;;  %495 = vst [vmem:[%s5345_s7 + $0x5a8] sm:$0xff] %v494_v17  ;;  %v502_v21 = vld [vmem:[%s5340_s6 + $0x1cf0] sm:$0xff] }
  0x5a   : > { %497 = vst [vmem:[%s5345_s7 + $0x5b4] sm:$0xff] %v496_v18  ;;  %v500_v20 = vld [vmem:[%s5340_s6 + $0x1ce8] sm:$0xff]  ;;  %499 = vst [vmem:[%s5345_s7 + $0x5bc] sm:$0xff] %v498_v19  ;;  %v506_v23 = vld [vmem:[%s5340_s6 + $0x1d54] sm:$0xff] }
  0x5b   : > { %501 = vst [vmem:[%s5345_s7 + $0x5c8] sm:$0xff] %v500_v20  ;;  %503 = vst [vmem:[%s5345_s7 + $0x5d0] sm:$0xff] %v502_v21  ;;  %v504_v22 = vld [vmem:[%s5340_s6 + $0x1d4c] sm:$0xff]  ;;  %v510_v25 = vld [vmem:[%s5340_s6 + $0x1db8] sm:$0xff] }
  0x5c   : > { %v508_v24 = vld [vmem:[%s5340_s6 + $0x1db0] sm:$0xff]  ;;  %505 = vst [vmem:[%s5345_s7 + $0x5dc] sm:$0xff] %v504_v22  ;;  %507 = vst [vmem:[%s5345_s7 + $0x5e4] sm:$0xff] %v506_v23  ;;  %v514_v27 = vld [vmem:[%s5340_s6 + $0x1e1c] sm:$0xff] }
  0x5d   : > { %509 = vst [vmem:[%s5345_s7 + $0x5f0] sm:$0xff] %v508_v24  ;;  %v512_v26 = vld [vmem:[%s5340_s6 + $0x1e14] sm:$0xff]  ;;  %511 = vst [vmem:[%s5345_s7 + $0x5f8] sm:$0xff] %v510_v25  ;;  %v518_v29 = vld [vmem:[%s5340_s6 + $0x1e80] sm:$0xff] }
  0x5e   : > { %513 = vst [vmem:[%s5345_s7 + $0x604] sm:$0xff] %v512_v26  ;;  %515 = vst [vmem:[%s5345_s7 + $0x60c] sm:$0xff] %v514_v27  ;;  %v516_v28 = vld [vmem:[%s5340_s6 + $0x1e78] sm:$0xff]  ;;  %v522_v31 = vld [vmem:[%s5340_s6 + $0x1ee4] sm:$0xff] }
  0x5f   : > { %v520_v30 = vld [vmem:[%s5340_s6 + $0x1edc] sm:$0xff]  ;;  %517 = vst [vmem:[%s5345_s7 + $0x618] sm:$0xff] %v516_v28  ;;  %519 = vst [vmem:[%s5345_s7 + $0x620] sm:$0xff] %v518_v29  ;;  %v526_v33 = vld [vmem:[%s5340_s6 + $0x1f48] sm:$0xff] }
  0x60   : > { %521 = vst [vmem:[%s5345_s7 + $0x62c] sm:$0xff] %v520_v30  ;;  %v524_v32 = vld [vmem:[%s5340_s6 + $0x1f40] sm:$0xff]  ;;  %523 = vst [vmem:[%s5345_s7 + $0x634] sm:$0xff] %v522_v31  ;;  %v530_v35 = vld [vmem:[%s5340_s6 + $0x1fac] sm:$0xff] }
  0x61   : > { %525 = vst [vmem:[%s5345_s7 + $0x640] sm:$0xff] %v524_v32  ;;  %527 = vst [vmem:[%s5345_s7 + $0x648] sm:$0xff] %v526_v33  ;;  %v528_v34 = vld [vmem:[%s5340_s6 + $0x1fa4] sm:$0xff]  ;;  %v534_v37 = vld [vmem:[%s5340_s6 + $0x2010] sm:$0xff] }
  0x62   : > { %v532_v36 = vld [vmem:[%s5340_s6 + $0x2008] sm:$0xff]  ;;  %529 = vst [vmem:[%s5345_s7 + $0x654] sm:$0xff] %v528_v34  ;;  %531 = vst [vmem:[%s5345_s7 + $0x65c] sm:$0xff] %v530_v35  ;;  %v538_v39 = vld [vmem:[%s5340_s6 + $0x2074] sm:$0xff] }
  0x63   : > { %533 = vst [vmem:[%s5345_s7 + $0x668] sm:$0xff] %v532_v36  ;;  %v536_v38 = vld [vmem:[%s5340_s6 + $0x206c] sm:$0xff]  ;;  %535 = vst [vmem:[%s5345_s7 + $0x670] sm:$0xff] %v534_v37  ;;  %v542_v41 = vld [vmem:[%s5340_s6 + $0x20d8] sm:$0xff] }
  0x64   : > { %537 = vst [vmem:[%s5345_s7 + $0x67c] sm:$0xff] %v536_v38  ;;  %539 = vst [vmem:[%s5345_s7 + $0x684] sm:$0xff] %v538_v39  ;;  %v540_v40 = vld [vmem:[%s5340_s6 + $0x20d0] sm:$0xff]  ;;  %v546_v43 = vld [vmem:[%s5340_s6 + $0x213c] sm:$0xff] }
  0x65   : > { %v544_v42 = vld [vmem:[%s5340_s6 + $0x2134] sm:$0xff]  ;;  %541 = vst [vmem:[%s5345_s7 + $0x690] sm:$0xff] %v540_v40  ;;  %543 = vst [vmem:[%s5345_s7 + $0x698] sm:$0xff] %v542_v41  ;;  %v550_v45 = vld [vmem:[%s5340_s6 + $0x21a0] sm:$0xff] }
  0x66   : > { %545 = vst [vmem:[%s5345_s7 + $0x6a4] sm:$0xff] %v544_v42  ;;  %v548_v44 = vld [vmem:[%s5340_s6 + $0x2198] sm:$0xff]  ;;  %547 = vst [vmem:[%s5345_s7 + $0x6ac] sm:$0xff] %v546_v43  ;;  %v554_v47 = vld [vmem:[%s5340_s6 + $0x2204] sm:$0xff] }
  0x67   : > { %549 = vst [vmem:[%s5345_s7 + $0x6b8] sm:$0xff] %v548_v44  ;;  %551 = vst [vmem:[%s5345_s7 + $0x6c0] sm:$0xff] %v550_v45  ;;  %v552_v46 = vld [vmem:[%s5340_s6 + $0x21fc] sm:$0xff]  ;;  %v558_v49 = vld [vmem:[%s5340_s6 + $0x2268] sm:$0xff] }
  0x68   : > { %v556_v48 = vld [vmem:[%s5340_s6 + $0x2260] sm:$0xff]  ;;  %553 = vst [vmem:[%s5345_s7 + $0x6cc] sm:$0xff] %v552_v46  ;;  %555 = vst [vmem:[%s5345_s7 + $0x6d4] sm:$0xff] %v554_v47  ;;  %v562_v51 = vld [vmem:[%s5340_s6 + $0x22cc] sm:$0xff] }
  0x69   : > { %557 = vst [vmem:[%s5345_s7 + $0x6e0] sm:$0xff] %v556_v48  ;;  %v560_v50 = vld [vmem:[%s5340_s6 + $0x22c4] sm:$0xff]  ;;  %559 = vst [vmem:[%s5345_s7 + $0x6e8] sm:$0xff] %v558_v49  ;;  %v566_v53 = vld [vmem:[%s5340_s6 + $0x2330] sm:$0xff] }
  0x6a   : > { %561 = vst [vmem:[%s5345_s7 + $0x6f4] sm:$0xff] %v560_v50  ;;  %563 = vst [vmem:[%s5345_s7 + $0x6fc] sm:$0xff] %v562_v51  ;;  %v564_v52 = vld [vmem:[%s5340_s6 + $0x2328] sm:$0xff]  ;;  %v570_v55 = vld [vmem:[%s5340_s6 + $0x2394] sm:$0xff] }
  0x6b   : > { %v568_v54 = vld [vmem:[%s5340_s6 + $0x238c] sm:$0xff]  ;;  %565 = vst [vmem:[%s5345_s7 + $0x708] sm:$0xff] %v564_v52  ;;  %567 = vst [vmem:[%s5345_s7 + $0x710] sm:$0xff] %v566_v53  ;;  %v574_v57 = vld [vmem:[%s5340_s6 + $0x23f8] sm:$0xff] }
  0x6c   : > { %569 = vst [vmem:[%s5345_s7 + $0x71c] sm:$0xff] %v568_v54  ;;  %v572_v56 = vld [vmem:[%s5340_s6 + $0x23f0] sm:$0xff]  ;;  %571 = vst [vmem:[%s5345_s7 + $0x724] sm:$0xff] %v570_v55  ;;  %v578_v59 = vld [vmem:[%s5340_s6 + $0x245c] sm:$0xff] }
  0x6d   : > { %573 = vst [vmem:[%s5345_s7 + $0x730] sm:$0xff] %v572_v56  ;;  %575 = vst [vmem:[%s5345_s7 + $0x738] sm:$0xff] %v574_v57  ;;  %v576_v58 = vld [vmem:[%s5340_s6 + $0x2454] sm:$0xff]  ;;  %v582_v61 = vld [vmem:[%s5340_s6 + $0x24c0] sm:$0xff] }
  0x6e   : > { %v580_v60 = vld [vmem:[%s5340_s6 + $0x24b8] sm:$0xff]  ;;  %577 = vst [vmem:[%s5345_s7 + $0x744] sm:$0xff] %v576_v58  ;;  %579 = vst [vmem:[%s5345_s7 + $0x74c] sm:$0xff] %v578_v59  ;;  %v586_v63 = vld [vmem:[%s5340_s6 + $0x2524] sm:$0xff] }
  0x6f   : > { %581 = vst [vmem:[%s5345_s7 + $0x758] sm:$0xff] %v580_v60  ;;  %v584_v62 = vld [vmem:[%s5340_s6 + $0x251c] sm:$0xff]  ;;  %583 = vst [vmem:[%s5345_s7 + $0x760] sm:$0xff] %v582_v61  ;;  %v590_v1 = vld [vmem:[%s5340_s6 + $0x2588] sm:$0xff] }
  0x70   : > { %585 = vst [vmem:[%s5345_s7 + $0x76c] sm:$0xff] %v584_v62  ;;  %587 = vst [vmem:[%s5345_s7 + $0x774] sm:$0xff] %v586_v63  ;;  %v588_v0 = vld [vmem:[%s5340_s6 + $0x2580] sm:$0xff]  ;;  %v594_v3 = vld [vmem:[%s5340_s6 + $0x25ec] sm:$0xff] }
  0x71   : > { %v592_v2 = vld [vmem:[%s5340_s6 + $0x25e4] sm:$0xff]  ;;  %589 = vst [vmem:[%s5345_s7 + $0x780] sm:$0xff] %v588_v0  ;;  %591 = vst [vmem:[%s5345_s7 + $0x788] sm:$0xff] %v590_v1  ;;  %v598_v5 = vld [vmem:[%s5340_s6 + $0x2650] sm:$0xff] }
  0x72   : > { %593 = vst [vmem:[%s5345_s7 + $0x794] sm:$0xff] %v592_v2  ;;  %v596_v4 = vld [vmem:[%s5340_s6 + $0x2648] sm:$0xff]  ;;  %595 = vst [vmem:[%s5345_s7 + $0x79c] sm:$0xff] %v594_v3  ;;  %v602_v7 = vld [vmem:[%s5340_s6 + $0x26b4] sm:$0xff] }
  0x73   : > { %597 = vst [vmem:[%s5345_s7 + $0x7a8] sm:$0xff] %v596_v4  ;;  %599 = vst [vmem:[%s5345_s7 + $0x7b0] sm:$0xff] %v598_v5  ;;  %v600_v6 = vld [vmem:[%s5340_s6 + $0x26ac] sm:$0xff]  ;;  %v606_v9 = vld [vmem:[%s5340_s6 + $0x2718] sm:$0xff] }
  0x74   : > { %v604_v8 = vld [vmem:[%s5340_s6 + $0x2710] sm:$0xff]  ;;  %601 = vst [vmem:[%s5345_s7 + $0x7bc] sm:$0xff] %v600_v6  ;;  %603 = vst [vmem:[%s5345_s7 + $0x7c4] sm:$0xff] %v602_v7  ;;  %v610_v11 = vld [vmem:[%s5340_s6 + $0x277c] sm:$0xff] }
  0x75   : > { %605 = vst [vmem:[%s5345_s7 + $0x7d0] sm:$0xff] %v604_v8  ;;  %v608_v10 = vld [vmem:[%s5340_s6 + $0x2774] sm:$0xff]  ;;  %607 = vst [vmem:[%s5345_s7 + $0x7d8] sm:$0xff] %v606_v9  ;;  %v614_v13 = vld [vmem:[%s5340_s6 + $0x27e0] sm:$0xff] }
  0x76   : > { %609 = vst [vmem:[%s5345_s7 + $0x7e4] sm:$0xff] %v608_v10  ;;  %611 = vst [vmem:[%s5345_s7 + $0x7ec] sm:$0xff] %v610_v11  ;;  %v612_v12 = vld [vmem:[%s5340_s6 + $0x27d8] sm:$0xff]  ;;  %v618_v15 = vld [vmem:[%s5340_s6 + $0x2844] sm:$0xff] }
  0x77   : > { %v616_v14 = vld [vmem:[%s5340_s6 + $0x283c] sm:$0xff]  ;;  %613 = vst [vmem:[%s5345_s7 + $0x7f8] sm:$0xff] %v612_v12  ;;  %615 = vst [vmem:[%s5345_s7 + $0x800] sm:$0xff] %v614_v13  ;;  %v622_v17 = vld [vmem:[%s5340_s6 + $0x28a8] sm:$0xff] }
  0x78   : > { %617 = vst [vmem:[%s5345_s7 + $0x80c] sm:$0xff] %v616_v14  ;;  %v620_v16 = vld [vmem:[%s5340_s6 + $0x28a0] sm:$0xff]  ;;  %619 = vst [vmem:[%s5345_s7 + $0x814] sm:$0xff] %v618_v15  ;;  %v626_v19 = vld [vmem:[%s5340_s6 + $0x290c] sm:$0xff] }
  0x79   : > { %621 = vst [vmem:[%s5345_s7 + $0x820] sm:$0xff] %v620_v16  ;;  %623 = vst [vmem:[%s5345_s7 + $0x828] sm:$0xff] %v622_v17  ;;  %v624_v18 = vld [vmem:[%s5340_s6 + $0x2904] sm:$0xff]  ;;  %v630_v21 = vld [vmem:[%s5340_s6 + $0x2970] sm:$0xff] }
  0x7a   : > { %v628_v20 = vld [vmem:[%s5340_s6 + $0x2968] sm:$0xff]  ;;  %625 = vst [vmem:[%s5345_s7 + $0x834] sm:$0xff] %v624_v18  ;;  %627 = vst [vmem:[%s5345_s7 + $0x83c] sm:$0xff] %v626_v19  ;;  %v634_v23 = vld [vmem:[%s5340_s6 + $0x29d4] sm:$0xff] }
  0x7b   : > { %629 = vst [vmem:[%s5345_s7 + $0x848] sm:$0xff] %v628_v20  ;;  %v632_v22 = vld [vmem:[%s5340_s6 + $0x29cc] sm:$0xff]  ;;  %631 = vst [vmem:[%s5345_s7 + $0x850] sm:$0xff] %v630_v21  ;;  %v638_v25 = vld [vmem:[%s5340_s6 + $0x2a38] sm:$0xff] }
  0x7c   : > { %633 = vst [vmem:[%s5345_s7 + $0x85c] sm:$0xff] %v632_v22  ;;  %635 = vst [vmem:[%s5345_s7 + $0x864] sm:$0xff] %v634_v23  ;;  %v636_v24 = vld [vmem:[%s5340_s6 + $0x2a30] sm:$0xff]  ;;  %v642_v27 = vld [vmem:[%s5340_s6 + $0x2a9c] sm:$0xff] }
  0x7d   : > { %v640_v26 = vld [vmem:[%s5340_s6 + $0x2a94] sm:$0xff]  ;;  %637 = vst [vmem:[%s5345_s7 + $0x870] sm:$0xff] %v636_v24  ;;  %639 = vst [vmem:[%s5345_s7 + $0x878] sm:$0xff] %v638_v25  ;;  %v646_v29 = vld [vmem:[%s5340_s6 + $0x2b00] sm:$0xff] }
  0x7e   : > { %641 = vst [vmem:[%s5345_s7 + $0x884] sm:$0xff] %v640_v26  ;;  %v644_v28 = vld [vmem:[%s5340_s6 + $0x2af8] sm:$0xff]  ;;  %643 = vst [vmem:[%s5345_s7 + $0x88c] sm:$0xff] %v642_v27  ;;  %v650_v31 = vld [vmem:[%s5340_s6 + $0x2b64] sm:$0xff] }
  0x7f   : > { %645 = vst [vmem:[%s5345_s7 + $0x898] sm:$0xff] %v644_v28  ;;  %647 = vst [vmem:[%s5345_s7 + $0x8a0] sm:$0xff] %v646_v29  ;;  %v648_v30 = vld [vmem:[%s5340_s6 + $0x2b5c] sm:$0xff]  ;;  %v654_v33 = vld [vmem:[%s5340_s6 + $0x2bc8] sm:$0xff] }
  0x80   : > { %v652_v32 = vld [vmem:[%s5340_s6 + $0x2bc0] sm:$0xff]  ;;  %649 = vst [vmem:[%s5345_s7 + $0x8ac] sm:$0xff] %v648_v30  ;;  %651 = vst [vmem:[%s5345_s7 + $0x8b4] sm:$0xff] %v650_v31  ;;  %v658_v35 = vld [vmem:[%s5340_s6 + $0x2c2c] sm:$0xff] }
  0x81   : > { %653 = vst [vmem:[%s5345_s7 + $0x8c0] sm:$0xff] %v652_v32  ;;  %v656_v34 = vld [vmem:[%s5340_s6 + $0x2c24] sm:$0xff]  ;;  %655 = vst [vmem:[%s5345_s7 + $0x8c8] sm:$0xff] %v654_v33  ;;  %v662_v37 = vld [vmem:[%s5340_s6 + $0x2c90] sm:$0xff] }
  0x82   : > { %657 = vst [vmem:[%s5345_s7 + $0x8d4] sm:$0xff] %v656_v34  ;;  %659 = vst [vmem:[%s5345_s7 + $0x8dc] sm:$0xff] %v658_v35  ;;  %v660_v36 = vld [vmem:[%s5340_s6 + $0x2c88] sm:$0xff]  ;;  %v666_v39 = vld [vmem:[%s5340_s6 + $0x2cf4] sm:$0xff] }
  0x83   : > { %v664_v38 = vld [vmem:[%s5340_s6 + $0x2cec] sm:$0xff]  ;;  %661 = vst [vmem:[%s5345_s7 + $0x8e8] sm:$0xff] %v660_v36  ;;  %663 = vst [vmem:[%s5345_s7 + $0x8f0] sm:$0xff] %v662_v37  ;;  %v670_v41 = vld [vmem:[%s5340_s6 + $0x2d58] sm:$0xff] }
  0x84   : > { %665 = vst [vmem:[%s5345_s7 + $0x8fc] sm:$0xff] %v664_v38  ;;  %v668_v40 = vld [vmem:[%s5340_s6 + $0x2d50] sm:$0xff]  ;;  %667 = vst [vmem:[%s5345_s7 + $0x904] sm:$0xff] %v666_v39  ;;  %v674_v43 = vld [vmem:[%s5340_s6 + $0x2dbc] sm:$0xff] }
  0x85   : > { %669 = vst [vmem:[%s5345_s7 + $0x910] sm:$0xff] %v668_v40  ;;  %671 = vst [vmem:[%s5345_s7 + $0x918] sm:$0xff] %v670_v41  ;;  %v672_v42 = vld [vmem:[%s5340_s6 + $0x2db4] sm:$0xff]  ;;  %v678_v45 = vld [vmem:[%s5340_s6 + $0x2e20] sm:$0xff] }
  0x86   : > { %v676_v44 = vld [vmem:[%s5340_s6 + $0x2e18] sm:$0xff]  ;;  %673 = vst [vmem:[%s5345_s7 + $0x924] sm:$0xff] %v672_v42  ;;  %675 = vst [vmem:[%s5345_s7 + $0x92c] sm:$0xff] %v674_v43  ;;  %v682_v47 = vld [vmem:[%s5340_s6 + $0x2e84] sm:$0xff] }
  0x87   : > { %677 = vst [vmem:[%s5345_s7 + $0x938] sm:$0xff] %v676_v44  ;;  %v680_v46 = vld [vmem:[%s5340_s6 + $0x2e7c] sm:$0xff]  ;;  %679 = vst [vmem:[%s5345_s7 + $0x940] sm:$0xff] %v678_v45  ;;  %v686_v49 = vld [vmem:[%s5340_s6 + $0x2ee8] sm:$0xff] }
  0x88   : > { %681 = vst [vmem:[%s5345_s7 + $0x94c] sm:$0xff] %v680_v46  ;;  %683 = vst [vmem:[%s5345_s7 + $0x954] sm:$0xff] %v682_v47  ;;  %v684_v48 = vld [vmem:[%s5340_s6 + $0x2ee0] sm:$0xff]  ;;  %v690_v51 = vld [vmem:[%s5340_s6 + $0x2f4c] sm:$0xff] }
  0x89   : > { %v688_v50 = vld [vmem:[%s5340_s6 + $0x2f44] sm:$0xff]  ;;  %685 = vst [vmem:[%s5345_s7 + $0x960] sm:$0xff] %v684_v48  ;;  %687 = vst [vmem:[%s5345_s7 + $0x968] sm:$0xff] %v686_v49  ;;  %v694_v53 = vld [vmem:[%s5340_s6 + $0x2fb0] sm:$0xff] }
  0x8a   : > { %689 = vst [vmem:[%s5345_s7 + $0x974] sm:$0xff] %v688_v50  ;;  %v692_v52 = vld [vmem:[%s5340_s6 + $0x2fa8] sm:$0xff]  ;;  %691 = vst [vmem:[%s5345_s7 + $0x97c] sm:$0xff] %v690_v51  ;;  %v698_v55 = vld [vmem:[%s5340_s6 + $0x3014] sm:$0xff] }
  0x8b   : > { %693 = vst [vmem:[%s5345_s7 + $0x988] sm:$0xff] %v692_v52  ;;  %695 = vst [vmem:[%s5345_s7 + $0x990] sm:$0xff] %v694_v53  ;;  %v696_v54 = vld [vmem:[%s5340_s6 + $0x300c] sm:$0xff]  ;;  %v702_v57 = vld [vmem:[%s5340_s6 + $0x3078] sm:$0xff] }
  0x8c   : > { %v700_v56 = vld [vmem:[%s5340_s6 + $0x3070] sm:$0xff]  ;;  %697 = vst [vmem:[%s5345_s7 + $0x99c] sm:$0xff] %v696_v54  ;;  %699 = vst [vmem:[%s5345_s7 + $0x9a4] sm:$0xff] %v698_v55  ;;  %v706_v59 = vld [vmem:[%s5340_s6 + $0x30dc] sm:$0xff] }
  0x8d   : > { %701 = vst [vmem:[%s5345_s7 + $0x9b0] sm:$0xff] %v700_v56  ;;  %v704_v58 = vld [vmem:[%s5340_s6 + $0x30d4] sm:$0xff]  ;;  %703 = vst [vmem:[%s5345_s7 + $0x9b8] sm:$0xff] %v702_v57  ;;  %v710_v61 = vld [vmem:[%s5340_s6 + $0x3140] sm:$0xff] }
  0x8e   : > { %705 = vst [vmem:[%s5345_s7 + $0x9c4] sm:$0xff] %v704_v58  ;;  %707 = vst [vmem:[%s5345_s7 + $0x9cc] sm:$0xff] %v706_v59  ;;  %v708_v60 = vld [vmem:[%s5340_s6 + $0x3138] sm:$0xff]  ;;  %v714_v63 = vld [vmem:[%s5340_s6 + $0x31a4] sm:$0xff] }
  0x8f   : > { %v712_v62 = vld [vmem:[%s5340_s6 + $0x319c] sm:$0xff]  ;;  %709 = vst [vmem:[%s5345_s7 + $0x9d8] sm:$0xff] %v708_v60  ;;  %711 = vst [vmem:[%s5345_s7 + $0x9e0] sm:$0xff] %v710_v61  ;;  %v4069_v0 = vld [vmem:[%s5340_s6 + $0x10] sm:$0xf] }
  0x90   : > { %713 = vst [vmem:[%s5345_s7 + $0x9ec] sm:$0xff] %v712_v62  ;;  %v4071_v1 = vld [vmem:[%s5340_s6 + $0x74] sm:$0xf]  ;;  %715 = vst [vmem:[%s5345_s7 + $0x9f4] sm:$0xff] %v714_v63  ;;  %v4073_v2 = vld [vmem:[%s5340_s6 + $0xd8] sm:$0xf] }
  0x91   : > { %4070 = vst [vmem:[%s5345_s7 + $0x10] sm:$0xf] %v4069_v0  ;;  %4072 = vst [vmem:[%s5345_s7 + $0x24] sm:$0xf] %v4071_v1  ;;  %v4075_v3 = vld [vmem:[%s5340_s6 + $0x13c] sm:$0xf] }
  0x92   : > { %v4077_v4 = vld [vmem:[%s5340_s6 + $0x1a0] sm:$0xf]  ;;  %4074 = vst [vmem:[%s5345_s7 + $0x38] sm:$0xf] %v4073_v2  ;;  %4076 = vst [vmem:[%s5345_s7 + $0x4c] sm:$0xf] %v4075_v3 }
  0x93   : > { %4078 = vst [vmem:[%s5345_s7 + $0x60] sm:$0xf] %v4077_v4  ;;  %v4079_v5 = vld [vmem:[%s5340_s6 + $0x204] sm:$0xf]  ;;  %v4081_v6 = vld [vmem:[%s5340_s6 + $0x268] sm:$0xf] }
  0x94   : > { %v4083_v7 = vld [vmem:[%s5340_s6 + $0x2cc] sm:$0xf]  ;;  %4080 = vst [vmem:[%s5345_s7 + $0x74] sm:$0xf] %v4079_v5  ;;  %4082 = vst [vmem:[%s5345_s7 + $0x88] sm:$0xf] %v4081_v6 }
  0x95   : > { %4084 = vst [vmem:[%s5345_s7 + $0x9c] sm:$0xf] %v4083_v7  ;;  %v4085_v8 = vld [vmem:[%s5340_s6 + $0x330] sm:$0xf]  ;;  %v4087_v9 = vld [vmem:[%s5340_s6 + $0x394] sm:$0xf] }
  0x96   : > { %v4089_v10 = vld [vmem:[%s5340_s6 + $0x3f8] sm:$0xf]  ;;  %4086 = vst [vmem:[%s5345_s7 + $0xb0] sm:$0xf] %v4085_v8  ;;  %4088 = vst [vmem:[%s5345_s7 + $0xc4] sm:$0xf] %v4087_v9 }
  0x97   : > { %4090 = vst [vmem:[%s5345_s7 + $0xd8] sm:$0xf] %v4089_v10  ;;  %v4091_v11 = vld [vmem:[%s5340_s6 + $0x45c] sm:$0xf]  ;;  %v4093_v12 = vld [vmem:[%s5340_s6 + $0x4c0] sm:$0xf] }
  0x98   : > { %v4095_v13 = vld [vmem:[%s5340_s6 + $0x524] sm:$0xf]  ;;  %4092 = vst [vmem:[%s5345_s7 + $0xec] sm:$0xf] %v4091_v11  ;;  %4094 = vst [vmem:[%s5345_s7 + $0x100] sm:$0xf] %v4093_v12 }
  0x99   : > { %4096 = vst [vmem:[%s5345_s7 + $0x114] sm:$0xf] %v4095_v13  ;;  %v4097_v14 = vld [vmem:[%s5340_s6 + $0x588] sm:$0xf]  ;;  %v4099_v15 = vld [vmem:[%s5340_s6 + $0x5ec] sm:$0xf] }
  0x9a   : > { %v4101_v16 = vld [vmem:[%s5340_s6 + $0x650] sm:$0xf]  ;;  %4098 = vst [vmem:[%s5345_s7 + $0x128] sm:$0xf] %v4097_v14  ;;  %4100 = vst [vmem:[%s5345_s7 + $0x13c] sm:$0xf] %v4099_v15 }
  0x9b   : > { %4102 = vst [vmem:[%s5345_s7 + $0x150] sm:$0xf] %v4101_v16  ;;  %v4103_v17 = vld [vmem:[%s5340_s6 + $0x6b4] sm:$0xf]  ;;  %v4105_v18 = vld [vmem:[%s5340_s6 + $0x718] sm:$0xf] }
  0x9c   : > { %v4107_v19 = vld [vmem:[%s5340_s6 + $0x77c] sm:$0xf]  ;;  %4104 = vst [vmem:[%s5345_s7 + $0x164] sm:$0xf] %v4103_v17  ;;  %4106 = vst [vmem:[%s5345_s7 + $0x178] sm:$0xf] %v4105_v18 }
  0x9d   : > { %4108 = vst [vmem:[%s5345_s7 + $0x18c] sm:$0xf] %v4107_v19  ;;  %v4109_v20 = vld [vmem:[%s5340_s6 + $0x7e0] sm:$0xf]  ;;  %v4111_v21 = vld [vmem:[%s5340_s6 + $0x844] sm:$0xf] }
  0x9e   : > { %v4113_v22 = vld [vmem:[%s5340_s6 + $0x8a8] sm:$0xf]  ;;  %4110 = vst [vmem:[%s5345_s7 + $0x1a0] sm:$0xf] %v4109_v20  ;;  %4112 = vst [vmem:[%s5345_s7 + $0x1b4] sm:$0xf] %v4111_v21 }
  0x9f   : > { %4114 = vst [vmem:[%s5345_s7 + $0x1c8] sm:$0xf] %v4113_v22  ;;  %v4115_v23 = vld [vmem:[%s5340_s6 + $0x90c] sm:$0xf]  ;;  %v4117_v24 = vld [vmem:[%s5340_s6 + $0x970] sm:$0xf] }
  0xa0   : > { %v4119_v25 = vld [vmem:[%s5340_s6 + $0x9d4] sm:$0xf]  ;;  %4116 = vst [vmem:[%s5345_s7 + $0x1dc] sm:$0xf] %v4115_v23  ;;  %4118 = vst [vmem:[%s5345_s7 + $0x1f0] sm:$0xf] %v4117_v24 }
  0xa1   : > { %4120 = vst [vmem:[%s5345_s7 + $0x204] sm:$0xf] %v4119_v25  ;;  %v4121_v26 = vld [vmem:[%s5340_s6 + $0xa38] sm:$0xf]  ;;  %v4123_v27 = vld [vmem:[%s5340_s6 + $0xa9c] sm:$0xf] }
  0xa2   : > { %v4125_v28 = vld [vmem:[%s5340_s6 + $0xb00] sm:$0xf]  ;;  %4122 = vst [vmem:[%s5345_s7 + $0x218] sm:$0xf] %v4121_v26  ;;  %4124 = vst [vmem:[%s5345_s7 + $0x22c] sm:$0xf] %v4123_v27 }
  0xa3   : > { %4126 = vst [vmem:[%s5345_s7 + $0x240] sm:$0xf] %v4125_v28  ;;  %v4127_v29 = vld [vmem:[%s5340_s6 + $0xb64] sm:$0xf]  ;;  %v4129_v30 = vld [vmem:[%s5340_s6 + $0xbc8] sm:$0xf] }
  0xa4   : > { %v4131_v31 = vld [vmem:[%s5340_s6 + $0xc2c] sm:$0xf]  ;;  %4128 = vst [vmem:[%s5345_s7 + $0x254] sm:$0xf] %v4127_v29  ;;  %4130 = vst [vmem:[%s5345_s7 + $0x268] sm:$0xf] %v4129_v30 }
  0xa5   : > { %4132 = vst [vmem:[%s5345_s7 + $0x27c] sm:$0xf] %v4131_v31  ;;  %v4133_v32 = vld [vmem:[%s5340_s6 + $0xc90] sm:$0xf]  ;;  %v4135_v33 = vld [vmem:[%s5340_s6 + $0xcf4] sm:$0xf] }
  0xa6   : > { %v4137_v34 = vld [vmem:[%s5340_s6 + $0xd58] sm:$0xf]  ;;  %4134 = vst [vmem:[%s5345_s7 + $0x290] sm:$0xf] %v4133_v32  ;;  %4136 = vst [vmem:[%s5345_s7 + $0x2a4] sm:$0xf] %v4135_v33 }
  0xa7   : > { %4138 = vst [vmem:[%s5345_s7 + $0x2b8] sm:$0xf] %v4137_v34  ;;  %v4139_v35 = vld [vmem:[%s5340_s6 + $0xdbc] sm:$0xf]  ;;  %v4141_v36 = vld [vmem:[%s5340_s6 + $0xe20] sm:$0xf] }
  0xa8   : > { %v4143_v37 = vld [vmem:[%s5340_s6 + $0xe84] sm:$0xf]  ;;  %4140 = vst [vmem:[%s5345_s7 + $0x2cc] sm:$0xf] %v4139_v35  ;;  %4142 = vst [vmem:[%s5345_s7 + $0x2e0] sm:$0xf] %v4141_v36 }
  0xa9   : > { %4144 = vst [vmem:[%s5345_s7 + $0x2f4] sm:$0xf] %v4143_v37  ;;  %v4145_v38 = vld [vmem:[%s5340_s6 + $0xee8] sm:$0xf]  ;;  %v4147_v39 = vld [vmem:[%s5340_s6 + $0xf4c] sm:$0xf] }
  0xaa   : > { %v4149_v40 = vld [vmem:[%s5340_s6 + $0xfb0] sm:$0xf]  ;;  %4146 = vst [vmem:[%s5345_s7 + $0x308] sm:$0xf] %v4145_v38  ;;  %4148 = vst [vmem:[%s5345_s7 + $0x31c] sm:$0xf] %v4147_v39 }
  0xab   : > { %4150 = vst [vmem:[%s5345_s7 + $0x330] sm:$0xf] %v4149_v40  ;;  %v4151_v41 = vld [vmem:[%s5340_s6 + $0x1014] sm:$0xf]  ;;  %v4153_v42 = vld [vmem:[%s5340_s6 + $0x1078] sm:$0xf] }
  0xac   : > { %v4155_v43 = vld [vmem:[%s5340_s6 + $0x10dc] sm:$0xf]  ;;  %4152 = vst [vmem:[%s5345_s7 + $0x344] sm:$0xf] %v4151_v41  ;;  %4154 = vst [vmem:[%s5345_s7 + $0x358] sm:$0xf] %v4153_v42 }
  0xad   : > { %4156 = vst [vmem:[%s5345_s7 + $0x36c] sm:$0xf] %v4155_v43  ;;  %v4157_v44 = vld [vmem:[%s5340_s6 + $0x1140] sm:$0xf]  ;;  %v4159_v45 = vld [vmem:[%s5340_s6 + $0x11a4] sm:$0xf] }
  0xae   : > { %v4161_v46 = vld [vmem:[%s5340_s6 + $0x1208] sm:$0xf]  ;;  %4158 = vst [vmem:[%s5345_s7 + $0x380] sm:$0xf] %v4157_v44  ;;  %4160 = vst [vmem:[%s5345_s7 + $0x394] sm:$0xf] %v4159_v45 }
  0xaf   : > { %4162 = vst [vmem:[%s5345_s7 + $0x3a8] sm:$0xf] %v4161_v46  ;;  %v4163_v47 = vld [vmem:[%s5340_s6 + $0x126c] sm:$0xf]  ;;  %v4165_v48 = vld [vmem:[%s5340_s6 + $0x12d0] sm:$0xf] }
  0xb0   : > { %v4167_v49 = vld [vmem:[%s5340_s6 + $0x1334] sm:$0xf]  ;;  %4164 = vst [vmem:[%s5345_s7 + $0x3bc] sm:$0xf] %v4163_v47  ;;  %4166 = vst [vmem:[%s5345_s7 + $0x3d0] sm:$0xf] %v4165_v48 }
  0xb1   : > { %4168 = vst [vmem:[%s5345_s7 + $0x3e4] sm:$0xf] %v4167_v49  ;;  %v4169_v50 = vld [vmem:[%s5340_s6 + $0x1398] sm:$0xf]  ;;  %v4171_v51 = vld [vmem:[%s5340_s6 + $0x13fc] sm:$0xf] }
  0xb2   : > { %v4173_v52 = vld [vmem:[%s5340_s6 + $0x1460] sm:$0xf]  ;;  %4170 = vst [vmem:[%s5345_s7 + $0x3f8] sm:$0xf] %v4169_v50  ;;  %4172 = vst [vmem:[%s5345_s7 + $0x40c] sm:$0xf] %v4171_v51 }
  0xb3   : > { %4174 = vst [vmem:[%s5345_s7 + $0x420] sm:$0xf] %v4173_v52  ;;  %v4175_v53 = vld [vmem:[%s5340_s6 + $0x14c4] sm:$0xf]  ;;  %v4177_v54 = vld [vmem:[%s5340_s6 + $0x1528] sm:$0xf] }
  0xb4   : > { %v4179_v55 = vld [vmem:[%s5340_s6 + $0x158c] sm:$0xf]  ;;  %4176 = vst [vmem:[%s5345_s7 + $0x434] sm:$0xf] %v4175_v53  ;;  %4178 = vst [vmem:[%s5345_s7 + $0x448] sm:$0xf] %v4177_v54 }
  0xb5   : > { %4180 = vst [vmem:[%s5345_s7 + $0x45c] sm:$0xf] %v4179_v55  ;;  %v4181_v56 = vld [vmem:[%s5340_s6 + $0x15f0] sm:$0xf]  ;;  %v4183_v57 = vld [vmem:[%s5340_s6 + $0x1654] sm:$0xf] }
  0xb6   : > { %v4185_v58 = vld [vmem:[%s5340_s6 + $0x16b8] sm:$0xf]  ;;  %4182 = vst [vmem:[%s5345_s7 + $0x470] sm:$0xf] %v4181_v56  ;;  %4184 = vst [vmem:[%s5345_s7 + $0x484] sm:$0xf] %v4183_v57 }
  0xb7   : > { %4186 = vst [vmem:[%s5345_s7 + $0x498] sm:$0xf] %v4185_v58  ;;  %v4187_v59 = vld [vmem:[%s5340_s6 + $0x171c] sm:$0xf]  ;;  %v4189_v60 = vld [vmem:[%s5340_s6 + $0x1780] sm:$0xf] }
  0xb8   : > { %v4191_v61 = vld [vmem:[%s5340_s6 + $0x17e4] sm:$0xf]  ;;  %4188 = vst [vmem:[%s5345_s7 + $0x4ac] sm:$0xf] %v4187_v59  ;;  %4190 = vst [vmem:[%s5345_s7 + $0x4c0] sm:$0xf] %v4189_v60 }
  0xb9   : > { %4192 = vst [vmem:[%s5345_s7 + $0x4d4] sm:$0xf] %v4191_v61  ;;  %v4193_v62 = vld [vmem:[%s5340_s6 + $0x1848] sm:$0xf]  ;;  %v4195_v63 = vld [vmem:[%s5340_s6 + $0x18ac] sm:$0xf] }
  0xba   : > { %v4197_v0 = vld [vmem:[%s5340_s6 + $0x1910] sm:$0xf]  ;;  %4194 = vst [vmem:[%s5345_s7 + $0x4e8] sm:$0xf] %v4193_v62  ;;  %4196 = vst [vmem:[%s5345_s7 + $0x4fc] sm:$0xf] %v4195_v63 }
  0xbb   : > { %4198 = vst [vmem:[%s5345_s7 + $0x510] sm:$0xf] %v4197_v0  ;;  %v4199_v1 = vld [vmem:[%s5340_s6 + $0x1974] sm:$0xf]  ;;  %v4201_v2 = vld [vmem:[%s5340_s6 + $0x19d8] sm:$0xf] }
  0xbc   : > { %v4203_v3 = vld [vmem:[%s5340_s6 + $0x1a3c] sm:$0xf]  ;;  %4200 = vst [vmem:[%s5345_s7 + $0x524] sm:$0xf] %v4199_v1  ;;  %4202 = vst [vmem:[%s5345_s7 + $0x538] sm:$0xf] %v4201_v2 }
  0xbd   : > { %4204 = vst [vmem:[%s5345_s7 + $0x54c] sm:$0xf] %v4203_v3  ;;  %v4205_v4 = vld [vmem:[%s5340_s6 + $0x1aa0] sm:$0xf]  ;;  %v4207_v5 = vld [vmem:[%s5340_s6 + $0x1b04] sm:$0xf] }
  0xbe   : > { %v4209_v6 = vld [vmem:[%s5340_s6 + $0x1b68] sm:$0xf]  ;;  %4206 = vst [vmem:[%s5345_s7 + $0x560] sm:$0xf] %v4205_v4  ;;  %4208 = vst [vmem:[%s5345_s7 + $0x574] sm:$0xf] %v4207_v5 }
  0xbf   : > { %4210 = vst [vmem:[%s5345_s7 + $0x588] sm:$0xf] %v4209_v6  ;;  %v4211_v7 = vld [vmem:[%s5340_s6 + $0x1bcc] sm:$0xf]  ;;  %v4213_v8 = vld [vmem:[%s5340_s6 + $0x1c30] sm:$0xf] }
  0xc0   : > { %v4215_v9 = vld [vmem:[%s5340_s6 + $0x1c94] sm:$0xf]  ;;  %4212 = vst [vmem:[%s5345_s7 + $0x59c] sm:$0xf] %v4211_v7  ;;  %4214 = vst [vmem:[%s5345_s7 + $0x5b0] sm:$0xf] %v4213_v8 }
  0xc1   : > { %4216 = vst [vmem:[%s5345_s7 + $0x5c4] sm:$0xf] %v4215_v9  ;;  %v4217_v10 = vld [vmem:[%s5340_s6 + $0x1cf8] sm:$0xf]  ;;  %v4219_v11 = vld [vmem:[%s5340_s6 + $0x1d5c] sm:$0xf] }
  0xc2   : > { %v4221_v12 = vld [vmem:[%s5340_s6 + $0x1dc0] sm:$0xf]  ;;  %4218 = vst [vmem:[%s5345_s7 + $0x5d8] sm:$0xf] %v4217_v10  ;;  %4220 = vst [vmem:[%s5345_s7 + $0x5ec] sm:$0xf] %v4219_v11 }
  0xc3   : > { %4222 = vst [vmem:[%s5345_s7 + $0x600] sm:$0xf] %v4221_v12  ;;  %v4223_v13 = vld [vmem:[%s5340_s6 + $0x1e24] sm:$0xf]  ;;  %v4225_v14 = vld [vmem:[%s5340_s6 + $0x1e88] sm:$0xf] }
  0xc4   : > { %v4227_v15 = vld [vmem:[%s5340_s6 + $0x1eec] sm:$0xf]  ;;  %4224 = vst [vmem:[%s5345_s7 + $0x614] sm:$0xf] %v4223_v13  ;;  %4226 = vst [vmem:[%s5345_s7 + $0x628] sm:$0xf] %v4225_v14 }
  0xc5   : > { %4228 = vst [vmem:[%s5345_s7 + $0x63c] sm:$0xf] %v4227_v15  ;;  %v4229_v16 = vld [vmem:[%s5340_s6 + $0x1f50] sm:$0xf]  ;;  %v4231_v17 = vld [vmem:[%s5340_s6 + $0x1fb4] sm:$0xf] }
  0xc6   : > { %v4233_v18 = vld [vmem:[%s5340_s6 + $0x2018] sm:$0xf]  ;;  %4230 = vst [vmem:[%s5345_s7 + $0x650] sm:$0xf] %v4229_v16  ;;  %4232 = vst [vmem:[%s5345_s7 + $0x664] sm:$0xf] %v4231_v17 }
  0xc7   : > { %4234 = vst [vmem:[%s5345_s7 + $0x678] sm:$0xf] %v4233_v18  ;;  %v4235_v19 = vld [vmem:[%s5340_s6 + $0x207c] sm:$0xf]  ;;  %v4237_v20 = vld [vmem:[%s5340_s6 + $0x20e0] sm:$0xf] }
  0xc8   : > { %v4239_v21 = vld [vmem:[%s5340_s6 + $0x2144] sm:$0xf]  ;;  %4236 = vst [vmem:[%s5345_s7 + $0x68c] sm:$0xf] %v4235_v19  ;;  %4238 = vst [vmem:[%s5345_s7 + $0x6a0] sm:$0xf] %v4237_v20 }
  0xc9   : > { %4240 = vst [vmem:[%s5345_s7 + $0x6b4] sm:$0xf] %v4239_v21  ;;  %v4241_v22 = vld [vmem:[%s5340_s6 + $0x21a8] sm:$0xf]  ;;  %v4243_v23 = vld [vmem:[%s5340_s6 + $0x220c] sm:$0xf] }
  0xca   : > { %v4245_v24 = vld [vmem:[%s5340_s6 + $0x2270] sm:$0xf]  ;;  %4242 = vst [vmem:[%s5345_s7 + $0x6c8] sm:$0xf] %v4241_v22  ;;  %4244 = vst [vmem:[%s5345_s7 + $0x6dc] sm:$0xf] %v4243_v23 }
  0xcb   : > { %4246 = vst [vmem:[%s5345_s7 + $0x6f0] sm:$0xf] %v4245_v24  ;;  %v4247_v25 = vld [vmem:[%s5340_s6 + $0x22d4] sm:$0xf]  ;;  %v4249_v26 = vld [vmem:[%s5340_s6 + $0x2338] sm:$0xf] }
  0xcc   : > { %v4251_v27 = vld [vmem:[%s5340_s6 + $0x239c] sm:$0xf]  ;;  %4248 = vst [vmem:[%s5345_s7 + $0x704] sm:$0xf] %v4247_v25  ;;  %4250 = vst [vmem:[%s5345_s7 + $0x718] sm:$0xf] %v4249_v26 }
  0xcd   : > { %4252 = vst [vmem:[%s5345_s7 + $0x72c] sm:$0xf] %v4251_v27  ;;  %v4253_v28 = vld [vmem:[%s5340_s6 + $0x2400] sm:$0xf]  ;;  %v4255_v29 = vld [vmem:[%s5340_s6 + $0x2464] sm:$0xf] }
  0xce   : > { %v4257_v30 = vld [vmem:[%s5340_s6 + $0x24c8] sm:$0xf]  ;;  %4254 = vst [vmem:[%s5345_s7 + $0x740] sm:$0xf] %v4253_v28  ;;  %4256 = vst [vmem:[%s5345_s7 + $0x754] sm:$0xf] %v4255_v29 }
  0xcf   : > { %4258 = vst [vmem:[%s5345_s7 + $0x768] sm:$0xf] %v4257_v30  ;;  %v4259_v31 = vld [vmem:[%s5340_s6 + $0x252c] sm:$0xf]  ;;  %v4261_v32 = vld [vmem:[%s5340_s6 + $0x2590] sm:$0xf] }
  0xd0   : > { %v4263_v33 = vld [vmem:[%s5340_s6 + $0x25f4] sm:$0xf]  ;;  %4260 = vst [vmem:[%s5345_s7 + $0x77c] sm:$0xf] %v4259_v31  ;;  %4262 = vst [vmem:[%s5345_s7 + $0x790] sm:$0xf] %v4261_v32 }
  0xd1   : > { %4264 = vst [vmem:[%s5345_s7 + $0x7a4] sm:$0xf] %v4263_v33  ;;  %v4265_v34 = vld [vmem:[%s5340_s6 + $0x2658] sm:$0xf]  ;;  %v4267_v35 = vld [vmem:[%s5340_s6 + $0x26bc] sm:$0xf] }
  0xd2   : > { %v4269_v36 = vld [vmem:[%s5340_s6 + $0x2720] sm:$0xf]  ;;  %4266 = vst [vmem:[%s5345_s7 + $0x7b8] sm:$0xf] %v4265_v34  ;;  %4268 = vst [vmem:[%s5345_s7 + $0x7cc] sm:$0xf] %v4267_v35 }
  0xd3   : > { %4270 = vst [vmem:[%s5345_s7 + $0x7e0] sm:$0xf] %v4269_v36  ;;  %v4271_v37 = vld [vmem:[%s5340_s6 + $0x2784] sm:$0xf]  ;;  %v4273_v38 = vld [vmem:[%s5340_s6 + $0x27e8] sm:$0xf] }
  0xd4   : > { %v4275_v39 = vld [vmem:[%s5340_s6 + $0x284c] sm:$0xf]  ;;  %4272 = vst [vmem:[%s5345_s7 + $0x7f4] sm:$0xf] %v4271_v37  ;;  %4274 = vst [vmem:[%s5345_s7 + $0x808] sm:$0xf] %v4273_v38 }
  0xd5   : > { %4276 = vst [vmem:[%s5345_s7 + $0x81c] sm:$0xf] %v4275_v39  ;;  %v4277_v40 = vld [vmem:[%s5340_s6 + $0x28b0] sm:$0xf]  ;;  %v4279_v41 = vld [vmem:[%s5340_s6 + $0x2914] sm:$0xf] }
  0xd6   : > { %v4281_v42 = vld [vmem:[%s5340_s6 + $0x2978] sm:$0xf]  ;;  %4278 = vst [vmem:[%s5345_s7 + $0x830] sm:$0xf] %v4277_v40  ;;  %4280 = vst [vmem:[%s5345_s7 + $0x844] sm:$0xf] %v4279_v41 }
  0xd7   : > { %4282 = vst [vmem:[%s5345_s7 + $0x858] sm:$0xf] %v4281_v42  ;;  %v4283_v43 = vld [vmem:[%s5340_s6 + $0x29dc] sm:$0xf]  ;;  %v4285_v44 = vld [vmem:[%s5340_s6 + $0x2a40] sm:$0xf] }
  0xd8   : > { %v4287_v45 = vld [vmem:[%s5340_s6 + $0x2aa4] sm:$0xf]  ;;  %4284 = vst [vmem:[%s5345_s7 + $0x86c] sm:$0xf] %v4283_v43  ;;  %4286 = vst [vmem:[%s5345_s7 + $0x880] sm:$0xf] %v4285_v44 }
  0xd9   : > { %4288 = vst [vmem:[%s5345_s7 + $0x894] sm:$0xf] %v4287_v45  ;;  %v4289_v46 = vld [vmem:[%s5340_s6 + $0x2b08] sm:$0xf]  ;;  %v4291_v47 = vld [vmem:[%s5340_s6 + $0x2b6c] sm:$0xf] }
  0xda   : > { %v4293_v48 = vld [vmem:[%s5340_s6 + $0x2bd0] sm:$0xf]  ;;  %4290 = vst [vmem:[%s5345_s7 + $0x8a8] sm:$0xf] %v4289_v46  ;;  %4292 = vst [vmem:[%s5345_s7 + $0x8bc] sm:$0xf] %v4291_v47 }
  0xdb   : > { %4294 = vst [vmem:[%s5345_s7 + $0x8d0] sm:$0xf] %v4293_v48  ;;  %v4295_v49 = vld [vmem:[%s5340_s6 + $0x2c34] sm:$0xf]  ;;  %v4297_v50 = vld [vmem:[%s5340_s6 + $0x2c98] sm:$0xf] }
  0xdc   : > { %v4299_v51 = vld [vmem:[%s5340_s6 + $0x2cfc] sm:$0xf]  ;;  %4296 = vst [vmem:[%s5345_s7 + $0x8e4] sm:$0xf] %v4295_v49  ;;  %4298 = vst [vmem:[%s5345_s7 + $0x8f8] sm:$0xf] %v4297_v50 }
  0xdd   : > { %4300 = vst [vmem:[%s5345_s7 + $0x90c] sm:$0xf] %v4299_v51  ;;  %v4301_v52 = vld [vmem:[%s5340_s6 + $0x2d60] sm:$0xf]  ;;  %v4303_v53 = vld [vmem:[%s5340_s6 + $0x2dc4] sm:$0xf] }
  0xde   : > { %v4305_v54 = vld [vmem:[%s5340_s6 + $0x2e28] sm:$0xf]  ;;  %4302 = vst [vmem:[%s5345_s7 + $0x920] sm:$0xf] %v4301_v52  ;;  %4304 = vst [vmem:[%s5345_s7 + $0x934] sm:$0xf] %v4303_v53 }
  0xdf   : > { %4306 = vst [vmem:[%s5345_s7 + $0x948] sm:$0xf] %v4305_v54  ;;  %v4307_v55 = vld [vmem:[%s5340_s6 + $0x2e8c] sm:$0xf]  ;;  %v4309_v56 = vld [vmem:[%s5340_s6 + $0x2ef0] sm:$0xf] }
  0xe0   : > { %v4311_v57 = vld [vmem:[%s5340_s6 + $0x2f54] sm:$0xf]  ;;  %4308 = vst [vmem:[%s5345_s7 + $0x95c] sm:$0xf] %v4307_v55  ;;  %4310 = vst [vmem:[%s5345_s7 + $0x970] sm:$0xf] %v4309_v56 }
  0xe1   : > { %4312 = vst [vmem:[%s5345_s7 + $0x984] sm:$0xf] %v4311_v57  ;;  %v4313_v58 = vld [vmem:[%s5340_s6 + $0x2fb8] sm:$0xf]  ;;  %v4315_v59 = vld [vmem:[%s5340_s6 + $0x301c] sm:$0xf] }
  0xe2   : > { %v4317_v60 = vld [vmem:[%s5340_s6 + $0x3080] sm:$0xf]  ;;  %4314 = vst [vmem:[%s5345_s7 + $0x998] sm:$0xf] %v4313_v58  ;;  %4316 = vst [vmem:[%s5345_s7 + $0x9ac] sm:$0xf] %v4315_v59 }
  0xe3   : > { %4318 = vst [vmem:[%s5345_s7 + $0x9c0] sm:$0xf] %v4317_v60  ;;  %v4319_v61 = vld [vmem:[%s5340_s6 + $0x30e4] sm:$0xf]  ;;  %v4321_v62 = vld [vmem:[%s5340_s6 + $0x3148] sm:$0xf] }
  0xe4   : > { %v4323_v63 = vld [vmem:[%s5340_s6 + $0x31ac] sm:$0xf]  ;;  %4320 = vst [vmem:[%s5345_s7 + $0x9d4] sm:$0xf] %v4319_v61  ;;  %4322 = vst [vmem:[%s5345_s7 + $0x9e8] sm:$0xf] %v4321_v62 }
  0xe5   : > { %4324 = vst [vmem:[%s5345_s7 + $0x9fc] sm:$0xf] %v4323_v63 }
  0xe6 PF: > { %p4325_p5 = scmp.ge.s32.totalorder %s5272_s20, 1  ;;  %p992_p6 = scmp.lt.s32.totalorder %s5272_s20, 6 }
  0xe8   : > { %p993_p7 = pnand %p4325_p5, %p992_p6 }
  0xe9   : > { %s999_s14 = sand.u32 (!%p993_p7), 1, %s5264_s18   ;;  %s1030_s7 = smul.u32 (!%p993_p7), 5, %s4064_s21 }
  0xea   : > { %996 = sbr.rel (%p993_p7) target bundleno = 936 (0x3a8), region = 62 }
  0xeb   : > { %s4765_s27 = smul.u32 (!%p993_p7), 2560, %s999_s14  ;;  %p1031_p8 = scmp.lt.s32.totalorder (!%p993_p7), %s1030_s7, 24 }
  0xed   : > { %s6154_s16 = scalar_lea.vmem (!%p993_p7), [#allocation2], %s4765_s27 }
  0xef   : > { %v1050_v0 = vld [vmem:[%s6618_s1 + $0x40] sm:$0xff]  ;;  %v1051_v2 = vld [vmem:[%s6618_s1 + $0x48] sm:$0xff]  ;;  %v5274_v8 = vmov 0   ;;  %v1052_v15 = vld [vmem:[%s6618_s1 + $0x50] sm:$0xff]  ;;  %vm1180_vm0 = vcmask 261120   ;;  %s6627_s7 = smov (!%p1031_p8, %s1030_s7), 24 }
  0xf0   : > { %v1054_v1 = vld [vmem:[%s6618_s1 + $0x60] sm:$0xff]  ;;  %v1055_v4 = vld [vmem:[%s6618_s1 + $0x68] sm:$0xff]  ;;  %1216 = vmatprep.mubr.bf16.mxu0 %v5274_v8  ;;  %1257 = vmatprep.mubr.bf16.mxu1 %v5274_v8  ;;  %v1056_v16 = vld [vmem:[%s6618_s1 + $0x70] sm:$0xff]  ;;  %s1033_s8 = scalar_lea.vmem %s6621_s4, %s6627_s7  ;;  %s1038_s11 = scalar_lea.vmem %s6622_s5, %s6627_s7 }
  0xf1   : > { %v4335_v3 = vcombine.high %v1050_v0, %v1054_v1  ;;  %v4334_v5 = vcombine.low %v1050_v0, %v1054_v1  ;;  %v1042_v6 = vld [vmem:[%s6618_s1] sm:$0xff]  ;;  %v4337_v9 = vcombine.high %v1051_v2, %v1055_v4  ;;  %v4336_v10 = vcombine.low %v1051_v2, %v1055_v4  ;;  %v1043_v12 = vld [vmem:[%s6618_s1 + $0x8] sm:$0xff]  ;;  %v1053_v17 = vld [vmem:[%s6618_s1 + $0x58] sm:$0xff] }
  0xf2   : > { %v1046_v7 = vld [vmem:[%s6618_s1 + $0x20] sm:$0xff]  ;;  %v1047_v13 = vld [vmem:[%s6618_s1 + $0x28] sm:$0xff]  ;;  %v1057_v19 = vld [vmem:[%s6618_s1 + $0x78] sm:$0xff]  ;;  %v4339_v21 = vcombine.high %v1052_v15, %v1056_v16  ;;  %v4338_v28 = vcombine.low %v1052_v15, %v1056_v16 }
  0xf3   : > { %v4327_v11 = vcombine.high %v1042_v6, %v1046_v7  ;;  %1196 = vmatprep.subr.bf16.mxu0 %v4335_v3  ;;  %v4329_v14 = vcombine.high %v1043_v12, %v1047_v13  ;;  %1237 = vmatprep.subr.bf16.mxu1 %v4337_v9  ;;  %v4326_v18 = vcombine.low %v1042_v6, %v1046_v7  ;;  %v1044_v22 = vld [vmem:[%s6618_s1 + $0x10] sm:$0xff]  ;;  %v1045_v25 = vld [vmem:[%s6618_s1 + $0x18] sm:$0xff]  ;;  %v1041_v27 = vld [vmem:[%s6617_s0] sm:$0x1] }
  0xf4   : > { %1197 = vmatpush1.bf16.msra.mxu0 %v4334_v5  ;;  %1238 = vmatpush1.bf16.msra.mxu1 %v4336_v10  ;;  %v4328_v20 = vcombine.low %v1043_v12, %v1047_v13  ;;  %v4341_v23 = vcombine.high %v1053_v17, %v1057_v19  ;;  %v1048_v24 = vld [vmem:[%s6618_s1 + $0x30] sm:$0xff]  ;;  %v1049_v26 = vld [vmem:[%s6618_s1 + $0x38] sm:$0xff]  ;;  %v4340_v29 = vcombine.low %v1053_v17, %v1057_v19  ;;  %v4806_v42 = vld [vmem:[%s6154_s16 + $0xcc] ss:$20 sps:$4 sm:$0xff]  }
  0xf5   : > { %1198 = vmatprep.subr.bf16.mxu0 %v4327_v11  ;;  %1239 = vmatprep.subr.bf16.mxu1 %v4329_v14  ;;  %v4331_v30 = vcombine.high %v1044_v22, %v1048_v24  ;;  %v4333_v31 = vcombine.high %v1045_v25, %v1049_v26  ;;  %v4330_v32 = vcombine.low %v1044_v22, %v1048_v24  ;;  %v4794_v34 = vld [vmem:[%s6154_s16 + $0x11c] ss:$20 sps:$4 sm:$0xff]   ;;  %v4792_v36 = vld [vmem:[%s6154_s16 + $0x118] ss:$20 sps:$4 sm:$0xff]   ;;  %v4800_v38 = vld [vmem:[%s6154_s16 + $0xf4] ss:$20 sps:$4 sm:$0xff]  }
  0xf6   : > { %v4332_v33 = vcombine.low %v1045_v25, %v1049_v26  ;;  %v4797_v35 = vld [vmem:[%s6154_s16 + $0x39c] ss:$20 sps:$4 sm:$0xff]   ;;  %v4795_v37 = vld [vmem:[%s6154_s16 + $0x398] ss:$20 sps:$4 sm:$0xff]   ;;  %v4803_v39 = vld [vmem:[%s6154_s16 + $0x374] ss:$20 sps:$4 sm:$0xff]  }
  0xf7   : > { %v4798_v40 = vld [vmem:[%s6154_s16 + $0xf0] ss:$20 sps:$4 sm:$0xff]   ;;  %v4809_v43 = vld [vmem:[%s6154_s16 + $0x34c] ss:$20 sps:$4 sm:$0xff]   ;;  %v4804_v44 = vld [vmem:[%s6154_s16 + $0xc8] ss:$20 sps:$4 sm:$0xff]  }
  0xf8   : > { %1199 = vmatpush1.bf16.msra.mxu0 %v4326_v18  ;;  %1240 = vmatpush1.bf16.msra.mxu1 %v4328_v20  ;;  %v4801_v41 = vld [vmem:[%s6154_s16 + $0x370] ss:$20 sps:$4 sm:$0xff]   ;;  %v4807_v45 = vld [vmem:[%s6154_s16 + $0x348] ss:$20 sps:$4 sm:$0xff]   ;;  %v4810_v48 = vld [vmem:[%s6154_s16 + $0xa0] ss:$20 sps:$4 sm:$0xff]  }
  0xf9   : > { %1278 = vmatprep.subr.bf16.mxu0 %v4339_v21  ;;  %1319 = vmatprep.subr.bf16.mxu1 %v4341_v23  ;;  %v4812_v46 = vld [vmem:[%s6154_s16 + $0xa4] ss:$20 sps:$4 sm:$0xff]   ;;  %v4813_v49 = vld [vmem:[%s6154_s16 + $0x320] ss:$20 sps:$4 sm:$0xff]   ;;  %v4818_v50 = vld [vmem:[%s6154_s16 + $0x7c] ss:$20 sps:$4 sm:$0xff]  }
  0xfa   : > { %v4815_v47 = vld [vmem:[%s6154_s16 + $0x324] ss:$20 sps:$4 sm:$0xff]   ;;  %v4821_v51 = vld [vmem:[%s6154_s16 + $0x2fc] ss:$20 sps:$4 sm:$0xff]   ;;  %v4824_v54 = vld [vmem:[%s6154_s16 + $0x54] ss:$20 sps:$4 sm:$0xff]  }
  0xfb   : > { %4342 = vmatmul.mubr.msk.bf16.vlgmr.msra.gmra.mxu0 %vm1180_vm0, %v1041_v27  ;;  %4343 = vmatmul.mubr.msk.bf16.vlgmr.msra.gmra.mxu1 %vm1180_vm0, %v1041_v27  ;;  %v4816_v52 = vld [vmem:[%s6154_s16 + $0x78] ss:$20 sps:$4 sm:$0xff]   ;;  %v4827_v55 = vld [vmem:[%s6154_s16 + $0x2d4] ss:$20 sps:$4 sm:$0xff]   ;;  %v4822_v56 = vld [vmem:[%s6154_s16 + $0x50] ss:$20 sps:$4 sm:$0xff]  }
  0xfc   : > { %1279 = vmatpush1.bf16.msra.mxu0 %v4338_v28  ;;  %1320 = vmatpush1.bf16.msra.mxu1 %v4340_v29  ;;  %v4819_v53 = vld [vmem:[%s6154_s16 + $0x2f8] ss:$20 sps:$4 sm:$0xff]   ;;  %v4825_v57 = vld [vmem:[%s6154_s16 + $0x2d0] ss:$20 sps:$4 sm:$0xff]   ;;  %v4828_v60 = vld [vmem:[%s6154_s16 + $0x28] ss:$20 sps:$4 sm:$0xff]  }
  0xfd   : > { %1280 = vmatprep.subr.bf16.mxu0 %v4331_v30  ;;  %1321 = vmatprep.subr.bf16.mxu1 %v4333_v31  ;;  %v4830_v58 = vld [vmem:[%s6154_s16 + $0x2c] ss:$20 sps:$4 sm:$0xff]   ;;  %v4831_v61 = vld [vmem:[%s6154_s16 + $0x2a8] ss:$20 sps:$4 sm:$0xff]   ;;  %v4836_v62 = vld [vmem:[%s6154_s16 + $0x4] ss:$20 sps:$4 sm:$0xff]  }
  0xfe   : > { %1298 = vmatprep.mubr.bf16.mxu0 %v5274_v8  ;;  %1339 = vmatprep.mubr.bf16.mxu1 %v5274_v8  ;;  %v4833_v59 = vld [vmem:[%s6154_s16 + $0x2ac] ss:$20 sps:$4 sm:$0xff]   ;;  %v4839_v63 = vld [vmem:[%s6154_s16 + $0x284] ss:$20 sps:$4 sm:$0xff]   ;;  %v4842_v2 = vld [vmem:[%s6154_s16 + $0x25c] ss:$20 sps:$4 sm:$0xff]  }
  0xff   : > { %v4834_v0 = vld [vmem:[%s6154_s16] ss:$20 sps:$4 sm:$0xff]   ;;  %v4845_v3 = vld [vmem:[%s6154_s16 + $0x4dc] ss:$20 sps:$4 sm:$0xff]   ;;  %v4840_v4 = vld [vmem:[%s6154_s16 + $0x258] ss:$20 sps:$4 sm:$0xff]  }
 0x100   : > { %1281 = vmatpush1.bf16.msra.mxu0 %v4330_v32  ;;  %1322 = vmatpush1.bf16.msra.mxu1 %v4332_v33  ;;  %v4837_v1 = vld [vmem:[%s6154_s16 + $0x280] ss:$20 sps:$4 sm:$0xff]   ;;  %v4843_v5 = vld [vmem:[%s6154_s16 + $0x4d8] ss:$20 sps:$4 sm:$0xff]   ;;  %v4846_v8 = vld [vmem:[%s6154_s16 + $0x230] ss:$20 sps:$4 sm:$0xff]  }
 0x101   : > { %3431 = vmatprep.subr.bf16.mxu0 %v4794_v34  ;;  %3472 = vmatprep.subr.bf16.mxu1 %v4797_v35  ;;  %v4848_v6 = vld [vmem:[%s6154_s16 + $0x234] ss:$20 sps:$4 sm:$0xff]   ;;  %v4849_v9 = vld [vmem:[%s6154_s16 + $0x4b0] ss:$20 sps:$4 sm:$0xff]   ;;  %v4854_v10 = vld [vmem:[%s6154_s16 + $0x20c] ss:$20 sps:$4 sm:$0xff]  }
 0x102   : > { %v4851_v7 = vld [vmem:[%s6154_s16 + $0x4b4] ss:$20 sps:$4 sm:$0xff]   ;;  %v4857_v11 = vld [vmem:[%s6154_s16 + $0x48c] ss:$20 sps:$4 sm:$0xff]   ;;  %v4860_v14 = vld [vmem:[%s6154_s16 + $0x1e4] ss:$20 sps:$4 sm:$0xff]  }
 0x103   : > { %4344 = vmatmul.mubr.msk.bf16.vlgmr.msra.gmra.mxu0 %vm1180_vm0, %v1041_v27  ;;  %4345 = vmatmul.mubr.msk.bf16.vlgmr.msra.gmra.mxu1 %vm1180_vm0, %v1041_v27  ;;  %v4852_v12 = vld [vmem:[%s6154_s16 + $0x208] ss:$20 sps:$4 sm:$0xff]   ;;  %v4863_v15 = vld [vmem:[%s6154_s16 + $0x464] ss:$20 sps:$4 sm:$0xff]   ;;  %v4858_v16 = vld [vmem:[%s6154_s16 + $0x1e0] ss:$20 sps:$4 sm:$0xff]  }
 0x104   : > { %3432 = vmatpush1.bf16.msra.mxu0 %v4792_v36  ;;  %3473 = vmatpush1.bf16.msra.mxu1 %v4795_v37  ;;  %v4855_v13 = vld [vmem:[%s6154_s16 + $0x488] ss:$20 sps:$4 sm:$0xff]   ;;  %v4861_v17 = vld [vmem:[%s6154_s16 + $0x460] ss:$20 sps:$4 sm:$0xff]   ;;  %v4864_v20 = vld [vmem:[%s6154_s16 + $0x1b8] ss:$20 sps:$4 sm:$0xff]   ;;  %v1060_v36 = vlaneseq }
 0x105   : > { %3433 = vmatprep.subr.bf16.mxu0 %v4800_v38  ;;  %3474 = vmatprep.subr.bf16.mxu1 %v4803_v39  ;;  %v4866_v18 = vld [vmem:[%s6154_s16 + $0x1bc] ss:$20 sps:$4 sm:$0xff]   ;;  %v4867_v21 = vld [vmem:[%s6154_s16 + $0x438] ss:$20 sps:$4 sm:$0xff]   ;;  %v4872_v22 = vld [vmem:[%s6154_s16 + $0x194] ss:$20 sps:$4 sm:$0xff]  }
 0x106   : > { %v4869_v19 = vld [vmem:[%s6154_s16 + $0x43c] ss:$20 sps:$4 sm:$0xff]   ;;  %v4875_v23 = vld [vmem:[%s6154_s16 + $0x414] ss:$20 sps:$4 sm:$0xff]   ;;  %v4878_v26 = vld [vmem:[%s6154_s16 + $0x16c] ss:$20 sps:$4 sm:$0xff]  }
 0x107   : > { %v4870_v24 = vld [vmem:[%s6154_s16 + $0x190] ss:$20 sps:$4 sm:$0xff]   ;;  %v4881_v27 = vld [vmem:[%s6154_s16 + $0x3ec] ss:$20 sps:$4 sm:$0xff]   ;;  %v4876_v28 = vld [vmem:[%s6154_s16 + $0x168] ss:$20 sps:$4 sm:$0xff]  }
 0x108   : > { %3434 = vmatpush1.bf16.msra.mxu0 %v4798_v40  ;;  %3475 = vmatpush1.bf16.msra.mxu1 %v4801_v41  ;;  %v4873_v25 = vld [vmem:[%s6154_s16 + $0x410] ss:$20 sps:$4 sm:$0xff]   ;;  %v4879_v29 = vld [vmem:[%s6154_s16 + $0x3e8] ss:$20 sps:$4 sm:$0xff]   ;;  %v4882_v32 = vld [vmem:[%s6154_s16 + $0x140] ss:$20 sps:$4 sm:$0xff]  }
 0x109   : > { %3435 = vmatprep.subr.bf16.mxu0 %v4806_v42  ;;  %3476 = vmatprep.subr.bf16.mxu1 %v4809_v43  ;;  %v4884_v30 = vld [vmem:[%s6154_s16 + $0x144] ss:$20 sps:$4 sm:$0xff]   ;;  %v4885_v33 = vld [vmem:[%s6154_s16 + $0x3c0] ss:$20 sps:$4 sm:$0xff]   ;;  %v4890_v34 = vld [vmem:[%s6154_s16 + $0x61c] ss:$20 sps:$4 sm:$0xff]  }
 0x10a   : > { %v4887_v31 = vld [vmem:[%s6154_s16 + $0x3c4] ss:$20 sps:$4 sm:$0xff]   ;;  %v4893_v35 = vld [vmem:[%s6154_s16 + $0x89c] ss:$20 sps:$4 sm:$0xff]   ;;  %v6238_v37 = vshrl.u32 %v1060_v36, 7 }
 0x10b   : > { %v6245_v40 = vld [vmem:[%s6619_s2] sm:$0xff] }
 0x10c   : > { %3436 = vmatpush1.bf16.msra.mxu0 %v4804_v44  ;;  %3477 = vmatpush1.bf16.msra.mxu1 %v4807_v45  ;;  %v1062_v38 = vsub.s32 0, %v6238_v37  ;;  %v1070_v39 = vsub.s32 2, %v6238_v37  ;;  %v1066_v41 = vsub.s32 1, %v6238_v37  ;;  %v1074_v42 = vsub.s32 3, %v6238_v37  ;;  %v4921_v36 = vld [vmem:[%s6154_s16 + $0x7d0] ss:$20 sps:$4 sm:$0xff]  }
 0x10d   : > { %3437 = vmatprep.subr.bf16.mxu0 %v4812_v46  ;;  %3478 = vmatprep.subr.bf16.mxu1 %v4815_v47 }
 0x10e   : > { %v1063_v43 = vrot.slane %v6245_v40, %v1062_v38  ;;  %v1071_v44 = vrot.slane %v6245_v40, %v1070_v39  ;;  %v1067_v45 = vrot.slane %v6245_v40, %v1066_v41  ;;  %v1075_v47 = vrot.slane %v6245_v40, %v1074_v42 }
 0x110   : > { %3438 = vmatpush1.bf16.msra.mxu0 %v4810_v48  ;;  %3479 = vmatpush1.bf16.msra.mxu1 %v4813_v49 }
 0x111   : > { %3439 = vmatprep.subr.bf16.mxu0 %v4818_v50  ;;  %3480 = vmatprep.subr.bf16.mxu1 %v4821_v51 }
 0x114   : > { %3440 = vmatpush1.bf16.msra.mxu0 %v4816_v52  ;;  %3481 = vmatpush1.bf16.msra.mxu1 %v4819_v53 }
 0x115   : > { %3441 = vmatprep.subr.bf16.mxu0 %v4824_v54  ;;  %3482 = vmatprep.subr.bf16.mxu1 %v4827_v55  ;;  %v1082_v54 = vsub.s32 5, %v6238_v37 }
 0x118   : > { %3442 = vmatpush1.bf16.msra.mxu0 %v4822_v56  ;;  %3483 = vmatpush1.bf16.msra.mxu1 %v4825_v57  ;;  %v1090_v57 = vsub.s32 7, %v6238_v37 }
 0x119   : > { %3443 = vmatprep.subr.bf16.mxu0 %v4830_v58  ;;  %3484 = vmatprep.subr.bf16.mxu1 %v4833_v59 }
 0x11c   : > { %3444 = vmatpush1.bf16.msra.mxu0 %v4828_v60  ;;  %3485 = vmatpush1.bf16.msra.mxu1 %v4831_v61  ;;  %v4888_v61 = vld [vmem:[%s6154_s16 + $0x618] ss:$20 sps:$4 sm:$0xff]  }
 0x11d   : > { %3445 = vmatprep.subr.bf16.mxu0 %v4836_v62  ;;  %3486 = vmatprep.subr.bf16.mxu1 %v4839_v63 }
 0x120   : > { %3446 = vmatpush1.bf16.msra.mxu0 %v4834_v0  ;;  %3487 = vmatpush1.bf16.msra.mxu1 %v4837_v1  ;;  %v4891_v1 = vld [vmem:[%s6154_s16 + $0x898] ss:$20 sps:$4 sm:$0xff]  }
 0x121   : > { %3447 = vmatprep.subr.bf16.mxu0 %v4842_v2  ;;  %3488 = vmatprep.subr.bf16.mxu1 %v4845_v3  ;;  %v4896_v2 = vld [vmem:[%s6154_s16 + $0x5f4] ss:$20 sps:$4 sm:$0xff]  }
 0x124   : > { %3448 = vmatpush2.bf16.msra.mxu0 %v4840_v4  ;;  %3489 = vmatpush2.bf16.msra.mxu1 %v4843_v5  ;;  %v4899_v4 = vld [vmem:[%s6154_s16 + $0x874] ss:$20 sps:$4 sm:$0xff]   ;;  %v1083_v5 = vrot.slane %v6245_v40, %v1082_v54  ;;  %v4939_v54 = vld [vmem:[%s6154_s16 + $0x9d8] ss:$20 sps:$4 sm:$0xff]  }
 0x125   : > { %3449 = vmatprep.subr.bf16.mxu0 %v4848_v6  ;;  %3490 = vmatprep.subr.bf16.mxu1 %v4851_v7  ;;  %v1091_v7 = vrot.slane %v6245_v40, %v1090_v57  ;;  %v4942_v57 = vld [vmem:[%s6154_s16 + $0x730] ss:$20 sps:$4 sm:$0xff]  }
 0x128   : > { %3450 = vmatpush2.bf16.msra.mxu0 %v4846_v8  ;;  %3491 = vmatpush2.bf16.msra.mxu1 %v4849_v9  ;;  %v4894_v8 = vld [vmem:[%s6154_s16 + $0x5f0] ss:$20 sps:$4 sm:$0xff]  }
 0x129   : > { %3451 = vmatprep.subr.bf16.mxu0 %v4854_v10  ;;  %3492 = vmatprep.subr.bf16.mxu1 %v4857_v11  ;;  %v4897_v10 = vld [vmem:[%s6154_s16 + $0x870] ss:$20 sps:$4 sm:$0xff]   ;;  %v4902_v11 = vld [vmem:[%s6154_s16 + $0x5cc] ss:$20 sps:$4 sm:$0xff]  }
 0x12c   : > { %3452 = vmatpush2.bf16.msra.mxu0 %v4852_v12  ;;  %3493 = vmatpush2.bf16.msra.mxu1 %v4855_v13  ;;  %v4905_v13 = vld [vmem:[%s6154_s16 + $0x84c] ss:$20 sps:$4 sm:$0xff]  }
 0x12d   : > { %3453 = vmatprep.subr.bf16.mxu0 %v4860_v14  ;;  %3494 = vmatprep.subr.bf16.mxu1 %v4863_v15 }
 0x130   : > { %3454 = vmatpush2.bf16.msra.mxu0 %v4858_v16  ;;  %3495 = vmatpush2.bf16.msra.mxu1 %v4861_v17 }
 0x131   : > { %3455 = vmatprep.subr.bf16.mxu0 %v4866_v18  ;;  %3496 = vmatprep.subr.bf16.mxu1 %v4869_v19  ;;  %v4900_v18 = vld [vmem:[%s6154_s16 + $0x5c8] ss:$20 sps:$4 sm:$0xff]  }
 0x134   : > { %3456 = vmatpush2.bf16.msra.mxu0 %v4864_v20  ;;  %3497 = vmatpush2.bf16.msra.mxu1 %v4867_v21  ;;  %v4903_v21 = vld [vmem:[%s6154_s16 + $0x848] ss:$20 sps:$4 sm:$0xff]  }
 0x135   : > { %3457 = vmatprep.subr.bf16.mxu0 %v4872_v22  ;;  %3498 = vmatprep.subr.bf16.mxu1 %v4875_v23  ;;  %v4908_v22 = vld [vmem:[%s6154_s16 + $0x5a4] ss:$20 sps:$4 sm:$0xff]  }
 0x138   : > { %3458 = vmatpush2.bf16.msra.mxu0 %v4870_v24  ;;  %3499 = vmatpush2.bf16.msra.mxu1 %v4873_v25  ;;  %v4911_v25 = vld [vmem:[%s6154_s16 + $0x824] ss:$20 sps:$4 sm:$0xff]  }
 0x139   : > { %3459 = vmatprep.subr.bf16.mxu0 %v4878_v26  ;;  %3500 = vmatprep.subr.bf16.mxu1 %v4881_v27  ;;  %v4906_v27 = vld [vmem:[%s6154_s16 + $0x5a0] ss:$20 sps:$4 sm:$0xff]  }
 0x13c   : > { %3460 = vmatpush2.bf16.msra.mxu0 %v4876_v28  ;;  %3501 = vmatpush2.bf16.msra.mxu1 %v4879_v29  ;;  %v4909_v28 = vld [vmem:[%s6154_s16 + $0x820] ss:$20 sps:$4 sm:$0xff]   ;;  %v4914_v29 = vld [vmem:[%s6154_s16 + $0x57c] ss:$20 sps:$4 sm:$0xff]  }
 0x13d   : > { %3461 = vmatprep.subr.bf16.mxu0 %v4884_v30  ;;  %3502 = vmatprep.subr.bf16.mxu1 %v4887_v31  ;;  %v4917_v30 = vld [vmem:[%s6154_s16 + $0x7fc] ss:$20 sps:$4 sm:$0xff]   ;;  %v4912_v31 = vld [vmem:[%s6154_s16 + $0x578] ss:$20 sps:$4 sm:$0xff]  }
 0x140   : > { %3462 = vmatpush2.bf16.msra.mxu0 %v4882_v32  ;;  %3503 = vmatpush2.bf16.msra.mxu1 %v4885_v33  ;;  %v4915_v32 = vld [vmem:[%s6154_s16 + $0x7f8] ss:$20 sps:$4 sm:$0xff]   ;;  %v4920_v33 = vld [vmem:[%s6154_s16 + $0x554] ss:$20 sps:$4 sm:$0xff]  }
 0x141   : > { %3513 = vmatprep.subr.bf16.mxu0 %v4890_v34  ;;  %3554 = vmatprep.subr.bf16.mxu1 %v4893_v35  ;;  %v4923_v34 = vld [vmem:[%s6154_s16 + $0x7d4] ss:$20 sps:$4 sm:$0xff]   ;;  %v4918_v35 = vld [vmem:[%s6154_s16 + $0x550] ss:$20 sps:$4 sm:$0xff]  }
 0x1bb   : > { %v1218_v46 = vpop.f32.mrf.mxu0  ;;  %v1259_v48 = vpop.f32.mrf.mxu1 }
 0x1bc   : > { %v1219_v49 = vadd.f32 %v1218_v46, %v1063_v43  ;;  %v1260_v50 = vadd.f32 %v1259_v48, %v1071_v44  ;;  %v4926_v43 = vld [vmem:[%s6154_s16 + $0x52c] ss:$20 sps:$4 sm:$0xff]   ;;  %v4927_v46 = vld [vmem:[%s6154_s16 + $0x7a8] ss:$20 sps:$4 sm:$0xff]   ;;  %v4935_v48 = vld [vmem:[%s6154_s16 + $0x784] ss:$20 sps:$4 sm:$0xff]  }
 0x1bd   : > { %v1220_v51 = vpop.f32.mrf.mxu0  ;;  %v1261_v53 = vpop.f32.mrf.mxu1  ;;  %v4929_v44 = vld [vmem:[%s6154_s16 + $0x7ac] ss:$20 sps:$4 sm:$0xff]  }
 0x1be   : > { %v1221_v52 = vadd.f32 %v1220_v51, %v1067_v45  ;;  %v1262_v55 = vadd.f32 %v1261_v53, %v1075_v47  ;;  %v6263_v58 = vpack.c.bf16 %v1260_v50, %v1260_v50  ;;  %v6268_v62 = vpack.c.bf16 %v1219_v49, %v1219_v49  ;;  %v4924_v45 = vld [vmem:[%s6154_s16 + $0x528] ss:$20 sps:$4 sm:$0xff]   ;;  %v4932_v47 = vld [vmem:[%s6154_s16 + $0x504] ss:$20 sps:$4 sm:$0xff]   ;;  %v4930_v49 = vld [vmem:[%s6154_s16 + $0x500] ss:$20 sps:$4 sm:$0xff]  }
 0x1bf   : > { %v1222_v56 = vpop.f32.mrf.mxu0  ;;  %v1263_v60 = vpop.f32.mrf.mxu1  ;;  %v4933_v50 = vld [vmem:[%s6154_s16 + $0x780] ss:$20 sps:$4 sm:$0xff]   ;;  %v4938_v51 = vld [vmem:[%s6154_s16 + $0x75c] ss:$20 sps:$4 sm:$0xff]   ;;  %v4936_v53 = vld [vmem:[%s6154_s16 + $0x758] ss:$20 sps:$4 sm:$0xff]  }
 0x1c0   : > { %v6265_v59 = vpack.c.bf16 %v1221_v52, %v1221_v52  ;;  %v6270_v63 = vpack.c.bf16 %v1262_v55, %v1262_v55  ;;  %v4941_v52 = vld [vmem:[%s6154_s16 + $0x9dc] ss:$20 sps:$4 sm:$0xff]   ;;  %v4944_v55 = vld [vmem:[%s6154_s16 + $0x734] ss:$20 sps:$4 sm:$0xff]  }
 0x1c1   : > { %v1223_v0 = vpop.f32.mrf.mxu0  ;;  %v1264_v3 = vpop.f32.mrf.mxu1  ;;  %v4947_v56 = vld [vmem:[%s6154_s16 + $0x9b4] ss:$20 sps:$4 sm:$0xff]   ;;  %v4945_v60 = vld [vmem:[%s6154_s16 + $0x9b0] ss:$20 sps:$4 sm:$0xff]  }
 0x1c2   : > { %3463 = vmatprep.mubr.bf16.mxu0 %v6265_v59  ;;  %3504 = vmatprep.mubr.bf16.mxu1 %v6270_v63  ;;  %v4953_v0 = vld [vmem:[%s6154_s16 + $0x98c] ss:$20 sps:$4 sm:$0xff]   ;;  %v4956_v3 = vld [vmem:[%s6154_s16 + $0x6e4] ss:$20 sps:$4 sm:$0xff]  }
 0x1c3   : > { %3464 = vmatmul.mubr.bf16.vlgmr.msra.gmra.mxu0 %v6268_v62  ;;  %v6279_v6 = vpop.f32.mrf.mxu0  ;;  %3505 = vmatmul.mubr.bf16.vlgmr.msra.gmra.mxu1 %v6263_v58  ;;  %v6284_v9 = vpop.f32.mrf.mxu1 }
 0x1c4   : > { %3514 = vmatpush1.bf16.msra.mxu0 %v4888_v61  ;;  %3555 = vmatpush1.bf16.msra.mxu1 %v4891_v1  ;;  %v4950_v61 = vld [vmem:[%s6154_s16 + $0x70c] ss:$20 sps:$4 sm:$0xff]   ;;  %v4948_v1 = vld [vmem:[%s6154_s16 + $0x708] ss:$20 sps:$4 sm:$0xff]  }
 0x1c5   : > { %3515 = vmatprep.subr.bf16.mxu0 %v4896_v2  ;;  %v1302_v12 = vpop.f32.mrf.mxu0  ;;  %3556 = vmatprep.subr.bf16.mxu1 %v4899_v4  ;;  %v1343_v15 = vpop.f32.mrf.mxu1  ;;  %v4951_v2 = vld [vmem:[%s6154_s16 + $0x988] ss:$20 sps:$4 sm:$0xff]   ;;  %v4959_v4 = vld [vmem:[%s6154_s16 + $0x964] ss:$20 sps:$4 sm:$0xff]  }
 0x1c6   : > { %v1303_v14 = vadd.f32 %v1302_v12, %v1083_v5  ;;  %v1344_v17 = vadd.f32 %v1343_v15, %v1091_v7  ;;  %v4954_v5 = vld [vmem:[%s6154_s16 + $0x6e0] ss:$20 sps:$4 sm:$0xff]   ;;  %v4963_v12 = vld [vmem:[%s6154_s16 + $0x938] ss:$20 sps:$4 sm:$0xff]   ;;  %v4966_v15 = vld [vmem:[%s6154_s16 + $0x690] ss:$20 sps:$4 sm:$0xff]  }
 0x1c7   : > { %v1304_v16 = vpop.f32.mrf.mxu0  ;;  %v1345_v20 = vpop.f32.mrf.mxu1  ;;  %v4957_v7 = vld [vmem:[%s6154_s16 + $0x960] ss:$20 sps:$4 sm:$0xff]  }
 0x1c8   : > { %3516 = vmatpush1.bf16.msra.mxu0 %v4894_v8  ;;  %v6290_v19 = vpack.c.bf16 %v1303_v14, %v1303_v14  ;;  %3557 = vmatpush1.bf16.msra.mxu1 %v4897_v10  ;;  %v6294_v23 = vpack.c.bf16 %v1344_v17, %v1344_v17  ;;  %v4962_v8 = vld [vmem:[%s6154_s16 + $0x6bc] ss:$20 sps:$4 sm:$0xff]   ;;  %v4971_v14 = vld [vmem:[%s6154_s16 + $0x914] ss:$20 sps:$4 sm:$0xff]   ;;  %v1086_v16 = vsub.s32 6, %v6238_v37  ;;  %v1078_v17 = vsub.s32 4, %v6238_v37 }
 0x1c9   : > { %3517 = vmatprep.subr.bf16.mxu0 %v4902_v11  ;;  %v1305_v24 = vpop.f32.mrf.mxu0  ;;  %3558 = vmatprep.subr.bf16.mxu1 %v4905_v13  ;;  %v1346_v26 = vpop.f32.mrf.mxu1  ;;  %v4965_v10 = vld [vmem:[%s6154_s16 + $0x93c] ss:$20 sps:$4 sm:$0xff]   ;;  %v4960_v11 = vld [vmem:[%s6154_s16 + $0x6b8] ss:$20 sps:$4 sm:$0xff]   ;;  %v4968_v13 = vld [vmem:[%s6154_s16 + $0x694] ss:$20 sps:$4 sm:$0xff]  }
 0x1ca   : > { %3545 = vmatprep.mubr.bf16.mxu0 %v6290_v19  ;;  %3586 = vmatprep.mubr.bf16.mxu1 %v6294_v23  ;;  %v4974_v20 = vld [vmem:[%s6154_s16 + $0x66c] ss:$20 sps:$4 sm:$0xff]   ;;  %v4972_v24 = vld [vmem:[%s6154_s16 + $0x668] ss:$20 sps:$4 sm:$0xff]  }
 0x1cb   : > { %v4975_v26 = vld [vmem:[%s6154_s16 + $0x8e8] ss:$20 sps:$4 sm:$0xff]  }
 0x1cc   : > { %3518 = vmatpush1.bf16.msra.mxu0 %v4900_v18  ;;  %3559 = vmatpush1.bf16.msra.mxu1 %v4903_v21  ;;  %v4969_v18 = vld [vmem:[%s6154_s16 + $0x910] ss:$20 sps:$4 sm:$0xff]   ;;  %v4977_v21 = vld [vmem:[%s6154_s16 + $0x8ec] ss:$20 sps:$4 sm:$0xff]  }
 0x1cd   : > { %3519 = vmatprep.subr.bf16.mxu0 %v4908_v22  ;;  %3560 = vmatprep.subr.bf16.mxu1 %v4911_v25  ;;  %v1087_v22 = vrot.slane %v6245_v40, %v1086_v16  ;;  %v1079_v25 = vrot.slane %v6245_v40, %v1078_v17  ;;  %v4981_v40 = vld [vmem:[%s6154_s16 + $0x8c0] ss:$20 sps:$4 sm:$0xff]   ;;  %v5040_v16 = vld [vmem:[%s6154_s16 + $0x23c] ss:$20 sps:$4 sm:$0xff]  }
 0x1d0   : > { %3520 = vmatpush1.bf16.msra.mxu0 %v4906_v27  ;;  %3561 = vmatpush1.bf16.msra.mxu1 %v4909_v28  ;;  %v4980_v27 = vld [vmem:[%s6154_s16 + $0x644] ss:$20 sps:$4 sm:$0xff]  }
 0x1d1   : > { %3521 = vmatprep.subr.bf16.mxu0 %v4914_v29  ;;  %3562 = vmatprep.subr.bf16.mxu1 %v4917_v30  ;;  %v4983_v28 = vld [vmem:[%s6154_s16 + $0x8c4] ss:$20 sps:$4 sm:$0xff]   ;;  %v1342_v29 = vadd.f32 %v6284_v9, %v1087_v22  ;;  %v4978_v30 = vld [vmem:[%s6154_s16 + $0x640] ss:$20 sps:$4 sm:$0xff]  }
 0x1d2   : > { %v4984_v9 = vld [vmem:[%s6154_s16 + $0x120] ss:$20 sps:$4 sm:$0xff]  }
 0x1d3   : > { %v5046_v22 = vld [vmem:[%s6154_s16 + $0x214] ss:$20 sps:$4 sm:$0xff]  }
 0x1d4   : > { %3522 = vmatpush1.bf16.msra.mxu0 %v4912_v31  ;;  %3563 = vmatpush1.bf16.msra.mxu1 %v4915_v32  ;;  %v1301_v31 = vadd.f32 %v6279_v6, %v1079_v25  ;;  %v4986_v32 = vld [vmem:[%s6154_s16 + $0x124] ss:$20 sps:$4 sm:$0xff]   ;;  %v4987_v6 = vld [vmem:[%s6154_s16 + $0x3a0] ss:$20 sps:$4 sm:$0xff]  }
 0x1d5   : > { %3523 = vmatprep.subr.bf16.mxu0 %v4920_v33  ;;  %3564 = vmatprep.subr.bf16.mxu1 %v4923_v34  ;;  %v4989_v33 = vld [vmem:[%s6154_s16 + $0x3a4] ss:$20 sps:$4 sm:$0xff]   ;;  %v6359_v34 = vpack.c.bf16 %v1342_v29, %v1342_v29  ;;  %v5050_v29 = vld [vmem:[%s6154_s16 + $0x1e8] ss:$20 sps:$4 sm:$0xff]  }
 0x1d6   : > { %v5044_v25 = vld [vmem:[%s6154_s16 + $0x210] ss:$20 sps:$4 sm:$0xff]  }
 0x1d8   : > { %3524 = vmatpush1.bf16.msra.mxu0 %v4918_v35  ;;  %3565 = vmatpush1.bf16.msra.mxu1 %v4921_v36  ;;  %v6362_v35 = vpack.c.bf16 %v1301_v31, %v1301_v31  ;;  %v4992_v36 = vld [vmem:[%s6154_s16 + $0xfc] ss:$20 sps:$4 sm:$0xff]   ;;  %v5058_v31 = vld [vmem:[%s6154_s16 + $0x1c4] ss:$20 sps:$4 sm:$0xff]  }
 0x1d9   : > { %3525 = vmatprep.subr.bf16.mxu0 %v4926_v43  ;;  %3566 = vmatprep.subr.bf16.mxu1 %v4929_v44  ;;  %v4995_v43 = vld [vmem:[%s6154_s16 + $0x37c] ss:$20 sps:$4 sm:$0xff]   ;;  %v4990_v44 = vld [vmem:[%s6154_s16 + $0xf8] ss:$20 sps:$4 sm:$0xff]  }
 0x1dc   : > { %3526 = vmatpush1.bf16.msra.mxu0 %v4924_v45  ;;  %3567 = vmatpush1.bf16.msra.mxu1 %v4927_v46  ;;  %v4993_v45 = vld [vmem:[%s6154_s16 + $0x378] ss:$20 sps:$4 sm:$0xff]   ;;  %v4998_v46 = vld [vmem:[%s6154_s16 + $0xd4] ss:$20 sps:$4 sm:$0xff]  }
 0x1dd   : > { %3527 = vmatprep.subr.bf16.mxu0 %v4932_v47  ;;  %3568 = vmatprep.subr.bf16.mxu1 %v4935_v48  ;;  %v5001_v47 = vld [vmem:[%s6154_s16 + $0x354] ss:$20 sps:$4 sm:$0xff]   ;;  %v4996_v48 = vld [vmem:[%s6154_s16 + $0xd0] ss:$20 sps:$4 sm:$0xff]  }
 0x1e0   : > { %3528 = vmatpush1.bf16.msra.mxu0 %v4930_v49  ;;  %3569 = vmatpush1.bf16.msra.mxu1 %v4933_v50  ;;  %v4999_v49 = vld [vmem:[%s6154_s16 + $0x350] ss:$20 sps:$4 sm:$0xff]   ;;  %v5004_v50 = vld [vmem:[%s6154_s16 + $0xac] ss:$20 sps:$4 sm:$0xff]  }
 0x1e1   : > { %3529 = vmatprep.subr.bf16.mxu0 %v4938_v51  ;;  %3570 = vmatprep.subr.bf16.mxu1 %v4941_v52  ;;  %v5007_v51 = vld [vmem:[%s6154_s16 + $0x32c] ss:$20 sps:$4 sm:$0xff]   ;;  %v5002_v52 = vld [vmem:[%s6154_s16 + $0xa8] ss:$20 sps:$4 sm:$0xff]  }
 0x1e4   : > { %3530 = vmatpush2.bf16.msra.mxu0 %v4936_v53  ;;  %3571 = vmatpush2.bf16.msra.mxu1 %v4939_v54  ;;  %v5005_v53 = vld [vmem:[%s6154_s16 + $0x328] ss:$20 sps:$4 sm:$0xff]   ;;  %v5010_v54 = vld [vmem:[%s6154_s16 + $0x84] ss:$20 sps:$4 sm:$0xff]  }
 0x1e5   : > { %3531 = vmatprep.subr.bf16.mxu0 %v4944_v55  ;;  %3572 = vmatprep.subr.bf16.mxu1 %v4947_v56  ;;  %v5013_v55 = vld [vmem:[%s6154_s16 + $0x304] ss:$20 sps:$4 sm:$0xff]   ;;  %v5008_v56 = vld [vmem:[%s6154_s16 + $0x80] ss:$20 sps:$4 sm:$0xff]  }
 0x1e8   : > { %3532 = vmatpush2.bf16.msra.mxu0 %v4942_v57  ;;  %3573 = vmatpush2.bf16.msra.mxu1 %v4945_v60  ;;  %v5011_v57 = vld [vmem:[%s6154_s16 + $0x300] ss:$20 sps:$4 sm:$0xff]   ;;  %v5016_v60 = vld [vmem:[%s6154_s16 + $0x5c] ss:$20 sps:$4 sm:$0xff]  }
 0x1e9   : > { %3533 = vmatprep.subr.bf16.mxu0 %v4950_v61  ;;  %3574 = vmatprep.subr.bf16.mxu1 %v4953_v0  ;;  %v5019_v61 = vld [vmem:[%s6154_s16 + $0x2dc] ss:$20 sps:$4 sm:$0xff]   ;;  %v5014_v0 = vld [vmem:[%s6154_s16 + $0x58] ss:$20 sps:$4 sm:$0xff]  }
 0x1ec   : > { %3534 = vmatpush2.bf16.msra.mxu0 %v4948_v1  ;;  %3575 = vmatpush2.bf16.msra.mxu1 %v4951_v2  ;;  %v5017_v1 = vld [vmem:[%s6154_s16 + $0x2d8] ss:$20 sps:$4 sm:$0xff]   ;;  %v5022_v2 = vld [vmem:[%s6154_s16 + $0x34] ss:$20 sps:$4 sm:$0xff]  }
 0x1ed   : > { %3535 = vmatprep.subr.bf16.mxu0 %v4956_v3  ;;  %3576 = vmatprep.subr.bf16.mxu1 %v4959_v4  ;;  %v5025_v3 = vld [vmem:[%s6154_s16 + $0x2b4] ss:$20 sps:$4 sm:$0xff]   ;;  %v5020_v4 = vld [vmem:[%s6154_s16 + $0x30] ss:$20 sps:$4 sm:$0xff]  }
 0x1f0   : > { %3536 = vmatpush2.bf16.msra.mxu0 %v4954_v5  ;;  %3577 = vmatpush2.bf16.msra.mxu1 %v4957_v7  ;;  %v5023_v5 = vld [vmem:[%s6154_s16 + $0x2b0] ss:$20 sps:$4 sm:$0xff]   ;;  %v5028_v7 = vld [vmem:[%s6154_s16 + $0xc] ss:$20 sps:$4 sm:$0xff]  }
 0x1f1   : > { %3537 = vmatprep.subr.bf16.mxu0 %v4962_v8  ;;  %3578 = vmatprep.subr.bf16.mxu1 %v4965_v10  ;;  %v5031_v8 = vld [vmem:[%s6154_s16 + $0x28c] ss:$20 sps:$4 sm:$0xff]   ;;  %v5026_v10 = vld [vmem:[%s6154_s16 + $0x8] ss:$20 sps:$4 sm:$0xff]  }
 0x1f4   : > { %3538 = vmatpush2.bf16.msra.mxu0 %v4960_v11  ;;  %3579 = vmatpush2.bf16.msra.mxu1 %v4963_v12  ;;  %v5029_v11 = vld [vmem:[%s6154_s16 + $0x288] ss:$20 sps:$4 sm:$0xff]   ;;  %v5034_v12 = vld [vmem:[%s6154_s16 + $0x264] ss:$20 sps:$4 sm:$0xff]  }
 0x1f5   : > { %3539 = vmatprep.subr.bf16.mxu0 %v4968_v13  ;;  %3580 = vmatprep.subr.bf16.mxu1 %v4971_v14  ;;  %v5037_v13 = vld [vmem:[%s6154_s16 + $0x4e4] ss:$20 sps:$4 sm:$0xff]   ;;  %v5032_v14 = vld [vmem:[%s6154_s16 + $0x260] ss:$20 sps:$4 sm:$0xff]  }
 0x1f8   : > { %3540 = vmatpush2.bf16.msra.mxu0 %v4966_v15  ;;  %3581 = vmatpush2.bf16.msra.mxu1 %v4969_v18  ;;  %v5035_v15 = vld [vmem:[%s6154_s16 + $0x4e0] ss:$20 sps:$4 sm:$0xff]   ;;  %v5043_v18 = vld [vmem:[%s6154_s16 + $0x4bc] ss:$20 sps:$4 sm:$0xff]  }
 0x1f9   : > { %3541 = vmatprep.subr.bf16.mxu0 %v4974_v20  ;;  %3582 = vmatprep.subr.bf16.mxu1 %v4977_v21  ;;  %v5038_v20 = vld [vmem:[%s6154_s16 + $0x238] ss:$20 sps:$4 sm:$0xff]  }
 0x1fa   : > { %v5041_v21 = vld [vmem:[%s6154_s16 + $0x4b8] ss:$20 sps:$4 sm:$0xff]  }
 0x1fc   : > { %3542 = vmatpush2.bf16.msra.mxu0 %v4972_v24  ;;  %3583 = vmatpush2.bf16.msra.mxu1 %v4975_v26  ;;  %v5049_v24 = vld [vmem:[%s6154_s16 + $0x494] ss:$20 sps:$4 sm:$0xff]   ;;  %v5047_v26 = vld [vmem:[%s6154_s16 + $0x490] ss:$20 sps:$4 sm:$0xff]  }
 0x1fd   : > { %3543 = vmatprep.subr.bf16.mxu0 %v4980_v27  ;;  %3584 = vmatprep.subr.bf16.mxu1 %v4983_v28  ;;  %v5052_v27 = vld [vmem:[%s6154_s16 + $0x1ec] ss:$20 sps:$4 sm:$0xff]  }
 0x1fe   : > { %v5055_v28 = vld [vmem:[%s6154_s16 + $0x46c] ss:$20 sps:$4 sm:$0xff]  }
 0x200   : > { %3544 = vmatpush2.bf16.msra.mxu0 %v4978_v30  ;;  %3585 = vmatpush2.bf16.msra.mxu1 %v4981_v40  ;;  %v5053_v30 = vld [vmem:[%s6154_s16 + $0x468] ss:$20 sps:$4 sm:$0xff]   ;;  %v5061_v40 = vld [vmem:[%s6154_s16 + $0x444] ss:$20 sps:$4 sm:$0xff]  }
 0x201   : > { %3595 = vmatprep.subr.bf16.mxu0 %v4986_v32  ;;  %3636 = vmatprep.subr.bf16.mxu1 %v4989_v33  ;;  %v5056_v32 = vld [vmem:[%s6154_s16 + $0x1c0] ss:$20 sps:$4 sm:$0xff]  }
 0x202   : > { %v5059_v33 = vld [vmem:[%s6154_s16 + $0x440] ss:$20 sps:$4 sm:$0xff]  }
 0x203   : > { %3546 = vmatmul.mubr.bf16.vlgmr.msra.gmra.mxu0 %v6362_v35  ;;  %3587 = vmatmul.mubr.bf16.vlgmr.msra.gmra.mxu1 %v6359_v34 }
 0x204   : > { %3596 = vmatpush1.bf16.msra.mxu0 %v4984_v9  ;;  %3627 = vmatprep.mubr.bf16.mxu0 %v6265_v59  ;;  %v5064_v9 = vld [vmem:[%s6154_s16 + $0x19c] ss:$20 sps:$4 sm:$0xff]  }
 0x205   : > { %3637 = vmatpush1.bf16.msra.mxu1 %v4987_v6  ;;  %3668 = vmatprep.mubr.bf16.mxu1 %v6270_v63  ;;  %v5067_v6 = vld [vmem:[%s6154_s16 + $0x41c] ss:$20 sps:$4 sm:$0xff]  }
 0x206   : > { %3597 = vmatprep.subr.bf16.mxu0 %v4992_v36  ;;  %3638 = vmatprep.subr.bf16.mxu1 %v4995_v43  ;;  %v5062_v36 = vld [vmem:[%s6154_s16 + $0x198] ss:$20 sps:$4 sm:$0xff]  }
 0x207   : > { %v5065_v43 = vld [vmem:[%s6154_s16 + $0x418] ss:$20 sps:$4 sm:$0xff]  }
 0x208   : > { %3598 = vmatpush1.bf16.msra.mxu0 %v4990_v44  ;;  %v5070_v44 = vld [vmem:[%s6154_s16 + $0x174] ss:$20 sps:$4 sm:$0xff]  }
 0x209   : > { %3639 = vmatpush1.bf16.msra.mxu1 %v4993_v45  ;;  %3599 = vmatprep.subr.bf16.mxu0 %v4998_v46  ;;  %v5073_v45 = vld [vmem:[%s6154_s16 + $0x3f4] ss:$20 sps:$4 sm:$0xff]   ;;  %v5068_v46 = vld [vmem:[%s6154_s16 + $0x170] ss:$20 sps:$4 sm:$0xff]  }
 0x20a   : > { %3640 = vmatprep.subr.bf16.mxu1 %v5001_v47  ;;  %v5071_v47 = vld [vmem:[%s6154_s16 + $0x3f0] ss:$20 sps:$4 sm:$0xff]  }
 0x20c   : > { %3600 = vmatpush1.bf16.msra.mxu0 %v4996_v48  ;;  %v5076_v48 = vld [vmem:[%s6154_s16 + $0x14c] ss:$20 sps:$4 sm:$0xff]  }
 0x20d   : > { %3641 = vmatpush1.bf16.msra.mxu1 %v4999_v49  ;;  %3601 = vmatprep.subr.bf16.mxu0 %v5004_v50  ;;  %v5079_v49 = vld [vmem:[%s6154_s16 + $0x3cc] ss:$20 sps:$4 sm:$0xff]   ;;  %v5074_v50 = vld [vmem:[%s6154_s16 + $0x148] ss:$20 sps:$4 sm:$0xff]  }
 0x20e   : > { %3642 = vmatprep.subr.bf16.mxu1 %v5007_v51  ;;  %v5077_v51 = vld [vmem:[%s6154_s16 + $0x3c8] ss:$20 sps:$4 sm:$0xff]  }
 0x210   : > { %3602 = vmatpush1.bf16.msra.mxu0 %v5002_v52  ;;  %v5082_v52 = vld [vmem:[%s6154_s16 + $0x624] ss:$20 sps:$4 sm:$0xff]  }
 0x211   : > { %3643 = vmatpush1.bf16.msra.mxu1 %v5005_v53  ;;  %3603 = vmatprep.subr.bf16.mxu0 %v5010_v54  ;;  %v5085_v53 = vld [vmem:[%s6154_s16 + $0x8a4] ss:$20 sps:$4 sm:$0xff]   ;;  %v5080_v54 = vld [vmem:[%s6154_s16 + $0x620] ss:$20 sps:$4 sm:$0xff]  }
 0x212   : > { %3644 = vmatprep.subr.bf16.mxu1 %v5013_v55  ;;  %v5083_v55 = vld [vmem:[%s6154_s16 + $0x8a0] ss:$20 sps:$4 sm:$0xff]  }
 0x214   : > { %3604 = vmatpush1.bf16.msra.mxu0 %v5008_v56  ;;  %v5088_v56 = vld [vmem:[%s6154_s16 + $0x5fc] ss:$20 sps:$4 sm:$0xff]  }
 0x215   : > { %3645 = vmatpush1.bf16.msra.mxu1 %v5011_v57  ;;  %3605 = vmatprep.subr.bf16.mxu0 %v5016_v60  ;;  %v5091_v57 = vld [vmem:[%s6154_s16 + $0x87c] ss:$20 sps:$4 sm:$0xff]   ;;  %v5086_v60 = vld [vmem:[%s6154_s16 + $0x5f8] ss:$20 sps:$4 sm:$0xff]  }
 0x216   : > { %3646 = vmatprep.subr.bf16.mxu1 %v5019_v61  ;;  %v5089_v61 = vld [vmem:[%s6154_s16 + $0x878] ss:$20 sps:$4 sm:$0xff]  }
 0x218   : > { %3606 = vmatpush1.bf16.msra.mxu0 %v5014_v0  ;;  %v5094_v0 = vld [vmem:[%s6154_s16 + $0x5d4] ss:$20 sps:$4 sm:$0xff]  }
 0x219   : > { %3647 = vmatpush1.bf16.msra.mxu1 %v5017_v1  ;;  %3607 = vmatprep.subr.bf16.mxu0 %v5022_v2  ;;  %v5097_v1 = vld [vmem:[%s6154_s16 + $0x854] ss:$20 sps:$4 sm:$0xff]   ;;  %v5092_v2 = vld [vmem:[%s6154_s16 + $0x5d0] ss:$20 sps:$4 sm:$0xff]  }
 0x21a   : > { %3648 = vmatprep.subr.bf16.mxu1 %v5025_v3  ;;  %v5095_v3 = vld [vmem:[%s6154_s16 + $0x850] ss:$20 sps:$4 sm:$0xff]  }
 0x21c   : > { %3608 = vmatpush1.bf16.msra.mxu0 %v5020_v4  ;;  %v5100_v4 = vld [vmem:[%s6154_s16 + $0x5ac] ss:$20 sps:$4 sm:$0xff]  }
 0x21d   : > { %3649 = vmatpush1.bf16.msra.mxu1 %v5023_v5  ;;  %3609 = vmatprep.subr.bf16.mxu0 %v5028_v7  ;;  %v5103_v5 = vld [vmem:[%s6154_s16 + $0x82c] ss:$20 sps:$4 sm:$0xff]   ;;  %v5098_v7 = vld [vmem:[%s6154_s16 + $0x5a8] ss:$20 sps:$4 sm:$0xff]  }
 0x21e   : > { %3650 = vmatprep.subr.bf16.mxu1 %v5031_v8  ;;  %v5101_v8 = vld [vmem:[%s6154_s16 + $0x828] ss:$20 sps:$4 sm:$0xff]  }
 0x220   : > { %3610 = vmatpush1.bf16.msra.mxu0 %v5026_v10  ;;  %v5106_v10 = vld [vmem:[%s6154_s16 + $0x584] ss:$20 sps:$4 sm:$0xff]  }
 0x221   : > { %3651 = vmatpush1.bf16.msra.mxu1 %v5029_v11  ;;  %3611 = vmatprep.subr.bf16.mxu0 %v5034_v12  ;;  %v5109_v11 = vld [vmem:[%s6154_s16 + $0x804] ss:$20 sps:$4 sm:$0xff]   ;;  %v5104_v12 = vld [vmem:[%s6154_s16 + $0x580] ss:$20 sps:$4 sm:$0xff]  }
 0x222   : > { %3652 = vmatprep.subr.bf16.mxu1 %v5037_v13  ;;  %v5107_v13 = vld [vmem:[%s6154_s16 + $0x800] ss:$20 sps:$4 sm:$0xff]  }
 0x224   : > { %3612 = vmatpush2.bf16.msra.mxu0 %v5032_v14  ;;  %v5112_v14 = vld [vmem:[%s6154_s16 + $0x55c] ss:$20 sps:$4 sm:$0xff]  }
 0x225   : > { %3653 = vmatpush2.bf16.msra.mxu1 %v5035_v15  ;;  %3613 = vmatprep.subr.bf16.mxu0 %v5040_v16  ;;  %v5115_v15 = vld [vmem:[%s6154_s16 + $0x7dc] ss:$20 sps:$4 sm:$0xff]   ;;  %v5110_v16 = vld [vmem:[%s6154_s16 + $0x558] ss:$20 sps:$4 sm:$0xff]  }
 0x226   : > { %3654 = vmatprep.subr.bf16.mxu1 %v5043_v18  ;;  %v5113_v18 = vld [vmem:[%s6154_s16 + $0x7d8] ss:$20 sps:$4 sm:$0xff]  }
 0x228   : > { %3614 = vmatpush2.bf16.msra.mxu0 %v5038_v20  ;;  %v5118_v20 = vld [vmem:[%s6154_s16 + $0x534] ss:$20 sps:$4 sm:$0xff]  }
 0x229   : > { %3655 = vmatpush2.bf16.msra.mxu1 %v5041_v21  ;;  %3615 = vmatprep.subr.bf16.mxu0 %v5046_v22  ;;  %v5121_v21 = vld [vmem:[%s6154_s16 + $0x7b4] ss:$20 sps:$4 sm:$0xff]   ;;  %v5116_v22 = vld [vmem:[%s6154_s16 + $0x530] ss:$20 sps:$4 sm:$0xff]  }
 0x22a   : > { %3656 = vmatprep.subr.bf16.mxu1 %v5049_v24  ;;  %v5119_v24 = vld [vmem:[%s6154_s16 + $0x7b0] ss:$20 sps:$4 sm:$0xff]  }
 0x22c   : > { %3616 = vmatpush2.bf16.msra.mxu0 %v5044_v25  ;;  %v5124_v25 = vld [vmem:[%s6154_s16 + $0x50c] ss:$20 sps:$4 sm:$0xff]  }
 0x22d   : > { %3657 = vmatpush2.bf16.msra.mxu1 %v5047_v26  ;;  %3617 = vmatprep.subr.bf16.mxu0 %v5052_v27  ;;  %v5127_v26 = vld [vmem:[%s6154_s16 + $0x78c] ss:$20 sps:$4 sm:$0xff]   ;;  %v5122_v27 = vld [vmem:[%s6154_s16 + $0x508] ss:$20 sps:$4 sm:$0xff]  }
 0x22e   : > { %3658 = vmatprep.subr.bf16.mxu1 %v5055_v28  ;;  %v5125_v28 = vld [vmem:[%s6154_s16 + $0x788] ss:$20 sps:$4 sm:$0xff]  }
 0x230   : > { %3618 = vmatpush2.bf16.msra.mxu0 %v5050_v29  ;;  %v5130_v29 = vld [vmem:[%s6154_s16 + $0x764] ss:$20 sps:$4 sm:$0xff]  }
 0x231   : > { %3659 = vmatpush2.bf16.msra.mxu1 %v5053_v30  ;;  %3619 = vmatprep.subr.bf16.mxu0 %v5058_v31  ;;  %v5133_v30 = vld [vmem:[%s6154_s16 + $0x9e4] ss:$20 sps:$4 sm:$0xff]   ;;  %v5128_v31 = vld [vmem:[%s6154_s16 + $0x760] ss:$20 sps:$4 sm:$0xff]  }
 0x232   : > { %3660 = vmatprep.subr.bf16.mxu1 %v5061_v40  ;;  %v5131_v40 = vld [vmem:[%s6154_s16 + $0x9e0] ss:$20 sps:$4 sm:$0xff]  }
 0x234   : > { %3620 = vmatpush2.bf16.msra.mxu0 %v5056_v32  ;;  %v5136_v32 = vld [vmem:[%s6154_s16 + $0x73c] ss:$20 sps:$4 sm:$0xff]  }
 0x235   : > { %3661 = vmatpush2.bf16.msra.mxu1 %v5059_v33  ;;  %3621 = vmatprep.subr.bf16.mxu0 %v5064_v9  ;;  %v5139_v33 = vld [vmem:[%s6154_s16 + $0x9bc] ss:$20 sps:$4 sm:$0xff]   ;;  %v5134_v9 = vld [vmem:[%s6154_s16 + $0x738] ss:$20 sps:$4 sm:$0xff]  }
 0x236   : > { %3662 = vmatprep.subr.bf16.mxu1 %v5067_v6  ;;  %v5137_v6 = vld [vmem:[%s6154_s16 + $0x9b8] ss:$20 sps:$4 sm:$0xff]  }
 0x238   : > { %3622 = vmatpush2.bf16.msra.mxu0 %v5062_v36  ;;  %v5142_v36 = vld [vmem:[%s6154_s16 + $0x714] ss:$20 sps:$4 sm:$0xff]  }
 0x239   : > { %3663 = vmatpush2.bf16.msra.mxu1 %v5065_v43  ;;  %3623 = vmatprep.subr.bf16.mxu0 %v5070_v44  ;;  %v5145_v43 = vld [vmem:[%s6154_s16 + $0x994] ss:$20 sps:$4 sm:$0xff]   ;;  %v5140_v44 = vld [vmem:[%s6154_s16 + $0x710] ss:$20 sps:$4 sm:$0xff]  }
 0x23a   : > { %3664 = vmatprep.subr.bf16.mxu1 %v5073_v45  ;;  %v5143_v45 = vld [vmem:[%s6154_s16 + $0x990] ss:$20 sps:$4 sm:$0xff]  }
 0x23c   : > { %3624 = vmatpush2.bf16.msra.mxu0 %v5068_v46  ;;  %v5148_v46 = vld [vmem:[%s6154_s16 + $0x6ec] ss:$20 sps:$4 sm:$0xff]  }
 0x23d   : > { %3665 = vmatpush2.bf16.msra.mxu1 %v5071_v47  ;;  %3625 = vmatprep.subr.bf16.mxu0 %v5076_v48  ;;  %v5151_v47 = vld [vmem:[%s6154_s16 + $0x96c] ss:$20 sps:$4 sm:$0xff]   ;;  %v5146_v48 = vld [vmem:[%s6154_s16 + $0x6e8] ss:$20 sps:$4 sm:$0xff]  }
 0x23e   : > { %3666 = vmatprep.subr.bf16.mxu1 %v5079_v49  ;;  %v5149_v49 = vld [vmem:[%s6154_s16 + $0x968] ss:$20 sps:$4 sm:$0xff]  }
 0x240   : > { %3626 = vmatpush2.bf16.msra.mxu0 %v5074_v50  ;;  %v5154_v50 = vld [vmem:[%s6154_s16 + $0x6c4] ss:$20 sps:$4 sm:$0xff]  }
 0x241   : > { %3667 = vmatpush2.bf16.msra.mxu1 %v5077_v51  ;;  %3677 = vmatprep.subr.bf16.mxu0 %v5082_v52  ;;  %v5157_v51 = vld [vmem:[%s6154_s16 + $0x944] ss:$20 sps:$4 sm:$0xff]   ;;  %v5152_v52 = vld [vmem:[%s6154_s16 + $0x6c0] ss:$20 sps:$4 sm:$0xff]  }
 0x242   : > { %3718 = vmatprep.subr.bf16.mxu1 %v5085_v53  ;;  %v5155_v53 = vld [vmem:[%s6154_s16 + $0x940] ss:$20 sps:$4 sm:$0xff]  }
 0x243   : > { %3628 = vmatmul.mubr.bf16.vlgmr.msra.gmra.mxu0 %v6268_v62 }
 0x244   : > { %3669 = vmatmul.mubr.bf16.vlgmr.msra.gmra.mxu1 %v6263_v58  ;;  %3678 = vmatpush1.bf16.msra.mxu0 %v5080_v54  ;;  %v5160_v54 = vld [vmem:[%s6154_s16 + $0x69c] ss:$20 sps:$4 sm:$0xff]  }
 0x245   : > { %3709 = vmatprep.mubr.bf16.mxu0 %v6290_v19  ;;  %3719 = vmatpush1.bf16.msra.mxu1 %v5083_v55  ;;  %v5163_v55 = vld [vmem:[%s6154_s16 + $0x91c] ss:$20 sps:$4 sm:$0xff]  }
 0x246   : > { %3750 = vmatprep.mubr.bf16.mxu1 %v6294_v23  ;;  %3679 = vmatprep.subr.bf16.mxu0 %v5088_v56  ;;  %v5158_v56 = vld [vmem:[%s6154_s16 + $0x698] ss:$20 sps:$4 sm:$0xff]  }
 0x247   : > { %3720 = vmatprep.subr.bf16.mxu1 %v5091_v57  ;;  %v5161_v57 = vld [vmem:[%s6154_s16 + $0x918] ss:$20 sps:$4 sm:$0xff]  }
 0x248   : > { %3680 = vmatpush1.bf16.msra.mxu0 %v5086_v60  ;;  %v5166_v60 = vld [vmem:[%s6154_s16 + $0x674] ss:$20 sps:$4 sm:$0xff]  }
 0x249   : > { %3721 = vmatpush1.bf16.msra.mxu1 %v5089_v61  ;;  %3681 = vmatprep.subr.bf16.mxu0 %v5094_v0  ;;  %v5169_v61 = vld [vmem:[%s6154_s16 + $0x8f4] ss:$20 sps:$4 sm:$0xff]   ;;  %v5164_v0 = vld [vmem:[%s6154_s16 + $0x670] ss:$20 sps:$4 sm:$0xff]  }
 0x24a   : > { %3722 = vmatprep.subr.bf16.mxu1 %v5097_v1  ;;  %v5167_v1 = vld [vmem:[%s6154_s16 + $0x8f0] ss:$20 sps:$4 sm:$0xff]  }
 0x24c   : > { %3682 = vmatpush1.bf16.msra.mxu0 %v5092_v2  ;;  %v5172_v2 = vld [vmem:[%s6154_s16 + $0x64c] ss:$20 sps:$4 sm:$0xff]  }
 0x24d   : > { %3723 = vmatpush1.bf16.msra.mxu1 %v5095_v3  ;;  %3683 = vmatprep.subr.bf16.mxu0 %v5100_v4  ;;  %v5175_v3 = vld [vmem:[%s6154_s16 + $0x8cc] ss:$20 sps:$4 sm:$0xff]   ;;  %v5170_v4 = vld [vmem:[%s6154_s16 + $0x648] ss:$20 sps:$4 sm:$0xff]  }
 0x24e   : > { %3724 = vmatprep.subr.bf16.mxu1 %v5103_v5  ;;  %v5173_v5 = vld [vmem:[%s6154_s16 + $0x8c8] ss:$20 sps:$4 sm:$0xff]  }
 0x250   : > { %3684 = vmatpush1.bf16.msra.mxu0 %v5098_v7  ;;  %v5176_v7 = vld [vmem:[%s6154_s16 + $0x268] ss:$20 sps:$4 sm:$0xff]  }
 0x251   : > { %3725 = vmatpush1.bf16.msra.mxu1 %v5101_v8  ;;  %3685 = vmatprep.subr.bf16.mxu0 %v5106_v10  ;;  %v6506_v8 = vld [vmem:[%s1033_s8] sm:$0x1f]  ;;  %v5177_v10 = vld [vmem:[%s6154_s16 + $0x4e8] ss:$20 sps:$4 sm:$0xff]  }
 0x252   : > { %3726 = vmatprep.subr.bf16.mxu1 %v5109_v11  ;;  %v1745_v11 = vrot.slane %v6506_v8, %v1062_v38 }
 0x254   : > { %3686 = vmatpush1.bf16.msra.mxu0 %v5104_v12  ;;  %v5178_v12 = vld [vmem:[%s6154_s16 + $0x128] ss:$20 sps:$4 sm:$0xff]  }
 0x255   : > { %3727 = vmatpush1.bf16.msra.mxu1 %v5107_v13  ;;  %3687 = vmatprep.subr.bf16.mxu0 %v5112_v14  ;;  %v5179_v13 = vld [vmem:[%s6154_s16 + $0x3a8] ss:$20 sps:$4 sm:$0xff]   ;;  %v1749_v14 = vrot.slane %v6506_v8, %v1066_v41 }
 0x256   : > { %3728 = vmatprep.subr.bf16.mxu1 %v5115_v15  ;;  %v5180_v15 = vld [vmem:[%s6154_s16 + $0x240] ss:$20 sps:$4 sm:$0xff]  }
 0x258   : > { %3688 = vmatpush1.bf16.msra.mxu0 %v5110_v16 }
 0x259   : > { %3729 = vmatpush1.bf16.msra.mxu1 %v5113_v18  ;;  %3689 = vmatprep.subr.bf16.mxu0 %v5118_v20  ;;  %v5181_v18 = vld [vmem:[%s6154_s16 + $0x4c0] ss:$20 sps:$4 sm:$0xff]  }
 0x25a   : > { %3730 = vmatprep.subr.bf16.mxu1 %v5121_v21  ;;  %v5182_v21 = vld [vmem:[%s6154_s16 + $0x100] ss:$20 sps:$4 sm:$0xff]  }
 0x25c   : > { %3690 = vmatpush1.bf16.msra.mxu0 %v5116_v22 }
 0x25d   : > { %3731 = vmatpush1.bf16.msra.mxu1 %v5119_v24  ;;  %3691 = vmatprep.subr.bf16.mxu0 %v5124_v25  ;;  %v5183_v24 = vld [vmem:[%s6154_s16 + $0x380] ss:$20 sps:$4 sm:$0xff]   ;;  %v5184_v25 = vld [vmem:[%s6154_s16 + $0x218] ss:$20 sps:$4 sm:$0xff]  }
 0x25e   : > { %3732 = vmatprep.subr.bf16.mxu1 %v5127_v26 }
 0x260   : > { %3692 = vmatpush1.bf16.msra.mxu0 %v5122_v27 }
 0x261   : > { %3733 = vmatpush1.bf16.msra.mxu1 %v5125_v28  ;;  %3693 = vmatprep.subr.bf16.mxu0 %v5130_v29  ;;  %v5185_v28 = vld [vmem:[%s6154_s16 + $0x498] ss:$20 sps:$4 sm:$0xff]  }
 0x262   : > { %3734 = vmatprep.subr.bf16.mxu1 %v5133_v30 }
 0x264   : > { %3694 = vmatpush2.bf16.msra.mxu0 %v5128_v31  ;;  %v5186_v31 = vld [vmem:[%s6154_s16 + $0xd8] ss:$20 sps:$4 sm:$0xff]  }
 0x265   : > { %3735 = vmatpush2.bf16.msra.mxu1 %v5131_v40  ;;  %3695 = vmatprep.subr.bf16.mxu0 %v5136_v32  ;;  %v5188_v32 = vld [vmem:[%s6154_s16 + $0x1f0] ss:$20 sps:$4 sm:$0xff]  }
 0x266   : > { %3736 = vmatprep.subr.bf16.mxu1 %v5139_v33 }
 0x268   : > { %3696 = vmatpush2.bf16.msra.mxu0 %v5134_v9  ;;  %v5189_v9 = vld [vmem:[%s6154_s16 + $0x470] ss:$20 sps:$4 sm:$0xff]  }
 0x269   : > { %3737 = vmatpush2.bf16.msra.mxu1 %v5137_v6  ;;  %3697 = vmatprep.subr.bf16.mxu0 %v5142_v36  ;;  %v5190_v6 = vld [vmem:[%s6154_s16 + $0xb0] ss:$20 sps:$4 sm:$0xff]  }
 0x26a   : > { %3738 = vmatprep.subr.bf16.mxu1 %v5145_v43  ;;  %v5191_v36 = vld [vmem:[%s6154_s16 + $0x330] ss:$20 sps:$4 sm:$0xff]   ;;  %v5192_v43 = vld [vmem:[%s6154_s16 + $0x1c8] ss:$20 sps:$4 sm:$0xff]  }
 0x26c   : > { %3698 = vmatpush2.bf16.msra.mxu0 %v5140_v44  ;;  %v5193_v44 = vld [vmem:[%s6154_s16 + $0x448] ss:$20 sps:$4 sm:$0xff]  }
 0x26d   : > { %3739 = vmatpush2.bf16.msra.mxu1 %v5143_v45  ;;  %3699 = vmatprep.subr.bf16.mxu0 %v5148_v46  ;;  %v5194_v45 = vld [vmem:[%s6154_s16 + $0x88] ss:$20 sps:$4 sm:$0xff]  }
 0x26e   : > { %3740 = vmatprep.subr.bf16.mxu1 %v5151_v47  ;;  %v5195_v46 = vld [vmem:[%s6154_s16 + $0x308] ss:$20 sps:$4 sm:$0xff]   ;;  %v5196_v47 = vld [vmem:[%s6154_s16 + $0x1a0] ss:$20 sps:$4 sm:$0xff]  }
 0x270   : > { %3700 = vmatpush2.bf16.msra.mxu0 %v5146_v48  ;;  %v5197_v48 = vld [vmem:[%s6154_s16 + $0x420] ss:$20 sps:$4 sm:$0xff]  }
 0x271   : > { %3741 = vmatpush2.bf16.msra.mxu1 %v5149_v49  ;;  %3701 = vmatprep.subr.bf16.mxu0 %v5154_v50  ;;  %v5198_v49 = vld [vmem:[%s6154_s16 + $0x60] ss:$20 sps:$4 sm:$0xff]  }
 0x272   : > { %3742 = vmatprep.subr.bf16.mxu1 %v5157_v51  ;;  %v5199_v50 = vld [vmem:[%s6154_s16 + $0x2e0] ss:$20 sps:$4 sm:$0xff]   ;;  %v5200_v51 = vld [vmem:[%s6154_s16 + $0x178] ss:$20 sps:$4 sm:$0xff]  }
 0x274   : > { %3702 = vmatpush2.bf16.msra.mxu0 %v5152_v52  ;;  %v5201_v52 = vld [vmem:[%s6154_s16 + $0x3f8] ss:$20 sps:$4 sm:$0xff]  }
 0x275   : > { %3743 = vmatpush2.bf16.msra.mxu1 %v5155_v53  ;;  %3703 = vmatprep.subr.bf16.mxu0 %v5160_v54  ;;  %v5202_v53 = vld [vmem:[%s6154_s16 + $0x38] ss:$20 sps:$4 sm:$0xff]  }
 0x276   : > { %3744 = vmatprep.subr.bf16.mxu1 %v5163_v55  ;;  %v5203_v54 = vld [vmem:[%s6154_s16 + $0x2b8] ss:$20 sps:$4 sm:$0xff]   ;;  %v5204_v55 = vld [vmem:[%s6154_s16 + $0x150] ss:$20 sps:$4 sm:$0xff]  }
 0x278   : > { %3704 = vmatpush2.bf16.msra.mxu0 %v5158_v56  ;;  %v5205_v56 = vld [vmem:[%s6154_s16 + $0x3d0] ss:$20 sps:$4 sm:$0xff]  }
 0x279   : > { %3745 = vmatpush2.bf16.msra.mxu1 %v5161_v57  ;;  %3705 = vmatprep.subr.bf16.mxu0 %v5166_v60  ;;  %v5206_v57 = vld [vmem:[%s6154_s16 + $0x10] ss:$20 sps:$4 sm:$0xff]  }
 0x27a   : > { %3746 = vmatprep.subr.bf16.mxu1 %v5169_v61  ;;  %v5207_v60 = vld [vmem:[%s6154_s16 + $0x290] ss:$20 sps:$4 sm:$0xff]   ;;  %v5208_v61 = vld [vmem:[%s6154_s16 + $0x768] ss:$20 sps:$4 sm:$0xff]  }
 0x27c   : > { %3706 = vmatpush2.bf16.msra.mxu0 %v5164_v0  ;;  %v5209_v0 = vld [vmem:[%s6154_s16 + $0x9e8] ss:$20 sps:$4 sm:$0xff]  }
 0x27d   : > { %3747 = vmatpush2.bf16.msra.mxu1 %v5167_v1  ;;  %3707 = vmatprep.subr.bf16.mxu0 %v5172_v2  ;;  %v5210_v1 = vld [vmem:[%s6154_s16 + $0x628] ss:$20 sps:$4 sm:$0xff]  }
 0x27e   : > { %3748 = vmatprep.subr.bf16.mxu1 %v5175_v3  ;;  %v5211_v2 = vld [vmem:[%s6154_s16 + $0x8a8] ss:$20 sps:$4 sm:$0xff]   ;;  %v5212_v3 = vld [vmem:[%s6154_s16 + $0x740] ss:$20 sps:$4 sm:$0xff]  }
 0x280   : > { %3708 = vmatpush2.bf16.msra.mxu0 %v5170_v4  ;;  %v5213_v4 = vld [vmem:[%s6154_s16 + $0x9c0] ss:$20 sps:$4 sm:$0xff]  }
 0x281   : > { %3749 = vmatpush2.bf16.msra.mxu1 %v5173_v5  ;;  %4676 = vmatprep.subr.bf16.mxu0 %v5176_v7  ;;  %v5214_v5 = vld [vmem:[%s6154_s16 + $0x600] ss:$20 sps:$4 sm:$0xff]  }
 0x282   : > { %4698 = vmatprep.subr.bf16.mxu1 %v5177_v10  ;;  %v5215_v7 = vld [vmem:[%s6154_s16 + $0x880] ss:$20 sps:$4 sm:$0xff]   ;;  %v5216_v10 = vld [vmem:[%s6154_s16 + $0x718] ss:$20 sps:$4 sm:$0xff]  }
 0x283   : > { %3710 = vmatmul.mubr.bf16.vlgmr.msra.gmra.mxu0 %v6362_v35  ;;  %v3465_v16 = vpop.f32.mrf.mxu0  ;;  %v3506_v20 = vpop.f32.mrf.mxu1 }
 0x284   : > { %3751 = vmatmul.mubr.bf16.vlgmr.msra.gmra.mxu1 %v6359_v34  ;;  %v3466_v38 = vadd.f32 %v3465_v16, %v1745_v11  ;;  %4677 = vmatpush3.bf16.msra.mxu0 %v5178_v12  ;;  %v5219_v11 = vld [vmem:[%s6154_s16 + $0x858] ss:$20 sps:$4 sm:$0xff]   ;;  %v5221_v12 = vld [vmem:[%s6154_s16 + $0x970] ss:$20 sps:$4 sm:$0xff]   ;;  %v5226_v16 = vld [vmem:[%s6154_s16 + $0x588] ss:$20 sps:$4 sm:$0xff]  }
 0x285   : > { %3791 = vmatprep.mubr.bf16.mxu0 %v6265_v59  ;;  %4699 = vmatpush3.bf16.msra.mxu1 %v5179_v13  ;;  %v3467_v22 = vpop.f32.mrf.mxu0  ;;  %v3508_v27 = vpop.f32.mrf.mxu1  ;;  %v5223_v13 = vld [vmem:[%s6154_s16 + $0x830] ss:$20 sps:$4 sm:$0xff]  }
 0x286   : > { %v6525_v41 = vadd.f32 %v3506_v20, %v3466_v38  ;;  %3831 = vmatprep.mubr.bf16.mxu1 %v6270_v63  ;;  %v3468_v26 = vadd.f32 %v3467_v22, %v1749_v14  ;;  %4678 = vmatprep.subr.bf16.mxu0 %v5180_v15  ;;  %v5187_v63 = vld [vmem:[%s6154_s16 + $0x358] ss:$20 sps:$4 sm:$0xff]   ;;  %v5224_v14 = vld [vmem:[%s6154_s16 + $0x6c8] ss:$20 sps:$4 sm:$0xff]   ;;  %v5228_v38 = vld [vmem:[%s6154_s16 + $0x6a0] ss:$20 sps:$4 sm:$0xff]  }
 0x287   : > { %4700 = vmatprep.subr.bf16.mxu1 %v5181_v18  ;;  %v3469_v29 = vpop.f32.mrf.mxu0  ;;  %v3510_v30 = vpop.f32.mrf.mxu1  ;;  %v5225_v15 = vld [vmem:[%s6154_s16 + $0x948] ss:$20 sps:$4 sm:$0xff]   ;;  %v5229_v20 = vld [vmem:[%s6154_s16 + $0x920] ss:$20 sps:$4 sm:$0xff]  }
 0x288   : > { %v6529_v59 = vadd.f32 %v3508_v27, %v3468_v26  ;;  %4679 = vmatpush3.bf16.msra.mxu0 %v5182_v21  ;;  %v5227_v18 = vld [vmem:[%s6154_s16 + $0x808] ss:$20 sps:$4 sm:$0xff]   ;;  %v5230_v21 = vld [vmem:[%s6154_s16 + $0x560] ss:$20 sps:$4 sm:$0xff]   ;;  %v5234_v26 = vld [vmem:[%s6154_s16 + $0x538] ss:$20 sps:$4 sm:$0xff]  }
 0x289   : > { %4701 = vmatpush3.bf16.msra.mxu1 %v5183_v24  ;;  %v3470_v40 = vpop.f32.mrf.mxu0  ;;  %4680 = vmatprep.subr.bf16.mxu0 %v5184_v25  ;;  %v3511_v33 = vpop.f32.mrf.mxu1  ;;  %v5231_v22 = vld [vmem:[%s6154_s16 + $0x7e0] ss:$20 sps:$4 sm:$0xff]   ;;  %v5232_v24 = vld [vmem:[%s6154_s16 + $0x678] ss:$20 sps:$4 sm:$0xff]   ;;  %v5237_v29 = vld [vmem:[%s6154_s16 + $0x8d0] ss:$20 sps:$4 sm:$0xff]  }
 0x28a   : > { %4702 = vmatprep.subr.bf16.mxu1 %v5185_v28  ;;  %v5233_v25 = vld [vmem:[%s6154_s16 + $0x8f8] ss:$20 sps:$4 sm:$0xff]   ;;  %v5236_v28 = vld [vmem:[%s6154_s16 + $0x650] ss:$20 sps:$4 sm:$0xff]  }
 0x28b   : > { %v5235_v27 = vld [vmem:[%s6154_s16 + $0x7b8] ss:$20 sps:$4 sm:$0xff]   ;;  %v5238_v30 = vld [vmem:[%s6154_s16 + $0x510] ss:$20 sps:$4 sm:$0xff]  }
 0x28c   : > { %4681 = vmatpush3.bf16.msra.mxu0 %v5186_v31  ;;  %v5239_v31 = vld [vmem:[%s6154_s16 + $0x790] ss:$20 sps:$4 sm:$0xff]  }
 0x28d   : > { %4703 = vmatpush3.bf16.msra.mxu1 %v5187_v63  ;;  %4682 = vmatprep.subr.bf16.mxu0 %v5188_v32 }
 0x28e   : > { %4704 = vmatprep.subr.bf16.mxu1 %v5189_v9 }
 0x290   : > { %4683 = vmatpush3.bf16.msra.mxu0 %v5190_v6 }
 0x291   : > { %4705 = vmatpush3.bf16.msra.mxu1 %v5191_v36  ;;  %4684 = vmatprep.subr.bf16.mxu0 %v5192_v43 }
 0x292   : > { %4706 = vmatprep.subr.bf16.mxu1 %v5193_v44 }
 0x294   : > { %4685 = vmatpush3.bf16.msra.mxu0 %v5194_v45 }
 0x295   : > { %4707 = vmatpush3.bf16.msra.mxu1 %v5195_v46  ;;  %4686 = vmatprep.subr.bf16.mxu0 %v5196_v47 }
 0x296   : > { %4708 = vmatprep.subr.bf16.mxu1 %v5197_v48 }
 0x298   : > { %4687 = vmatpush3.bf16.msra.mxu0 %v5198_v49 }
 0x299   : > { %4709 = vmatpush3.bf16.msra.mxu1 %v5199_v50  ;;  %4688 = vmatprep.subr.bf16.mxu0 %v5200_v51 }
 0x29a   : > { %4710 = vmatprep.subr.bf16.mxu1 %v5201_v52 }
 0x29c   : > { %4689 = vmatpush3.bf16.msra.mxu0 %v5202_v53 }
 0x29d   : > { %4711 = vmatpush3.bf16.msra.mxu1 %v5203_v54  ;;  %4690 = vmatprep.subr.bf16.mxu0 %v5204_v55  ;;  %v1757_v54 = vrot.slane %v6506_v8, %v1074_v42 }
 0x29e   : > { %4712 = vmatprep.subr.bf16.mxu1 %v5205_v56 }
 0x2a0   : > { %4691 = vmatpush3.bf16.msra.mxu0 %v5206_v57 }
 0x2a1   : > { %4713 = vmatpush3.bf16.msra.mxu1 %v5207_v60  ;;  %4720 = vmatprep.subr.bf16.mxu0 %v5208_v61 }
 0x2a2   : > { %4742 = vmatprep.subr.bf16.mxu1 %v5209_v0 }
 0x2a3   : > { %3792 = vmatmul.mubr.bf16.vlgmr.msra.gmra.mxu0 %v6268_v62  ;;  %v5217_v62 = vld [vmem:[%s6154_s16 + $0x998] ss:$20 sps:$4 sm:$0xff]  }
 0x2a4   : > { %3832 = vmatmul.mubr.bf16.vlgmr.msra.gmra.mxu1 %v6263_v58  ;;  %4721 = vmatpush3.bf16.msra.mxu0 %v5210_v1  ;;  %v5218_v58 = vld [vmem:[%s6154_s16 + $0x5d8] ss:$20 sps:$4 sm:$0xff]  }
 0x2a5   : > { %3871 = vmatprep.mubr.bf16.mxu0 %v6290_v19  ;;  %4743 = vmatpush3.bf16.msra.mxu1 %v5211_v2  ;;  %v5220_v19 = vld [vmem:[%s6154_s16 + $0x6f0] ss:$20 sps:$4 sm:$0xff]  }
 0x2a6   : > { %3911 = vmatprep.mubr.bf16.mxu1 %v6294_v23  ;;  %4722 = vmatprep.subr.bf16.mxu0 %v5212_v3  ;;  %v5222_v23 = vld [vmem:[%s6154_s16 + $0x5b0] ss:$20 sps:$4 sm:$0xff]  }
 0x2a7   : > { %4744 = vmatprep.subr.bf16.mxu1 %v5213_v4 }
 0x2a8   : > { %4723 = vmatpush3.bf16.msra.mxu0 %v5214_v5 }
 0x2a9   : > { %4745 = vmatpush3.bf16.msra.mxu1 %v5215_v7  ;;  %4724 = vmatprep.subr.bf16.mxu0 %v5216_v10 }
 0x2aa   : > { %4746 = vmatprep.subr.bf16.mxu1 %v5217_v62 }
 0x2ac   : > { %4725 = vmatpush3.bf16.msra.mxu0 %v5218_v58 }
 0x2ad   : > { %4747 = vmatpush3.bf16.msra.mxu1 %v5219_v11  ;;  %4726 = vmatprep.subr.bf16.mxu0 %v5220_v19 }
 0x2ae   : > { %4748 = vmatprep.subr.bf16.mxu1 %v5221_v12 }
 0x2b0   : > { %4727 = vmatpush3.bf16.msra.mxu0 %v5222_v23 }
 0x2b1   : > { %4749 = vmatpush3.bf16.msra.mxu1 %v5223_v13  ;;  %4728 = vmatprep.subr.bf16.mxu0 %v5224_v14 }
 0x2b2   : > { %4750 = vmatprep.subr.bf16.mxu1 %v5225_v15 }
 0x2b4   : > { %4729 = vmatpush3.bf16.msra.mxu0 %v5226_v16 }
 0x2b5   : > { %4751 = vmatpush3.bf16.msra.mxu1 %v5227_v18  ;;  %4730 = vmatprep.subr.bf16.mxu0 %v5228_v38  ;;  %v5275_v38 = vmov 1966171168  }
 0x2b6   : > { %4752 = vmatprep.subr.bf16.mxu1 %v5229_v20  ;;  %v3957_v20 = vunpack.c.l.s4 %v5275_v38 }
 0x2b8   : > { %4731 = vmatpush3.bf16.msra.mxu0 %v5230_v21 }
 0x2b9   : > { %4753 = vmatpush3.bf16.msra.mxu1 %v5231_v22  ;;  %4732 = vmatprep.subr.bf16.mxu0 %v5232_v24  ;;  %v3958_v22 = vunpack.c.0.s8 %v3957_v20 }
 0x2ba   : > { %4754 = vmatprep.subr.bf16.mxu1 %v5233_v25 }
 0x2bc   : > { %4733 = vmatpush3.bf16.msra.mxu0 %v5234_v26 }
 0x2bd   : > { %4755 = vmatpush3.bf16.msra.mxu1 %v5235_v27  ;;  %4734 = vmatprep.subr.bf16.mxu0 %v5236_v28  ;;  %v3961_v27 = vsub.s32 %v3958_v22, %v6238_v37 }
 0x2be   : > { %4756 = vmatprep.subr.bf16.mxu1 %v5237_v29 }
 0x2c0   : > { %4735 = vmatpush3.bf16.msra.mxu0 %v5238_v30 }
 0x2c1   : > { %4757 = vmatpush3.bf16.msra.mxu1 %v5239_v31 }
 0x2c3   : > { %v3547_v40 = vpop.f32.mrf.mxu0  ;;  %3872 = vmatmul.mubr.bf16.vlgmr.msra.gmra.mxu0 %v6362_v35  ;;  %v3588_v32 = vpop.f32.mrf.mxu1 }
 0x2c4   : > { %v3548_v63 = vadd.f32 %v3547_v40, %v6525_v41  ;;  %3912 = vmatmul.mubr.bf16.vlgmr.msra.gmra.mxu1 %v6359_v34 }
 0x2c5   : > { %v3549_v33 = vpop.f32.mrf.mxu0  ;;  %v3590_v36 = vpop.f32.mrf.mxu1 }
 0x2c6   : > { %v3589_v9 = vadd.f32 %v3588_v32, %v3548_v63  ;;  %v3550_v6 = vadd.f32 %v3549_v33, %v6529_v59  ;;  %v1753_v59 = vrot.slane %v6506_v8, %v1070_v39 }
 0x2c7   : > { %v3551_v43 = vpop.f32.mrf.mxu0  ;;  %v3592_v46 = vpop.f32.mrf.mxu1 }
 0x2c8   : > { %v3924_v44 = vmul.f32 1.442695, %v3589_v9  ;;  %v3591_v45 = vadd.f32 %v3590_v36, %v3550_v6  ;;  %vm3919_vm1 = vcmp.gt.f32.partialorder %v3589_v9, 0.0  ;;  %v1761_v46 = vrot.slane %v6506_v8, %v1078_v17 }
 0x2c9   : > { %v3552_v47 = vpop.f32.mrf.mxu0  ;;  %v3593_v49 = vpop.f32.mrf.mxu1 }
 0x2ca   : > { %5240 = vpow2.f32 %v3924_v44  ;;  %v3926_v48 = vmul.f32 1.442695, %v3591_v45  ;;  %vm3920_vm2 = vcmp.gt.f32.partialorder %v3591_v45, 0.0 }
 0x2cc   : > { %5242 = vpow2.f32 %v3926_v48 }
 0x2d7   : > { %v5241_v35 = vpop.eup %5240 }
 0x2d8   : > { %v4666_v50 = vadd.f32 -1.0, %v5241_v35 }
 0x2d9   : > { %v5243_v41 = vpop.eup %5242 }
 0x2da   : > { %v4667_v51 = vadd.f32 -1.0, %v5243_v41  ;;  %v3939_v34 = vsel %vm3919_vm1, %v3589_v9, %v4666_v50 }
 0x2dc   : > { %v3940_v52 = vsel %vm3920_vm2, %v3591_v45, %v4667_v51 }
 0x2dd   : > { %v4671_v53 = vpack.c.bf16 %v3940_v52, %v3939_v34 }
 0x2df   : > { %v3962_v31 = vrot.slane %v4671_v53, %v3961_v27 }
 0x303   : > { %v3629_v55 = vpop.f32.mrf.mxu0 }
 0x304   : > { %v3630_v56 = vadd.f32 %v3629_v55, %v1753_v59  ;;  %v3670_v57 = vpop.f32.mrf.mxu1 }
 0x305   : > { %v3631_v60 = vpop.f32.mrf.mxu0 }
 0x306   : > { %v3671_v61 = vadd.f32 %v3670_v57, %v3630_v56  ;;  %v3632_v0 = vadd.f32 %v3631_v60, %v1757_v54  ;;  %v3672_v1 = vpop.f32.mrf.mxu1 }
 0x307   : > { %v3633_v2 = vpop.f32.mrf.mxu0 }
 0x308   : > { %v3673_v3 = vadd.f32 %v3672_v1, %v3632_v0  ;;  %v3674_v4 = vpop.f32.mrf.mxu1 }
 0x309   : > { %v3634_v5 = vpop.f32.mrf.mxu0 }
 0x30a   : > { %v3675_v7 = vpop.f32.mrf.mxu1 }
 0x343   : > { %v3711_v10 = vpop.f32.mrf.mxu0 }
 0x344   : > { %v3712_v62 = vadd.f32 %v3711_v10, %v3671_v61  ;;  %v3752_v58 = vpop.f32.mrf.mxu1 }
 0x345   : > { %v3713_v39 = vpop.f32.mrf.mxu0 }
 0x346   : > { %v3753_v11 = vadd.f32 %v3752_v58, %v3712_v62  ;;  %v3714_v19 = vadd.f32 %v3713_v39, %v3673_v3  ;;  %v3754_v12 = vpop.f32.mrf.mxu1 }
 0x347   : > { %v3715_v42 = vpop.f32.mrf.mxu0 }
 0x348   : > { %v3928_v23 = vmul.f32 1.442695, %v3753_v11  ;;  %v3755_v13 = vadd.f32 %v3754_v12, %v3714_v19  ;;  %v3756_v14 = vpop.f32.mrf.mxu1  ;;  %vm3921_vm3 = vcmp.gt.f32.partialorder %v3753_v11, 0.0 }
 0x349   : > { %v3716_v15 = vpop.f32.mrf.mxu0 }
 0x34a   : > { %5244 = vpow2.f32 %v3928_v23  ;;  %v3930_v16 = vmul.f32 1.442695, %v3755_v13  ;;  %v3757_v18 = vpop.f32.mrf.mxu1  ;;  %vm3922_vm4 = vcmp.gt.f32.partialorder %v3755_v13, 0.0 }
 0x34c   : > { %5246 = vpow2.f32 %v3930_v16 }
 0x357   : > { %v5245_v21 = vpop.eup %5244 }
 0x358   : > { %v4668_v24 = vadd.f32 -1.0, %v5245_v21 }
 0x359   : > { %v5247_v25 = vpop.eup %5246 }
 0x35a   : > { %v4669_v26 = vadd.f32 -1.0, %v5247_v25  ;;  %v3941_v28 = vsel %vm3921_vm3, %v3753_v11, %v4668_v24 }
 0x35c   : > { %v3942_v29 = vsel %vm3922_vm4, %v3755_v13, %v4669_v26 }
 0x35d   : > { %v4672_v30 = vpack.c.bf16 %v3942_v29, %v3941_v28 }
 0x35f   : > { %v3969_v40 = vrot.slane %v4672_v30, %v3961_v27 }
 0x361   : > { %v3977_v63 = vcombine.low %v3962_v31, %v3969_v40 }
 0x363   : > { %v4692_v32 = vpop.f32.mrf.mxu0  ;;  %v3984_v2 = vrot.slane %v3977_v63, %v3961_v27 }
 0x364   : > { %v4714_v33 = vpop.f32.mrf.mxu1 }
 0x365   : > { %v4693_v9 = vpop.f32.mrf.mxu0 }
 0x366   : > { %v4715_v6 = vpop.f32.mrf.mxu1  ;;  %v4694_v47 = vadd.f32 %v4693_v9, %v4692_v32 }
 0x367   : > { %v4695_v36 = vpop.f32.mrf.mxu0  ;;  %v4716_v35 = vadd.f32 %v4715_v6, %v4714_v33 }
 0x368   : > { %v4717_v43 = vpop.f32.mrf.mxu1  ;;  %v3794_v48 = vadd.f32 %v4694_v47, %v1761_v46 }
 0x369   : > { %v4696_v44 = vpop.f32.mrf.mxu0 }
 0x36a   : > { %v4718_v45 = vpop.f32.mrf.mxu1  ;;  %v3834_v51 = vadd.f32 %v4716_v35, %v3794_v48 }
 0x383   : > { %v4736_v49 = vpop.f32.mrf.mxu0 }
 0x384   : > { %v4758_v50 = vpop.f32.mrf.mxu1 }
 0x385   : > { %v4737_v41 = vpop.f32.mrf.mxu0 }
 0x386   : > { %v4738_v34 = vadd.f32 %v4737_v41, %v4736_v49  ;;  %v4759_v52 = vpop.f32.mrf.mxu1 }
 0x387   : > { %v4739_v53 = vpop.f32.mrf.mxu0  ;;  %v4760_v54 = vadd.f32 %v4759_v52, %v4758_v50 }
 0x388   : > { %v3874_v59 = vadd.f32 %v4738_v34, %v3834_v51  ;;  %v4761_v55 = vpop.f32.mrf.mxu1 }
 0x389   : > { %v4740_v56 = vpop.f32.mrf.mxu0 }
 0x38a   : > { %v3914_v57 = vadd.f32 %v4760_v54, %v3874_v59  ;;  %v4762_v60 = vpop.f32.mrf.mxu1 }
 0x38c   : > { %v3932_v37 = vmul.f32 1.442695, %v3914_v57  ;;  %vm3923_vm5 = vcmp.gt.f32.partialorder %v3914_v57, 0.0 }
 0x38e   : > { %5248 = vpow2.f32 %v3932_v37 }
 0x39b   : > { %v5249_v17 = vpop.eup %5248 }
 0x39c   : > { %v4670_v8 = vadd.f32 -1.0, %v5249_v17 }
 0x39e   : > { %v3943_v61 = vsel %vm3923_vm5, %v3914_v57, %v4670_v8 }
 0x39f   : > { %v3948_v0 = vpack.c.bf16 %v3943_v61, %v3943_v61 }
 0x3a1   : > { %v3976_v1 = vrot.slane %v3948_v0, %v3961_v27 }
 0x3a3   : > { %v3991_v3 = vrot.slane %v3976_v1, %v3961_v27 }
 0x3a5   : > { %v3992_v4 = vcombine.low %v3984_v2, %v3991_v3 }
 0x3a7   : > { %3994 = vst [vmem:[%s1038_s11] sm:$0x1f] %v3992_v4 }
 0x3a8 PF: > { %p12_p9 = scmp.ge.s32.totalorder %s5323_s22, 7   ;;  %s6623_s18 = smov %s5268_s19 }
 0x3a9   : > { %s6624_s19 = smov %s5332_s25  ;;  %s6625_s20 = smov %s5323_s22 }
 0x3aa   :  { %14 = sbr.rel (!%p12_p9) target bundleno = 2 (0x2), region = 110 }

// kernel: conv_decoder_cat_forward.5
= control target key start
LH: loop header
LB: loop body
LE: loop exit
PB: predicated region body
PF: predicated region fallthrough
CT: control target
= control target key end

     0   :  { %s2747_s12 = smov 0   ;;  %s2749_s13 = smov 0   ;;  %s3431_s0 = inlined_call_operand.vmem [shape: bf16[98,1152], index: 0, kind: input, shape index: {}]   ;;  %s3432_s1 = inlined_call_operand.vmem [shape: bf16[1152,256], index: 1, kind: input, shape index: {}]   ;;  %s3433_s2 = inlined_call_operand.vmem [shape: f32[1,256], index: 2, kind: input, shape index: {}]   ;;  %s3434_s3 = inlined_call_operand.vmem [shape: bf16[98,256], index: 3, kind: output, shape index: {}]  }
   0x1   :  { %s2751_s14 = smov 0  }
   0x2 LB: > { %s2760_s15 = sadd.s32 4294967295, %s2692_s14   ;;  %s2762_s16 = sadd.s32 1, %s2692_s14   ;;  %s2692_s14 = sphi %s2751_s14, %s3441_s14   ;;  %s2688_s13 = sphi %s2749_s13, %s3440_s13   ;;  %s2684_s12 = sphi %s2747_s12, %s3439_s12  }
   0x3   : > { %s85_s17 = ssub.s32 %s2692_s14, %s2762_s16  ;;  %s88_s18 = sadd.s32 1, %s2688_s13 }
   0x4   : > { %p86_p0 = scmp.eq.s32.totalorder %s85_s17, 0  ;;  %p98_p1 = scmp.ne.s32.totalorder %s2688_s13, %s2684_s12 }
   0x5   : > { %p99_p2 = scmp.eq.s32.totalorder %s2760_s15, 1  ;;  %p2006_p3 = scmp.ge.s32.totalorder %s2692_s14, 1 }
   0x6   : > { %s2770_s19 = scalar_select %p86_p0, %s2688_s13, %s88_s18  }
   0x7   : > { %p2772_p4 = por %p99_p2, %p98_p1  ;;  %p149_p5 = scmp.lt.s32.totalorder %s2692_s14, 3 }
   0x9   : > { %p150_p6 = pnand %p2006_p3, %p149_p5 }
   0xa   : > { %s2864_s10 = smul.u32 (!%p150_p6), 7, %s2760_s15 }
   0xb   : > { %153 = sbr.rel (%p150_p6) target bundleno = 461 (0x1cd), region = 32 }
   0xc   : > { %p184_p7 = scmp.lt.s32.totalorder (!%p150_p6), %s2864_s10, 12 }
  0x10   : > { %v2342_v0 = vld [vmem:[%s3432_s1 + $0x74] ss:$8 sps:$4 sm:$0xff]   ;;  %v2346_v2 = vld [vmem:[%s3432_s1 + $0x70] ss:$8 sps:$4 sm:$0xff]   ;;  %v2348_v4 = vld [vmem:[%s3432_s1 + $0x64] ss:$8 sps:$4 sm:$0xff]  }
  0x11   : > { %v2344_v1 = vld [vmem:[%s3432_s1 + $0x174] ss:$8 sps:$4 sm:$0xff]   ;;  %1283 = vmatprep.subr.bf16.mxu0 %v2342_v0  ;;  %v2347_v3 = vld [vmem:[%s3432_s1 + $0x170] ss:$8 sps:$4 sm:$0xff]   ;;  %v2350_v5 = vld [vmem:[%s3432_s1 + $0x164] ss:$8 sps:$4 sm:$0xff]  }
  0x12   : > { %1354 = vmatprep.subr.bf16.mxu1 %v2344_v1  ;;  %1284 = vmatpush1.bf16.msra.mxu0 %v2346_v2  ;;  %v2352_v6 = vld [vmem:[%s3432_s1 + $0x60] ss:$8 sps:$4 sm:$0xff]   ;;  %v2354_v8 = vld [vmem:[%s3432_s1 + $0x54] ss:$8 sps:$4 sm:$0xff]   ;;  %v2358_v10 = vld [vmem:[%s3432_s1 + $0x50] ss:$8 sps:$4 sm:$0xff]  }
  0x13   : > { %1355 = vmatpush1.bf16.msra.mxu1 %v2347_v3  ;;  %1285 = vmatprep.subr.bf16.mxu0 %v2348_v4  ;;  %v2353_v7 = vld [vmem:[%s3432_s1 + $0x160] ss:$8 sps:$4 sm:$0xff]   ;;  %v2356_v9 = vld [vmem:[%s3432_s1 + $0x154] ss:$8 sps:$4 sm:$0xff]   ;;  %v2359_v11 = vld [vmem:[%s3432_s1 + $0x150] ss:$8 sps:$4 sm:$0xff]  }
  0x14   : > { %1356 = vmatprep.subr.bf16.mxu1 %v2350_v5  ;;  %v2360_v12 = vld [vmem:[%s3432_s1 + $0x44] ss:$8 sps:$4 sm:$0xff]   ;;  %v2364_v14 = vld [vmem:[%s3432_s1 + $0x40] ss:$8 sps:$4 sm:$0xff]   ;;  %v2366_v16 = vld [vmem:[%s3432_s1 + $0x34] ss:$8 sps:$4 sm:$0xff]  }
  0x15   : > { %v2362_v13 = vld [vmem:[%s3432_s1 + $0x144] ss:$8 sps:$4 sm:$0xff]   ;;  %v2365_v15 = vld [vmem:[%s3432_s1 + $0x140] ss:$8 sps:$4 sm:$0xff]   ;;  %v2368_v17 = vld [vmem:[%s3432_s1 + $0x134] ss:$8 sps:$4 sm:$0xff]  }
  0x16   : > { %1286 = vmatpush1.bf16.msra.mxu0 %v2352_v6  ;;  %v2370_v18 = vld [vmem:[%s3432_s1 + $0x30] ss:$8 sps:$4 sm:$0xff]   ;;  %v2372_v20 = vld [vmem:[%s3432_s1 + $0x24] ss:$8 sps:$4 sm:$0xff]   ;;  %v2376_v22 = vld [vmem:[%s3432_s1 + $0x20] ss:$8 sps:$4 sm:$0xff]  }
  0x17   : > { %1357 = vmatpush1.bf16.msra.mxu1 %v2353_v7  ;;  %1287 = vmatprep.subr.bf16.mxu0 %v2354_v8  ;;  %v2371_v19 = vld [vmem:[%s3432_s1 + $0x130] ss:$8 sps:$4 sm:$0xff]   ;;  %v2374_v21 = vld [vmem:[%s3432_s1 + $0x124] ss:$8 sps:$4 sm:$0xff]   ;;  %v2377_v23 = vld [vmem:[%s3432_s1 + $0x120] ss:$8 sps:$4 sm:$0xff]  }
  0x18   : > { %1358 = vmatprep.subr.bf16.mxu1 %v2356_v9  ;;  %v2378_v24 = vld [vmem:[%s3432_s1 + $0x14] ss:$8 sps:$4 sm:$0xff]   ;;  %v2382_v26 = vld [vmem:[%s3432_s1 + $0x10] ss:$8 sps:$4 sm:$0xff]   ;;  %v2384_v28 = vld [vmem:[%s3432_s1 + $0x4] ss:$8 sps:$4 sm:$0xff]  }
  0x19   : > { %v2380_v25 = vld [vmem:[%s3432_s1 + $0x114] ss:$8 sps:$4 sm:$0xff]   ;;  %v2383_v27 = vld [vmem:[%s3432_s1 + $0x110] ss:$8 sps:$4 sm:$0xff]   ;;  %v2386_v29 = vld [vmem:[%s3432_s1 + $0x104] ss:$8 sps:$4 sm:$0xff]  }
  0x1a   : > { %1288 = vmatpush1.bf16.msra.mxu0 %v2358_v10  ;;  %v2388_v30 = vld [vmem:[%s3432_s1] ss:$8 sps:$4 sm:$0xff]   ;;  %v2390_v32 = vld [vmem:[%s3432_s1 + $0xf4] ss:$8 sps:$4 sm:$0xff]   ;;  %v2394_v34 = vld [vmem:[%s3432_s1 + $0xf0] ss:$8 sps:$4 sm:$0xff]  }
  0x1b   : > { %1359 = vmatpush1.bf16.msra.mxu1 %v2359_v11  ;;  %1289 = vmatprep.subr.bf16.mxu0 %v2360_v12  ;;  %v2389_v31 = vld [vmem:[%s3432_s1 + $0x100] ss:$8 sps:$4 sm:$0xff]   ;;  %v2392_v33 = vld [vmem:[%s3432_s1 + $0x1f4] ss:$8 sps:$4 sm:$0xff]   ;;  %v2395_v35 = vld [vmem:[%s3432_s1 + $0x1f0] ss:$8 sps:$4 sm:$0xff]  }
  0x1c   : > { %1360 = vmatprep.subr.bf16.mxu1 %v2362_v13  ;;  %v2396_v36 = vld [vmem:[%s3432_s1 + $0xe4] ss:$8 sps:$4 sm:$0xff]   ;;  %s185_s6 = scalar_select %p184_p7, %s2864_s10, 12  ;;  %v2400_v38 = vld [vmem:[%s3432_s1 + $0xe0] ss:$8 sps:$4 sm:$0xff]  }
  0x1d   : > { %v2398_v37 = vld [vmem:[%s3432_s1 + $0x1e4] ss:$8 sps:$4 sm:$0xff]   ;;  %v2401_v39 = vld [vmem:[%s3432_s1 + $0x1e0] ss:$8 sps:$4 sm:$0xff]   ;;  %v2402_v40 = vld [vmem:[%s3432_s1 + $0xd4] ss:$8 sps:$4 sm:$0xff]  }
  0x1e   : > { %1290 = vmatpush1.bf16.msra.mxu0 %v2364_v14  ;;  %s2251_s22 = smul.u32 36, %s185_s6  ;;  %v2404_v41 = vld [vmem:[%s3432_s1 + $0x1d4] ss:$8 sps:$4 sm:$0xff]   ;;  %v2406_v42 = vld [vmem:[%s3432_s1 + $0xd0] ss:$8 sps:$4 sm:$0xff]   ;;  %s1767_s25 = ssub.s32 (%p2772_p4), 13, %s2864_s10 }
  0x1f   : > { %1361 = vmatpush1.bf16.msra.mxu1 %v2365_v15  ;;  %1291 = vmatprep.subr.bf16.mxu0 %v2366_v16  ;;  %v2407_v43 = vld [vmem:[%s3432_s1 + $0x1d0] ss:$8 sps:$4 sm:$0xff]   ;;  %v2408_v44 = vld [vmem:[%s3432_s1 + $0xc4] ss:$8 sps:$4 sm:$0xff]   ;;  %v2412_v46 = vld [vmem:[%s3432_s1 + $0xc0] ss:$8 sps:$4 sm:$0xff]  }
  0x20   : > { %1362 = vmatprep.subr.bf16.mxu1 %v2368_v17  ;;  %s2919_s6 = scalar_lea.vmem %s3431_s0, %s2251_s22  ;;  %v2410_v45 = vld [vmem:[%s3432_s1 + $0x1c4] ss:$8 sps:$4 sm:$0xff]   ;;  %v2413_v47 = vld [vmem:[%s3432_s1 + $0x1c0] ss:$8 sps:$4 sm:$0xff]   ;;  %v2414_v48 = vld [vmem:[%s3432_s1 + $0xb4] ss:$8 sps:$4 sm:$0xff]  }
  0x21   : > { %v2440_v49 = vld [vmem:[%s2919_s6 + $0x4] ss:$36 sps:$4 sm:$0xff]   ;;  %v2416_v50 = vld [vmem:[%s3432_s1 + $0x1b4] ss:$8 sps:$4 sm:$0xff]   ;;  %v2443_v51 = vld [vmem:[%s2919_s6 + $0xc] ss:$36 sps:$4 sm:$0xff]  }
  0x22   : > { %1292 = vmatpush1.bf16.msra.mxu0 %v2370_v18  ;;  %1315 = vmatprep.mubr.bf16.mxu0 %v2440_v49  ;;  %v2418_v52 = vld [vmem:[%s3432_s1 + $0xb0] ss:$8 sps:$4 sm:$0xff]   ;;  %v2420_v54 = vld [vmem:[%s3432_s1 + $0xa4] ss:$8 sps:$4 sm:$0xff]   ;;  %v2424_v56 = vld [vmem:[%s3432_s1 + $0xa0] ss:$8 sps:$4 sm:$0xff]  }
  0x23   : > { %1363 = vmatpush1.bf16.msra.mxu1 %v2371_v19  ;;  %1293 = vmatprep.subr.bf16.mxu0 %v2372_v20  ;;  %v2419_v53 = vld [vmem:[%s3432_s1 + $0x1b0] ss:$8 sps:$4 sm:$0xff]   ;;  %v2422_v55 = vld [vmem:[%s3432_s1 + $0x1a4] ss:$8 sps:$4 sm:$0xff]   ;;  %v2425_v57 = vld [vmem:[%s3432_s1 + $0x1a0] ss:$8 sps:$4 sm:$0xff]  }
  0x24   : > { %1364 = vmatprep.subr.bf16.mxu1 %v2374_v21  ;;  %1386 = vmatprep.mubr.bf16.mxu1 %v2443_v51  ;;  %v2426_v58 = vld [vmem:[%s3432_s1 + $0x94] ss:$8 sps:$4 sm:$0xff]   ;;  %v2430_v60 = vld [vmem:[%s3432_s1 + $0x90] ss:$8 sps:$4 sm:$0xff]   ;;  %v2432_v62 = vld [vmem:[%s3432_s1 + $0x84] ss:$8 sps:$4 sm:$0xff]  }
  0x25   : > { %v2428_v59 = vld [vmem:[%s3432_s1 + $0x194] ss:$8 sps:$4 sm:$0xff]   ;;  %v2431_v61 = vld [vmem:[%s3432_s1 + $0x190] ss:$8 sps:$4 sm:$0xff]   ;;  %v2434_v63 = vld [vmem:[%s3432_s1 + $0x184] ss:$8 sps:$4 sm:$0xff]  }
  0x26   : > { %1294 = vmatpush1.bf16.msra.mxu0 %v2376_v22  ;;  %v2436_v0 = vld [vmem:[%s3432_s1 + $0x80] ss:$8 sps:$4 sm:$0xff]   ;;  %v2446_v2 = vld [vmem:[%s3432_s1 + $0x274] ss:$8 sps:$4 sm:$0xff]   ;;  %v2444_v6 = vld [vmem:[%s3432_s1 + $0x270] ss:$8 sps:$4 sm:$0xff]  }
  0x27   : > { %1365 = vmatpush1.bf16.msra.mxu1 %v2377_v23  ;;  %1295 = vmatprep.subr.bf16.mxu0 %v2378_v24  ;;  %v2437_v1 = vld [vmem:[%s3432_s1 + $0x180] ss:$8 sps:$4 sm:$0xff]   ;;  %v2449_v3 = vld [vmem:[%s3432_s1 + $0x374] ss:$8 sps:$4 sm:$0xff]   ;;  %v2447_v7 = vld [vmem:[%s3432_s1 + $0x370] ss:$8 sps:$4 sm:$0xff]  }
  0x28   : > { %1366 = vmatprep.subr.bf16.mxu1 %v2380_v25  ;;  %v2438_v4 = vld [vmem:[%s2919_s6] ss:$36 sps:$4 sm:$0xff]   ;;  %v2441_v5 = vld [vmem:[%s2919_s6 + $0x8] ss:$36 sps:$4 sm:$0xff]   ;;  %v2458_v12 = vld [vmem:[%s3432_s1 + $0x254] ss:$8 sps:$4 sm:$0xff]  }
  0x29   : > { %v2452_v8 = vld [vmem:[%s3432_s1 + $0x264] ss:$8 sps:$4 sm:$0xff]   ;;  %v2450_v10 = vld [vmem:[%s3432_s1 + $0x260] ss:$8 sps:$4 sm:$0xff]   ;;  %v2461_v13 = vld [vmem:[%s3432_s1 + $0x354] ss:$8 sps:$4 sm:$0xff]  }
  0x2a   : > { %1296 = vmatpush1.bf16.msra.mxu0 %v2382_v26  ;;  %v2455_v9 = vld [vmem:[%s3432_s1 + $0x364] ss:$8 sps:$4 sm:$0xff]   ;;  %v2453_v11 = vld [vmem:[%s3432_s1 + $0x360] ss:$8 sps:$4 sm:$0xff]   ;;  %v2456_v14 = vld [vmem:[%s3432_s1 + $0x250] ss:$8 sps:$4 sm:$0xff]  }
  0x2b   : > { %1367 = vmatpush1.bf16.msra.mxu1 %v2383_v27  ;;  %1297 = vmatprep.subr.bf16.mxu0 %v2384_v28  ;;  %v2498_v15 = vld [vmem:[%s2919_s6 + $0x4c] ss:$36 sps:$4 sm:$0xff]   ;;  %v2501_v17 = vld [vmem:[%s2919_s6 + $0x54] ss:$36 sps:$4 sm:$0xff]   ;;  %v2462_v22 = vld [vmem:[%s3432_s1 + $0x240] ss:$8 sps:$4 sm:$0xff]  }
  0x2c   : > { %1368 = vmatprep.subr.bf16.mxu1 %v2386_v29  ;;  %v2500_v16 = vld [vmem:[%s2919_s6 + $0x48] ss:$36 sps:$4 sm:$0xff]   ;;  %v2459_v18 = vld [vmem:[%s3432_s1 + $0x350] ss:$8 sps:$4 sm:$0xff]   ;;  %v2470_v24 = vld [vmem:[%s3432_s1 + $0x234] ss:$8 sps:$4 sm:$0xff]  }
  0x2d   : > { %v2464_v19 = vld [vmem:[%s3432_s1 + $0x244] ss:$8 sps:$4 sm:$0xff]   ;;  %v2509_v21 = vld [vmem:[%s2919_s6 + $0x50] ss:$36 sps:$4 sm:$0xff]   ;;  %v2465_v23 = vld [vmem:[%s3432_s1 + $0x340] ss:$8 sps:$4 sm:$0xff]  }
  0x2e   : > { %1298 = vmatpush1.bf16.msra.mxu0 %v2388_v30  ;;  %v2467_v20 = vld [vmem:[%s3432_s1 + $0x344] ss:$8 sps:$4 sm:$0xff]   ;;  %v2473_v25 = vld [vmem:[%s3432_s1 + $0x334] ss:$8 sps:$4 sm:$0xff]   ;;  %v2468_v26 = vld [vmem:[%s3432_s1 + $0x230] ss:$8 sps:$4 sm:$0xff]  }
  0x2f   : > { %1369 = vmatpush1.bf16.msra.mxu1 %v2389_v31  ;;  %1299 = vmatprep.subr.bf16.mxu0 %v2390_v32  ;;  %v2516_v27 = vld [vmem:[%s2919_s6 + $0x94] ss:$36 sps:$4 sm:$0xff]   ;;  %v2519_v29 = vld [vmem:[%s2919_s6 + $0x9c] ss:$36 sps:$4 sm:$0xff]   ;;  %v2476_v31 = vld [vmem:[%s3432_s1 + $0x224] ss:$8 sps:$4 sm:$0xff]  }
  0x30   : > { %1370 = vmatprep.subr.bf16.mxu1 %v2392_v33  ;;  %v2518_v28 = vld [vmem:[%s2919_s6 + $0x90] ss:$36 sps:$4 sm:$0xff]   ;;  %v2479_v32 = vld [vmem:[%s3432_s1 + $0x324] ss:$8 sps:$4 sm:$0xff]   ;;  %v2527_v33 = vld [vmem:[%s2919_s6 + $0x98] ss:$36 sps:$4 sm:$0xff]  }
  0x31   : > { %v2471_v30 = vld [vmem:[%s3432_s1 + $0x330] ss:$8 sps:$4 sm:$0xff]   ;;  %v2489_v49 = vld [vmem:[%s3432_s1 + $0x300] ss:$8 sps:$4 sm:$0xff]   ;;  %v2497_v51 = vld [vmem:[%s3432_s1 + $0x3f4] ss:$8 sps:$4 sm:$0xff]  }
  0x32   : > { %1300 = vmatpush2.bf16.msra.mxu0 %v2394_v34  ;;  %v2474_v34 = vld [vmem:[%s3432_s1 + $0x220] ss:$8 sps:$4 sm:$0xff]   ;;  %s2233_s26 = smul.u32 (%p2772_p4), 56, %s2760_s15  ;;  %p1768_p8 = scmp.lt.s32.totalorder (%p2772_p4), %s1767_s25, 7 }
  0x33   : > { %1371 = vmatpush2.bf16.msra.mxu1 %v2395_v35  ;;  %1301 = vmatprep.subr.bf16.mxu0 %v2396_v36  ;;  %v2477_v35 = vld [vmem:[%s3432_s1 + $0x320] ss:$8 sps:$4 sm:$0xff]   ;;  %v2482_v36 = vld [vmem:[%s3432_s1 + $0x214] ss:$8 sps:$4 sm:$0xff]  }
  0x34   : > { %1372 = vmatprep.subr.bf16.mxu1 %v2398_v37  ;;  %v2485_v37 = vld [vmem:[%s3432_s1 + $0x314] ss:$8 sps:$4 sm:$0xff]   ;;  %s3382_s29 = scalar_lea.vmem (%p2772_p4), %s3434_s3, %s2233_s26  }
  0x36   : > { %1302 = vmatpush2.bf16.msra.mxu0 %v2400_v38  ;;  %v232_v38 = vld [vmem:[%s2919_s6 + $0xd8] sm:$0xff] }
  0x37   : > { %1373 = vmatpush2.bf16.msra.mxu1 %v2401_v39  ;;  %1303 = vmatprep.subr.bf16.mxu0 %v2402_v40  ;;  %v2036_v39 = vcombine.high %v232_v38, %v232_v38  ;;  %v2480_v40 = vld [vmem:[%s3432_s1 + $0x210] ss:$8 sps:$4 sm:$0xff]  }
  0x38   : > { %1374 = vmatprep.subr.bf16.mxu1 %v2404_v41  ;;  %v2035_v41 = vcombine.low %v232_v38, %v232_v38  ;;  %v2585_v38 = vld [vmem:[%s2919_s6 + $0xa8] ss:$36 sps:$4 sm:$0xff]  }
  0x3a   : > { %1304 = vmatpush2.bf16.msra.mxu0 %v2406_v42  ;;  %v2483_v42 = vld [vmem:[%s3432_s1 + $0x310] ss:$8 sps:$4 sm:$0xff]  }
  0x3b   : > { %1375 = vmatpush2.bf16.msra.mxu1 %v2407_v43  ;;  %1305 = vmatprep.subr.bf16.mxu0 %v2408_v44  ;;  %v233_v43 = vld [vmem:[%s2919_s6 + $0xe0] sm:$0xff] }
  0x3c   : > { %1376 = vmatprep.subr.bf16.mxu1 %v2410_v45  ;;  %v2488_v44 = vld [vmem:[%s3432_s1 + $0x204] ss:$8 sps:$4 sm:$0xff]  }
  0x3d   : > { %v2491_v45 = vld [vmem:[%s3432_s1 + $0x304] ss:$8 sps:$4 sm:$0xff]  }
  0x3e   : > { %1306 = vmatpush2.bf16.msra.mxu0 %v2412_v46  ;;  %v2038_v46 = vcombine.high %v233_v43, %v233_v43 }
  0x3f   : > { %1377 = vmatpush2.bf16.msra.mxu1 %v2413_v47  ;;  %1307 = vmatprep.subr.bf16.mxu0 %v2414_v48  ;;  %v2037_v47 = vcombine.low %v233_v43, %v233_v43  ;;  %v2486_v48 = vld [vmem:[%s3432_s1 + $0x200] ss:$8 sps:$4 sm:$0xff]  }
  0x40   : > { %1378 = vmatprep.subr.bf16.mxu1 %v2416_v50  ;;  %v2494_v50 = vld [vmem:[%s3432_s1 + $0x2f4] ss:$8 sps:$4 sm:$0xff]  }
  0x42   : > { %1308 = vmatpush2.bf16.msra.mxu0 %v2418_v52  ;;  %v2492_v52 = vld [vmem:[%s3432_s1 + $0x2f0] ss:$8 sps:$4 sm:$0xff]  }
  0x43   : > { %1379 = vmatpush2.bf16.msra.mxu1 %v2419_v53  ;;  %1309 = vmatprep.subr.bf16.mxu0 %v2420_v54  ;;  %v2558_v53 = vld [vmem:[%s2919_s6 + $0x14] ss:$36 sps:$4 sm:$0xff]  }
  0x44   : > { %1380 = vmatprep.subr.bf16.mxu1 %v2422_v55  ;;  %v2495_v54 = vld [vmem:[%s3432_s1 + $0x3f0] ss:$8 sps:$4 sm:$0xff]   ;;  %v2561_v55 = vld [vmem:[%s2919_s6 + $0x1c] ss:$36 sps:$4 sm:$0xff]  }
  0x46   : > { %1310 = vmatpush2.bf16.msra.mxu0 %v2424_v56  ;;  %v2505_v56 = vld [vmem:[%s3432_s1 + $0x2e4] ss:$8 sps:$4 sm:$0xff]  }
  0x47   : > { %1381 = vmatpush2.bf16.msra.mxu1 %v2425_v57  ;;  %1311 = vmatprep.subr.bf16.mxu0 %v2426_v58  ;;  %v2508_v57 = vld [vmem:[%s3432_s1 + $0x3e4] ss:$8 sps:$4 sm:$0xff]   ;;  %v2503_v58 = vld [vmem:[%s3432_s1 + $0x2e0] ss:$8 sps:$4 sm:$0xff]  }
  0x48   : > { %1382 = vmatprep.subr.bf16.mxu1 %v2428_v59  ;;  %v2506_v59 = vld [vmem:[%s3432_s1 + $0x3e0] ss:$8 sps:$4 sm:$0xff]  }
  0x4a   : > { %1312 = vmatpush2.bf16.msra.mxu0 %v2430_v60  ;;  %v2512_v60 = vld [vmem:[%s3432_s1 + $0x2d4] ss:$8 sps:$4 sm:$0xff]  }
  0x4b   : > { %1383 = vmatpush2.bf16.msra.mxu1 %v2431_v61  ;;  %1313 = vmatprep.subr.bf16.mxu0 %v2432_v62  ;;  %v2515_v61 = vld [vmem:[%s3432_s1 + $0x3d4] ss:$8 sps:$4 sm:$0xff]   ;;  %v2510_v62 = vld [vmem:[%s3432_s1 + $0x2d0] ss:$8 sps:$4 sm:$0xff]  }
  0x4c   : > { %1384 = vmatprep.subr.bf16.mxu1 %v2434_v63  ;;  %v2513_v63 = vld [vmem:[%s3432_s1 + $0x3d0] ss:$8 sps:$4 sm:$0xff]  }
  0x4e   : > { %1314 = vmatpush2.bf16.msra.mxu0 %v2436_v0  ;;  %v2523_v0 = vld [vmem:[%s3432_s1 + $0x2c4] ss:$8 sps:$4 sm:$0xff]  }
  0x4f   : > { %1385 = vmatpush2.bf16.msra.mxu1 %v2437_v1  ;;  %1425 = vmatprep.subr.bf16.mxu0 %v2446_v2  ;;  %v2526_v1 = vld [vmem:[%s3432_s1 + $0x3c4] ss:$8 sps:$4 sm:$0xff]   ;;  %v2521_v2 = vld [vmem:[%s3432_s1 + $0x2c0] ss:$8 sps:$4 sm:$0xff]  }
  0x50   : > { %1496 = vmatprep.subr.bf16.mxu1 %v2449_v3  ;;  %v2524_v3 = vld [vmem:[%s3432_s1 + $0x3c0] ss:$8 sps:$4 sm:$0xff]  }
  0x51   : > { %1316 = vmatmul.mubr.bf16.vlgmr.msra.gmra.mxu0 %v2438_v4  ;;  %v2530_v4 = vld [vmem:[%s3432_s1 + $0x2b4] ss:$8 sps:$4 sm:$0xff]  }
  0x52   : > { %1387 = vmatmul.mubr.bf16.vlgmr.msra.gmra.mxu1 %v2441_v5  ;;  %1426 = vmatpush1.bf16.msra.mxu0 %v2444_v6  ;;  %v2533_v5 = vld [vmem:[%s3432_s1 + $0x3b4] ss:$8 sps:$4 sm:$0xff]   ;;  %v2528_v6 = vld [vmem:[%s3432_s1 + $0x2b0] ss:$8 sps:$4 sm:$0xff]  }
  0x53   : > { %1497 = vmatpush1.bf16.msra.mxu1 %v2447_v7  ;;  %1427 = vmatprep.subr.bf16.mxu0 %v2452_v8  ;;  %v2531_v7 = vld [vmem:[%s3432_s1 + $0x3b0] ss:$8 sps:$4 sm:$0xff]   ;;  %v2538_v8 = vld [vmem:[%s3432_s1 + $0x2a4] ss:$8 sps:$4 sm:$0xff]  }
  0x54   : > { %1498 = vmatprep.subr.bf16.mxu1 %v2455_v9  ;;  %1325 = vmatprep.mubr.bf16.mxu0 %v2498_v15  ;;  %v2541_v9 = vld [vmem:[%s3432_s1 + $0x3a4] ss:$8 sps:$4 sm:$0xff]   ;;  %v2547_v15 = vld [vmem:[%s3432_s1 + $0x390] ss:$8 sps:$4 sm:$0xff]  }
  0x55   : > { %1396 = vmatprep.mubr.bf16.mxu1 %v2501_v17  ;;  %v2555_v17 = vld [vmem:[%s3432_s1 + $0x384] ss:$8 sps:$4 sm:$0xff]  }
  0x56   : > { %1428 = vmatpush1.bf16.msra.mxu0 %v2450_v10  ;;  %v2536_v10 = vld [vmem:[%s3432_s1 + $0x2a0] ss:$8 sps:$4 sm:$0xff]  }
  0x57   : > { %1499 = vmatpush1.bf16.msra.mxu1 %v2453_v11  ;;  %1429 = vmatprep.subr.bf16.mxu0 %v2458_v12  ;;  %v2539_v11 = vld [vmem:[%s3432_s1 + $0x3a0] ss:$8 sps:$4 sm:$0xff]   ;;  %v2546_v12 = vld [vmem:[%s3432_s1 + $0x294] ss:$8 sps:$4 sm:$0xff]  }
  0x58   : > { %1500 = vmatprep.subr.bf16.mxu1 %v2461_v13  ;;  %v2549_v13 = vld [vmem:[%s3432_s1 + $0x394] ss:$8 sps:$4 sm:$0xff]  }
  0x59   : > { %1326 = vmatmul.mubr.bf16.gmra.mxu0 %v2500_v16  ;;  %v2552_v16 = vld [vmem:[%s3432_s1 + $0x284] ss:$8 sps:$4 sm:$0xff]  }
  0x5a   : > { %1430 = vmatpush1.bf16.msra.mxu0 %v2456_v14  ;;  %1397 = vmatmul.mubr.bf16.gmra.mxu1 %v2509_v21  ;;  %v2544_v14 = vld [vmem:[%s3432_s1 + $0x290] ss:$8 sps:$4 sm:$0xff]  }
  0x5b   : > { %1501 = vmatpush1.bf16.msra.mxu1 %v2459_v18  ;;  %1431 = vmatprep.subr.bf16.mxu0 %v2464_v19  ;;  %v2550_v18 = vld [vmem:[%s3432_s1 + $0x280] ss:$8 sps:$4 sm:$0xff]   ;;  %v2556_v21 = vld [vmem:[%s2919_s6 + $0x10] ss:$36 sps:$4 sm:$0xff]  }
  0x5c   : > { %1502 = vmatprep.subr.bf16.mxu1 %v2467_v20  ;;  %1335 = vmatprep.mubr.bf16.mxu0 %v2516_v27  ;;  %v2553_v19 = vld [vmem:[%s3432_s1 + $0x380] ss:$8 sps:$4 sm:$0xff]   ;;  %v2564_v20 = vld [vmem:[%s3432_s1 + $0x474] ss:$8 sps:$4 sm:$0xff]  }
  0x5d   : > { %1406 = vmatprep.mubr.bf16.mxu1 %v2519_v29  ;;  %v2565_v27 = vld [vmem:[%s3432_s1 + $0x460] ss:$8 sps:$4 sm:$0xff]   ;;  %v2572_v29 = vld [vmem:[%s2919_s6 + $0x58] ss:$36 sps:$4 sm:$0xff]  }
  0x5e   : > { %1432 = vmatpush1.bf16.msra.mxu0 %v2462_v22  ;;  %v2559_v22 = vld [vmem:[%s2919_s6 + $0x18] ss:$36 sps:$4 sm:$0xff]  }
  0x5f   : > { %1503 = vmatpush1.bf16.msra.mxu1 %v2465_v23  ;;  %1433 = vmatprep.subr.bf16.mxu0 %v2470_v24  ;;  %v2562_v23 = vld [vmem:[%s3432_s1 + $0x470] ss:$8 sps:$4 sm:$0xff]   ;;  %v2567_v24 = vld [vmem:[%s3432_s1 + $0x464] ss:$8 sps:$4 sm:$0xff]  }
  0x60   : > { %1504 = vmatprep.subr.bf16.mxu1 %v2473_v25  ;;  %v2568_v25 = vld [vmem:[%s2919_s6 + $0x5c] ss:$36 sps:$4 sm:$0xff]  }
  0x61   : > { %1336 = vmatmul.mubr.bf16.gmra.mxu0 %v2518_v28  ;;  %v2576_v28 = vld [vmem:[%s3432_s1 + $0x454] ss:$8 sps:$4 sm:$0xff]  }
  0x62   : > { %1434 = vmatpush1.bf16.msra.mxu0 %v2468_v26  ;;  %1407 = vmatmul.mubr.bf16.gmra.mxu1 %v2527_v33  ;;  %v2570_v26 = vld [vmem:[%s2919_s6 + $0x64] ss:$36 sps:$4 sm:$0xff]  }
  0x63   : > { %1505 = vmatpush1.bf16.msra.mxu1 %v2471_v30  ;;  %1435 = vmatprep.subr.bf16.mxu0 %v2476_v31  ;;  %v2573_v30 = vld [vmem:[%s2919_s6 + $0x60] ss:$36 sps:$4 sm:$0xff]   ;;  %v2574_v31 = vld [vmem:[%s3432_s1 + $0x450] ss:$8 sps:$4 sm:$0xff]  }
  0x64   : > { %1506 = vmatprep.subr.bf16.mxu1 %v2479_v32  ;;  %1345 = vmatprep.mubr.bf16.mxu0 %v2036_v39  ;;  %v2579_v32 = vld [vmem:[%s3432_s1 + $0x444] ss:$8 sps:$4 sm:$0xff]  }
  0x65   : > { %1416 = vmatprep.mubr.bf16.mxu1 %v2038_v46  ;;  %v2580_v33 = vld [vmem:[%s2919_s6 + $0xa4] ss:$36 sps:$4 sm:$0xff]   ;;  %v2598_v46 = vld [vmem:[%s3432_s1 + $0x414] ss:$8 sps:$4 sm:$0xff]  }
  0x66   : > { %1436 = vmatpush1.bf16.msra.mxu0 %v2474_v34  ;;  %v2582_v34 = vld [vmem:[%s2919_s6 + $0xac] ss:$36 sps:$4 sm:$0xff]  }
  0x67   : > { %1507 = vmatpush1.bf16.msra.mxu1 %v2477_v35  ;;  %1437 = vmatprep.subr.bf16.mxu0 %v2482_v36  ;;  %v2577_v35 = vld [vmem:[%s3432_s1 + $0x440] ss:$8 sps:$4 sm:$0xff]   ;;  %v2588_v36 = vld [vmem:[%s3432_s1 + $0x434] ss:$8 sps:$4 sm:$0xff]  }
  0x68   : > { %1508 = vmatprep.subr.bf16.mxu1 %v2485_v37  ;;  %v2584_v37 = vld [vmem:[%s2919_s6 + $0xa0] ss:$36 sps:$4 sm:$0xff]   ;;  %v234_v39 = vld [vmem:[%s2919_s6 + $0xe8] sm:$0xff] }
  0x69   : > { %1346 = vmatmul.mubr.bf16.gmra.mxu0 %v2035_v41  ;;  %v2586_v41 = vld [vmem:[%s3432_s1 + $0x430] ss:$8 sps:$4 sm:$0xff]   ;;  %v2040_v43 = vcombine.high %v234_v39, %v234_v39 }
  0x6a   : > { %1438 = vmatpush1.bf16.msra.mxu0 %v2480_v40  ;;  %1417 = vmatmul.mubr.bf16.gmra.mxu1 %v2037_v47  ;;  %v235_v40 = vld [vmem:[%s2919_s6 + $0xf0] sm:$0xff]  ;;  %v2039_v47 = vcombine.low %v234_v39, %v234_v39 }
  0x6b   : > { %1509 = vmatpush1.bf16.msra.mxu1 %v2483_v42  ;;  %1439 = vmatprep.subr.bf16.mxu0 %v2488_v44  ;;  %v2591_v42 = vld [vmem:[%s3432_s1 + $0x424] ss:$8 sps:$4 sm:$0xff]   ;;  %v2042_v44 = vcombine.high %v235_v40, %v235_v40 }
  0x6c   : > { %1510 = vmatprep.subr.bf16.mxu1 %v2491_v45  ;;  %1457 = vmatprep.mubr.bf16.mxu0 %v2558_v53  ;;  %v2589_v45 = vld [vmem:[%s3432_s1 + $0x420] ss:$8 sps:$4 sm:$0xff]  }
  0x6d   : > { %1528 = vmatprep.mubr.bf16.mxu1 %v2561_v55  ;;  %v2602_v53 = vld [vmem:[%s2919_s6 + $0x20] ss:$36 sps:$4 sm:$0xff]   ;;  %v2604_v55 = vld [vmem:[%s2919_s6 + $0x68] ss:$36 sps:$4 sm:$0xff]  }
  0x6e   : > { %1440 = vmatpush1.bf16.msra.mxu0 %v2486_v48  ;;  %v2041_v48 = vcombine.low %v235_v40, %v235_v40 }
  0x6f   : > { %1511 = vmatpush1.bf16.msra.mxu1 %v2489_v49  ;;  %1441 = vmatprep.subr.bf16.mxu0 %v2494_v50  ;;  %v2596_v49 = vld [vmem:[%s3432_s1 + $0x410] ss:$8 sps:$4 sm:$0xff]   ;;  %v2601_v50 = vld [vmem:[%s3432_s1 + $0x404] ss:$8 sps:$4 sm:$0xff]  }
  0x70   : > { %1512 = vmatprep.subr.bf16.mxu1 %v2497_v51  ;;  %v2599_v51 = vld [vmem:[%s3432_s1 + $0x400] ss:$8 sps:$4 sm:$0xff]  }
  0x72   : > { %1442 = vmatpush2.bf16.msra.mxu0 %v2492_v52  ;;  %v2726_v52 = vmov 0  }
  0x73   : > { %1513 = vmatpush2.bf16.msra.mxu1 %v2495_v54  ;;  %1443 = vmatprep.subr.bf16.mxu0 %v2505_v56  ;;  %v2603_v54 = vld [vmem:[%s2919_s6 + $0xb0] ss:$36 sps:$4 sm:$0xff]   ;;  %v2605_v56 = vld [vmem:[%s2919_s6 + $0xf8] ss:$0 sps:$4 sm:$0xff]   ;;  %s175_s6 = sand.u32 1, %s2684_s12  }
  0x74   : > { %1514 = vmatprep.subr.bf16.mxu1 %v2508_v57  ;;  %v383_v57 = vlaneseq  ;;  %s2250_s24 = smul.u32 56, %s175_s6 }
  0x76   : > { %1444 = vmatpush2.bf16.msra.mxu0 %v2503_v58  ;;  %v384_v58 = vshrl.u32 %v383_v57, 7  ;;  %s3346_s12 = scalar_lea.vmem [#allocation2], %s2250_s24  }
  0x77   : > { %1515 = vmatpush2.bf16.msra.mxu1 %v2506_v59  ;;  %1445 = vmatprep.subr.bf16.mxu0 %v2512_v60  ;;  %v381_v60 = vld [vmem:[%s3433_s2] sm:$0x3] }
  0x78   : > { %1516 = vmatprep.subr.bf16.mxu1 %v2515_v61  ;;  %v385_v59 = vsub.s32 0, %v384_v58  ;;  %v389_v61 = vsub.s32 1, %v384_v58 }
  0x7a   : > { %1446 = vmatpush2.bf16.msra.mxu0 %v2510_v62  ;;  %v386_v62 = vrot.slane %v381_v60, %v385_v59 }
  0x7b   : > { %1517 = vmatpush2.bf16.msra.mxu1 %v2513_v63  ;;  %1447 = vmatprep.subr.bf16.mxu0 %v2523_v0  ;;  %v390_v63 = vrot.slane %v381_v60, %v389_v61 }
  0x7c   : > { %1518 = vmatprep.subr.bf16.mxu1 %v2526_v1 }
  0x7e   : > { %1448 = vmatpush2.bf16.msra.mxu0 %v2521_v2 }
  0x7f   : > { %1519 = vmatpush2.bf16.msra.mxu1 %v2524_v3  ;;  %1449 = vmatprep.subr.bf16.mxu0 %v2530_v4 }
  0x80   : > { %1520 = vmatprep.subr.bf16.mxu1 %v2533_v5 }
  0x82   : > { %1450 = vmatpush2.bf16.msra.mxu0 %v2528_v6 }
  0x83   : > { %1521 = vmatpush2.bf16.msra.mxu1 %v2531_v7  ;;  %1451 = vmatprep.subr.bf16.mxu0 %v2538_v8 }
  0x84   : > { %1522 = vmatprep.subr.bf16.mxu1 %v2541_v9 }
  0x86   : > { %1452 = vmatpush2.bf16.msra.mxu0 %v2536_v10 }
  0x87   : > { %1523 = vmatpush2.bf16.msra.mxu1 %v2539_v11  ;;  %1453 = vmatprep.subr.bf16.mxu0 %v2546_v12 }
  0x88   : > { %1524 = vmatprep.subr.bf16.mxu1 %v2549_v13 }
  0x8a   : > { %1454 = vmatpush2.bf16.msra.mxu0 %v2544_v14 }
  0x8b   : > { %1525 = vmatpush2.bf16.msra.mxu1 %v2547_v15  ;;  %1455 = vmatprep.subr.bf16.mxu0 %v2552_v16 }
  0x8c   : > { %1526 = vmatprep.subr.bf16.mxu1 %v2555_v17 }
  0x8e   : > { %1456 = vmatpush2.bf16.msra.mxu0 %v2550_v18 }
  0x8f   : > { %1527 = vmatpush2.bf16.msra.mxu1 %v2553_v19  ;;  %1567 = vmatprep.subr.bf16.mxu0 %v2564_v20 }
  0x90   : > { %2234 = vmatprep.subr.bf16.mxu1 %v2564_v20 }
  0x91   : > { %1458 = vmatmul.mubr.bf16.vlgmr.msra.gmra.mxu0 %v2556_v21 }
  0x92   : > { %1529 = vmatmul.mubr.bf16.vlgmr.msra.gmra.mxu1 %v2559_v22  ;;  %1568 = vmatpush1.bf16.msra.mxu0 %v2562_v23 }
  0x93   : > { %2242 = vmatpush1.bf16.msra.mxu1 %v2562_v23  ;;  %1569 = vmatprep.subr.bf16.mxu0 %v2567_v24 }
  0x94   : > { %2235 = vmatprep.subr.bf16.mxu1 %v2567_v24  ;;  %1467 = vmatprep.mubr.bf16.mxu0 %v2568_v25 }
  0x95   : > { %1538 = vmatprep.mubr.bf16.mxu1 %v2570_v26 }
  0x96   : > { %1570 = vmatpush1.bf16.msra.mxu0 %v2565_v27 }
  0x97   : > { %2243 = vmatpush1.bf16.msra.mxu1 %v2565_v27  ;;  %1571 = vmatprep.subr.bf16.mxu0 %v2576_v28 }
  0x98   : > { %2236 = vmatprep.subr.bf16.mxu1 %v2576_v28 }
  0x99   : > { %1468 = vmatmul.mubr.bf16.gmra.mxu0 %v2572_v29 }
  0x9a   : > { %1539 = vmatmul.mubr.bf16.gmra.mxu1 %v2573_v30  ;;  %1572 = vmatpush1.bf16.msra.mxu0 %v2574_v31 }
  0x9b   : > { %2244 = vmatpush1.bf16.msra.mxu1 %v2574_v31  ;;  %1573 = vmatprep.subr.bf16.mxu0 %v2579_v32 }
  0x9c   : > { %2237 = vmatprep.subr.bf16.mxu1 %v2579_v32  ;;  %1477 = vmatprep.mubr.bf16.mxu0 %v2580_v33 }
  0x9d   : > { %1548 = vmatprep.mubr.bf16.mxu1 %v2582_v34 }
  0x9e   : > { %1574 = vmatpush1.bf16.msra.mxu0 %v2577_v35 }
  0x9f   : > { %2245 = vmatpush1.bf16.msra.mxu1 %v2577_v35  ;;  %1575 = vmatprep.subr.bf16.mxu0 %v2588_v36 }
  0xa0   : > { %2238 = vmatprep.subr.bf16.mxu1 %v2588_v36 }
  0xa1   : > { %1478 = vmatmul.mubr.bf16.gmra.mxu0 %v2584_v37 }
  0xa2   : > { %1549 = vmatmul.mubr.bf16.gmra.mxu1 %v2585_v38  ;;  %1576 = vmatpush1.bf16.msra.mxu0 %v2586_v41 }
  0xa3   : > { %2246 = vmatpush1.bf16.msra.mxu1 %v2586_v41  ;;  %1577 = vmatprep.subr.bf16.mxu0 %v2591_v42 }
  0xa4   : > { %2239 = vmatprep.subr.bf16.mxu1 %v2591_v42  ;;  %1487 = vmatprep.mubr.bf16.mxu0 %v2040_v43 }
  0xa5   : > { %1558 = vmatprep.mubr.bf16.mxu1 %v2042_v44 }
  0xa6   : > { %1578 = vmatpush1.bf16.msra.mxu0 %v2589_v45 }
  0xa7   : > { %2247 = vmatpush1.bf16.msra.mxu1 %v2589_v45  ;;  %1579 = vmatprep.subr.bf16.mxu0 %v2598_v46 }
  0xa8   : > { %2240 = vmatprep.subr.bf16.mxu1 %v2598_v46 }
  0xa9   : > { %1488 = vmatmul.mubr.bf16.gmra.mxu0 %v2039_v47 }
  0xaa   : > { %1559 = vmatmul.mubr.bf16.gmra.mxu1 %v2041_v48  ;;  %1580 = vmatpush1.bf16.msra.mxu0 %v2596_v49 }
  0xab   : > { %2248 = vmatpush1.bf16.msra.mxu1 %v2596_v49  ;;  %1581 = vmatprep.subr.bf16.mxu0 %v2601_v50 }
  0xac   : > { %2241 = vmatprep.subr.bf16.mxu1 %v2601_v50  ;;  %1599 = vmatprep.mubr.bf16.mxu0 %v2726_v52 }
  0xad   : > { %1619 = vmatprep.mubr.bf16.mxu1 %v2726_v52 }
  0xae   : > { %1582 = vmatpush1.bf16.msra.mxu0 %v2599_v51 }
  0xaf   : > { %2249 = vmatpush1.bf16.msra.mxu1 %v2599_v51 }
  0xb1   : > { %1600 = vmatmul.mubr.bf16.vlgmr.msra.gmra.mxu0 %v2602_v53 }
  0xb2   : > { %1620 = vmatmul.mubr.bf16.vlgmr.msra.gmra.mxu1 %v2603_v54  ;;  %1609 = vmatprep.mubr.bf16.mxu0 %v2726_v52 }
  0xb3   : > { %1629 = vmatprep.mubr.bf16.mxu1 %v2726_v52 }
  0xb9   : > { %1610 = vmatmul.mubr.bf16.gmra.mxu0 %v2604_v55 }
  0xba   : > { %1630 = vmatmul.mubr.bf16.gmra.mxu1 %v2605_v56 }
 0x111   : > { %v1317_v0 = vpop.f32.mrf.mxu0 }
 0x112   : > { %v1388_v1 = vpop.f32.mrf.mxu1  ;;  %v1318_v2 = vadd.f32 %v1317_v0, %v386_v62 }
 0x113   : > { %v1319_v3 = vpop.f32.mrf.mxu0 }
 0x114   : > { %v1390_v4 = vpop.f32.mrf.mxu1  ;;  %v3253_v5 = vadd.f32 %v1388_v1, %v1318_v2  ;;  %v1320_v6 = vadd.f32 %v1319_v3, %v390_v63 }
 0x115   : > { %v1321_v7 = vpop.f32.mrf.mxu0 }
 0x116   : > { %v1392_v8 = vpop.f32.mrf.mxu1  ;;  %v3255_v9 = vadd.f32 %v1390_v4, %v1320_v6  ;;  %v1322_v10 = vadd.f32 %v1321_v7, %v386_v62 }
 0x117   : > { %v1323_v11 = vpop.f32.mrf.mxu0 }
 0x118   : > { %v3257_v12 = vadd.f32 %v1392_v8, %v1322_v10  ;;  %v1324_v13 = vadd.f32 %v1323_v11, %v390_v63  ;;  %v1394_v14 = vpop.f32.mrf.mxu1 }
 0x119   : > { %v1327_v15 = vpop.f32.mrf.mxu0 }
 0x11a   : > { %v3259_v16 = vadd.f32 %v1394_v14, %v1324_v13  ;;  %v1328_v17 = vadd.f32 %v1327_v15, %v386_v62  ;;  %v1398_v20 = vpop.f32.mrf.mxu1 }
 0x11b   : > { %v1329_v18 = vpop.f32.mrf.mxu0 }
 0x11c   : > { %v1330_v19 = vadd.f32 %v1329_v18, %v390_v63  ;;  %v3261_v21 = vadd.f32 %v1398_v20, %v1328_v17  ;;  %v1400_v24 = vpop.f32.mrf.mxu1 }
 0x11d   : > { %v1331_v22 = vpop.f32.mrf.mxu0 }
 0x11e   : > { %v1332_v23 = vadd.f32 %v1331_v22, %v386_v62  ;;  %v3263_v25 = vadd.f32 %v1400_v24, %v1330_v19  ;;  %v1402_v28 = vpop.f32.mrf.mxu1 }
 0x11f   : > { %v1333_v26 = vpop.f32.mrf.mxu0 }
 0x120   : > { %v1334_v27 = vadd.f32 %v1333_v26, %v390_v63  ;;  %v3265_v29 = vadd.f32 %v1402_v28, %v1332_v23  ;;  %v1404_v32 = vpop.f32.mrf.mxu1 }
 0x121   : > { %v1337_v30 = vpop.f32.mrf.mxu0 }
 0x122   : > { %v1338_v31 = vadd.f32 %v1337_v30, %v386_v62  ;;  %v3267_v33 = vadd.f32 %v1404_v32, %v1334_v27  ;;  %v1408_v36 = vpop.f32.mrf.mxu1 }
 0x123   : > { %v1339_v34 = vpop.f32.mrf.mxu0 }
 0x124   : > { %v1340_v35 = vadd.f32 %v1339_v34, %v390_v63  ;;  %v1409_v37 = vadd.f32 %v1408_v36, %v1338_v31  ;;  %v1410_v40 = vpop.f32.mrf.mxu1 }
 0x125   : > { %v1341_v38 = vpop.f32.mrf.mxu0 }
 0x126   : > { %v1342_v39 = vadd.f32 %v1341_v38, %v386_v62  ;;  %v1411_v41 = vadd.f32 %v1410_v40, %v1340_v35  ;;  %v1412_v44 = vpop.f32.mrf.mxu1 }
 0x127   : > { %v1343_v42 = vpop.f32.mrf.mxu0 }
 0x128   : > { %v1344_v43 = vadd.f32 %v1343_v42, %v390_v63  ;;  %v1413_v45 = vadd.f32 %v1412_v44, %v1342_v39  ;;  %v1414_v48 = vpop.f32.mrf.mxu1 }
 0x129   : > { %v1347_v46 = vpop.f32.mrf.mxu0 }
 0x12a   : > { %v1348_v47 = vadd.f32 %v1347_v46, %v386_v62  ;;  %v1415_v49 = vadd.f32 %v1414_v48, %v1344_v43  ;;  %v1418_v52 = vpop.f32.mrf.mxu1 }
 0x12b   : > { %v1349_v50 = vpop.f32.mrf.mxu0 }
 0x12c   : > { %v1350_v51 = vadd.f32 %v1349_v50, %v390_v63  ;;  %v1419_v54 = vadd.f32 %v1418_v52, %v1348_v47  ;;  %v1420_v55 = vpop.f32.mrf.mxu1 }
 0x12d   : > { %v1351_v53 = vpop.f32.mrf.mxu0 }
 0x12e   : > { %v3269_v57 = vadd.f32 %v1420_v55, %v1350_v51  ;;  %v1422_v58 = vpop.f32.mrf.mxu1 }
 0x12f   : > { %v1352_v56 = vpop.f32.mrf.mxu0 }
 0x130   : > { %v1423_v59 = vpop.f32.mrf.mxu1 }
 0x151   : > { %v1459_v60 = vpop.f32.mrf.mxu0 }
 0x152   : > { %v1530_v61 = vpop.f32.mrf.mxu1  ;;  %v1460_v31 = vadd.f32 %v1459_v60, %v3253_v5 }
 0x153   : > { %v1461_v0 = vpop.f32.mrf.mxu0 }
 0x154   : > { %v1532_v1 = vpop.f32.mrf.mxu1  ;;  %v1462_v36 = vadd.f32 %v1461_v0, %v3255_v9  ;;  %v1531_v43 = vadd.f32 %v1530_v61, %v1460_v31 }
 0x155   : > { %v1463_v2 = vpop.f32.mrf.mxu0 }
 0x156   : > { %v1534_v3 = vpop.f32.mrf.mxu1  ;;  %v1464_v38 = vadd.f32 %v1463_v2, %v3257_v12  ;;  %v1533_v52 = vadd.f32 %v1532_v1, %v1462_v36 }
 0x157   : > { %v1465_v62 = vpop.f32.mrf.mxu0 }
 0x158   : > { %v1536_v4 = vpop.f32.mrf.mxu1  ;;  %v1466_v47 = vadd.f32 %v1465_v62, %v3259_v16  ;;  %v1535_v9 = vadd.f32 %v1534_v3, %v1464_v38 }
 0x159   : > { %v1469_v6 = vpop.f32.mrf.mxu0 }
 0x15a   : > { %v1540_v7 = vpop.f32.mrf.mxu1  ;;  %v1470_v48 = vadd.f32 %v1469_v6, %v3261_v21  ;;  %v1537_v59 = vadd.f32 %v1536_v4, %v1466_v47 }
 0x15b   : > { %v1471_v63 = vpop.f32.mrf.mxu0 }
 0x15c   : > { %v3271_v8 = vpop.f32.mrf.mxu1  ;;  %v1541_v21 = vadd.f32 %v1540_v7, %v1470_v48  ;;  %v1472_v1 = vadd.f32 %v1471_v63, %v3263_v25 }
 0x15d   : > { %v1473_v10 = vpop.f32.mrf.mxu0 }
 0x15e   : > { %v3273_v11 = vpop.f32.mrf.mxu1 }
 0x15f   : > { %v3275_v13 = vpop.f32.mrf.mxu0 }
 0x160   : > { %v3277_v14 = vpop.f32.mrf.mxu1 }
 0x161   : > { %v1479_v15 = vpop.f32.mrf.mxu0 }
 0x162   : > { %v1550_v17 = vpop.f32.mrf.mxu1  ;;  %v1480_v32 = vadd.f32 %v1479_v15, %v1409_v37 }
 0x163   : > { %v1481_v18 = vpop.f32.mrf.mxu0 }
 0x164   : > { %v1552_v19 = vpop.f32.mrf.mxu1  ;;  %v1482_v39 = vadd.f32 %v1481_v18, %v1411_v41  ;;  %v1551_v44 = vadd.f32 %v1550_v17, %v1480_v32 }
 0x165   : > { %v1483_v20 = vpop.f32.mrf.mxu0 }
 0x166   : > { %v1554_v22 = vpop.f32.mrf.mxu1  ;;  %v1484_v46 = vadd.f32 %v1483_v20, %v1413_v45  ;;  %v1553_v53 = vadd.f32 %v1552_v19, %v1482_v39 }
 0x167   : > { %v1485_v23 = vpop.f32.mrf.mxu0 }
 0x168   : > { %v1556_v24 = vpop.f32.mrf.mxu1  ;;  %v1486_v12 = vadd.f32 %v1485_v23, %v1415_v49  ;;  %v1555_v56 = vadd.f32 %v1554_v22, %v1484_v46  ;;  %v1543_v22 = vadd.f32 %v3271_v8, %v1472_v1 }
 0x169   : > { %v1489_v26 = vpop.f32.mrf.mxu0 }
 0x16a   : > { %v1560_v27 = vpop.f32.mrf.mxu1  ;;  %v1490_v58 = vadd.f32 %v1489_v26, %v1419_v54  ;;  %v1474_v54 = vadd.f32 %v1473_v10, %v3265_v29  ;;  %v1557_v62 = vadd.f32 %v1556_v24, %v1486_v12  ;;  %v1476_v26 = vadd.f32 %v3275_v13, %v3267_v33 }
 0x16b   : > { %v1491_v28 = vpop.f32.mrf.mxu0 }
 0x16c   : > { %v3279_v30 = vpop.f32.mrf.mxu1  ;;  %v1561_v15 = vadd.f32 %v1560_v27, %v1490_v58  ;;  %v1492_v17 = vadd.f32 %v1491_v28, %v3269_v57  ;;  %v1545_v57 = vadd.f32 %v3273_v11, %v1474_v54 }
 0x16d   : > { %v1493_v34 = vpop.f32.mrf.mxu0 }
 0x16e   : > { %v1564_v35 = vpop.f32.mrf.mxu1  ;;  %v1563_v32 = vadd.f32 %v3279_v30, %v1492_v17  ;;  %v1547_v30 = vadd.f32 %v3277_v14, %v1476_v26 }
 0x16f   : > { %v1494_v40 = vpop.f32.mrf.mxu0 }
 0x170   : > { %v1565_v42 = vpop.f32.mrf.mxu1 }
 0x171   : > { %v1601_v50 = vpop.f32.mrf.mxu0 }
 0x172   : > { %v1621_v51 = vpop.f32.mrf.mxu1  ;;  %v3286_v5 = vadd.f32 %v1601_v50, %v1531_v43 }
 0x173   : > { %v3288_v37 = vadd.f32 %v1621_v51, %v1551_v44  ;;  %v1603_v41 = vpop.f32.mrf.mxu0 }
 0x174   : > { %v1623_v55 = vpop.f32.mrf.mxu1  ;;  %v1652_v45 = vmul.f32 1.442695, %v3286_v5  ;;  %v3292_v60 = vadd.f32 %v1603_v41, %v1533_v52  ;;  %vm1638_vm0 = vcmp.gt.f32.partialorder %v3286_v5, 0.0 }
 0x175   : > { %v1668_v16 = vmul.f32 1.442695, %v3288_v37  ;;  %v3294_v61 = vadd.f32 %v1623_v55, %v1553_v53  ;;  %v1605_v0 = vpop.f32.mrf.mxu0  ;;  %vm1646_vm1 = vcmp.gt.f32.partialorder %v3288_v37, 0.0 }
 0x176   : > { %v1625_v2 = vpop.f32.mrf.mxu1  ;;  %2606 = vpow2.f32 %v1652_v45  ;;  %v3297_v49 = vadd.f32 %v1605_v0, %v1535_v9  ;;  %v1654_v4 = vmul.f32 1.442695, %v3292_v60  ;;  %vm1639_vm2 = vcmp.gt.f32.partialorder %v3292_v60, 0.0 }
 0x177   : > { %v3299_v3 = vadd.f32 %v1625_v2, %v1555_v56  ;;  %2608 = vpow2.f32 %v1668_v16  ;;  %v1607_v6 = vpop.f32.mrf.mxu0  ;;  %v1670_v18 = vmul.f32 1.442695, %v3294_v61  ;;  %vm1647_vm3 = vcmp.gt.f32.partialorder %v3294_v61, 0.0 }
 0x178   : > { %v1627_v7 = vpop.f32.mrf.mxu1  ;;  %v1656_v25 = vmul.f32 1.442695, %v3297_v49  ;;  %2610 = vpow2.f32 %v1654_v4  ;;  %v3307_v19 = vadd.f32 %v1607_v6, %v1537_v59  ;;  %vm1640_vm4 = vcmp.gt.f32.partialorder %v3297_v49, 0.0 }
 0x179   : > { %v1672_v63 = vmul.f32 1.442695, %v3299_v3  ;;  %v3309_v20 = vadd.f32 %v1627_v7, %v1557_v62  ;;  %v1611_v29 = vpop.f32.mrf.mxu0  ;;  %2612 = vpow2.f32 %v1670_v18  ;;  %vm1648_vm5 = vcmp.gt.f32.partialorder %v3299_v3, 0.0 }
 0x17a   : > { %v1631_v10 = vpop.f32.mrf.mxu1  ;;  %v3312_v23 = vadd.f32 %v1611_v29, %v1541_v21  ;;  %2614 = vpow2.f32 %v1656_v25  ;;  %v1658_v27 = vmul.f32 1.442695, %v3307_v19  ;;  %vm1641_vm6 = vcmp.gt.f32.partialorder %v3307_v19, 0.0 }
 0x17b   : > { %v3314_v24 = vadd.f32 %v1631_v10, %v1561_v15  ;;  %v1613_v28 = vpop.f32.mrf.mxu0  ;;  %2616 = vpow2.f32 %v1672_v63  ;;  %v1674_v8 = vmul.f32 1.442695, %v3309_v20  ;;  %vm1649_vm7 = vcmp.gt.f32.partialorder %v3309_v20, 0.0 }
 0x17c   : > { %v1633_v31 = vpop.f32.mrf.mxu1  ;;  %v1660_v34 = vmul.f32 1.442695, %v3312_v23  ;;  %2618 = vpow2.f32 %v1658_v27  ;;  %v3324_v36 = vadd.f32 %v1613_v28, %v1543_v22  ;;  %vm1642_vm8 = vcmp.gt.f32.partialorder %v3312_v23, 0.0 }
 0x17d   : > { %v1676_v35 = vmul.f32 1.442695, %v3314_v24  ;;  %v1615_v11 = vpop.f32.mrf.mxu0  ;;  %2620 = vpow2.f32 %v1674_v8  ;;  %v3326_v13 = vadd.f32 %v1633_v31, %v1563_v32  ;;  %vm1650_vm9 = vcmp.gt.f32.partialorder %v3314_v24, 0.0 }
 0x17e   : > { %v1635_v33 = vpop.f32.mrf.mxu1  ;;  %v3328_v38 = vadd.f32 %v1615_v11, %v1545_v57  ;;  %2622 = vpow2.f32 %v1660_v34  ;;  %v1662_v39 = vmul.f32 1.442695, %v3324_v36  ;;  %vm1643_vm10 = vcmp.gt.f32.partialorder %v3324_v36, 0.0 }
 0x17f   : > { %v1617_v40 = vpop.f32.mrf.mxu0  ;;  %2624 = vpow2.f32 %v1676_v35  ;;  %v1678_v43 = vmul.f32 1.442695, %v3326_v13  ;;  %vm1651_vm11 = vcmp.gt.f32.partialorder %v3326_v13, 0.0 }
 0x180   : > { %v1636_v42 = vpop.f32.mrf.mxu1  ;;  %2626 = vpow2.f32 %v1662_v39  ;;  %v1664_v44 = vmul.f32 1.442695, %v3328_v38  ;;  %v3334_v46 = vadd.f32 %v1617_v40, %v1547_v30  ;;  %vm1644_vm12 = vcmp.gt.f32.partialorder %v3328_v38, 0.0 }
 0x181   : > { %2628 = vpow2.f32 %v1678_v43 }
 0x182   : > { %2630 = vpow2.f32 %v1664_v44  ;;  %v1666_v48 = vmul.f32 1.442695, %v3334_v46  ;;  %vm1645_vm13 = vcmp.gt.f32.partialorder %v3334_v46, 0.0 }
 0x183   : > { %v2607_v47 = vpop.eup %2606 }
 0x184   : > { %v2609_v14 = vpop.eup %2608  ;;  %v2188_v50 = vadd.f32 -1.0, %v2607_v47  ;;  %2632 = vpow2.f32 %v1666_v48 }
 0x185   : > { %v2611_v51 = vpop.eup %2610  ;;  %v2196_v52 = vadd.f32 -1.0, %v2609_v14 }
 0x186   : > { %v2613_v9 = vpop.eup %2612  ;;  %v2189_v53 = vadd.f32 -1.0, %v2611_v51  ;;  %v1694_v56 = vsel %vm1638_vm0, %v3286_v5, %v2188_v50 }
 0x187   : > { %v2615_v12 = vpop.eup %2614  ;;  %v2197_v41 = vadd.f32 -1.0, %v2613_v9  ;;  %v1702_v59 = vsel %vm1646_vm1, %v3288_v37, %v2196_v52 }
 0x188   : > { %v2617_v55 = vpop.eup %2616  ;;  %v1695_v58 = vsel %vm1639_vm2, %v3292_v60, %v2189_v53  ;;  %v2190_v45 = vadd.f32 -1.0, %v2615_v12 }
 0x189   : > { %v2619_v16 = vpop.eup %2618  ;;  %v2223_v21 = vpack.c.bf16 %v1695_v58, %v1694_v56  ;;  %v1703_v0 = vsel %vm1647_vm3, %v3294_v61, %v2197_v41  ;;  %v2198_v2 = vadd.f32 -1.0, %v2617_v55 }
 0x18a   : > { %v2621_v1 = vpop.eup %2620  ;;  %v2227_v54 = vpack.c.bf16 %v1703_v0, %v1702_v59  ;;  %v2191_v62 = vadd.f32 -1.0, %v2619_v16  ;;  %v1696_v60 = vsel %vm1640_vm4, %v3297_v49, %v2190_v45 }
 0x18b   : > { %v2623_v4 = vpop.eup %2622  ;;  %1752 = vst [vmem:[%s3346_s12] sm:$0xff] %v2223_v21  ;;  %v2199_v5 = vadd.f32 -1.0, %v2621_v1  ;;  %v1704_v15 = vsel %vm1648_vm5, %v3299_v3, %v2198_v2 }
 0x18c   : > { %v2625_v37 = vpop.eup %2624  ;;  %1756 = vst [vmem:[%s3346_s12 + $0x20] sm:$0xff] %v2227_v54  ;;  %v1697_v61 = vsel %vm1641_vm6, %v3307_v19, %v2191_v62  ;;  %v2192_v6 = vadd.f32 -1.0, %v2623_v4 }
 0x18d   : > { %v2627_v7 = vpop.eup %2626  ;;  %v2224_v17 = vpack.c.bf16 %v1697_v61, %v1696_v60  ;;  %v1705_v18 = vsel %vm1649_vm7, %v3309_v20, %v2199_v5  ;;  %v2200_v25 = vadd.f32 -1.0, %v2625_v37 }
 0x18e   : > { %v2629_v63 = vpop.eup %2628  ;;  %v2228_v29 = vpack.c.bf16 %v1705_v18, %v1704_v15  ;;  %v2193_v10 = vadd.f32 -1.0, %v2627_v7  ;;  %v1698_v3 = vsel %vm1642_vm8, %v3312_v23, %v2192_v6 }
 0x18f   : > { %v2631_v22 = vpop.eup %2630  ;;  %1753 = vst [vmem:[%s3346_s12 + $0x8] sm:$0xff] %v2224_v17  ;;  %v2201_v49 = vadd.f32 -1.0, %v2629_v63  ;;  %v1706_v26 = vsel %vm1650_vm9, %v3314_v24, %v2200_v25 }
 0x190   : > { %1757 = vst [vmem:[%s3346_s12 + $0x28] sm:$0xff] %v2228_v29  ;;  %v1699_v19 = vsel %vm1643_vm10, %v3324_v36, %v2193_v10  ;;  %v2194_v20 = vadd.f32 -1.0, %v2631_v22 }
 0x191   : > { %v2633_v57 = vpop.eup %2632  ;;  %v2225_v27 = vpack.c.bf16 %v1699_v19, %v1698_v3  ;;  %v1707_v28 = vsel %vm1651_vm11, %v3326_v13, %v2201_v49 }
 0x192   : > { %v2229_v31 = vpack.c.bf16 %v1707_v28, %v1706_v26  ;;  %v2195_v32 = vadd.f32 -1.0, %v2633_v57  ;;  %v1700_v23 = vsel %vm1644_vm12, %v3328_v38, %v2194_v20 }
 0x193   : > { %1754 = vst [vmem:[%s3346_s12 + $0x10] sm:$0xff] %v2225_v27  ;;  %1765 = sbr.rel (!%p2772_p4) target bundleno = 461 (0x1cd), region = 36 }
 0x194   : > { %1758 = vst [vmem:[%s3346_s12 + $0x30] sm:$0xff] %v2229_v31  ;;  %v1701_v8 = vsel %vm1645_vm13, %v3334_v46, %v2195_v32 }
 0x195   : > { %v2226_v34 = vpack.c.bf16 %v1701_v8, %v1700_v23 }
 0x197   : > { %1755 = vst [vmem:[%s3346_s12 + $0x18] sm:$0xff] %v2226_v34 }
 0x198   : > { %s3443_s25 = smov (!%p1768_p8, %s1767_s25), 7 }
 0x199   : > { %s2230_s30 = sshll.u32 %s3443_s25, 7 }
 0x19a   : > { %p2214_p9 = scmp.eq.s32.totalorder %s2230_s30, 0 }
 0x19b   : > { %2634 = sdivrem.u32 (!%p2214_p9), %s3443_s25, 7 }
 0x19c   : > { %1778 = sbr.rel (%p2214_p9) target bundleno = 461 (0x1cd), region = 40 }
 0x1a4   : > { %s3388_s20 = spop.drf %2634 }
 0x1a5   : > { %p2215_p10 = scmp.le.s32.totalorder %s3388_s20, 0 }
 0x1a6   : > { %s3436_s15 = smov (!%p2215_p10), %s3382_s29  ;;  %s3437_s10 = smov (!%p2215_p10), %s3346_s12 }
 0x1a7   : > { %1959 = sbr.rel (%p2215_p10) target bundleno = 436 (0x1b4), region = 116  ;;  %s3397_s4 = smov (!%p2215_p10), 0  }
 0x1a8   : > { %s3399_s5 = smov (!%p2215_p10), 0  }
 0x1ac LB: >> { %v1855_v24 = vld [vmem:[%s2700_s10] sm:$0xff]  ;;  %v1857_v35 = vld [vmem:[%s2700_s10 + $0x8] sm:$0xff]  ;;  %v1859_v36 = vld [vmem:[%s2700_s10 + $0x10] sm:$0xff]  ;;  %s1869_s7 = sadd.s32 1, %s2704_s4  ;;  %s1849_s5 = sadd.s32 1, %s2708_s5   ;;  %s2708_s5 = sphi %s3399_s5, %s1849_s5   ;;  %s2704_s4 = sphi %s3397_s4, %s3438_s4   ;;  %s2700_s10 = sphi %s3437_s10, %s1874_s10   ;;  %s2696_s15 = sphi %s3436_s15, %s1875_s15  }
 0x1ad   : >> { %1856 = vst [vmem:[%s2696_s15] sm:$0xff] %v1855_v24  ;;  %1858 = vst [vmem:[%s2696_s15 + $0x8] sm:$0xff] %v1857_v35  ;;  %v1861_v11 = vld [vmem:[%s2700_s10 + $0x18] sm:$0xff]  ;;  %v1863_v33 = vld [vmem:[%s2700_s10 + $0x20] sm:$0xff]  ;;  %p1870_p11 = scmp.ge.s32.totalorder %s1869_s7, %s3388_s20  ;;  %p1848_p12 = scmp.ge.s32.totalorder %s1849_s5, %s3388_s20 }
 0x1ae   : >> { %1860 = vst [vmem:[%s2696_s15 + $0x10] sm:$0xff] %v1859_v36  ;;  %v1865_v13 = vld [vmem:[%s2700_s10 + $0x28] sm:$0xff]  ;;  %1862 = vst [vmem:[%s2696_s15 + $0x18] sm:$0xff] %v1861_v11  ;;  %v1867_v38 = vld [vmem:[%s2700_s10 + $0x30] sm:$0xff] }
 0x1af   : >> { %1864 = vst [vmem:[%s2696_s15 + $0x20] sm:$0xff] %v1863_v33  ;;  %1866 = vst [vmem:[%s2696_s15 + $0x28] sm:$0xff] %v1865_v13  ;;  %s3445_s7 = smov (%p1870_p11, %s1869_s7), 0  ;;  %1851 = sbr.rel (!%p1848_p12) target bundleno = 428 (0x1ac), region = 122 }
 0x1b0   : >> { %1868 = vst [vmem:[%s2696_s15 + $0x30] sm:$0xff] %v1867_v38  ;;  %s1872_s8 = smul.u32 56, %s3445_s7  ;;  %s3438_s4 = smov %s3445_s7 }
 0x1b2   : >> { %s1874_s10 = scalar_lea.vmem %s3346_s12, %s1872_s8 [#allocation2]   ;;  %s1875_s15 = scalar_lea.vmem %s3382_s29, %s1872_s8  }
 0x1b4 PF: > { %2636 = sdivrem.u32 %s3443_s25, 7 }
 0x1b5   : > { %s2216_s9 = smul.u32 56, %s3388_s20 }
 0x1b7   : > { %s1880_s11 = scalar_lea.vmem %s3346_s12, %s2216_s9 [#allocation2]   ;;  %s1882_s14 = scalar_lea.vmem %s3382_s29, %s2216_s9  }
 0x1bd   : > { %s2637_s17 = spop.drf %2636 }
 0x1be   : > { %p2218_p13 = scmp.le.s32.totalorder %s2637_s17, 0 }
 0x1bf   : > { %s2710_s18 = smov (!%p2218_p13), %s1882_s14   ;;  %s2714_s21 = smov (!%p2218_p13), %s1880_s11  }
 0x1c0   : > { %1973 = sbr.rel (%p2218_p13) target bundleno = 461 (0x1cd), region = 127  ;;  %s2718_s22 = smov (!%p2218_p13), 0  }
 0x1c1   : > { %s2722_s23 = smov (!%p2218_p13), 0  }
 0x1c5 LB: >> { %v1892_v30 = vld [vmem:[%s2716_s21] sm:$0xff]  ;;  %s1894_s6 = sadd.s32 1, %s2720_s22  ;;  %s1886_s23 = sadd.s32 1, %s2724_s23   ;;  %s2724_s23 = sphi %s2722_s23, %s1886_s23   ;;  %s2720_s22 = sphi %s2718_s22, %s2719_s22   ;;  %s2716_s21 = sphi %s2714_s21, %s1899_s21   ;;  %s2712_s18 = sphi %s2710_s18, %s1900_s18  }
 0x1c6   : >> { %1893 = vst [vmem:[%s2712_s18] sm:$0xff] %v1892_v30  ;;  %p1895_p0 = scmp.ge.s32.totalorder %s1894_s6, %s2637_s17  ;;  %p1885_p1 = scmp.ge.s32.totalorder %s1886_s23, %s2637_s17 }
 0x1c8   : >> { %s3447_s6 = smov (%p1895_p0, %s1894_s6), 0  ;;  %1888 = sbr.rel (!%p1885_p1) target bundleno = 453 (0x1c5), region = 133 }
 0x1c9   : >> { %s2219_s24 = sshll.u32 %s3447_s6, 3  ;;  %s2719_s22 = smov %s3447_s6  }
 0x1ca   : >> { %s1899_s21 = scalar_lea.vmem %s1880_s11, %s2219_s24 [#allocation2]   ;;  %s1900_s18 = scalar_lea.vmem %s1882_s14, %s2219_s24  }
 0x1cd PF: > { %p10_p2 = scmp.ge.s32.totalorder %s2762_s16, 4   ;;  %s3439_s12 = smov %s2688_s13 }
 0x1ce   : > { %s3440_s13 = smov %s2770_s19  ;;  %s3441_s14 = smov %s2762_s16 }
 0x1cf   :  { %12 = sbr.rel (!%p10_p2) target bundleno = 2 (0x2), region = 144 }

// kernel: tile.33
= control target key start
LH: loop header
LB: loop body
LE: loop exit
PB: predicated region body
PF: predicated region fallthrough
CT: control target
= control target key end

     0   :  { %s22_s0 = inlined_call_operand.vmem [shape: f32[32], index: 0, kind: input, shape index: {}]   ;;  %s23_s1 = inlined_call_operand.vmem [shape: f32[4,32], index: 1, kind: output, shape index: {}]  }
   0x1   :  { %v4_v0 = vld [vmem:[%s22_s0] ss:$0 sm:$0xff] }
   0x2   :  { %5 = vst [vmem:[%s23_s1] sm:$0xf] %v4_v0 }

// kernel: tile.34
= control target key start
LH: loop header
LB: loop body
LE: loop exit
PB: predicated region body
PF: predicated region fallthrough
CT: control target
= control target key end

     0   :  { %vm8_vm0 = vcmask 261120   ;;  %s40_s8 = smov 32   ;;  %s41_s9 = smov 64   ;;  %vm14_vm1 = vcmask 1048320   ;;  %vm20_vm2 = vcmask 785920   ;;  %vm26_vm3 = vcmask 523520   ;;  %s58_s0 = inlined_call_operand.vmem [shape: f32[4,32], index: 0, kind: input, shape index: {}]   ;;  %s59_s1 = inlined_call_operand.vmem [shape: f32[1,128], index: 1, kind: output, shape index: {}]  }
   0x1   :  { %v5_v0 = vld [vmem:[%s58_s0] sm:$0xf]  ;;  %s39_s0 = smov 96  }
   0x2   :  { %6 = vst [vmem:[#allocation1] sm:$0xf] %v5_v0 }
   0x9   :  { %v11_v1 = vld [vmem:[#allocation1 + $0x3] sm:$0x1]   ;;  %v23_v2 = vld [vmem:[#allocation1 + $0x1] sm:$0x1]   ;;  %v7_v3 = vld [vmem:[#allocation1] sm:$0x1]  }
   0xa   :  { %12 = vrot.lane.b32.xlu0 %v11_v1, %s39_s0  ;;  %24 = vrot.lane.b32.xlu1 %v23_v2, %s40_s8  ;;  %v17_v4 = vld [vmem:[#allocation1 + $0x2] sm:$0x1]   ;;  %9 = vst.msk [vmem:[#allocation0] sm:$0x1] %vm8_vm0, %v7_v3  }
   0xe   :  { %18 = vrot.lane.b32.xlu0 %v17_v4, %s41_s9 }
  0x7c   :  { %v13_v5 = vpop.permute.xlu0 %12   ;;  %v25_v6 = vpop.permute.xlu1 %24  }
  0x7d   :  { %15 = vst.msk [vmem:[#allocation0] sm:$0x1] %vm14_vm1, %v13_v5  }
  0x80   :  { %v19_v7 = vpop.permute.xlu0 %18  }
  0x81   :  { %21 = vst.msk [vmem:[#allocation0] sm:$0x1] %vm20_vm2, %v19_v7  }
  0x82   :  { %27 = vst.msk [vmem:[#allocation0] sm:$0x1] %vm26_vm3, %v25_v6  }
  0x89   :  { %v32_v8 = vld [vmem:[#allocation0] sm:$0x1] }
  0x8a   :  { %35 = vst [vmem:[%s59_s1] sm:$0x1] %v32_v8 }

// kernel: conv_decoder_cat_forward.6
= control target key start
LH: loop header
LB: loop body
LE: loop exit
PB: predicated region body
PF: predicated region fallthrough
CT: control target
= control target key end

     0   :  { %s3107_s12 = smov 0   ;;  %s3109_s13 = smov 0   ;;  %s3812_s0 = inlined_call_operand.vmem [shape: bf16[450,576], index: 0, kind: input, shape index: {}]   ;;  %s3813_s1 = inlined_call_operand.vmem [shape: bf16[576,128], index: 1, kind: input, shape index: {}]   ;;  %s3814_s2 = inlined_call_operand.vmem [shape: f32[1,128], index: 2, kind: input, shape index: {}]   ;;  %s3815_s3 = inlined_call_operand.vmem [shape: bf16[450,128], index: 3, kind: output, shape index: {}]  }
   0x1   :  { %s3111_s14 = smov 0  }
   0x2 LB: > { %s3120_s15 = sadd.s32 4294967295, %s3051_s14   ;;  %s3122_s16 = sadd.s32 1, %s3051_s14   ;;  %s3051_s14 = sphi %s3111_s14, %s3822_s14   ;;  %s3047_s13 = sphi %s3109_s13, %s3821_s13   ;;  %s3043_s12 = sphi %s3107_s12, %s3820_s12  }
   0x3   : > { %s85_s17 = ssub.s32 %s3051_s14, %s3122_s16  ;;  %s88_s18 = sadd.s32 1, %s3047_s13 }
   0x4   : > { %p86_p0 = scmp.eq.s32.totalorder %s85_s17, 0  ;;  %p98_p1 = scmp.ne.s32.totalorder %s3047_s13, %s3043_s12 }
   0x5   : > { %p99_p2 = scmp.eq.s32.totalorder %s3120_s15, 1  ;;  %p2076_p3 = scmp.ge.s32.totalorder %s3051_s14, 1 }
   0x6   : > { %s3130_s19 = scalar_select %p86_p0, %s3047_s13, %s88_s18  }
   0x7   : > { %p3132_p4 = por %p99_p2, %p98_p1  ;;  %p149_p5 = scmp.lt.s32.totalorder %s3051_s14, 3 }
   0x9   : > { %p150_p6 = pnand %p2076_p3, %p149_p5 }
   0xa   : > { %s3140_s23 = smul.u32 (!%p150_p6), 29, %s3120_s15 }
   0xb   : > { %153 = sbr.rel (%p150_p6) target bundleno = 516 (0x204), region = 32 }
   0xc   : > { %p184_p7 = scmp.lt.s32.totalorder (!%p150_p6), %s3140_s23, 56 }
  0x10   : > { %v2796_v0 = vld [vmem:[%s3813_s1 + $0x78] sm:$0xff]   ;;  %v2798_v2 = vld [vmem:[%s3813_s1 + $0x70] sm:$0xff]   ;;  %v2800_v4 = vld [vmem:[%s3813_s1 + $0x68] sm:$0xff]   ;;  %s185_s5 = scalar_select %p184_p7, %s3140_s23, 56  ;;  %v3085_v24 = vmov 0.0   ;;  %vm3086_vm0 = vmmov 0  }
  0x11   : > { %v2797_v1 = vld [vmem:[%s3813_s1 + $0x38] sm:$0xff]   ;;  %2388 = vmatprep.subr.bf16.mxu0 %v2796_v0  ;;  %2687 = vmatprep.subr.bf16.mxu1 %v2796_v0  ;;  %v2799_v3 = vld [vmem:[%s3813_s1 + $0x30] sm:$0xff]   ;;  %v2801_v5 = vld [vmem:[%s3813_s1 + $0x28] sm:$0xff]   ;;  %vm950_vm1 = vcmask 523264   ;;  %s1751_s25 = ssub.s32 (%p3132_p4), 57, %s3140_s23  ;;  %s2304_s26 = smul.u32 (%p3132_p4), 116, %s3120_s15 }
  0x12   : > { %2389 = vmatpush3.bf16.msra.mxu0 %v2797_v1  ;;  %2695 = vmatpush3.bf16.msra.mxu1 %v2797_v1  ;;  %v2802_v6 = vld [vmem:[%s3813_s1 + $0x60] sm:$0xff]   ;;  %s2704_s10 = smul.u32 20, %s185_s5  ;;  %v2804_v8 = vld [vmem:[%s3813_s1 + $0x58] sm:$0xff]   ;;  %v2806_v10 = vld [vmem:[%s3813_s1 + $0x50] sm:$0xff]   ;;  %p1752_p8 = scmp.lt.s32.totalorder (%p3132_p4), %s1751_s25, 29 }
  0x13   : > { %2390 = vmatprep.subr.bf16.mxu0 %v2798_v2  ;;  %2688 = vmatprep.subr.bf16.mxu1 %v2798_v2  ;;  %v2803_v7 = vld [vmem:[%s3813_s1 + $0x20] sm:$0xff]   ;;  %v2805_v9 = vld [vmem:[%s3813_s1 + $0x18] sm:$0xff]   ;;  %v2807_v13 = vld [vmem:[%s3813_s1 + $0x10] sm:$0xff]   ;;  %s3695_s29 = scalar_lea.vmem (%p3132_p4), %s3815_s3, %s2304_s26  }
  0x14   : > { %s3171_s24 = scalar_lea.vmem %s3812_s0, %s2704_s10  ;;  %v2808_v14 = vld [vmem:[%s3813_s1 + $0x48] sm:$0xff]   ;;  %v2810_v16 = vld [vmem:[%s3813_s1 + $0x40] sm:$0xff]   ;;  %v2819_v20 = vld [vmem:[%s3813_s1 + $0xf8] sm:$0xff]  }
  0x15   : > { %v2814_v11 = vld [vmem:[%s3171_s24 + $0x4] ss:$20 sps:$4 sm:$0xff]   ;;  %v2809_v15 = vld [vmem:[%s3813_s1 + $0x8] sm:$0xff]   ;;  %v2812_v18 = vld [vmem:[%s3171_s24] ss:$20 sps:$4 sm:$0xff]  }
  0x16   : > { %2391 = vmatpush3.bf16.msra.mxu0 %v2799_v3  ;;  %2696 = vmatpush3.bf16.msra.mxu1 %v2799_v3  ;;  %v2817_v12 = vld [vmem:[%s3171_s24 + $0x144] ss:$20 sps:$4 sm:$0xff]   ;;  %v2815_v19 = vld [vmem:[%s3171_s24 + $0x140] ss:$20 sps:$4 sm:$0xff]   ;;  %v2825_v29 = vld [vmem:[%s3171_s24 + $0x28] ss:$20 sps:$4 sm:$0xff]  }
  0x17   : > { %2392 = vmatprep.subr.bf16.mxu0 %v2800_v4  ;;  %2689 = vmatprep.subr.bf16.mxu1 %v2800_v4  ;;  %v2811_v17 = vld [vmem:[%s3813_s1] sm:$0xff]   ;;  %v2818_v21 = vld [vmem:[%s3813_s1 + $0x118] sm:$0xff]   ;;  %v2827_v26 = vld [vmem:[%s3813_s1 + $0xf0] sm:$0xff]  }
  0x18   : > { %1028 = vmatprep.mubr.bf16.mxu0 %v2814_v11  ;;  %1092 = vmatprep.mubr.bf16.mxu1 %v2817_v12  ;;  %v2820_v22 = vld [vmem:[%s3813_s1 + $0xb8] sm:$0xff]   ;;  %v2821_v23 = vld [vmem:[%s3171_s24 + $0x2c] ss:$20 sps:$4 sm:$0xff]   ;;  %v2828_v27 = vld [vmem:[%s3813_s1 + $0xb0] sm:$0xff]  }
  0x19   : > { %v2823_v25 = vld [vmem:[%s3171_s24 + $0x16c] ss:$20 sps:$4 sm:$0xff]   ;;  %v2837_v28 = vld [vmem:[%s3813_s1 + $0x110] sm:$0xff]   ;;  %v2826_v31 = vld [vmem:[%s3171_s24 + $0x168] ss:$20 sps:$4 sm:$0xff]  }
  0x1a   : > { %2393 = vmatpush3.bf16.msra.mxu0 %v2801_v5  ;;  %2697 = vmatpush3.bf16.msra.mxu1 %v2801_v5  ;;  %v2835_v30 = vld [vmem:[%s3813_s1 + $0xe8] sm:$0xff]   ;;  %v2842_v35 = vld [vmem:[%s3813_s1 + $0xe0] sm:$0xff]   ;;  %v2846_v38 = vld [vmem:[%s3813_s1 + $0xd8] sm:$0xff]  }
  0x1b   : > { %2394 = vmatprep.subr.bf16.mxu0 %v2802_v6  ;;  %2690 = vmatprep.subr.bf16.mxu1 %v2802_v6  ;;  %v2829_v32 = vld [vmem:[%s3171_s24 + $0x54] ss:$20 sps:$4 sm:$0xff]   ;;  %v2845_v37 = vld [vmem:[%s3813_s1 + $0xa0] sm:$0xff]   ;;  %v2838_v41 = vld [vmem:[%s3171_s24 + $0x7c] ss:$20 sps:$4 sm:$0xff]  }
  0x1c   : > { %v2831_v33 = vld [vmem:[%s3171_s24 + $0x194] ss:$20 sps:$4 sm:$0xff]   ;;  %v2833_v39 = vld [vmem:[%s3171_s24 + $0x50] ss:$20 sps:$4 sm:$0xff]   ;;  %v2851_v43 = vld [vmem:[%s3813_s1 + $0x98] sm:$0xff]  }
  0x1d   : > { %v2836_v34 = vld [vmem:[%s3813_s1 + $0xa8] sm:$0xff]   ;;  %v2834_v40 = vld [vmem:[%s3171_s24 + $0x190] ss:$20 sps:$4 sm:$0xff]   ;;  %v2852_v54 = vld [vmem:[%s3171_s24 + $0xa0] ss:$20 sps:$4 sm:$0xff]  }
  0x1e   : > { %2395 = vmatpush3.bf16.msra.mxu0 %v2803_v7  ;;  %2698 = vmatpush3.bf16.msra.mxu1 %v2803_v7  ;;  %v2854_v36 = vld [vmem:[%s3813_s1 + $0x108] sm:$0xff]   ;;  %v2840_v42 = vld [vmem:[%s3171_s24 + $0x1bc] ss:$20 sps:$4 sm:$0xff]   ;;  %v2870_v45 = vld [vmem:[%s3813_s1 + $0x100] sm:$0xff]  }
  0x1f   : > { %2396 = vmatprep.subr.bf16.mxu0 %v2804_v8  ;;  %2691 = vmatprep.subr.bf16.mxu1 %v2804_v8  ;;  %v2855_v44 = vld [vmem:[%s3813_s1 + $0xd0] sm:$0xff]   ;;  %v2843_v46 = vld [vmem:[%s3171_s24 + $0x78] ss:$20 sps:$4 sm:$0xff]   ;;  %v2871_v53 = vld [vmem:[%s3813_s1 + $0xc0] sm:$0xff]  }
  0x20   : > { %v2856_v47 = vld [vmem:[%s3813_s1 + $0x90] sm:$0xff]   ;;  %v2863_v48 = vld [vmem:[%s3813_s1 + $0xc8] sm:$0xff]   ;;  %v2847_v50 = vld [vmem:[%s3171_s24 + $0xa4] ss:$20 sps:$4 sm:$0xff]  }
  0x21   : > { %v2844_v49 = vld [vmem:[%s3171_s24 + $0x1b8] ss:$20 sps:$4 sm:$0xff]   ;;  %v2872_v55 = vld [vmem:[%s3813_s1 + $0x80] sm:$0xff]   ;;  %v285_v59 = vld [vmem:[%s3171_s24 + $0x230] sm:$0xff] }
  0x22   : > { %2397 = vmatpush3.bf16.msra.mxu0 %v2805_v9  ;;  %2699 = vmatpush3.bf16.msra.mxu1 %v2805_v9  ;;  %v2849_v51 = vld [vmem:[%s3171_s24 + $0x1e4] ss:$20 sps:$4 sm:$0xff]   ;;  %v2864_v52 = vld [vmem:[%s3813_s1 + $0x88] sm:$0xff]   ;;  %v2853_v56 = vld [vmem:[%s3171_s24 + $0x1e0] ss:$20 sps:$4 sm:$0xff]   ;;  %v2150_v63 = vcombine.high %v285_v59, %v285_v59  ;;  %v2149_v1 = vcombine.low %v285_v59, %v285_v59 }
  0x23   : > { %2398 = vmatprep.subr.bf16.mxu0 %v2806_v10  ;;  %2692 = vmatprep.subr.bf16.mxu1 %v2806_v10  ;;  %v2857_v57 = vld [vmem:[%s3171_s24 + $0xcc] ss:$20 sps:$4 sm:$0xff]   ;;  %v2861_v60 = vld [vmem:[%s3171_s24 + $0xc8] ss:$20 sps:$4 sm:$0xff]   ;;  %v2868_v0 = vld [vmem:[%s3171_s24 + $0xf0] ss:$20 sps:$4 sm:$0xff]  }
  0x24   : > { %v2859_v58 = vld [vmem:[%s3171_s24 + $0x20c] ss:$20 sps:$4 sm:$0xff]   ;;  %v2862_v61 = vld [vmem:[%s3171_s24 + $0x208] ss:$20 sps:$4 sm:$0xff]   ;;  %v2881_v7 = vld [vmem:[%s3171_s24 + $0x30] ss:$20 sps:$4 sm:$0xff]  }
  0x25   : > { %v2865_v62 = vld [vmem:[%s3171_s24 + $0xf4] ss:$20 sps:$4 sm:$0xff]   ;;  %v2873_v2 = vld [vmem:[%s3171_s24 + $0x11c] ss:$20 sps:$4 sm:$0xff]   ;;  %v2877_v3 = vld [vmem:[%s3171_s24 + $0xc] ss:$20 sps:$4 sm:$0xff]  }
  0x26   : > { %2399 = vmatpush3.bf16.msra.mxu0 %v2807_v13  ;;  %2700 = vmatpush3.bf16.msra.mxu1 %v2807_v13  ;;  %v2875_v4 = vld [vmem:[%s3171_s24 + $0x8] ss:$20 sps:$4 sm:$0xff]   ;;  %v2878_v5 = vld [vmem:[%s3171_s24 + $0x118] ss:$20 sps:$4 sm:$0xff]   ;;  %v2882_v8 = vld [vmem:[%s3171_s24 + $0x10] ss:$20 sps:$4 sm:$0xff]  }
  0x27   : > { %2400 = vmatprep.subr.bf16.mxu0 %v2808_v14  ;;  %2693 = vmatprep.subr.bf16.mxu1 %v2808_v14  ;;  %v2879_v6 = vld [vmem:[%s3171_s24 + $0x34] ss:$20 sps:$4 sm:$0xff]   ;;  %v2883_v9 = vld [vmem:[%s3171_s24 + $0x5c] ss:$20 sps:$4 sm:$0xff]   ;;  %v2885_v10 = vld [vmem:[%s3171_s24 + $0x58] ss:$20 sps:$4 sm:$0xff]  }
  0x28   : > { %v2886_v11 = vld [vmem:[%s3171_s24 + $0x38] ss:$20 sps:$4 sm:$0xff]   ;;  %v2889_v13 = vld [vmem:[%s3171_s24 + $0x80] ss:$20 sps:$4 sm:$0xff]  }
  0x29   : > { %v2887_v12 = vld [vmem:[%s3171_s24 + $0x84] ss:$20 sps:$4 sm:$0xff]   ;;  %v2890_v14 = vld [vmem:[%s3171_s24 + $0x60] ss:$20 sps:$4 sm:$0xff]  }
  0x2a   : > { %2401 = vmatpush3.bf16.msra.mxu0 %v2809_v15  ;;  %2701 = vmatpush3.bf16.msra.mxu1 %v2809_v15  ;;  %v2891_v15 = vld [vmem:[%s3171_s24 + $0xac] ss:$20 sps:$4 sm:$0xff]  }
  0x2b   : > { %2402 = vmatprep.subr.bf16.mxu0 %v2810_v16  ;;  %2694 = vmatprep.subr.bf16.mxu1 %v2810_v16  ;;  %v2893_v16 = vld [vmem:[%s3171_s24 + $0xa8] ss:$20 sps:$4 sm:$0xff]  }
  0x2e   : > { %2403 = vmatpush3.bf16.msra.mxu0 %v2811_v17  ;;  %2702 = vmatpush3.bf16.msra.mxu1 %v2811_v17  ;;  %v2894_v17 = vld [vmem:[%s3171_s24 + $0x88] ss:$20 sps:$4 sm:$0xff]  }
  0x2f   : > { %2619 = vmatprep.subr.bf16.mxu0 %v3085_v24  ;;  %2494 = vmatprep.subr.bf16.mxu1 %v2819_v20  ;;  %v2898_v20 = vld [vmem:[%s3171_s24 + $0xb0] ss:$20 sps:$4 sm:$0xff]  }
  0x31   : > { %1029 = vmatmul.mubr.bf16.vlgmr.msra.gmra.mxu0 %v2812_v18  ;;  %1093 = vmatmul.mubr.bf16.vlgmr.msra.gmra.mxu1 %v2815_v19  ;;  %v2895_v18 = vld [vmem:[%s3171_s24 + $0xd4] ss:$20 sps:$4 sm:$0xff]   ;;  %v2897_v19 = vld [vmem:[%s3171_s24 + $0xd0] ss:$20 sps:$4 sm:$0xff]  }
  0x32   : > { %2620 = vmatpush3.bf16.msra.mxu0 %v2818_v21  ;;  %2495 = vmatpush3.bf16.msra.mxu1 %v2820_v22  ;;  %v2899_v21 = vld [vmem:[%s3171_s24 + $0xfc] ss:$20 sps:$4 sm:$0xff]   ;;  %v2901_v22 = vld [vmem:[%s3171_s24 + $0xf8] ss:$20 sps:$4 sm:$0xff]  }
  0x33   : > { %1036 = vmatprep.mubr.bf16.mxu0 %v2821_v23  ;;  %1100 = vmatprep.mubr.bf16.mxu1 %v2823_v25  ;;  %v2902_v23 = vld [vmem:[%s3171_s24 + $0xd8] ss:$20 sps:$4 sm:$0xff]  }
  0x34   : > { %2496 = vmatprep.subr.bf16.mxu1 %v2827_v26  ;;  %2621 = vmatprep.subr.bf16.mxu0 %v3085_v24  ;;  %v2903_v25 = vld [vmem:[%s3171_s24 + $0x124] ss:$20 sps:$4 sm:$0xff]   ;;  %v2905_v26 = vld [vmem:[%s3171_s24 + $0x120] ss:$20 sps:$4 sm:$0xff]  }
  0x36   : > { %2497 = vmatpush3.bf16.msra.mxu1 %v2828_v27  ;;  %2622 = vmatpush3.bf16.msra.mxu0 %v2837_v28  ;;  %v2906_v27 = vld [vmem:[%s3171_s24 + $0x100] ss:$20 sps:$4 sm:$0xff]  }
  0x37   : > { %2498 = vmatprep.subr.bf16.mxu1 %v2835_v30  ;;  %2623 = vmatprep.subr.bf16.mxu0 %v3085_v24  ;;  %v2907_v28 = vld [vmem:[%s3171_s24 + $0x14c] ss:$20 sps:$4 sm:$0xff]   ;;  %v2910_v30 = vld [vmem:[%s3171_s24 + $0x128] ss:$20 sps:$4 sm:$0xff]  }
  0x39   : > { %1037 = vmatmul.mubr.bf16.gmra.mxu0 %v2825_v29  ;;  %1101 = vmatmul.mubr.bf16.gmra.mxu1 %v2826_v31  ;;  %v2909_v29 = vld [vmem:[%s3171_s24 + $0x148] ss:$20 sps:$4 sm:$0xff]  }
  0x3a   : > { %1044 = vmatprep.mubr.bf16.mxu0 %v2829_v32  ;;  %1108 = vmatprep.mubr.bf16.mxu1 %v2831_v33  ;;  %v2911_v31 = vld [vmem:[%s3171_s24 + $0x174] ss:$20 sps:$4 sm:$0xff]   ;;  %v2913_v32 = vld [vmem:[%s3171_s24 + $0x170] ss:$20 sps:$4 sm:$0xff]  }
  0x3b   : > { %2499 = vmatpush3.bf16.msra.mxu1 %v2836_v34  ;;  %2624 = vmatpush3.bf16.msra.mxu0 %v2854_v36  ;;  %v2914_v33 = vld [vmem:[%s3171_s24 + $0x150] ss:$20 sps:$4 sm:$0xff]   ;;  %v2918_v36 = vld [vmem:[%s3171_s24 + $0x178] ss:$20 sps:$4 sm:$0xff]  }
  0x3c   : > { %2500 = vmatprep.subr.bf16.mxu1 %v2842_v35  ;;  %2625 = vmatprep.subr.bf16.mxu0 %v3085_v24  ;;  %v2915_v34 = vld [vmem:[%s3171_s24 + $0x19c] ss:$20 sps:$4 sm:$0xff]   ;;  %v2917_v35 = vld [vmem:[%s3171_s24 + $0x198] ss:$20 sps:$4 sm:$0xff]  }
  0x3f   : > { %2501 = vmatpush3.bf16.msra.mxu1 %v2845_v37  ;;  %2626 = vmatpush3.bf16.msra.mxu0 %v2870_v45  ;;  %v2919_v37 = vld [vmem:[%s3171_s24 + $0x1c4] ss:$20 sps:$4 sm:$0xff]  }
  0x40   : > { %2502 = vmatprep.subr.bf16.mxu1 %v2846_v38  ;;  %v2921_v38 = vld [vmem:[%s3171_s24 + $0x1c0] ss:$20 sps:$4 sm:$0xff]   ;;  %v2929_v45 = vld [vmem:[%s3171_s24 + $0x210] ss:$20 sps:$4 sm:$0xff]  }
  0x41   : > { %1045 = vmatmul.mubr.bf16.gmra.mxu0 %v2833_v39  ;;  %1109 = vmatmul.mubr.bf16.gmra.mxu1 %v2834_v40  ;;  %v2922_v39 = vld [vmem:[%s3171_s24 + $0x1a0] ss:$20 sps:$4 sm:$0xff]  }
  0x42   : > { %1052 = vmatprep.mubr.bf16.mxu0 %v2838_v41  ;;  %1116 = vmatprep.mubr.bf16.mxu1 %v2840_v42  ;;  %v2923_v40 = vld [vmem:[%s3171_s24 + $0x1ec] ss:$20 sps:$4 sm:$0xff]   ;;  %v2925_v41 = vld [vmem:[%s3171_s24 + $0x1e8] ss:$20 sps:$4 sm:$0xff]  }
  0x43   : > { %2503 = vmatpush3.bf16.msra.mxu1 %v2851_v43  ;;  %v2926_v42 = vld [vmem:[%s3171_s24 + $0x1c8] ss:$20 sps:$4 sm:$0xff]  }
  0x44   : > { %2504 = vmatprep.subr.bf16.mxu1 %v2855_v44  ;;  %v2927_v43 = vld [vmem:[%s3171_s24 + $0x214] ss:$20 sps:$4 sm:$0xff]   ;;  %v286_v44 = vld [vmem:[%s3171_s24 + $0x238] sm:$0xff] }
  0x47   : > { %2505 = vmatpush3.bf16.msra.mxu1 %v2856_v47  ;;  %v2152_v47 = vcombine.high %v286_v44, %v286_v44 }
  0x48   : > { %2506 = vmatprep.subr.bf16.mxu1 %v2863_v48  ;;  %v2151_v48 = vcombine.low %v286_v44, %v286_v44 }
  0x49   : > { %1053 = vmatmul.mubr.bf16.gmra.mxu0 %v2843_v46  ;;  %1117 = vmatmul.mubr.bf16.gmra.mxu1 %v2844_v49  ;;  %v2930_v46 = vld [vmem:[%s3171_s24 + $0x1f0] ss:$20 sps:$4 sm:$0xff]   ;;  %v2933_v49 = vld [vmem:[%s3171_s24 + $0x218] ss:$20 sps:$4 sm:$0xff]  }
  0x4a   : > { %1060 = vmatprep.mubr.bf16.mxu0 %v2847_v50  ;;  %1124 = vmatprep.mubr.bf16.mxu1 %v2849_v51  ;;  %v2934_v50 = vld [vmem:[%s3171_s24 + $0x240] ss:$0 sps:$4 sm:$0xff]   ;;  %s175_s24 = sand.u32 1, %s3043_s12  }
  0x4b   : > { %2507 = vmatpush3.bf16.msra.mxu1 %v2864_v52  ;;  %s2703_s22 = smul.u32 116, %s175_s24 }
  0x4c   : > { %2508 = vmatprep.subr.bf16.mxu1 %v2871_v53  ;;  %v3381_v53 = vld [vmem:[%s3814_s2] ss:$0 sm:$0xff] }
  0x4d   : > { %s3538_s12 = scalar_lea.vmem [#allocation2], %s2703_s22  }
  0x4f   : > { %2509 = vmatpush3.bf16.msra.mxu1 %v2872_v55 }
  0x51   : > { %1061 = vmatmul.mubr.bf16.gmra.mxu0 %v2852_v54  ;;  %1125 = vmatmul.mubr.bf16.gmra.mxu1 %v2853_v56 }
  0x52   : > { %1068 = vmatprep.mubr.bf16.mxu0 %v2857_v57  ;;  %1132 = vmatprep.mubr.bf16.mxu1 %v2859_v58 }
  0x59   : > { %1069 = vmatmul.mubr.bf16.gmra.mxu0 %v2861_v60  ;;  %1133 = vmatmul.mubr.bf16.gmra.mxu1 %v2862_v61 }
  0x5a   : > { %1076 = vmatprep.mubr.bf16.mxu0 %v2865_v62  ;;  %1140 = vmatprep.mubr.bf16.mxu1 %v2150_v63 }
  0x61   : > { %1077 = vmatmul.mubr.bf16.gmra.mxu0 %v2868_v0  ;;  %1141 = vmatmul.mubr.bf16.gmra.mxu1 %v2149_v1 }
  0x62   : > { %1084 = vmatprep.mubr.bf16.mxu0 %v2873_v2  ;;  %1180 = vmatprep.mubr.bf16.mxu1 %v2877_v3 }
  0x69   : > { %1085 = vmatmul.mubr.bf16.gmra.mxu0 %v2878_v5  ;;  %1181 = vmatmul.mubr.bf16.vlgmr.msra.gmra.mxu1 %v2875_v4 }
  0x6a   : > { %1188 = vmatprep.mubr.bf16.mxu1 %v2879_v6  ;;  %2627 = vmatprep.mubr.msk.bf16.mxu0 %vm3086_vm0, %v3085_v24 }
  0x71   : > { %1189 = vmatmul.mubr.bf16.gmra.mxu1 %v2881_v7  ;;  %2628 = vmatmul.mubr.msk.bf16.vlgmr.msra.gmra.mxu0 %vm950_vm1, %v2882_v8 }
  0x72   : > { %1196 = vmatprep.mubr.bf16.mxu1 %v2883_v9  ;;  %2631 = vmatprep.mubr.msk.bf16.mxu0 %vm3086_vm0, %v3085_v24 }
  0x79   : > { %1197 = vmatmul.mubr.bf16.gmra.mxu1 %v2885_v10  ;;  %2632 = vmatmul.mubr.msk.bf16.gmra.mxu0 %vm950_vm1, %v2886_v11 }
  0x7a   : > { %1204 = vmatprep.mubr.bf16.mxu1 %v2887_v12  ;;  %2635 = vmatprep.mubr.msk.bf16.mxu0 %vm3086_vm0, %v3085_v24 }
  0x81   : > { %1205 = vmatmul.mubr.bf16.gmra.mxu1 %v2889_v13  ;;  %2636 = vmatmul.mubr.msk.bf16.gmra.mxu0 %vm950_vm1, %v2890_v14 }
  0x82   : > { %1212 = vmatprep.mubr.bf16.mxu1 %v2891_v15  ;;  %2639 = vmatprep.mubr.msk.bf16.mxu0 %vm3086_vm0, %v3085_v24 }
  0x89   : > { %1213 = vmatmul.mubr.bf16.gmra.mxu1 %v2893_v16  ;;  %2640 = vmatmul.mubr.msk.bf16.gmra.mxu0 %vm950_vm1, %v2894_v17 }
  0x8a   : > { %1220 = vmatprep.mubr.bf16.mxu1 %v2895_v18  ;;  %2643 = vmatprep.mubr.msk.bf16.mxu0 %vm3086_vm0, %v3085_v24 }
  0x91   : > { %1221 = vmatmul.mubr.bf16.gmra.mxu1 %v2897_v19  ;;  %2644 = vmatmul.mubr.msk.bf16.gmra.mxu0 %vm950_vm1, %v2898_v20 }
  0x92   : > { %1228 = vmatprep.mubr.bf16.mxu1 %v2899_v21  ;;  %2647 = vmatprep.mubr.msk.bf16.mxu0 %vm3086_vm0, %v3085_v24 }
  0x99   : > { %1229 = vmatmul.mubr.bf16.gmra.mxu1 %v2901_v22  ;;  %2648 = vmatmul.mubr.msk.bf16.gmra.mxu0 %vm950_vm1, %v2902_v23 }
  0x9a   : > { %1236 = vmatprep.mubr.bf16.mxu1 %v2903_v25  ;;  %2651 = vmatprep.mubr.msk.bf16.mxu0 %vm3086_vm0, %v3085_v24 }
  0xa1   : > { %1237 = vmatmul.mubr.bf16.gmra.mxu1 %v2905_v26  ;;  %2652 = vmatmul.mubr.msk.bf16.gmra.mxu0 %vm950_vm1, %v2906_v27 }
  0xa2   : > { %1244 = vmatprep.mubr.bf16.mxu1 %v2907_v28  ;;  %2655 = vmatprep.mubr.msk.bf16.mxu0 %vm3086_vm0, %v3085_v24 }
  0xa9   : > { %1245 = vmatmul.mubr.bf16.gmra.mxu1 %v2909_v29  ;;  %2656 = vmatmul.mubr.msk.bf16.gmra.mxu0 %vm950_vm1, %v2910_v30 }
  0xaa   : > { %1252 = vmatprep.mubr.bf16.mxu1 %v2911_v31  ;;  %2659 = vmatprep.mubr.msk.bf16.mxu0 %vm3086_vm0, %v3085_v24 }
  0xb1   : > { %1253 = vmatmul.mubr.bf16.gmra.mxu1 %v2913_v32  ;;  %2660 = vmatmul.mubr.msk.bf16.gmra.mxu0 %vm950_vm1, %v2914_v33 }
  0xb2   : > { %1260 = vmatprep.mubr.bf16.mxu1 %v2915_v34  ;;  %2663 = vmatprep.mubr.msk.bf16.mxu0 %vm3086_vm0, %v3085_v24 }
  0xb9   : > { %1261 = vmatmul.mubr.bf16.gmra.mxu1 %v2917_v35  ;;  %2664 = vmatmul.mubr.msk.bf16.gmra.mxu0 %vm950_vm1, %v2918_v36 }
  0xba   : > { %1268 = vmatprep.mubr.bf16.mxu1 %v2919_v37  ;;  %2667 = vmatprep.mubr.msk.bf16.mxu0 %vm3086_vm0, %v3085_v24 }
  0xc1   : > { %1269 = vmatmul.mubr.bf16.gmra.mxu1 %v2921_v38  ;;  %2668 = vmatmul.mubr.msk.bf16.gmra.mxu0 %vm950_vm1, %v2922_v39 }
  0xc2   : > { %1276 = vmatprep.mubr.bf16.mxu1 %v2923_v40  ;;  %2671 = vmatprep.mubr.msk.bf16.mxu0 %vm3086_vm0, %v3085_v24 }
  0xc9   : > { %1277 = vmatmul.mubr.bf16.gmra.mxu1 %v2925_v41  ;;  %2672 = vmatmul.mubr.msk.bf16.gmra.mxu0 %vm950_vm1, %v2926_v42 }
  0xca   : > { %1284 = vmatprep.mubr.bf16.mxu1 %v2927_v43  ;;  %2675 = vmatprep.mubr.msk.bf16.mxu0 %vm3086_vm0, %v3085_v24 }
  0xd1   : > { %1285 = vmatmul.mubr.bf16.gmra.mxu1 %v2929_v45  ;;  %2676 = vmatmul.mubr.msk.bf16.gmra.mxu0 %vm950_vm1, %v2930_v46 }
  0xd2   : > { %1292 = vmatprep.mubr.bf16.mxu1 %v2152_v47  ;;  %2679 = vmatprep.mubr.msk.bf16.mxu0 %vm3086_vm0, %v3085_v24 }
  0xd9   : > { %1293 = vmatmul.mubr.bf16.gmra.mxu1 %v2151_v48  ;;  %2680 = vmatmul.mubr.msk.bf16.gmra.mxu0 %vm950_vm1, %v2933_v49 }
  0xda   : > { %2683 = vmatprep.mubr.msk.bf16.mxu0 %vm3086_vm0, %v3085_v24 }
  0xe1   : > { %2684 = vmatmul.mubr.msk.bf16.gmra.mxu0 %vm950_vm1, %v2934_v50 }
  0xf1   : > { %v3376_v51 = vpop.f32.mrf.mxu0  ;;  %v2452_v52 = vpop.f32.mrf.mxu1 }
  0xf3   : > { %v3383_v54 = vpop.f32.mrf.mxu0  ;;  %v2453_v55 = vpop.f32.mrf.mxu1 }
  0xf4   : > { %v2454_v56 = vadd.f32 %v2453_v55, %v2452_v52 }
  0xf5   : > { %v3385_v57 = vpop.f32.mrf.mxu0  ;;  %v2455_v58 = vpop.f32.mrf.mxu1 }
  0xf6   : > { %v3388_v24 = vadd.f32 %v2454_v56, %v3381_v53 }
  0xf7   : > { %v3390_v59 = vpop.f32.mrf.mxu0  ;;  %v2456_v60 = vpop.f32.mrf.mxu1 }
  0xf8   : > { %v2457_v61 = vadd.f32 %v2456_v60, %v2455_v58 }
  0xf9   : > { %v3392_v62 = vpop.f32.mrf.mxu0  ;;  %v2458_v63 = vpop.f32.mrf.mxu1 }
  0xfa   : > { %v3395_v0 = vadd.f32 %v2457_v61, %v3381_v53 }
  0xfb   : > { %v3397_v1 = vpop.f32.mrf.mxu0  ;;  %v2459_v2 = vpop.f32.mrf.mxu1 }
  0xfc   : > { %v2460_v3 = vadd.f32 %v2459_v2, %v2458_v63 }
  0xfd   : > { %v3399_v4 = vpop.f32.mrf.mxu0  ;;  %v2461_v5 = vpop.f32.mrf.mxu1 }
  0xfe   : > { %v3402_v6 = vadd.f32 %v2460_v3, %v3381_v53 }
  0xff   : > { %v3404_v7 = vpop.f32.mrf.mxu0  ;;  %v2462_v8 = vpop.f32.mrf.mxu1 }
 0x100   : > { %v2463_v9 = vadd.f32 %v2462_v8, %v2461_v5 }
 0x101   : > { %v3406_v10 = vpop.f32.mrf.mxu0  ;;  %v2464_v11 = vpop.f32.mrf.mxu1 }
 0x102   : > { %v3409_v12 = vadd.f32 %v2463_v9, %v3381_v53 }
 0x103   : > { %v3411_v13 = vpop.f32.mrf.mxu0  ;;  %v2465_v14 = vpop.f32.mrf.mxu1 }
 0x104   : > { %v2466_v15 = vadd.f32 %v2465_v14, %v2464_v11 }
 0x105   : > { %v3413_v16 = vpop.f32.mrf.mxu0  ;;  %v2467_v17 = vpop.f32.mrf.mxu1 }
 0x106   : > { %v3416_v18 = vadd.f32 %v2466_v15, %v3381_v53 }
 0x107   : > { %v3418_v19 = vpop.f32.mrf.mxu0  ;;  %v2468_v20 = vpop.f32.mrf.mxu1 }
 0x108   : > { %v2469_v21 = vadd.f32 %v2468_v20, %v2467_v17 }
 0x109   : > { %v3420_v22 = vpop.f32.mrf.mxu0  ;;  %v2470_v23 = vpop.f32.mrf.mxu1 }
 0x10a   : > { %v3423_v25 = vadd.f32 %v2469_v21, %v3381_v53 }
 0x10b   : > { %v3425_v26 = vpop.f32.mrf.mxu0  ;;  %v2471_v27 = vpop.f32.mrf.mxu1 }
 0x10c   : > { %v2472_v28 = vadd.f32 %v2471_v27, %v2470_v23 }
 0x10d   : > { %v3427_v29 = vpop.f32.mrf.mxu0  ;;  %v2473_v30 = vpop.f32.mrf.mxu1 }
 0x10e   : > { %v3430_v31 = vadd.f32 %v2472_v28, %v3381_v53 }
 0x10f   : > { %v3432_v32 = vpop.f32.mrf.mxu0  ;;  %v2474_v33 = vpop.f32.mrf.mxu1 }
 0x110   : > { %v2475_v34 = vadd.f32 %v2474_v33, %v2473_v30  ;;  %v2406_v30 = vadd.f32 %v3383_v54, %v3376_v51  ;;  %v2412_v54 = vadd.f32 %v3397_v1, %v3392_v62 }
 0x111   : > { %v3434_v35 = vpop.f32.mrf.mxu0  ;;  %v2476_v36 = vpop.f32.mrf.mxu1 }
 0x112   : > { %v3437_v37 = vadd.f32 %v2475_v34, %v3381_v53 }
 0x113   : > { %v3439_v38 = vpop.f32.mrf.mxu0  ;;  %v2477_v39 = vpop.f32.mrf.mxu1 }
 0x114   : > { %v2478_v40 = vadd.f32 %v2477_v39, %v2476_v36 }
 0x115   : > { %v3441_v41 = vpop.f32.mrf.mxu0  ;;  %v2479_v42 = vpop.f32.mrf.mxu1 }
 0x116   : > { %v3444_v43 = vadd.f32 %v2478_v40, %v3381_v53 }
 0x117   : > { %v3446_v44 = vpop.f32.mrf.mxu0  ;;  %v2480_v45 = vpop.f32.mrf.mxu1 }
 0x118   : > { %v2481_v46 = vadd.f32 %v2480_v45, %v2479_v42  ;;  %v1031_v42 = vadd.f32 %v2406_v30, %v3381_v53  ;;  %v2409_v45 = vadd.f32 %v3390_v59, %v3385_v57  ;;  %v2415_v30 = vadd.f32 %v3404_v7, %v3399_v4 }
 0x119   : > { %v3448_v47 = vpop.f32.mrf.mxu0  ;;  %v2482_v48 = vpop.f32.mrf.mxu1 }
 0x11a   : > { %v3451_v49 = vadd.f32 %v2481_v46, %v3381_v53  ;;  %v1034_v51 = vadd.f32 %v2409_v45, %v3381_v53 }
 0x11b   : > { %v3453_v50 = vpop.f32.mrf.mxu0  ;;  %v2483_v52 = vpop.f32.mrf.mxu1 }
 0x11c   : > { %v2484_v55 = vadd.f32 %v2483_v52, %v2482_v48 }
 0x11d   : > { %v3455_v56 = vpop.f32.mrf.mxu0  ;;  %v2485_v58 = vpop.f32.mrf.mxu1 }
 0x11e   : > { %v3458_v60 = vadd.f32 %v2484_v55, %v3381_v53 }
 0x11f   : > { %v3460_v61 = vpop.f32.mrf.mxu0  ;;  %v2486_v63 = vpop.f32.mrf.mxu1 }
 0x120   : > { %v2487_v2 = vadd.f32 %v2486_v63, %v2485_v58 }
 0x121   : > { %v3462_v3 = vpop.f32.mrf.mxu0  ;;  %v2488_v5 = vpop.f32.mrf.mxu1 }
 0x122   : > { %v3465_v8 = vadd.f32 %v2487_v2, %v3381_v53 }
 0x123   : > { %v3467_v9 = vpop.f32.mrf.mxu0  ;;  %v2489_v11 = vpop.f32.mrf.mxu1 }
 0x124   : > { %v2490_v14 = vadd.f32 %v2489_v11, %v2488_v5 }
 0x125   : > { %v3469_v15 = vpop.f32.mrf.mxu0  ;;  %v2491_v17 = vpop.f32.mrf.mxu1 }
 0x126   : > { %v3472_v20 = vadd.f32 %v2490_v14, %v3381_v53 }
 0x127   : > { %v3474_v21 = vpop.f32.mrf.mxu0  ;;  %v2492_v23 = vpop.f32.mrf.mxu1 }
 0x129   : > { %v3476_v27 = vpop.f32.mrf.mxu0  ;;  %v2510_v28 = vpop.f32.mrf.mxu1 }
 0x12b   : > { %v3480_v33 = vpop.f32.mrf.mxu0  ;;  %v2511_v34 = vpop.f32.mrf.mxu1 }
 0x12c   : > { %v2512_v36 = vadd.f32 %v2511_v34, %v2510_v28  ;;  %v1039_v28 = vadd.f32 %v2412_v54, %v3381_v53 }
 0x12d   : > { %v3482_v39 = vpop.f32.mrf.mxu0  ;;  %v2513_v40 = vpop.f32.mrf.mxu1 }
 0x12e   : > { %v1183_v55 = vadd.f32 %v2512_v36, %v1031_v42 }
 0x12f   : > { %v3487_v46 = vpop.f32.mrf.mxu0  ;;  %v2514_v48 = vpop.f32.mrf.mxu1 }
 0x130   : > { %v2515_v52 = vadd.f32 %v2514_v48, %v2513_v40 }
 0x131   : > { %v2516_v58 = vpop.f32.mrf.mxu1  ;;  %v1334_v63 = vpop.f32.mrf.mxu0 }
 0x132   : > { %v3492_v2 = vadd.f32 %v1334_v63, %v1183_v55  ;;  %v1186_v57 = vadd.f32 %v2515_v52, %v1034_v51  ;;  %v1042_v52 = vadd.f32 %v2415_v30, %v3381_v53  ;;  %v2418_v55 = vadd.f32 %v3411_v13, %v3406_v10 }
 0x133   : > { %v2517_v5 = vpop.f32.mrf.mxu1  ;;  %v2629_v11 = vpop.f32.mrf.mxu0 }
 0x134   : > { %v1481_v14 = vmul.f32 1.442695, %v3492_v2  ;;  %v2518_v17 = vadd.f32 %v2517_v5, %v2516_v58  ;;  %vm1452_vm2 = vcmp.gt.f32.partialorder %v3492_v2, 0.0 }
 0x135   : > { %v2519_v59 = vpop.f32.mrf.mxu1  ;;  %v1337_v23 = vpop.f32.mrf.mxu0 }
 0x136   : > { %2935 = vpow2.f32 %v1481_v14  ;;  %v3498_v34 = vadd.f32 %v1337_v23, %v1186_v57  ;;  %v1191_v42 = vadd.f32 %v2518_v17, %v1039_v28  ;;  %v1047_v14 = vadd.f32 %v2418_v55, %v3381_v53 }
 0x137   : > { %v2520_v36 = vpop.f32.mrf.mxu1  ;;  %v2630_v62 = vpop.f32.mrf.mxu0  ;;  %v2421_v17 = vadd.f32 %v3418_v19, %v3413_v16  ;;  %v2427_v55 = vadd.f32 %v3432_v32, %v3427_v29  ;;  %v2430_v29 = vadd.f32 %v3439_v38, %v3434_v35 }
 0x138   : > { %v1483_v1 = vmul.f32 1.442695, %v3498_v34  ;;  %v2521_v40 = vadd.f32 %v2520_v36, %v2519_v59  ;;  %vm1453_vm3 = vcmp.gt.f32.partialorder %v3498_v34, 0.0 }
 0x139   : > { %v2522_v45 = vpop.f32.mrf.mxu1  ;;  %v1342_v48 = vpop.f32.mrf.mxu0  ;;  %v1050_v62 = vadd.f32 %v2421_v17, %v3381_v53 }
 0x13a   : > { %2937 = vpow2.f32 %v1483_v1  ;;  %v3504_v58 = vadd.f32 %v1342_v48, %v1191_v42  ;;  %v1194_v54 = vadd.f32 %v2521_v40, %v1042_v52  ;;  %v2424_v1 = vadd.f32 %v3425_v26, %v3420_v22 }
 0x13b   : > { %v2523_v4 = vpop.f32.mrf.mxu1  ;;  %v2633_v7 = vpop.f32.mrf.mxu0 }
 0x13c   : > { %v1485_v63 = vmul.f32 1.442695, %v3504_v58  ;;  %v2524_v51 = vadd.f32 %v2523_v4, %v2522_v45  ;;  %vm1454_vm4 = vcmp.gt.f32.partialorder %v3504_v58, 0.0 }
 0x13d   : > { %v2525_v5 = vpop.f32.mrf.mxu1  ;;  %v1345_v11 = vpop.f32.mrf.mxu0 }
 0x13e   : > { %2939 = vpow2.f32 %v1485_v63  ;;  %v3510_v57 = vadd.f32 %v1345_v11, %v1194_v54  ;;  %v1199_v28 = vadd.f32 %v2524_v51, %v1047_v14  ;;  %v1055_v63 = vadd.f32 %v2424_v1, %v3381_v53 }
 0x13f   : > { %v2526_v10 = vpop.f32.mrf.mxu1  ;;  %v2634_v13 = vpop.f32.mrf.mxu0 }
 0x140   : > { %v1487_v59 = vmul.f32 1.442695, %v3510_v57  ;;  %v2527_v23 = vadd.f32 %v2526_v10, %v2525_v5  ;;  %v1058_v13 = vadd.f32 %v2427_v55, %v3381_v53  ;;  %vm1455_vm5 = vcmp.gt.f32.partialorder %v3510_v57, 0.0 }
 0x141   : > { %v2528_v30 = vpop.f32.mrf.mxu1  ;;  %v1350_v36 = vpop.f32.mrf.mxu0 }
 0x142   : > { %2941 = vpow2.f32 %v1487_v59  ;;  %v3516_v40 = vadd.f32 %v1350_v36, %v1199_v28  ;;  %v1202_v52 = vadd.f32 %v2527_v23, %v1050_v62 }
 0x143   : > { %v2936_v16 = vpop.eup %2935  ;;  %v2529_v19 = vpop.f32.mrf.mxu1 }
 0x144   : > { %v2637_v42 = vpop.f32.mrf.mxu0  ;;  %v1489_v45 = vmul.f32 1.442695, %v3516_v40  ;;  %v2530_v48 = vadd.f32 %v2529_v19, %v2528_v30  ;;  %v2205_v51 = vadd.f32 -1.0, %v2936_v16  ;;  %vm1456_vm6 = vcmp.gt.f32.partialorder %v3516_v40, 0.0 }
 0x145   : > { %v2531_v4 = vpop.f32.mrf.mxu1  ;;  %v2433_v42 = vadd.f32 %v3446_v44, %v3441_v41 }
 0x146   : > { %v1353_v7 = vpop.f32.mrf.mxu0  ;;  %2943 = vpow2.f32 %v1489_v45  ;;  %v1207_v10 = vadd.f32 %v2530_v48, %v1055_v63  ;;  %v1568_v23 = vsel %vm1452_vm2, %v3492_v2, %v2205_v51  ;;  %v1063_v45 = vadd.f32 %v2430_v29, %v3381_v53 }
 0x147   : > { %v3523_v22 = vadd.f32 %v1353_v7, %v1202_v52  ;;  %v2938_v26 = vpop.eup %2937  ;;  %v2532_v54 = vpop.f32.mrf.mxu1  ;;  %v1066_v44 = vadd.f32 %v2433_v42, %v3381_v53 }
 0x148   : > { %v2638_v5 = vpop.f32.mrf.mxu0  ;;  %v2206_v11 = vadd.f32 -1.0, %v2938_v26  ;;  %v2533_v17 = vadd.f32 %v2532_v54, %v2531_v4  ;;  %v2436_v54 = vadd.f32 %v3453_v50, %v3448_v47 }
 0x149   : > { %v1491_v14 = vmul.f32 1.442695, %v3523_v22  ;;  %v2534_v32 = vpop.f32.mrf.mxu1  ;;  %vm1457_vm7 = vcmp.gt.f32.partialorder %v3523_v22, 0.0 }
 0x14a   : > { %v1358_v59 = vpop.f32.mrf.mxu0  ;;  %v1569_v28 = vsel %vm1453_vm3, %v3498_v34, %v2206_v11  ;;  %v1210_v38 = vadd.f32 %v2533_v17, %v1058_v13 }
 0x14b   : > { %2945 = vpow2.f32 %v1491_v14  ;;  %v3533_v30 = vadd.f32 %v1358_v59, %v1207_v10  ;;  %v2940_v36 = vpop.eup %2939  ;;  %v2308_v62 = vpack.c.bf16 %v1569_v28, %v1568_v23  ;;  %v2535_v1 = vpop.f32.mrf.mxu1  ;;  %v2439_v28 = vadd.f32 %v3460_v61, %v3455_v56 }
 0x14c   : > { %v2641_v16 = vpop.f32.mrf.mxu0  ;;  %v2536_v35 = vadd.f32 %v2535_v1, %v2534_v32  ;;  %v2207_v48 = vadd.f32 -1.0, %v2940_v36  ;;  %v2442_v56 = vadd.f32 %v3467_v9, %v3462_v3 }
 0x14d   : > { %v1493_v19 = vmul.f32 1.442695, %v3533_v30  ;;  %2309 = vst [vmem:[%s3538_s12] sm:$0xff] %v2308_v62   ;;  %v2537_v2 = vpop.f32.mrf.mxu1  ;;  %vm1458_vm8 = vcmp.gt.f32.partialorder %v3533_v30, 0.0 }
 0x14e   : > { %v1361_v34 = vpop.f32.mrf.mxu0  ;;  %v1215_v41 = vadd.f32 %v2536_v35, %v1063_v45  ;;  %v1570_v14 = vsel %vm1454_vm4, %v3504_v58, %v2207_v48  ;;  %v1071_v58 = vadd.f32 %v2436_v54, %v3381_v53  ;;  %v1074_v45 = vadd.f32 %v2439_v28, %v3381_v53 }
 0x14f   : > { %2947 = vpow2.f32 %v1493_v19  ;;  %v3542_v52 = vadd.f32 %v1361_v34, %v1210_v38  ;;  %v2942_v55 = vpop.eup %2941  ;;  %v2538_v4 = vpop.f32.mrf.mxu1  ;;  %v2445_v54 = vadd.f32 %v3474_v21, %v3469_v15  ;;  %v2448_v15 = vadd.f32 %v3480_v33, %v3476_v27 }
 0x150   : > { %v2642_v7 = vpop.f32.mrf.mxu0  ;;  %v2208_v63 = vadd.f32 -1.0, %v2942_v55  ;;  %v2539_v26 = vadd.f32 %v2538_v4, %v2537_v2 }
 0x151   : > { %v1495_v51 = vmul.f32 1.442695, %v3542_v52  ;;  %v2540_v5 = vpop.f32.mrf.mxu1  ;;  %vm1459_vm9 = vcmp.gt.f32.partialorder %v3542_v52, 0.0 }
 0x152   : > { %v1366_v11 = vpop.f32.mrf.mxu0  ;;  %v1571_v17 = vsel %vm1455_vm5, %v3510_v57, %v2208_v63  ;;  %v1218_v23 = vadd.f32 %v2539_v26, %v1066_v44 }
 0x153   : > { %2949 = vpow2.f32 %v1495_v51  ;;  %v3552_v10 = vadd.f32 %v1366_v11, %v1215_v41  ;;  %v2944_v13 = vpop.eup %2943  ;;  %v2313_v29 = vpack.c.bf16 %v1571_v17, %v1570_v14  ;;  %v2541_v32 = vpop.f32.mrf.mxu1 }
 0x154   : > { %v2645_v59 = vpop.f32.mrf.mxu0  ;;  %v2542_v50 = vadd.f32 %v2541_v32, %v2540_v5  ;;  %v2209_v57 = vadd.f32 -1.0, %v2944_v13 }
 0x155   : > { %v1497_v47 = vmul.f32 1.442695, %v3552_v10  ;;  %2375 = vst [vmem:[%s3538_s12 + $0x8] sm:$0xff] %v2313_v29   ;;  %v2543_v36 = vpop.f32.mrf.mxu1  ;;  %vm1460_vm10 = vcmp.gt.f32.partialorder %v3552_v10, 0.0 }
 0x156   : > { %v1369_v62 = vpop.f32.mrf.mxu0  ;;  %v1223_v34 = vadd.f32 %v2542_v50, %v1071_v58  ;;  %v1572_v55 = vsel %vm1456_vm6, %v3516_v40, %v2209_v57  ;;  %v1079_v40 = vadd.f32 %v2442_v56, %v3381_v53 }
 0x157   : > { %2951 = vpow2.f32 %v1497_v47  ;;  %v3559_v1 = vadd.f32 %v1369_v62, %v1218_v23  ;;  %v2544_v19 = vpop.f32.mrf.mxu1  ;;  %v1082_v23 = vadd.f32 %v2445_v54, %v3381_v53 }
 0x158   : > { %v2946_v16 = vpop.eup %2945  ;;  %v2646_v35 = vpop.f32.mrf.mxu0  ;;  %v2545_v2 = vadd.f32 %v2544_v19, %v2543_v36 }
 0x159   : > { %v2210_v38 = vadd.f32 -1.0, %v2946_v16  ;;  %v1499_v42 = vmul.f32 1.442695, %v3559_v1  ;;  %v2546_v61 = vpop.f32.mrf.mxu1  ;;  %vm1461_vm11 = vcmp.gt.f32.partialorder %v3559_v1, 0.0 }
 0x15a   : > { %v1374_v48 = vpop.f32.mrf.mxu0  ;;  %v1226_v44 = vadd.f32 %v2545_v2, %v1074_v45 }
 0x15b   : > { %v1573_v4 = vsel %vm1457_vm7, %v3523_v22, %v2210_v38  ;;  %2953 = vpow2.f32 %v1499_v42  ;;  %v3569_v7 = vadd.f32 %v1374_v48, %v1223_v34  ;;  %v2547_v26 = vpop.f32.mrf.mxu1  ;;  %v2451_v42 = vadd.f32 %v3487_v46, %v3482_v39 }
 0x15c   : > { %v2948_v63 = vpop.eup %2947  ;;  %v2318_v51 = vpack.c.bf16 %v1573_v4, %v1572_v55  ;;  %v2649_v41 = vpop.f32.mrf.mxu0  ;;  %v2548_v9 = vadd.f32 %v2547_v26, %v2546_v61 }
 0x15d   : > { %v1501_v3 = vmul.f32 1.442695, %v3569_v7  ;;  %v2549_v5 = vpop.f32.mrf.mxu1  ;;  %v2211_v22 = vadd.f32 -1.0, %v2948_v63  ;;  %v1090_v26 = vadd.f32 %v2451_v42, %v3381_v53  ;;  %vm1462_vm12 = vcmp.gt.f32.partialorder %v3569_v7, 0.0 }
 0x15e   : > { %2376 = vst [vmem:[%s3538_s12 + $0x10] sm:$0xff] %v2318_v51   ;;  %v1377_v11 = vpop.f32.mrf.mxu0  ;;  %v1231_v50 = vadd.f32 %v2548_v9, %v1079_v40 }
 0x15f   : > { %2955 = vpow2.f32 %v1501_v3  ;;  %v3576_v14 = vadd.f32 %v1377_v11, %v1226_v44  ;;  %v2550_v13 = vpop.f32.mrf.mxu1  ;;  %v1574_v36 = vsel %vm1458_vm8, %v3533_v30, %v2211_v22  ;;  %v1087_v30 = vadd.f32 %v2448_v15, %v3381_v53 }
 0x160   : > { %v2950_v17 = vpop.eup %2949  ;;  %v2650_v29 = vpop.f32.mrf.mxu0  ;;  %v2551_v47 = vadd.f32 %v2550_v13, %v2549_v5 }
 0x161   : > { %v2212_v32 = vadd.f32 -1.0, %v2950_v17  ;;  %v1503_v59 = vmul.f32 1.442695, %v3576_v14  ;;  %v2552_v21 = vpop.f32.mrf.mxu1  ;;  %vm1463_vm13 = vcmp.gt.f32.partialorder %v3576_v14, 0.0 }
 0x162   : > { %v1382_v28 = vpop.f32.mrf.mxu0  ;;  %v1234_v38 = vadd.f32 %v2551_v47, %v1082_v23 }
 0x163   : > { %v1575_v62 = vsel %vm1459_vm9, %v3542_v52, %v2212_v32  ;;  %2957 = vpow2.f32 %v1503_v59  ;;  %v3586_v58 = vadd.f32 %v1382_v28, %v1231_v50  ;;  %v2553_v19 = vpop.f32.mrf.mxu1 }
 0x164   : > { %v2952_v57 = vpop.eup %2951  ;;  %v2323_v16 = vpack.c.bf16 %v1575_v62, %v1574_v36  ;;  %v2653_v35 = vpop.f32.mrf.mxu0  ;;  %v2554_v33 = vadd.f32 %v2553_v19, %v2552_v21 }
 0x165   : > { %v1505_v27 = vmul.f32 1.442695, %v3586_v58  ;;  %v2555_v2 = vpop.f32.mrf.mxu1  ;;  %v2213_v52 = vadd.f32 -1.0, %v2952_v57  ;;  %vm1464_vm14 = vcmp.gt.f32.partialorder %v3586_v58, 0.0 }
 0x166   : > { %2377 = vst [vmem:[%s3538_s12 + $0x18] sm:$0xff] %v2323_v16   ;;  %v1385_v34 = vpop.f32.mrf.mxu0  ;;  %v1239_v51 = vadd.f32 %v2554_v33, %v1087_v30 }
 0x167   : > { %2959 = vpow2.f32 %v1505_v27  ;;  %v3593_v45 = vadd.f32 %v1385_v34, %v1234_v38  ;;  %v2556_v61 = vpop.f32.mrf.mxu1  ;;  %v1576_v41 = vsel %vm1460_vm10, %v3552_v10, %v2213_v52 }
 0x168   : > { %v2954_v56 = vpop.eup %2953  ;;  %v2654_v48 = vpop.f32.mrf.mxu0  ;;  %v2557_v63 = vadd.f32 %v2556_v61, %v2555_v2 }
 0x169   : > { %v2214_v55 = vadd.f32 -1.0, %v2954_v56  ;;  %v1507_v4 = vmul.f32 1.442695, %v3593_v45  ;;  %v2558_v39 = vpop.f32.mrf.mxu1  ;;  %vm1465_vm15 = vcmp.gt.f32.partialorder %v3593_v45, 0.0 }
 0x16a   : > { %v1390_v46 = vpop.f32.mrf.mxu0  ;;  %v1242_v22 = vadd.f32 %v2557_v63, %v1090_v26 }
 0x16b   : > { %v1577_v3 = vsel %vm1461_vm11, %v3559_v1, %v2214_v55  ;;  %2961 = vpow2.f32 %v1507_v4  ;;  %v3601_v9 = vadd.f32 %v1390_v46, %v1239_v51  ;;  %v2559_v5 = vpop.f32.mrf.mxu1 }
 0x16c   : > { %v2956_v44 = vpop.eup %2955  ;;  %v2328_v54 = vpack.c.bf16 %v1577_v3, %v1576_v41  ;;  %v2657_v11 = vpop.f32.mrf.mxu0  ;;  %v2560_v40 = vadd.f32 %v2559_v5, %v2558_v39 }
 0x16d   : > { %v1509_v53 = vmul.f32 1.442695, %v3601_v9  ;;  %v2561_v17 = vpop.f32.mrf.mxu1  ;;  %v2215_v29 = vadd.f32 -1.0, %v2956_v44  ;;  %vm1466_vm0 = vcmp.gt.f32.partialorder %v3601_v9, 0.0 }
 0x16e   : > { %2378 = vst [vmem:[%s3538_s12 + $0x20] sm:$0xff] %v2328_v54   ;;  %v1393_v13 = vpop.f32.mrf.mxu0  ;;  %v1247_v15 = vadd.f32 %v2560_v40, %v3388_v24 }
 0x16f   : > { %2963 = vpow2.f32 %v1509_v53  ;;  %v3605_v32 = vadd.f32 %v1393_v13, %v1242_v22  ;;  %v2562_v1 = vpop.f32.mrf.mxu1  ;;  %v1578_v36 = vsel %vm1462_vm12, %v3569_v7, %v2215_v29 }
 0x170   : > { %v2958_v10 = vpop.eup %2957  ;;  %v2658_v59 = vpop.f32.mrf.mxu0  ;;  %v2563_v23 = vadd.f32 %v2562_v1, %v2561_v17 }
 0x171   : > { %v2216_v47 = vadd.f32 -1.0, %v2958_v10  ;;  %v1511_v50 = vmul.f32 1.442695, %v3605_v32  ;;  %v2564_v21 = vpop.f32.mrf.mxu1  ;;  %vm1467_vm1 = vcmp.gt.f32.partialorder %v3605_v32, 0.0 }
 0x172   : > { %v1398_v28 = vpop.f32.mrf.mxu0  ;;  %v1250_v38 = vadd.f32 %v2563_v23, %v3395_v0 }
 0x173   : > { %v1579_v62 = vsel %vm1463_vm13, %v3576_v14, %v2216_v47  ;;  %2965 = vpow2.f32 %v1511_v50  ;;  %v3613_v57 = vadd.f32 %v1398_v28, %v1247_v15  ;;  %v2565_v35 = vpop.f32.mrf.mxu1 }
 0x174   : > { %v2960_v16 = vpop.eup %2959  ;;  %v2333_v19 = vpack.c.bf16 %v1579_v62, %v1578_v36  ;;  %v2661_v27 = vpop.f32.mrf.mxu0  ;;  %v2566_v33 = vadd.f32 %v2565_v35, %v2564_v21 }
 0x175   : > { %v1513_v24 = vmul.f32 1.442695, %v3613_v57  ;;  %v2567_v42 = vpop.f32.mrf.mxu1  ;;  %v2217_v34 = vadd.f32 -1.0, %v2960_v16  ;;  %vm1468_vm2 = vcmp.gt.f32.partialorder %v3613_v57, 0.0 }
 0x176   : > { %2379 = vst [vmem:[%s3538_s12 + $0x28] sm:$0xff] %v2333_v19   ;;  %v1401_v2 = vpop.f32.mrf.mxu0  ;;  %v1255_v55 = vadd.f32 %v2566_v33, %v3402_v6 }
 0x177   : > { %2967 = vpow2.f32 %v1513_v24  ;;  %v3618_v7 = vadd.f32 %v1401_v2, %v1250_v38  ;;  %v2568_v30 = vpop.f32.mrf.mxu1  ;;  %v1580_v63 = vsel %vm1464_vm14, %v3586_v58, %v2217_v34 }
 0x178   : > { %v2962_v14 = vpop.eup %2961  ;;  %v2662_v52 = vpop.f32.mrf.mxu0  ;;  %v2569_v48 = vadd.f32 %v2568_v30, %v2567_v42 }
 0x179   : > { %v2218_v56 = vadd.f32 -1.0, %v2962_v14  ;;  %v1515_v61 = vmul.f32 1.442695, %v3618_v7  ;;  %v2570_v0 = vpop.f32.mrf.mxu1  ;;  %vm1469_vm3 = vcmp.gt.f32.partialorder %v3618_v7, 0.0 }
 0x17a   : > { %v1406_v4 = vpop.f32.mrf.mxu0  ;;  %v1258_v54 = vadd.f32 %v2569_v48, %v3409_v12 }
 0x17b   : > { %v1581_v51 = vsel %vm1465_vm15, %v3593_v45, %v2218_v56  ;;  %2969 = vpow2.f32 %v1515_v61  ;;  %v3626_v26 = vadd.f32 %v1406_v4, %v1255_v55  ;;  %v2571_v41 = vpop.f32.mrf.mxu1 }
 0x17c   : > { %v2964_v39 = vpop.eup %2963  ;;  %v2338_v46 = vpack.c.bf16 %v1581_v51, %v1580_v63  ;;  %v2665_v3 = vpop.f32.mrf.mxu0  ;;  %v2572_v44 = vadd.f32 %v2571_v41, %v2570_v0 }
 0x17d   : > { %v1517_v6 = vmul.f32 1.442695, %v3626_v26  ;;  %v2573_v5 = vpop.f32.mrf.mxu1  ;;  %v2219_v53 = vadd.f32 -1.0, %v2964_v39  ;;  %vm1470_vm4 = vcmp.gt.f32.partialorder %v3626_v26, 0.0 }
 0x17e   : > { %2380 = vst [vmem:[%s3538_s12 + $0x30] sm:$0xff] %v2338_v46   ;;  %v1409_v11 = vpop.f32.mrf.mxu0  ;;  %v1263_v10 = vadd.f32 %v2572_v44, %v3416_v18 }
 0x17f   : > { %2971 = vpow2.f32 %v1517_v6  ;;  %v3631_v58 = vadd.f32 %v1409_v11, %v1258_v54  ;;  %v2574_v40 = vpop.f32.mrf.mxu1  ;;  %v1582_v59 = vsel %vm1466_vm0, %v3601_v9, %v2219_v53 }
 0x180   : > { %v2966_v45 = vpop.eup %2965  ;;  %v2666_v22 = vpop.f32.mrf.mxu0  ;;  %v2575_v29 = vadd.f32 %v2574_v40, %v2573_v5 }
 0x181   : > { %v2220_v17 = vadd.f32 -1.0, %v2966_v45  ;;  %v1519_v13 = vmul.f32 1.442695, %v3631_v58  ;;  %v2576_v12 = vpop.f32.mrf.mxu1  ;;  %vm1471_vm5 = vcmp.gt.f32.partialorder %v3631_v58, 0.0 }
 0x182   : > { %v1414_v1 = vpop.f32.mrf.mxu0  ;;  %v1266_v62 = vadd.f32 %v2575_v29, %v3423_v25 }
 0x183   : > { %v1583_v47 = vsel %vm1467_vm1, %v3605_v32, %v2220_v17  ;;  %2973 = vpow2.f32 %v1519_v13  ;;  %v3639_v50 = vadd.f32 %v1414_v1, %v1263_v10  ;;  %v2577_v21 = vpop.f32.mrf.mxu1 }
 0x184   : > { %v2968_v23 = vpop.eup %2967  ;;  %v2343_v15 = vpack.c.bf16 %v1583_v47, %v1582_v59  ;;  %v2669_v28 = vpop.f32.mrf.mxu0  ;;  %v2578_v36 = vadd.f32 %v2577_v21, %v2576_v12 }
 0x185   : > { %v1521_v18 = vmul.f32 1.442695, %v3639_v50  ;;  %v2579_v16 = vpop.f32.mrf.mxu1  ;;  %v2221_v35 = vadd.f32 -1.0, %v2968_v23  ;;  %vm1472_vm6 = vcmp.gt.f32.partialorder %v3639_v50, 0.0 }
 0x186   : > { %2381 = vst [vmem:[%s3538_s12 + $0x38] sm:$0xff] %v2343_v15   ;;  %v1417_v19 = vpop.f32.mrf.mxu0  ;;  %v1271_v2 = vadd.f32 %v2578_v36, %v3430_v31 }
 0x187   : > { %2975 = vpow2.f32 %v1521_v18  ;;  %v3644_v9 = vadd.f32 %v1417_v19, %v1266_v62  ;;  %v2580_v27 = vpop.f32.mrf.mxu1  ;;  %v1584_v14 = vsel %vm1468_vm2, %v3613_v57, %v2221_v35 }
 0x188   : > { %v2970_v32 = vpop.eup %2969  ;;  %v2670_v24 = vpop.f32.mrf.mxu0  ;;  %v2581_v42 = vadd.f32 %v2580_v27, %v2579_v16 }
 0x189   : > { %v2222_v33 = vadd.f32 -1.0, %v2970_v32  ;;  %v1523_v38 = vmul.f32 1.442695, %v3644_v9  ;;  %v2582_v25 = vpop.f32.mrf.mxu1  ;;  %vm1473_vm7 = vcmp.gt.f32.partialorder %v3644_v9, 0.0 }
 0x18a   : > { %v1422_v34 = vpop.f32.mrf.mxu0  ;;  %v1274_v4 = vadd.f32 %v2581_v42, %v3437_v37 }
 0x18b   : > { %v1585_v30 = vsel %vm1469_vm3, %v3618_v7, %v2222_v33  ;;  %2977 = vpow2.f32 %v1523_v38  ;;  %v3652_v52 = vadd.f32 %v1422_v34, %v1271_v2  ;;  %v2583_v48 = vpop.f32.mrf.mxu1 }
 0x18c   : > { %v2972_v56 = vpop.eup %2971  ;;  %v2348_v61 = vpack.c.bf16 %v1585_v30, %v1584_v14  ;;  %v2673_v55 = vpop.f32.mrf.mxu0  ;;  %v2584_v0 = vadd.f32 %v2583_v48, %v2582_v25 }
 0x18d   : > { %v1525_v31 = vmul.f32 1.442695, %v3652_v52  ;;  %v2585_v63 = vpop.f32.mrf.mxu1  ;;  %v2223_v39 = vadd.f32 -1.0, %v2972_v56  ;;  %vm1474_vm8 = vcmp.gt.f32.partialorder %v3652_v52, 0.0 }
 0x18e   : > { %2382 = vst [vmem:[%s3538_s12 + $0x40] sm:$0xff] %v2348_v61   ;;  %v1425_v51 = vpop.f32.mrf.mxu0  ;;  %v1279_v54 = vadd.f32 %v2584_v0, %v3444_v43 }
 0x18f   : > { %2979 = vpow2.f32 %v1525_v31  ;;  %v3657_v57 = vadd.f32 %v1425_v51, %v1274_v4  ;;  %v2586_v46 = vpop.f32.mrf.mxu1  ;;  %v1586_v11 = vsel %vm1470_vm4, %v3626_v26, %v2223_v39 }
 0x190   : > { %v2974_v7 = vpop.eup %2973  ;;  %v2674_v41 = vpop.f32.mrf.mxu0  ;;  %v2587_v44 = vadd.f32 %v2586_v46, %v2585_v63 }
 0x191   : > { %v2224_v3 = vadd.f32 -1.0, %v2974_v7  ;;  %v1527_v6 = vmul.f32 1.442695, %v3657_v57  ;;  %v2588_v37 = vpop.f32.mrf.mxu1  ;;  %vm1475_vm9 = vcmp.gt.f32.partialorder %v3657_v57, 0.0 }
 0x192   : > { %v1430_v5 = vpop.f32.mrf.mxu0  ;;  %v1282_v10 = vadd.f32 %v2587_v44, %v3451_v49 }
 0x193   : > { %v1587_v53 = vsel %vm1471_vm5, %v3631_v58, %v2224_v3  ;;  %2981 = vpow2.f32 %v1527_v6  ;;  %v3665_v45 = vadd.f32 %v1430_v5, %v1279_v54  ;;  %v2589_v17 = vpop.f32.mrf.mxu1 }
 0x194   : > { %v2976_v40 = vpop.eup %2975  ;;  %v2353_v22 = vpack.c.bf16 %v1587_v53, %v1586_v11  ;;  %v2677_v13 = vpop.f32.mrf.mxu0  ;;  %v2590_v29 = vadd.f32 %v2589_v17, %v2588_v37 }
 0x195   : > { %v1529_v43 = vmul.f32 1.442695, %v3665_v45  ;;  %v2591_v12 = vpop.f32.mrf.mxu1  ;;  %v2225_v59 = vadd.f32 -1.0, %v2976_v40  ;;  %vm1476_vm10 = vcmp.gt.f32.partialorder %v3665_v45, 0.0 }
 0x196   : > { %2383 = vst [vmem:[%s3538_s12 + $0x48] sm:$0xff] %v2353_v22   ;;  %v1433_v1 = vpop.f32.mrf.mxu0  ;;  %v1287_v18 = vadd.f32 %v2590_v29, %v3458_v60 }
 0x197   : > { %2983 = vpow2.f32 %v1529_v43  ;;  %v1434_v26 = vadd.f32 %v1433_v1, %v1282_v10  ;;  %v2592_v58 = vpop.f32.mrf.mxu1  ;;  %v1588_v62 = vsel %vm1472_vm6, %v3639_v50, %v2225_v59 }
 0x198   : > { %v2978_v47 = vpop.eup %2977  ;;  %v2678_v23 = vpop.f32.mrf.mxu0  ;;  %v2593_v28 = vadd.f32 %v2592_v58, %v2591_v12 }
 0x199   : > { %v2226_v15 = vadd.f32 -1.0, %v2978_v47  ;;  %v1531_v21 = vmul.f32 1.442695, %v1434_v26  ;;  %v2594_v49 = vpop.f32.mrf.mxu1  ;;  %vm1477_vm11 = vcmp.gt.f32.partialorder %v1434_v26, 0.0 }
 0x19a   : > { %v1438_v36 = vpop.f32.mrf.mxu0  ;;  %v1290_v60 = vadd.f32 %v2593_v28, %v3465_v8 }
 0x19b   : > { %v1589_v16 = vsel %vm1473_vm7, %v3644_v9, %v2226_v15  ;;  %2985 = vpow2.f32 %v1531_v21  ;;  %v1439_v19 = vadd.f32 %v1438_v36, %v1287_v18  ;;  %v2595_v27 = vpop.f32.mrf.mxu1 }
 0x19c   : > { %v2980_v35 = vpop.eup %2979  ;;  %v2358_v32 = vpack.c.bf16 %v1589_v16, %v1588_v62  ;;  %v2681_v24 = vpop.f32.mrf.mxu0  ;;  %v2596_v38 = vadd.f32 %v2595_v27, %v2594_v49 }
 0x19d   : > { %v1533_v33 = vmul.f32 1.442695, %v1439_v19  ;;  %v2597_v42 = vpop.f32.mrf.mxu1  ;;  %v2227_v25 = vadd.f32 -1.0, %v2980_v35  ;;  %vm1478_vm12 = vcmp.gt.f32.partialorder %v1439_v19, 0.0 }
 0x19e   : > { %2384 = vst [vmem:[%s3538_s12 + $0x50] sm:$0xff] %v2358_v32   ;;  %v1441_v2 = vpop.f32.mrf.mxu0  ;;  %v1295_v61 = vadd.f32 %v2596_v38, %v3472_v20 }
 0x19f   : > { %2987 = vpow2.f32 %v1533_v33  ;;  %v1442_v34 = vadd.f32 %v1441_v2, %v1290_v60  ;;  %v2598_v50 = vpop.f32.mrf.mxu1  ;;  %v1590_v8 = vsel %vm1474_vm8, %v3652_v52, %v2227_v25 }
 0x1a0   : > { %v2982_v14 = vpop.eup %2981  ;;  %v2682_v9 = vpop.f32.mrf.mxu0 }
 0x1a1   : > { %v2228_v30 = vadd.f32 -1.0, %v2982_v14  ;;  %v1535_v56 = vmul.f32 1.442695, %v1442_v34  ;;  %vm1479_vm13 = vcmp.gt.f32.partialorder %v1442_v34, 0.0 }
 0x1a2   : > { %v1446_v48 = vpop.f32.mrf.mxu0 }
 0x1a3   : > { %v1591_v55 = vsel %vm1475_vm9, %v3657_v57, %v2228_v30  ;;  %2989 = vpow2.f32 %v1535_v56  ;;  %v1447_v31 = vadd.f32 %v1446_v48, %v1295_v61 }
 0x1a4   : > { %v2984_v0 = vpop.eup %2983  ;;  %v2363_v4 = vpack.c.bf16 %v1591_v55, %v1590_v8  ;;  %v2685_v63 = vpop.f32.mrf.mxu0 }
 0x1a5   : > { %v1537_v51 = vmul.f32 1.442695, %v1447_v31  ;;  %v2229_v7 = vadd.f32 -1.0, %v2984_v0  ;;  %vm1480_vm14 = vcmp.gt.f32.partialorder %v1447_v31, 0.0 }
 0x1a6   : > { %2385 = vst [vmem:[%s3538_s12 + $0x58] sm:$0xff] %v2363_v4   ;;  %v1449_v39 = vpop.f32.mrf.mxu0 }
 0x1a7   : > { %2991 = vpow2.f32 %v1537_v51  ;;  %v1592_v52 = vsel %vm1476_vm10, %v3665_v45, %v2229_v7 }
 0x1a8   : > { %v2986_v20 = vpop.eup %2985  ;;  %v2686_v46 = vpop.f32.mrf.mxu0 }
 0x1a9   : > { %v2230_v41 = vadd.f32 -1.0, %v2986_v20 }
 0x1ab   : > { %v1593_v57 = vsel %vm1477_vm11, %v1434_v26, %v2230_v41 }
 0x1ac   : > { %v2988_v3 = vpop.eup %2987  ;;  %v2368_v6 = vpack.c.bf16 %v1593_v57, %v1592_v52 }
 0x1ad   : > { %v2231_v44 = vadd.f32 -1.0, %v2988_v3 }
 0x1ae   : > { %2386 = vst [vmem:[%s3538_s12 + $0x60] sm:$0xff] %v2368_v6  }
 0x1af   : > { %v1594_v5 = vsel %vm1478_vm12, %v1439_v19, %v2231_v44 }
 0x1b0   : > { %v2990_v54 = vpop.eup %2989 }
 0x1b1   : > { %v2232_v37 = vadd.f32 -1.0, %v2990_v54 }
 0x1b3   : > { %v1595_v11 = vsel %vm1479_vm13, %v1442_v34, %v2232_v37 }
 0x1b4   : > { %v2992_v53 = vpop.eup %2991  ;;  %v2373_v40 = vpack.c.bf16 %v1595_v11, %v1594_v5 }
 0x1b5   : > { %v2233_v22 = vadd.f32 -1.0, %v2992_v53 }
 0x1b6   : > { %2387 = vst [vmem:[%s3538_s12 + $0x68] sm:$0xff] %v2373_v40   ;;  %1749 = sbr.rel (!%p3132_p4) target bundleno = 516 (0x204), region = 36 }
 0x1b7   : > { %v1596_v17 = vsel %vm1480_vm14, %v1447_v31, %v2233_v22 }
 0x1b8   : > { %v2303_v13 = vpack.c.bf16 %v1596_v17, %v1596_v17 }
 0x1ba   : > { %1742 = vst [vmem:[%s3538_s12 + $0x70] sm:$0xf] %v2303_v13 }
 0x1bb   : > { %s3824_s25 = smov (!%p1752_p8, %s1751_s25), 29 }
 0x1bc   : > { %s2263_s30 = sshll.u32 %s3824_s25, 6 }
 0x1bd   : > { %p2266_p9 = scmp.eq.s32.totalorder %s2263_s30, 0 }
 0x1be   : > { %2993 = sdivrem.u32 (!%p2266_p9), %s3824_s25, 29 }
 0x1bf   : > { %1760 = sbr.rel (%p2266_p9) target bundleno = 516 (0x204), region = 40 }
 0x1c7   : > { %s3701_s20 = spop.drf %2993 }
 0x1c8   : > { %p2267_p10 = scmp.le.s32.totalorder %s3701_s20, 0 }
 0x1c9   : > { %s3817_s15 = smov (!%p2267_p10), %s3695_s29  ;;  %s3818_s23 = smov (!%p2267_p10), %s3538_s12 }
 0x1ca   : > { %2029 = sbr.rel (%p2267_p10) target bundleno = 491 (0x1eb), region = 112  ;;  %s3710_s4 = smov (!%p2267_p10), 0  }
 0x1cb   : > { %s3712_s5 = smov (!%p2267_p10), 0  }
 0x1cf LB: >> { %v1778_v45 = vld [vmem:[%s3059_s23] sm:$0xf]  ;;  %v1780_v43 = vld [vmem:[%s3059_s23 + $0x4] sm:$0xf]  ;;  %v1782_v29 = vld [vmem:[%s3059_s23 + $0x8] sm:$0xf]  ;;  %s3067_s5 = sphi %s3712_s5, %s1772_s5   ;;  %s3063_s4 = sphi %s3710_s4, %s3819_s4   ;;  %s3059_s23 = sphi %s3818_s23, %s1841_s23   ;;  %s3055_s15 = sphi %s3817_s15, %s1842_s15  }
 0x1d0   : >> { %1779 = vst [vmem:[%s3055_s15] sm:$0xf] %v1778_v45  ;;  %1781 = vst [vmem:[%s3055_s15 + $0x4] sm:$0xf] %v1780_v43  ;;  %v1784_v10 = vld [vmem:[%s3059_s23 + $0xc] sm:$0xf]  ;;  %s1836_s6 = sadd.s32 1, %s3063_s4 }
 0x1d1   : >> { %1783 = vst [vmem:[%s3055_s15 + $0x8] sm:$0xf] %v1782_v29  ;;  %v1786_v12 = vld [vmem:[%s3059_s23 + $0x10] sm:$0xf]  ;;  %v1788_v1 = vld [vmem:[%s3059_s23 + $0x14] sm:$0xf]  ;;  %p1837_p11 = scmp.ge.s32.totalorder %s1836_s6, %s3701_s20 }
 0x1d2   : >> { %1785 = vst [vmem:[%s3055_s15 + $0xc] sm:$0xf] %v1784_v10  ;;  %1787 = vst [vmem:[%s3055_s15 + $0x10] sm:$0xf] %v1786_v12  ;;  %v1790_v59 = vld [vmem:[%s3059_s23 + $0x18] sm:$0xf] }
 0x1d3   : >> { %1789 = vst [vmem:[%s3055_s15 + $0x14] sm:$0xf] %v1788_v1  ;;  %v1792_v26 = vld [vmem:[%s3059_s23 + $0x1c] sm:$0xf]  ;;  %v1794_v47 = vld [vmem:[%s3059_s23 + $0x20] sm:$0xf] }
 0x1d4   : >> { %1791 = vst [vmem:[%s3055_s15 + $0x18] sm:$0xf] %v1790_v59  ;;  %1793 = vst [vmem:[%s3055_s15 + $0x1c] sm:$0xf] %v1792_v26  ;;  %v1796_v58 = vld [vmem:[%s3059_s23 + $0x24] sm:$0xf] }
 0x1d5   : >> { %1795 = vst [vmem:[%s3055_s15 + $0x20] sm:$0xf] %v1794_v47  ;;  %v1798_v23 = vld [vmem:[%s3059_s23 + $0x28] sm:$0xf]  ;;  %v1800_v15 = vld [vmem:[%s3059_s23 + $0x2c] sm:$0xf] }
 0x1d6   : >> { %1797 = vst [vmem:[%s3055_s15 + $0x24] sm:$0xf] %v1796_v58  ;;  %1799 = vst [vmem:[%s3055_s15 + $0x28] sm:$0xf] %v1798_v23  ;;  %v1802_v21 = vld [vmem:[%s3059_s23 + $0x30] sm:$0xf] }
 0x1d7   : >> { %1801 = vst [vmem:[%s3055_s15 + $0x2c] sm:$0xf] %v1800_v15  ;;  %v1804_v28 = vld [vmem:[%s3059_s23 + $0x34] sm:$0xf]  ;;  %v1806_v18 = vld [vmem:[%s3059_s23 + $0x38] sm:$0xf] }
 0x1d8   : >> { %1803 = vst [vmem:[%s3055_s15 + $0x30] sm:$0xf] %v1802_v21  ;;  %1805 = vst [vmem:[%s3055_s15 + $0x34] sm:$0xf] %v1804_v28  ;;  %v1808_v49 = vld [vmem:[%s3059_s23 + $0x3c] sm:$0xf] }
 0x1d9   : >> { %1807 = vst [vmem:[%s3055_s15 + $0x38] sm:$0xf] %v1806_v18  ;;  %v1810_v36 = vld [vmem:[%s3059_s23 + $0x40] sm:$0xf]  ;;  %v1812_v62 = vld [vmem:[%s3059_s23 + $0x44] sm:$0xf] }
 0x1da   : >> { %1809 = vst [vmem:[%s3055_s15 + $0x3c] sm:$0xf] %v1808_v49  ;;  %1811 = vst [vmem:[%s3055_s15 + $0x40] sm:$0xf] %v1810_v36  ;;  %v1814_v16 = vld [vmem:[%s3059_s23 + $0x48] sm:$0xf] }
 0x1db   : >> { %1813 = vst [vmem:[%s3055_s15 + $0x44] sm:$0xf] %v1812_v62  ;;  %v1816_v19 = vld [vmem:[%s3059_s23 + $0x4c] sm:$0xf]  ;;  %v1818_v35 = vld [vmem:[%s3059_s23 + $0x50] sm:$0xf] }
 0x1dc   : >> { %1815 = vst [vmem:[%s3055_s15 + $0x48] sm:$0xf] %v1814_v16  ;;  %1817 = vst [vmem:[%s3055_s15 + $0x4c] sm:$0xf] %v1816_v19  ;;  %v1820_v32 = vld [vmem:[%s3059_s23 + $0x54] sm:$0xf] }
 0x1dd   : >> { %1819 = vst [vmem:[%s3055_s15 + $0x50] sm:$0xf] %v1818_v35  ;;  %v1822_v27 = vld [vmem:[%s3059_s23 + $0x58] sm:$0xf]  ;;  %v1824_v24 = vld [vmem:[%s3059_s23 + $0x5c] sm:$0xf] }
 0x1de   : >> { %1821 = vst [vmem:[%s3055_s15 + $0x54] sm:$0xf] %v1820_v32  ;;  %1823 = vst [vmem:[%s3055_s15 + $0x58] sm:$0xf] %v1822_v27  ;;  %v1826_v33 = vld [vmem:[%s3059_s23 + $0x60] sm:$0xf] }
 0x1df   : >> { %1825 = vst [vmem:[%s3055_s15 + $0x5c] sm:$0xf] %v1824_v24  ;;  %v1828_v38 = vld [vmem:[%s3059_s23 + $0x64] sm:$0xf]  ;;  %v1830_v60 = vld [vmem:[%s3059_s23 + $0x68] sm:$0xf] }
 0x1e0   : >> { %1827 = vst [vmem:[%s3055_s15 + $0x60] sm:$0xf] %v1826_v33  ;;  %1829 = vst [vmem:[%s3055_s15 + $0x64] sm:$0xf] %v1828_v38  ;;  %v1832_v42 = vld [vmem:[%s3059_s23 + $0x6c] sm:$0xf] }
 0x1e1   : >> { %1831 = vst [vmem:[%s3055_s15 + $0x68] sm:$0xf] %v1830_v60  ;;  %v1834_v2 = vld [vmem:[%s3059_s23 + $0x70] sm:$0xf]  ;;  %1833 = vst [vmem:[%s3055_s15 + $0x6c] sm:$0xf] %v1832_v42 }
 0x1e2   : >> { %1835 = vst [vmem:[%s3055_s15 + $0x70] sm:$0xf] %v1834_v2  ;;  %s3826_s6 = smov (%p1837_p11, %s1836_s6), 0  ;;  %s1772_s5 = sadd.s32 1, %s3067_s5  }
 0x1e3   : >> { %s1839_s7 = smul.u32 116, %s3826_s6  ;;  %p1771_p12 = scmp.ge.s32.totalorder %s1772_s5, %s3701_s20 }
 0x1e4   : >> { %s3819_s4 = smov %s3826_s6 }
 0x1e5   : >> { %s1841_s23 = scalar_lea.vmem %s3538_s12, %s1839_s7 [#allocation2]   ;;  %s1842_s15 = scalar_lea.vmem %s3695_s29, %s1839_s7  }
 0x1e6   : > { %1774 = sbr.rel (!%p1771_p12) target bundleno = 463 (0x1cf), region = 118 }
 0x1eb PF: > { %2995 = sdivrem.u32 %s3824_s25, 29 }
 0x1ec   : > { %s2268_s8 = smul.u32 116, %s3701_s20 }
 0x1ee   : > { %s1847_s9 = scalar_lea.vmem %s3538_s12, %s2268_s8 [#allocation2]   ;;  %s1849_s10 = scalar_lea.vmem %s3695_s29, %s2268_s8  }
 0x1f4   : > { %s2996_s11 = spop.drf %2995 }
 0x1f5   : > { %p2270_p13 = scmp.le.s32.totalorder %s2996_s11, 0 }
 0x1f6   : > { %s3069_s14 = smov (!%p2270_p13), %s1849_s10   ;;  %s3073_s17 = smov (!%p2270_p13), %s1847_s9  }
 0x1f7   : > { %2043 = sbr.rel (%p2270_p13) target bundleno = 516 (0x204), region = 123  ;;  %s3077_s18 = smov (!%p2270_p13), 0  }
 0x1f8   : > { %s3081_s21 = smov (!%p2270_p13), 0  }
 0x1fc LB: >> { %v1859_v25 = vld [vmem:[%s3075_s17] sm:$0xf]  ;;  %s1861_s24 = sadd.s32 1, %s3079_s18  ;;  %s1853_s21 = sadd.s32 1, %s3083_s21   ;;  %s3083_s21 = sphi %s3081_s21, %s1853_s21   ;;  %s3079_s18 = sphi %s3077_s18, %s3078_s18   ;;  %s3075_s17 = sphi %s3073_s17, %s1866_s17   ;;  %s3071_s14 = sphi %s3069_s14, %s1867_s14  }
 0x1fd   : >> { %1860 = vst [vmem:[%s3071_s14] sm:$0xf] %v1859_v25  ;;  %p1862_p0 = scmp.ge.s32.totalorder %s1861_s24, %s2996_s11  ;;  %p1852_p1 = scmp.ge.s32.totalorder %s1853_s21, %s2996_s11 }
 0x1ff   : >> { %s3828_s24 = smov (%p1862_p0, %s1861_s24), 0  ;;  %1855 = sbr.rel (!%p1852_p1) target bundleno = 508 (0x1fc), region = 129 }
 0x200   : >> { %s2271_s22 = sshll.u32 %s3828_s24, 2  ;;  %s3078_s18 = smov %s3828_s24  }
 0x201   : >> { %s1866_s17 = scalar_lea.vmem %s1847_s9, %s2271_s22 [#allocation2]   ;;  %s1867_s14 = scalar_lea.vmem %s1849_s10, %s2271_s22  }
 0x204 PF: > { %p10_p2 = scmp.ge.s32.totalorder %s3122_s16, 4   ;;  %s3820_s12 = smov %s3047_s13 }
 0x205   : > { %s3821_s13 = smov %s3130_s19  ;;  %s3822_s14 = smov %s3122_s16 }
 0x206   :  { %12 = sbr.rel (!%p10_p2) target bundleno = 2 (0x2), region = 140 }

// kernel: tile.38
= control target key start
LH: loop header
LB: loop body
LE: loop exit
PB: predicated region body
PF: predicated region fallthrough
CT: control target
= control target key end

     0   :  { %s22_s0 = inlined_call_operand.vmem [shape: f32[3], index: 0, kind: input, shape index: {}]   ;;  %s23_s1 = inlined_call_operand.vmem [shape: f32[4,3], index: 1, kind: output, shape index: {}]  }
   0x1   :  { %v4_v0 = vld [vmem:[%s22_s0] ss:$0 sm:$0xff] }
   0x2   :  { %5 = vst [vmem:[%s23_s1] sm:$0xf] %v4_v0 }

// kernel: tile.39
= control target key start
LH: loop header
LB: loop body
LE: loop exit
PB: predicated region body
PF: predicated region fallthrough
CT: control target
= control target key end

     0   :  { %vm8_vm0 = vcmask 23552   ;;  %s40_s8 = smov 3   ;;  %s41_s9 = smov 6   ;;  %vm14_vm1 = vcmask 97352   ;;  %vm20_vm2 = vcmask 72752   ;;  %vm26_vm3 = vcmask 48152   ;;  %s58_s0 = inlined_call_operand.vmem [shape: f32[4,3], index: 0, kind: input, shape index: {}]   ;;  %s59_s1 = inlined_call_operand.vmem [shape: f32[1,12], index: 1, kind: output, shape index: {}]  }
   0x1   :  { %v5_v0 = vld [vmem:[%s58_s0] sm:$0xf]  ;;  %s39_s0 = smov 9  }
   0x2   :  { %6 = vst [vmem:[#allocation1] sm:$0xf] %v5_v0 }
   0x9   :  { %v11_v1 = vld [vmem:[#allocation1 + $0x3] sm:$0x1]   ;;  %v23_v2 = vld [vmem:[#allocation1 + $0x1] sm:$0x1]   ;;  %v7_v3 = vld [vmem:[#allocation1] sm:$0x1]  }
   0xa   :  { %12 = vrot.lane.b32.xlu0 %v11_v1, %s39_s0  ;;  %24 = vrot.lane.b32.xlu1 %v23_v2, %s40_s8  ;;  %v17_v4 = vld [vmem:[#allocation1 + $0x2] sm:$0x1]   ;;  %9 = vst.msk [vmem:[#allocation0] sm:$0x1] %vm8_vm0, %v7_v3  }
   0xe   :  { %18 = vrot.lane.b32.xlu0 %v17_v4, %s41_s9 }
  0x7c   :  { %v13_v5 = vpop.permute.xlu0 %12   ;;  %v25_v6 = vpop.permute.xlu1 %24  }
  0x7d   :  { %15 = vst.msk [vmem:[#allocation0] sm:$0x1] %vm14_vm1, %v13_v5  }
  0x80   :  { %v19_v7 = vpop.permute.xlu0 %18  }
  0x81   :  { %21 = vst.msk [vmem:[#allocation0] sm:$0x1] %vm20_vm2, %v19_v7  }
  0x82   :  { %27 = vst.msk [vmem:[#allocation0] sm:$0x1] %vm26_vm3, %v25_v6  }
  0x89   :  { %v32_v8 = vld [vmem:[#allocation0] sm:$0x1] }
  0x8a   :  { %35 = vst [vmem:[%s59_s1] sm:$0x1] %v32_v8 }

// kernel: conv_decoder_cat_forward.7
= control target key start
LH: loop header
LB: loop body
LE: loop exit
PB: predicated region body
PF: predicated region fallthrough
CT: control target
= control target key end

     0   :  { %s3843_s12 = smov 0   ;;  %s4895_s0 = inlined_call_operand.vmem [shape: bf16[2048,288], index: 0, kind: input, shape index: {}]   ;;  %s4896_s1 = inlined_call_operand.vmem [shape: bf16[288,12], index: 1, kind: input, shape index: {}]   ;;  %s4897_s2 = inlined_call_operand.vmem [shape: f32[1,12], index: 2, kind: input, shape index: {}]   ;;  %s4898_s3 = inlined_call_operand.vmem [shape: f32[2048,12], index: 3, kind: output, shape index: {}]  }
   0x1 LB: > { %s3013_s13 = sadd.s32 4294967295, %s3820_s12   ;;  %p3017_p0 = scmp.ge.s32.totalorder %s3820_s12, 1  ;;  %s3820_s12 = sphi %s3843_s12, %s13_s12  }
   0x2   : > { %p139_p1 = scmp.lt.s32.totalorder %s3820_s12, 3 }
   0x4   : > { %p140_p2 = pnand %p3017_p0, %p139_p1 }
   0x6   : > { %143 = sbr.rel (%p140_p2) target bundleno = 654 (0x28e), region = 32 }
   0xb   : > { %v3539_v0 = vld [vmem:[%s4896_s1 + $0x38] sm:$0xff]   ;;  %v3822_v1 = vmov 0   ;;  %s3018_s16 = sshll.u32 %s3013_s13, 7  ;;  %v3540_v2 = vld [vmem:[%s4896_s1 + $0x30] sm:$0xff]   ;;  %v3541_v3 = vld [vmem:[%s4896_s1 + $0x28] sm:$0xff]   ;;  %vm1545_vm0 = vcmask 261120  }
   0xc   : > { %1738 = vmatprep.subr.bf16.mxu0 %v3822_v1  ;;  %3497 = vmatprep.subr.bf16.mxu1 %v3822_v1  ;;  %p165_p3 = scmp.lt.s32.totalorder %s3018_s16, 255  ;;  %v3542_v4 = vld [vmem:[%s4896_s1 + $0x20] sm:$0xff]   ;;  %v3543_v5 = vld [vmem:[%s4896_s1 + $0x18] sm:$0xff]   ;;  %v3544_v7 = vld [vmem:[%s4896_s1 + $0x10] sm:$0xff]   ;;  %vm2828_vm1 = vcmask 97280  }
   0xd   : > { %1739 = vmatpush1.bf16.msra.mxu0 %v3539_v0  ;;  %3513 = vmatpush1.bf16.msra.mxu1 %v3539_v0  ;;  %v3545_v9 = vld [vmem:[%s4896_s1 + $0x8] sm:$0xff]   ;;  %v3546_v10 = vld [vmem:[%s4896_s1] sm:$0xff]   ;;  %v3547_v11 = vld [vmem:[%s4896_s1 + $0x78] sm:$0xff]  }
   0xe   : > { %1740 = vmatprep.subr.bf16.mxu0 %v3822_v1  ;;  %3498 = vmatprep.subr.bf16.mxu1 %v3822_v1  ;;  %s4930_s16 = smov (!%p165_p3, %s3018_s16), 255  ;;  %v3548_v12 = vld [vmem:[%s4896_s1 + $0x70] sm:$0xff]   ;;  %v3549_v13 = vld [vmem:[%s4896_s1 + $0x68] sm:$0xff]   ;;  %v3550_v14 = vld [vmem:[%s4896_s1 + $0x60] sm:$0xff]  }
   0xf   : > { %s3529_s23 = smul.u32 12, %s4930_s16  ;;  %v3551_v15 = vld [vmem:[%s4896_s1 + $0x58] sm:$0xff]   ;;  %v3552_v16 = vld [vmem:[%s4896_s1 + $0x50] sm:$0xff]   ;;  %v3553_v17 = vld [vmem:[%s4896_s1 + $0x48] sm:$0xff]   ;;  %s3021_s4 = sshll.u32 %s4930_s16, 3 }
  0x10   : > { %v3554_v18 = vld [vmem:[%s4896_s1 + $0x40] sm:$0xff]   ;;  %v3561_v19 = vld [vmem:[%s4896_s1 + $0x88] sm:$0xff]   ;;  %s4301_s16 = scalar_lea.vmem %s4898_s3, %s3021_s4 }
  0x11   : > { %1741 = vmatpush1.bf16.msra.mxu0 %v3540_v2  ;;  %3514 = vmatpush1.bf16.msra.mxu1 %v3540_v2  ;;  %s3880_s28 = scalar_lea.vmem %s4895_s0, %s3529_s23  ;;  %v3610_v24 = vld [vmem:[%s4896_s1 + $0x80] sm:$0xff]  }
  0x12   : > { %1742 = vmatprep.subr.bf16.mxu0 %v3822_v1  ;;  %3499 = vmatprep.subr.bf16.mxu1 %v3822_v1  ;;  %v3557_v6 = vld [vmem:[%s3880_s28 + $0x4] ss:$12 sps:$4 sm:$0xff]   ;;  %v3555_v20 = vld [vmem:[%s3880_s28] ss:$12 sps:$4 sm:$0xff]   ;;  %v3562_v22 = vld [vmem:[%s3880_s28 + $0x1c] ss:$12 sps:$4 sm:$0xff]  }
  0x13   : > { %v3560_v8 = vld [vmem:[%s3880_s28 + $0x484] ss:$12 sps:$4 sm:$0xff]   ;;  %1770 = vmatprep.mubr.bf16.mxu0 %v3557_v6  ;;  %v3558_v21 = vld [vmem:[%s3880_s28 + $0x480] ss:$12 sps:$4 sm:$0xff]   ;;  %v3564_v23 = vld [vmem:[%s3880_s28 + $0x49c] ss:$12 sps:$4 sm:$0xff]  }
  0x14   : > { %2154 = vmatprep.mubr.bf16.mxu1 %v3560_v8  ;;  %v3566_v25 = vld [vmem:[%s3880_s28 + $0x18] ss:$12 sps:$4 sm:$0xff]   ;;  %v3568_v27 = vld [vmem:[%s3880_s28 + $0x34] ss:$12 sps:$4 sm:$0xff]   ;;  %v3572_v29 = vld [vmem:[%s3880_s28 + $0x30] ss:$12 sps:$4 sm:$0xff]  }
  0x15   : > { %1743 = vmatpush1.bf16.msra.mxu0 %v3541_v3  ;;  %3515 = vmatpush1.bf16.msra.mxu1 %v3541_v3  ;;  %v3567_v26 = vld [vmem:[%s3880_s28 + $0x498] ss:$12 sps:$4 sm:$0xff]   ;;  %v3570_v28 = vld [vmem:[%s3880_s28 + $0x4b4] ss:$12 sps:$4 sm:$0xff]   ;;  %v3573_v30 = vld [vmem:[%s3880_s28 + $0x4b0] ss:$12 sps:$4 sm:$0xff]  }
  0x16   : > { %1744 = vmatprep.subr.bf16.mxu0 %v3822_v1  ;;  %3500 = vmatprep.subr.bf16.mxu1 %v3822_v1  ;;  %v3574_v31 = vld [vmem:[%s3880_s28 + $0x4c] ss:$12 sps:$4 sm:$0xff]   ;;  %v3578_v33 = vld [vmem:[%s3880_s28 + $0x48] ss:$12 sps:$4 sm:$0xff]   ;;  %v3580_v35 = vld [vmem:[%s3880_s28 + $0x64] ss:$12 sps:$4 sm:$0xff]  }
  0x17   : > { %v3576_v32 = vld [vmem:[%s3880_s28 + $0x4cc] ss:$12 sps:$4 sm:$0xff]   ;;  %v3579_v34 = vld [vmem:[%s3880_s28 + $0x4c8] ss:$12 sps:$4 sm:$0xff]   ;;  %v3582_v36 = vld [vmem:[%s3880_s28 + $0x4e4] ss:$12 sps:$4 sm:$0xff]  }
  0x18   : > { %v3584_v37 = vld [vmem:[%s3880_s28 + $0x60] ss:$12 sps:$4 sm:$0xff]   ;;  %v3586_v39 = vld [vmem:[%s3880_s28 + $0x7c] ss:$12 sps:$4 sm:$0xff]   ;;  %v3590_v41 = vld [vmem:[%s3880_s28 + $0x78] ss:$12 sps:$4 sm:$0xff]  }
  0x19   : > { %1745 = vmatpush1.bf16.msra.mxu0 %v3542_v4  ;;  %3516 = vmatpush1.bf16.msra.mxu1 %v3542_v4  ;;  %v3585_v38 = vld [vmem:[%s3880_s28 + $0x4e0] ss:$12 sps:$4 sm:$0xff]   ;;  %v3588_v40 = vld [vmem:[%s3880_s28 + $0x4fc] ss:$12 sps:$4 sm:$0xff]   ;;  %v3591_v42 = vld [vmem:[%s3880_s28 + $0x4f8] ss:$12 sps:$4 sm:$0xff]  }
  0x1a   : > { %1746 = vmatprep.subr.bf16.mxu0 %v3822_v1  ;;  %3501 = vmatprep.subr.bf16.mxu1 %v3822_v1  ;;  %v3592_v43 = vld [vmem:[%s3880_s28 + $0x94] ss:$12 sps:$4 sm:$0xff]   ;;  %v3596_v45 = vld [vmem:[%s3880_s28 + $0x90] ss:$12 sps:$4 sm:$0xff]   ;;  %v3598_v47 = vld [vmem:[%s3880_s28 + $0xac] ss:$12 sps:$4 sm:$0xff]  }
  0x1b   : > { %v3594_v44 = vld [vmem:[%s3880_s28 + $0x514] ss:$12 sps:$4 sm:$0xff]   ;;  %v3597_v46 = vld [vmem:[%s3880_s28 + $0x510] ss:$12 sps:$4 sm:$0xff]   ;;  %v3600_v48 = vld [vmem:[%s3880_s28 + $0x52c] ss:$12 sps:$4 sm:$0xff]  }
  0x1c   : > { %v3602_v49 = vld [vmem:[%s3880_s28 + $0xa8] ss:$12 sps:$4 sm:$0xff]   ;;  %v3604_v51 = vld [vmem:[%s3880_s28 + $0xc4] ss:$12 sps:$4 sm:$0xff]   ;;  %v3608_v53 = vld [vmem:[%s3880_s28 + $0xc0] ss:$12 sps:$4 sm:$0xff]  }
  0x1d   : > { %1747 = vmatpush1.bf16.msra.mxu0 %v3543_v5  ;;  %3517 = vmatpush1.bf16.msra.mxu1 %v3543_v5  ;;  %v3603_v50 = vld [vmem:[%s3880_s28 + $0x528] ss:$12 sps:$4 sm:$0xff]   ;;  %v3606_v52 = vld [vmem:[%s3880_s28 + $0x544] ss:$12 sps:$4 sm:$0xff]   ;;  %v3609_v54 = vld [vmem:[%s3880_s28 + $0x540] ss:$12 sps:$4 sm:$0xff]  }
  0x1e   : > { %1748 = vmatprep.subr.bf16.mxu0 %v3822_v1  ;;  %3502 = vmatprep.subr.bf16.mxu1 %v3822_v1  ;;  %v3611_v55 = vld [vmem:[%s3880_s28 + $0xdc] ss:$12 sps:$4 sm:$0xff]   ;;  %v3615_v57 = vld [vmem:[%s3880_s28 + $0xd8] ss:$12 sps:$4 sm:$0xff]   ;;  %v3617_v59 = vld [vmem:[%s3880_s28 + $0xf4] ss:$12 sps:$4 sm:$0xff]  }
  0x1f   : > { %v3613_v56 = vld [vmem:[%s3880_s28 + $0x55c] ss:$12 sps:$4 sm:$0xff]   ;;  %v3616_v58 = vld [vmem:[%s3880_s28 + $0x558] ss:$12 sps:$4 sm:$0xff]   ;;  %v3619_v60 = vld [vmem:[%s3880_s28 + $0x574] ss:$12 sps:$4 sm:$0xff]  }
  0x20   : > { %v3621_v61 = vld [vmem:[%s3880_s28 + $0xf0] ss:$12 sps:$4 sm:$0xff]   ;;  %v3623_v63 = vld [vmem:[%s3880_s28 + $0x10c] ss:$12 sps:$4 sm:$0xff]   ;;  %v3628_v2 = vld [vmem:[%s3880_s28 + $0x588] ss:$12 sps:$4 sm:$0xff]  }
  0x21   : > { %1749 = vmatpush1.bf16.msra.mxu0 %v3544_v7  ;;  %3518 = vmatpush1.bf16.msra.mxu1 %v3544_v7  ;;  %v3622_v62 = vld [vmem:[%s3880_s28 + $0x570] ss:$12 sps:$4 sm:$0xff]   ;;  %v3625_v0 = vld [vmem:[%s3880_s28 + $0x58c] ss:$12 sps:$4 sm:$0xff]  }
  0x22   : > { %1750 = vmatprep.subr.bf16.mxu0 %v3822_v1  ;;  %3503 = vmatprep.subr.bf16.mxu1 %v3822_v1  ;;  %v3629_v3 = vld [vmem:[%s3880_s28 + $0x124] ss:$12 sps:$4 sm:$0xff]   ;;  %v3633_v5 = vld [vmem:[%s3880_s28 + $0x120] ss:$12 sps:$4 sm:$0xff]   ;;  %v3635_v7 = vld [vmem:[%s3880_s28 + $0x13c] ss:$12 sps:$4 sm:$0xff]  }
  0x23   : > { %v3631_v4 = vld [vmem:[%s3880_s28 + $0x5a4] ss:$12 sps:$4 sm:$0xff]   ;;  %v3634_v6 = vld [vmem:[%s3880_s28 + $0x5a0] ss:$12 sps:$4 sm:$0xff]   ;;  %v3637_v8 = vld [vmem:[%s3880_s28 + $0x5bc] ss:$12 sps:$4 sm:$0xff]  }
  0x25   : > { %1751 = vmatpush1.bf16.msra.mxu0 %v3545_v9  ;;  %3519 = vmatpush1.bf16.msra.mxu1 %v3545_v9  ;;  %v3639_v9 = vld [vmem:[%s3880_s28 + $0x138] ss:$12 sps:$4 sm:$0xff]  }
  0x26   : > { %1752 = vmatprep.subr.bf16.mxu0 %v3822_v1  ;;  %3504 = vmatprep.subr.bf16.mxu1 %v3822_v1 }
  0x29   : > { %1753 = vmatpush1.bf16.msra.mxu0 %v3546_v10  ;;  %3520 = vmatpush1.bf16.msra.mxu1 %v3546_v10  ;;  %v3640_v10 = vld [vmem:[%s3880_s28 + $0x5b8] ss:$12 sps:$4 sm:$0xff]  }
  0x2a   : > { %1754 = vmatprep.subr.bf16.mxu0 %v3822_v1  ;;  %3505 = vmatprep.subr.bf16.mxu1 %v3822_v1 }
  0x2d   : > { %1755 = vmatpush2.bf16.msra.mxu0 %v3547_v11  ;;  %3521 = vmatpush2.bf16.msra.mxu1 %v3547_v11  ;;  %v3641_v11 = vld [vmem:[%s3880_s28 + $0x154] ss:$12 sps:$4 sm:$0xff]  }
  0x2e   : > { %1756 = vmatprep.subr.bf16.mxu0 %v3822_v1  ;;  %3506 = vmatprep.subr.bf16.mxu1 %v3822_v1 }
  0x31   : > { %1757 = vmatpush2.bf16.msra.mxu0 %v3548_v12  ;;  %3522 = vmatpush2.bf16.msra.mxu1 %v3548_v12  ;;  %v3643_v12 = vld [vmem:[%s3880_s28 + $0x5d4] ss:$12 sps:$4 sm:$0xff]  }
  0x32   : > { %1758 = vmatprep.subr.bf16.mxu0 %v3822_v1  ;;  %3507 = vmatprep.subr.bf16.mxu1 %v3822_v1 }
  0x35   : > { %1759 = vmatpush2.bf16.msra.mxu0 %v3549_v13  ;;  %3523 = vmatpush2.bf16.msra.mxu1 %v3549_v13  ;;  %v3645_v13 = vld [vmem:[%s3880_s28 + $0x150] ss:$12 sps:$4 sm:$0xff]  }
  0x36   : > { %1760 = vmatprep.subr.bf16.mxu0 %v3822_v1  ;;  %3508 = vmatprep.subr.bf16.mxu1 %v3822_v1 }
  0x39   : > { %1761 = vmatpush2.bf16.msra.mxu0 %v3550_v14  ;;  %3524 = vmatpush2.bf16.msra.mxu1 %v3550_v14  ;;  %v3646_v14 = vld [vmem:[%s3880_s28 + $0x5d0] ss:$12 sps:$4 sm:$0xff]  }
  0x3a   : > { %1762 = vmatprep.subr.bf16.mxu0 %v3822_v1  ;;  %3509 = vmatprep.subr.bf16.mxu1 %v3822_v1 }
  0x3d   : > { %1763 = vmatpush2.bf16.msra.mxu0 %v3551_v15  ;;  %3525 = vmatpush2.bf16.msra.mxu1 %v3551_v15  ;;  %v3647_v15 = vld [vmem:[%s3880_s28 + $0x16c] ss:$12 sps:$4 sm:$0xff]  }
  0x3e   : > { %1764 = vmatprep.subr.bf16.mxu0 %v3822_v1  ;;  %3510 = vmatprep.subr.bf16.mxu1 %v3822_v1 }
  0x41   : > { %1765 = vmatpush2.bf16.msra.mxu0 %v3552_v16  ;;  %3526 = vmatpush2.bf16.msra.mxu1 %v3552_v16  ;;  %v3649_v16 = vld [vmem:[%s3880_s28 + $0x5ec] ss:$12 sps:$4 sm:$0xff]  }
  0x42   : > { %1766 = vmatprep.subr.bf16.mxu0 %v3822_v1  ;;  %3511 = vmatprep.subr.bf16.mxu1 %v3822_v1 }
  0x45   : > { %1767 = vmatpush2.bf16.msra.mxu0 %v3553_v17  ;;  %3527 = vmatpush2.bf16.msra.mxu1 %v3553_v17  ;;  %v3651_v17 = vld [vmem:[%s3880_s28 + $0x168] ss:$12 sps:$4 sm:$0xff]  }
  0x46   : > { %1768 = vmatprep.subr.bf16.mxu0 %v3822_v1  ;;  %3512 = vmatprep.subr.bf16.mxu1 %v3822_v1  ;;  %v3627_v1 = vld [vmem:[%s3880_s28 + $0x108] ss:$12 sps:$4 sm:$0xff]  }
  0x49   : > { %1769 = vmatpush2.bf16.msra.mxu0 %v3554_v18  ;;  %3528 = vmatpush2.bf16.msra.mxu1 %v3554_v18  ;;  %v3652_v18 = vld [vmem:[%s3880_s28 + $0x5e8] ss:$12 sps:$4 sm:$0xff]  }
  0x4a   : > { %3365 = vmatprep.subr.bf16.mxu1 %v3561_v19 }
  0x4c   : > { %1771 = vmatmul.mubr.bf16.vlgmr.msra.gmra.mxu0 %v3555_v20  ;;  %2155 = vmatmul.mubr.bf16.vlgmr.msra.gmra.mxu1 %v3558_v21  ;;  %v3655_v20 = vld [vmem:[%s3880_s28 + $0x8] ss:$12 sps:$4 sm:$0xff]   ;;  %v3656_v21 = vld [vmem:[%s3880_s28 + $0x180] ss:$12 sps:$4 sm:$0xff]  }
  0x4d   : > { %3366 = vmatpush3.bf16.msra.mxu1 %v3561_v19  ;;  %1778 = vmatprep.mubr.bf16.mxu0 %v3562_v22  ;;  %v3653_v19 = vld [vmem:[%s3880_s28 + $0x184] ss:$12 sps:$4 sm:$0xff]   ;;  %v3657_v22 = vld [vmem:[%s3880_s28 + $0x20] ss:$12 sps:$4 sm:$0xff]  }
  0x4e   : > { %2162 = vmatprep.mubr.bf16.mxu1 %v3564_v23  ;;  %3367 = vmatprep.subr.bf16.mxu1 %v3610_v24  ;;  %v3658_v23 = vld [vmem:[%s3880_s28 + $0x19c] ss:$12 sps:$4 sm:$0xff]  }
  0x51   : > { %3368 = vmatpush3.bf16.msra.mxu1 %v3610_v24  ;;  %v3660_v24 = vld [vmem:[%s3880_s28 + $0x38] ss:$12 sps:$4 sm:$0xff]  }
  0x54   : > { %1779 = vmatmul.mubr.bf16.gmra.mxu0 %v3566_v25  ;;  %2163 = vmatmul.mubr.bf16.gmra.mxu1 %v3567_v26  ;;  %v3661_v25 = vld [vmem:[%s3880_s28 + $0x198] ss:$12 sps:$4 sm:$0xff]   ;;  %v3662_v26 = vld [vmem:[%s3880_s28 + $0x50] ss:$12 sps:$4 sm:$0xff]  }
  0x55   : > { %1786 = vmatprep.mubr.bf16.mxu0 %v3568_v27  ;;  %2170 = vmatprep.mubr.bf16.mxu1 %v3570_v28  ;;  %v3663_v27 = vld [vmem:[%s3880_s28 + $0x1b4] ss:$12 sps:$4 sm:$0xff]  }
  0x56   : > { %v3665_v28 = vld [vmem:[%s3880_s28 + $0x68] ss:$12 sps:$4 sm:$0xff]  }
  0x5c   : > { %1787 = vmatmul.mubr.bf16.gmra.mxu0 %v3572_v29  ;;  %2171 = vmatmul.mubr.bf16.gmra.mxu1 %v3573_v30  ;;  %v3666_v29 = vld [vmem:[%s3880_s28 + $0x1b0] ss:$12 sps:$4 sm:$0xff]   ;;  %v3667_v30 = vld [vmem:[%s3880_s28 + $0x80] ss:$12 sps:$4 sm:$0xff]  }
  0x5d   : > { %1794 = vmatprep.mubr.bf16.mxu0 %v3574_v31  ;;  %2178 = vmatprep.mubr.bf16.mxu1 %v3576_v32  ;;  %v3668_v31 = vld [vmem:[%s3880_s28 + $0x1cc] ss:$12 sps:$4 sm:$0xff]  }
  0x5e   : > { %v3670_v32 = vld [vmem:[%s3880_s28 + $0x98] ss:$12 sps:$4 sm:$0xff]  }
  0x64   : > { %1795 = vmatmul.mubr.bf16.gmra.mxu0 %v3578_v33  ;;  %2179 = vmatmul.mubr.bf16.gmra.mxu1 %v3579_v34  ;;  %v3671_v33 = vld [vmem:[%s3880_s28 + $0x1c8] ss:$12 sps:$4 sm:$0xff]   ;;  %v3672_v34 = vld [vmem:[%s3880_s28 + $0xb0] ss:$12 sps:$4 sm:$0xff]  }
  0x65   : > { %1802 = vmatprep.mubr.bf16.mxu0 %v3580_v35  ;;  %2186 = vmatprep.mubr.bf16.mxu1 %v3582_v36  ;;  %v3673_v35 = vld [vmem:[%s3880_s28 + $0x1e4] ss:$12 sps:$4 sm:$0xff]   ;;  %v3675_v36 = vld [vmem:[%s3880_s28 + $0xc8] ss:$12 sps:$4 sm:$0xff]  }
  0x6c   : > { %1803 = vmatmul.mubr.bf16.gmra.mxu0 %v3584_v37  ;;  %2187 = vmatmul.mubr.bf16.gmra.mxu1 %v3585_v38  ;;  %v3676_v37 = vld [vmem:[%s3880_s28 + $0x1e0] ss:$12 sps:$4 sm:$0xff]  }
  0x6d   : > { %1810 = vmatprep.mubr.bf16.mxu0 %v3586_v39  ;;  %2194 = vmatprep.mubr.bf16.mxu1 %v3588_v40  ;;  %v3677_v38 = vld [vmem:[%s3880_s28 + $0xe0] ss:$12 sps:$4 sm:$0xff]   ;;  %v3678_v39 = vld [vmem:[%s3880_s28 + $0x1fc] ss:$12 sps:$4 sm:$0xff]   ;;  %v3680_v40 = vld [vmem:[%s3880_s28 + $0xf8] ss:$12 sps:$4 sm:$0xff]  }
  0x74   : > { %1811 = vmatmul.mubr.bf16.gmra.mxu0 %v3590_v41  ;;  %2195 = vmatmul.mubr.bf16.gmra.mxu1 %v3591_v42  ;;  %v3681_v41 = vld [vmem:[%s3880_s28 + $0x1f8] ss:$12 sps:$4 sm:$0xff]   ;;  %v3682_v42 = vld [vmem:[%s3880_s28 + $0x110] ss:$12 sps:$4 sm:$0xff]  }
  0x75   : > { %1818 = vmatprep.mubr.bf16.mxu0 %v3592_v43  ;;  %2202 = vmatprep.mubr.bf16.mxu1 %v3594_v44  ;;  %v3683_v43 = vld [vmem:[%s3880_s28 + $0x214] ss:$12 sps:$4 sm:$0xff]  }
  0x76   : > { %v3685_v44 = vld [vmem:[%s3880_s28 + $0x128] ss:$12 sps:$4 sm:$0xff]  }
  0x7c   : > { %1819 = vmatmul.mubr.bf16.gmra.mxu0 %v3596_v45  ;;  %2203 = vmatmul.mubr.bf16.gmra.mxu1 %v3597_v46  ;;  %v3686_v45 = vld [vmem:[%s3880_s28 + $0x210] ss:$12 sps:$4 sm:$0xff]   ;;  %v3687_v46 = vld [vmem:[%s3880_s28 + $0x140] ss:$12 sps:$4 sm:$0xff]  }
  0x7d   : > { %1826 = vmatprep.mubr.bf16.mxu0 %v3598_v47  ;;  %2210 = vmatprep.mubr.bf16.mxu1 %v3600_v48  ;;  %v3688_v47 = vld [vmem:[%s3880_s28 + $0x22c] ss:$12 sps:$4 sm:$0xff]  }
  0x7e   : > { %v3690_v48 = vld [vmem:[%s3880_s28 + $0x158] ss:$12 sps:$4 sm:$0xff]  }
  0x84   : > { %1827 = vmatmul.mubr.bf16.gmra.mxu0 %v3602_v49  ;;  %2211 = vmatmul.mubr.bf16.gmra.mxu1 %v3603_v50  ;;  %v3691_v49 = vld [vmem:[%s3880_s28 + $0x228] ss:$12 sps:$4 sm:$0xff]   ;;  %v3692_v50 = vld [vmem:[%s3880_s28 + $0x170] ss:$12 sps:$4 sm:$0xff]  }
  0x85   : > { %1834 = vmatprep.mubr.bf16.mxu0 %v3604_v51  ;;  %2218 = vmatprep.mubr.bf16.mxu1 %v3606_v52  ;;  %v3693_v51 = vld [vmem:[%s3880_s28 + $0x244] ss:$12 sps:$4 sm:$0xff]   ;;  %v3695_v52 = vld [vmem:[%s3880_s28 + $0x188] ss:$12 sps:$4 sm:$0xff]  }
  0x8c   : > { %1835 = vmatmul.mubr.bf16.gmra.mxu0 %v3608_v53  ;;  %2219 = vmatmul.mubr.bf16.gmra.mxu1 %v3609_v54  ;;  %v3696_v53 = vld [vmem:[%s3880_s28 + $0x240] ss:$12 sps:$4 sm:$0xff]  }
  0x8d   : > { %1842 = vmatprep.mubr.bf16.mxu0 %v3611_v55  ;;  %2226 = vmatprep.mubr.bf16.mxu1 %v3613_v56  ;;  %v3697_v54 = vld [vmem:[%s3880_s28 + $0x1a0] ss:$12 sps:$4 sm:$0xff]   ;;  %v3698_v55 = vld [vmem:[%s3880_s28 + $0x25c] ss:$12 sps:$4 sm:$0xff]   ;;  %v3700_v56 = vld [vmem:[%s3880_s28 + $0x1b8] ss:$12 sps:$4 sm:$0xff]  }
  0x94   : > { %1843 = vmatmul.mubr.bf16.gmra.mxu0 %v3615_v57  ;;  %2227 = vmatmul.mubr.bf16.gmra.mxu1 %v3616_v58 }
  0x95   : > { %1850 = vmatprep.mubr.bf16.mxu0 %v3617_v59  ;;  %2234 = vmatprep.mubr.bf16.mxu1 %v3619_v60 }
  0x9c   : > { %1851 = vmatmul.mubr.bf16.gmra.mxu0 %v3621_v61  ;;  %2235 = vmatmul.mubr.bf16.gmra.mxu1 %v3622_v62 }
  0x9d   : > { %1858 = vmatprep.mubr.bf16.mxu0 %v3623_v63  ;;  %2242 = vmatprep.mubr.bf16.mxu1 %v3625_v0  ;;  %v3701_v63 = vld [vmem:[%s3880_s28 + $0x258] ss:$12 sps:$4 sm:$0xff]   ;;  %v3702_v0 = vld [vmem:[%s3880_s28 + $0x1d0] ss:$12 sps:$4 sm:$0xff]  }
  0xa4   : > { %1859 = vmatmul.mubr.bf16.gmra.mxu0 %v3627_v1  ;;  %2243 = vmatmul.mubr.bf16.gmra.mxu1 %v3628_v2  ;;  %v3703_v1 = vld [vmem:[%s3880_s28 + $0x274] ss:$12 sps:$4 sm:$0xff]  }
  0xa5   : > { %1866 = vmatprep.mubr.bf16.mxu0 %v3629_v3  ;;  %2250 = vmatprep.mubr.bf16.mxu1 %v3631_v4  ;;  %v3705_v2 = vld [vmem:[%s3880_s28 + $0x1e8] ss:$12 sps:$4 sm:$0xff]  }
  0xac   : > { %1867 = vmatmul.mubr.bf16.gmra.mxu0 %v3633_v5  ;;  %2251 = vmatmul.mubr.bf16.gmra.mxu1 %v3634_v6 }
  0xad   : > { %1874 = vmatprep.mubr.bf16.mxu0 %v3635_v7  ;;  %2258 = vmatprep.mubr.bf16.mxu1 %v3637_v8 }
  0xb4   : > { %1875 = vmatmul.mubr.bf16.gmra.mxu0 %v3639_v9  ;;  %2259 = vmatmul.mubr.bf16.gmra.mxu1 %v3640_v10 }
  0xb5   : > { %1882 = vmatprep.mubr.bf16.mxu0 %v3641_v11  ;;  %2266 = vmatprep.mubr.bf16.mxu1 %v3643_v12  ;;  %v3706_v11 = vld [vmem:[%s3880_s28 + $0x270] ss:$12 sps:$4 sm:$0xff]   ;;  %v3707_v12 = vld [vmem:[%s3880_s28 + $0x200] ss:$12 sps:$4 sm:$0xff]  }
  0xbc   : > { %1883 = vmatmul.mubr.bf16.gmra.mxu0 %v3645_v13  ;;  %2267 = vmatmul.mubr.bf16.gmra.mxu1 %v3646_v14  ;;  %v3708_v13 = vld [vmem:[%s3880_s28 + $0x28c] ss:$12 sps:$4 sm:$0xff]  }
  0xbd   : > { %1890 = vmatprep.mubr.bf16.mxu0 %v3647_v15  ;;  %2274 = vmatprep.mubr.bf16.mxu1 %v3649_v16  ;;  %v3710_v14 = vld [vmem:[%s3880_s28 + $0x218] ss:$12 sps:$4 sm:$0xff]  }
  0xc4   : > { %1891 = vmatmul.mubr.bf16.gmra.mxu0 %v3651_v17  ;;  %2275 = vmatmul.mubr.bf16.gmra.mxu1 %v3652_v18 }
  0xc5   : > { %1898 = vmatprep.mubr.bf16.mxu0 %v3653_v19  ;;  %3369 = vmatprep.mubr.msk.bf16.mxu1 %vm1545_vm0, %v3655_v20 }
  0xcc   : > { %1899 = vmatmul.mubr.bf16.gmra.mxu0 %v3656_v21  ;;  %3370 = vmatmul.mubr.msk.bf16.vlgmr.msra.gmra.mxu1 %vm1545_vm0, %v3657_v22 }
  0xcd   : > { %1906 = vmatprep.mubr.bf16.mxu0 %v3658_v23  ;;  %3373 = vmatprep.mubr.msk.bf16.mxu1 %vm1545_vm0, %v3660_v24  ;;  %v3711_v23 = vld [vmem:[%s3880_s28 + $0x288] ss:$12 sps:$4 sm:$0xff]   ;;  %v3712_v24 = vld [vmem:[%s3880_s28 + $0x230] ss:$12 sps:$4 sm:$0xff]  }
  0xd4   : > { %1907 = vmatmul.mubr.bf16.gmra.mxu0 %v3661_v25  ;;  %3374 = vmatmul.mubr.msk.bf16.gmra.mxu1 %vm1545_vm0, %v3662_v26  ;;  %v3715_v25 = vld [vmem:[%s3880_s28 + $0x2a4] ss:$12 sps:$4 sm:$0xff]   ;;  %v3716_v26 = vld [vmem:[%s3880_s28 + $0x248] ss:$12 sps:$4 sm:$0xff]  }
  0xd5   : > { %1914 = vmatprep.mubr.bf16.mxu0 %v3663_v27  ;;  %3377 = vmatprep.mubr.msk.bf16.mxu1 %vm1545_vm0, %v3665_v28 }
  0xdc   : > { %1915 = vmatmul.mubr.bf16.gmra.mxu0 %v3666_v29  ;;  %3378 = vmatmul.mubr.msk.bf16.gmra.mxu1 %vm1545_vm0, %v3667_v30 }
  0xdd   : > { %1922 = vmatprep.mubr.bf16.mxu0 %v3668_v31  ;;  %3381 = vmatprep.mubr.msk.bf16.mxu1 %vm1545_vm0, %v3670_v32 }
  0xe4   : > { %1923 = vmatmul.mubr.bf16.gmra.mxu0 %v3671_v33  ;;  %3382 = vmatmul.mubr.msk.bf16.gmra.mxu1 %vm1545_vm0, %v3672_v34 }
  0xe5   : > { %1930 = vmatprep.mubr.bf16.mxu0 %v3673_v35  ;;  %3385 = vmatprep.mubr.msk.bf16.mxu1 %vm1545_vm0, %v3675_v36  ;;  %v3713_v35 = vld [vmem:[%s3880_s28 + $0x2a0] ss:$12 sps:$4 sm:$0xff]  }
  0xe6   : > { %v3717_v36 = vld [vmem:[%s3880_s28 + $0x260] ss:$12 sps:$4 sm:$0xff]  }
  0xec   : > { %1931 = vmatmul.mubr.bf16.gmra.mxu0 %v3676_v37  ;;  %3386 = vmatmul.mubr.msk.bf16.gmra.mxu1 %vm1545_vm0, %v3677_v38  ;;  %v3720_v37 = vld [vmem:[%s3880_s28 + $0x2bc] ss:$12 sps:$4 sm:$0xff]   ;;  %v3721_v38 = vld [vmem:[%s3880_s28 + $0x278] ss:$12 sps:$4 sm:$0xff]  }
  0xed   : > { %1938 = vmatprep.mubr.bf16.mxu0 %v3678_v39  ;;  %3389 = vmatprep.mubr.msk.bf16.mxu1 %vm1545_vm0, %v3680_v40 }
  0xf4   : > { %1939 = vmatmul.mubr.bf16.gmra.mxu0 %v3681_v41  ;;  %3390 = vmatmul.mubr.msk.bf16.gmra.mxu1 %vm1545_vm0, %v3682_v42 }
  0xf5   : > { %1946 = vmatprep.mubr.bf16.mxu0 %v3683_v43  ;;  %3393 = vmatprep.mubr.msk.bf16.mxu1 %vm1545_vm0, %v3685_v44 }
  0xfc   : > { %1947 = vmatmul.mubr.bf16.gmra.mxu0 %v3686_v45  ;;  %3394 = vmatmul.mubr.msk.bf16.gmra.mxu1 %vm1545_vm0, %v3687_v46 }
  0xfd   : > { %1954 = vmatprep.mubr.bf16.mxu0 %v3688_v47  ;;  %3397 = vmatprep.mubr.msk.bf16.mxu1 %vm1545_vm0, %v3690_v48  ;;  %v3718_v47 = vld [vmem:[%s3880_s28 + $0x2b8] ss:$12 sps:$4 sm:$0xff]   ;;  %v3722_v48 = vld [vmem:[%s3880_s28 + $0x290] ss:$12 sps:$4 sm:$0xff]  }
 0x104   : > { %1955 = vmatmul.mubr.bf16.gmra.mxu0 %v3691_v49  ;;  %3398 = vmatmul.mubr.msk.bf16.gmra.mxu1 %vm1545_vm0, %v3692_v50  ;;  %v3725_v49 = vld [vmem:[%s3880_s28 + $0x2d4] ss:$12 sps:$4 sm:$0xff]  }
 0x105   : > { %1962 = vmatprep.mubr.bf16.mxu0 %v3693_v51  ;;  %3401 = vmatprep.mubr.msk.bf16.mxu1 %vm1545_vm0, %v3695_v52  ;;  %v3726_v50 = vld [vmem:[%s3880_s28 + $0x2a8] ss:$12 sps:$4 sm:$0xff]  }
 0x10c   : > { %v4064_v57 = vpop.f32.mrf.mxu0  ;;  %1963 = vmatmul.mubr.bf16.gmra.mxu0 %v3696_v53  ;;  %v4066_v58 = vpop.f32.mrf.mxu1  ;;  %3402 = vmatmul.mubr.msk.bf16.gmra.mxu1 %vm1545_vm0, %v3697_v54 }
 0x10d   : > { %1970 = vmatprep.mubr.bf16.mxu0 %v3698_v55  ;;  %3405 = vmatprep.mubr.msk.bf16.mxu1 %vm1545_vm0, %v3700_v56 }
 0x10e   : > { %v1774_v59 = vpop.f32.mrf.mxu0  ;;  %v2158_v60 = vpop.f32.mrf.mxu1 }
 0x110   : > { %v4070_v61 = vpop.f32.mrf.mxu0  ;;  %v4072_v62 = vpop.f32.mrf.mxu1 }
 0x112   : > { %v1777_v3 = vpop.f32.mrf.mxu0  ;;  %v2161_v4 = vpop.f32.mrf.mxu1 }
 0x114   : > { %v4078_v5 = vpop.f32.mrf.mxu0  ;;  %1971 = vmatmul.mubr.bf16.gmra.mxu0 %v3701_v63  ;;  %v4080_v6 = vpop.f32.mrf.mxu1  ;;  %3406 = vmatmul.mubr.msk.bf16.gmra.mxu1 %vm1545_vm0, %v3702_v0  ;;  %v3723_v63 = vld [vmem:[%s3880_s28 + $0x2d0] ss:$12 sps:$4 sm:$0xff]   ;;  %v3727_v0 = vld [vmem:[%s3880_s28 + $0x2c0] ss:$12 sps:$4 sm:$0xff]  }
 0x115   : > { %1978 = vmatprep.mubr.bf16.mxu0 %v3703_v1  ;;  %3409 = vmatprep.mubr.msk.bf16.mxu1 %vm1545_vm0, %v3705_v2  ;;  %v3730_v1 = vld [vmem:[%s3880_s28 + $0x2ec] ss:$12 sps:$4 sm:$0xff]  }
 0x116   : > { %v1782_v7 = vpop.f32.mrf.mxu0  ;;  %v2166_v8 = vpop.f32.mrf.mxu1  ;;  %v3731_v2 = vld [vmem:[%s3880_s28 + $0x2d8] ss:$12 sps:$4 sm:$0xff]  }
 0x118   : > { %v4084_v9 = vpop.f32.mrf.mxu0  ;;  %v4086_v10 = vpop.f32.mrf.mxu1 }
 0x11a   : > { %v1785_v15 = vpop.f32.mrf.mxu0  ;;  %v2169_v16 = vpop.f32.mrf.mxu1 }
 0x11b   : > { %v3728_v15 = vld [vmem:[%s3880_s28 + $0x2e8] ss:$12 sps:$4 sm:$0xff]   ;;  %v3732_v16 = vld [vmem:[%s3880_s28 + $0x2f0] ss:$12 sps:$4 sm:$0xff]  }
 0x11c   : > { %v4092_v17 = vpop.f32.mrf.mxu0  ;;  %1979 = vmatmul.mubr.bf16.gmra.mxu0 %v3706_v11  ;;  %v4094_v18 = vpop.f32.mrf.mxu1  ;;  %3410 = vmatmul.mubr.msk.bf16.gmra.mxu1 %vm1545_vm0, %v3707_v12 }
 0x11d   : > { %1986 = vmatprep.mubr.bf16.mxu0 %v3708_v13  ;;  %3413 = vmatprep.mubr.msk.bf16.mxu1 %vm1545_vm0, %v3710_v14 }
 0x11e   : > { %v1790_v19 = vpop.f32.mrf.mxu0  ;;  %v2174_v20 = vpop.f32.mrf.mxu1 }
 0x11f   : > { %v3735_v19 = vld [vmem:[%s3880_s28 + $0x304] ss:$12 sps:$4 sm:$0xff]   ;;  %v3736_v20 = vld [vmem:[%s3880_s28 + $0x308] ss:$12 sps:$4 sm:$0xff]  }
 0x120   : > { %v4098_v21 = vpop.f32.mrf.mxu0  ;;  %v4100_v22 = vpop.f32.mrf.mxu1 }
 0x122   : > { %v1793_v27 = vpop.f32.mrf.mxu0  ;;  %v2177_v28 = vpop.f32.mrf.mxu1 }
 0x124   : > { %v4106_v29 = vpop.f32.mrf.mxu0  ;;  %1987 = vmatmul.mubr.bf16.gmra.mxu0 %v3711_v23  ;;  %v4108_v30 = vpop.f32.mrf.mxu1  ;;  %3414 = vmatmul.mubr.msk.bf16.gmra.mxu1 %vm1545_vm0, %v3712_v24 }
 0x125   : > { %1994 = vmatprep.mubr.bf16.mxu0 %v3715_v25  ;;  %3417 = vmatprep.mubr.msk.bf16.mxu1 %vm1545_vm0, %v3716_v26 }
 0x126   : > { %v1798_v31 = vpop.f32.mrf.mxu0  ;;  %v2182_v32 = vpop.f32.mrf.mxu1 }
 0x128   : > { %v4112_v33 = vpop.f32.mrf.mxu0  ;;  %v4114_v34 = vpop.f32.mrf.mxu1 }
 0x12a   : > { %v1801_v39 = vpop.f32.mrf.mxu0  ;;  %v2185_v40 = vpop.f32.mrf.mxu1 }
 0x12c   : > { %v4120_v41 = vpop.f32.mrf.mxu0  ;;  %1995 = vmatmul.mubr.bf16.gmra.mxu0 %v3713_v35  ;;  %v4122_v42 = vpop.f32.mrf.mxu1  ;;  %3418 = vmatmul.mubr.msk.bf16.gmra.mxu1 %vm1545_vm0, %v3717_v36  ;;  %v3733_v35 = vld [vmem:[%s3880_s28 + $0x300] ss:$12 sps:$4 sm:$0xff]  }
 0x12d   : > { %2002 = vmatprep.mubr.bf16.mxu0 %v3720_v37  ;;  %3421 = vmatprep.mubr.msk.bf16.mxu1 %vm1545_vm0, %v3721_v38  ;;  %v3737_v36 = vld [vmem:[%s3880_s28 + $0x320] ss:$12 sps:$4 sm:$0xff]   ;;  %v3740_v37 = vld [vmem:[%s3880_s28 + $0x31c] ss:$12 sps:$4 sm:$0xff]   ;;  %v3741_v38 = vld [vmem:[%s3880_s28 + $0x338] ss:$12 sps:$4 sm:$0xff]  }
 0x12e   : > { %v1806_v43 = vpop.f32.mrf.mxu0  ;;  %v2190_v44 = vpop.f32.mrf.mxu1 }
 0x130   : > { %v4126_v45 = vpop.f32.mrf.mxu0  ;;  %v4128_v46 = vpop.f32.mrf.mxu1 }
 0x132   : > { %v1809_v51 = vpop.f32.mrf.mxu0  ;;  %v2193_v52 = vpop.f32.mrf.mxu1 }
 0x133   : > { %v3738_v51 = vld [vmem:[%s3880_s28 + $0x318] ss:$12 sps:$4 sm:$0xff]   ;;  %v3742_v52 = vld [vmem:[%s3880_s28 + $0x350] ss:$12 sps:$4 sm:$0xff]  }
 0x134   : > { %v4134_v53 = vpop.f32.mrf.mxu0  ;;  %2003 = vmatmul.mubr.bf16.gmra.mxu0 %v3718_v47  ;;  %v4136_v54 = vpop.f32.mrf.mxu1  ;;  %3422 = vmatmul.mubr.msk.bf16.gmra.mxu1 %vm1545_vm0, %v3722_v48 }
 0x135   : > { %2010 = vmatprep.mubr.bf16.mxu0 %v3725_v49  ;;  %3425 = vmatprep.mubr.msk.bf16.mxu1 %vm1545_vm0, %v3726_v50 }
 0x136   : > { %v1814_v55 = vpop.f32.mrf.mxu0  ;;  %v2198_v56 = vpop.f32.mrf.mxu1 }
 0x137   : > { %v3745_v55 = vld [vmem:[%s3880_s28 + $0x334] ss:$12 sps:$4 sm:$0xff]  }
 0x138   : > { %v4140_v59 = vpop.f32.mrf.mxu0  ;;  %v4142_v60 = vpop.f32.mrf.mxu1  ;;  %v3746_v56 = vld [vmem:[%s3880_s28 + $0x368] ss:$12 sps:$4 sm:$0xff]  }
 0x13a   : > { %v1817_v3 = vpop.f32.mrf.mxu0  ;;  %v2201_v4 = vpop.f32.mrf.mxu1 }
 0x13c   : > { %v4148_v7 = vpop.f32.mrf.mxu0  ;;  %2011 = vmatmul.mubr.bf16.gmra.mxu0 %v3723_v63  ;;  %v4150_v8 = vpop.f32.mrf.mxu1  ;;  %3426 = vmatmul.mubr.msk.bf16.gmra.mxu1 %vm1545_vm0, %v3727_v0 }
 0x13d   : > { %2018 = vmatprep.mubr.bf16.mxu0 %v3730_v1  ;;  %3429 = vmatprep.mubr.msk.bf16.mxu1 %vm1545_vm0, %v3731_v2 }
 0x13e   : > { %v1822_v11 = vpop.f32.mrf.mxu0  ;;  %v2206_v12 = vpop.f32.mrf.mxu1 }
 0x140   : > { %v4154_v13 = vpop.f32.mrf.mxu0  ;;  %v4156_v14 = vpop.f32.mrf.mxu1 }
 0x142   : > { %v1825_v23 = vpop.f32.mrf.mxu0  ;;  %v2209_v24 = vpop.f32.mrf.mxu1 }
 0x144   : > { %v4162_v25 = vpop.f32.mrf.mxu0  ;;  %2019 = vmatmul.mubr.bf16.gmra.mxu0 %v3728_v15  ;;  %v4164_v26 = vpop.f32.mrf.mxu1  ;;  %3430 = vmatmul.mubr.msk.bf16.gmra.mxu1 %vm1545_vm0, %v3732_v16  ;;  %v3743_v15 = vld [vmem:[%s3880_s28 + $0x330] ss:$12 sps:$4 sm:$0xff]   ;;  %v3747_v16 = vld [vmem:[%s3880_s28 + $0x380] ss:$12 sps:$4 sm:$0xff]  }
 0x145   : > { %2026 = vmatprep.mubr.bf16.mxu0 %v3735_v19  ;;  %3433 = vmatprep.mubr.msk.bf16.mxu1 %vm1545_vm0, %v3736_v20  ;;  %v3750_v19 = vld [vmem:[%s3880_s28 + $0x34c] ss:$12 sps:$4 sm:$0xff]  }
 0x146   : > { %v1830_v27 = vpop.f32.mrf.mxu0  ;;  %v2214_v28 = vpop.f32.mrf.mxu1  ;;  %v3751_v20 = vld [vmem:[%s3880_s28 + $0x398] ss:$12 sps:$4 sm:$0xff]  }
 0x148   : > { %v4168_v31 = vpop.f32.mrf.mxu0  ;;  %v4170_v32 = vpop.f32.mrf.mxu1 }
 0x14a   : > { %v1833_v39 = vpop.f32.mrf.mxu0  ;;  %v2217_v40 = vpop.f32.mrf.mxu1 }
 0x14b   : > { %v3748_v39 = vld [vmem:[%s3880_s28 + $0x348] ss:$12 sps:$4 sm:$0xff]   ;;  %v3752_v40 = vld [vmem:[%s3880_s28 + $0x3b0] ss:$12 sps:$4 sm:$0xff]  }
 0x14c   : > { %v4176_v43 = vpop.f32.mrf.mxu0  ;;  %2027 = vmatmul.mubr.bf16.gmra.mxu0 %v3733_v35  ;;  %v4178_v44 = vpop.f32.mrf.mxu1  ;;  %3434 = vmatmul.mubr.msk.bf16.gmra.mxu1 %vm1545_vm0, %v3737_v36 }
 0x14d   : > { %4899 = vst [vmem:[#allocation2_spill] sm:$0xff] %v4178_v44  ;;  %2034 = vmatprep.mubr.bf16.mxu0 %v3740_v37  ;;  %3437 = vmatprep.mubr.msk.bf16.mxu1 %vm1545_vm0, %v3741_v38 }
 0x14e   : > { %v1838_v47 = vpop.f32.mrf.mxu0  ;;  %v2222_v48 = vpop.f32.mrf.mxu1 }
 0x14f   : > { %v3755_v47 = vld [vmem:[%s3880_s28 + $0x364] ss:$12 sps:$4 sm:$0xff]   ;;  %v3756_v48 = vld [vmem:[%s3880_s28 + $0x3c8] ss:$12 sps:$4 sm:$0xff]  }
 0x150   : > { %v4182_v49 = vpop.f32.mrf.mxu0  ;;  %v4184_v50 = vpop.f32.mrf.mxu1 }
 0x151   : > { %4900 = vst [vmem:[#allocation3_spill] sm:$0xff] %v4184_v50 }
 0x152   : > { %v1841_v63 = vpop.f32.mrf.mxu0  ;;  %v2225_v0 = vpop.f32.mrf.mxu1 }
 0x154   : > { %v4190_v1 = vpop.f32.mrf.mxu0  ;;  %2035 = vmatmul.mubr.bf16.gmra.mxu0 %v3738_v51  ;;  %v4192_v2 = vpop.f32.mrf.mxu1  ;;  %3438 = vmatmul.mubr.msk.bf16.gmra.mxu1 %vm1545_vm0, %v3742_v52 }
 0x155   : > { %2042 = vmatprep.mubr.bf16.mxu0 %v3745_v55  ;;  %3441 = vmatprep.mubr.msk.bf16.mxu1 %vm1545_vm0, %v3746_v56 }
 0x156   : > { %v1846_v3 = vpop.f32.mrf.mxu0  ;;  %v2230_v4 = vpop.f32.mrf.mxu1 }
 0x158   : > { %v4196_v11 = vpop.f32.mrf.mxu0  ;;  %v4198_v12 = vpop.f32.mrf.mxu1 }
 0x159   : > { %4901 = vst [vmem:[#allocation4_spill] sm:$0xff] %v4198_v12  ;;  %v3778_v12 = vld [vmem:[%s3880_s28 + $0x3d8] ss:$12 sps:$4 sm:$0xff]  }
 0x15a   : > { %v1849_v23 = vpop.f32.mrf.mxu0  ;;  %v2233_v24 = vpop.f32.mrf.mxu1 }
 0x15c   : > { %v4204_v27 = vpop.f32.mrf.mxu0  ;;  %2043 = vmatmul.mubr.bf16.gmra.mxu0 %v3743_v15  ;;  %v4206_v28 = vpop.f32.mrf.mxu1  ;;  %3442 = vmatmul.mubr.msk.bf16.gmra.mxu1 %vm1545_vm0, %v3747_v16  ;;  %v3753_v15 = vld [vmem:[%s3880_s28 + $0x360] ss:$12 sps:$4 sm:$0xff]  }
 0x15d   : > { %4902 = vst [vmem:[#allocation5_spill] sm:$0xff] %v4206_v28  ;;  %2050 = vmatprep.mubr.bf16.mxu0 %v3750_v19  ;;  %3445 = vmatprep.mubr.msk.bf16.mxu1 %vm1545_vm0, %v3751_v20  ;;  %v3757_v16 = vld [vmem:[%s3880_s28 + $0x3e0] ss:$12 sps:$4 sm:$0xff]   ;;  %v3760_v19 = vld [vmem:[%s3880_s28 + $0x37c] ss:$12 sps:$4 sm:$0xff]  }
 0x15e   : > { %v1854_v35 = vpop.f32.mrf.mxu0  ;;  %v2238_v36 = vpop.f32.mrf.mxu1  ;;  %v3761_v20 = vld [vmem:[%s3880_s28 + $0x3f8] ss:$12 sps:$4 sm:$0xff]   ;;  %v3773_v28 = vld [vmem:[%s3880_s28 + $0x3c0] ss:$12 sps:$4 sm:$0xff]  }
 0x160   : > { %v4210_v37 = vpop.f32.mrf.mxu0  ;;  %v4212_v38 = vpop.f32.mrf.mxu1 }
 0x161   : > { %4903 = vst [vmem:[#allocation6_spill] sm:$0xff] %v4212_v38  ;;  %v3768_v38 = vld [vmem:[%s3880_s28 + $0x3a8] ss:$12 sps:$4 sm:$0xff]  }
 0x162   : > { %v1857_v51 = vpop.f32.mrf.mxu0  ;;  %v2241_v52 = vpop.f32.mrf.mxu1 }
 0x163   : > { %v3758_v51 = vld [vmem:[%s3880_s28 + $0x378] ss:$12 sps:$4 sm:$0xff]   ;;  %v3762_v52 = vld [vmem:[%s3880_s28 + $0x410] ss:$12 sps:$4 sm:$0xff]  }
 0x164   : > { %v4218_v55 = vpop.f32.mrf.mxu0  ;;  %2051 = vmatmul.mubr.bf16.gmra.mxu0 %v3748_v39  ;;  %v4220_v56 = vpop.f32.mrf.mxu1  ;;  %3446 = vmatmul.mubr.msk.bf16.gmra.mxu1 %vm1545_vm0, %v3752_v40 }
 0x165   : > { %4904 = vst [vmem:[#allocation7_spill] sm:$0xff] %v4220_v56  ;;  %2058 = vmatprep.mubr.bf16.mxu0 %v3755_v47  ;;  %3449 = vmatprep.mubr.msk.bf16.mxu1 %vm1545_vm0, %v3756_v48  ;;  %v3781_v56 = vld [vmem:[%s3880_s28 + $0x4b8] ss:$12 sps:$4 sm:$0xff]  }
 0x166   : > { %v1862_v63 = vpop.f32.mrf.mxu0  ;;  %v2246_v0 = vpop.f32.mrf.mxu1 }
 0x167   : > { %v3765_v63 = vld [vmem:[%s3880_s28 + $0x394] ss:$12 sps:$4 sm:$0xff]  }
 0x168   : > { %v4224_v3 = vpop.f32.mrf.mxu0  ;;  %v4226_v4 = vpop.f32.mrf.mxu1  ;;  %v3766_v0 = vld [vmem:[%s3880_s28 + $0x428] ss:$12 sps:$4 sm:$0xff]  }
 0x169   : > { %4905 = vst [vmem:[#allocation8_spill] sm:$0xff] %v4226_v4 }
 0x16a   : > { %v1865_v23 = vpop.f32.mrf.mxu0  ;;  %v2249_v24 = vpop.f32.mrf.mxu1 }
 0x16c   : > { %v4232_v35 = vpop.f32.mrf.mxu0  ;;  %2059 = vmatmul.mubr.bf16.gmra.mxu0 %v3753_v15  ;;  %v4234_v36 = vpop.f32.mrf.mxu1  ;;  %3450 = vmatmul.mubr.msk.bf16.gmra.mxu1 %vm1545_vm0, %v3757_v16 }
 0x16d   : > { %4906 = vst [vmem:[#allocation9_spill] sm:$0xff] %v4234_v36  ;;  %2066 = vmatprep.mubr.bf16.mxu0 %v3760_v19  ;;  %3453 = vmatprep.mubr.msk.bf16.mxu1 %vm1545_vm0, %v3761_v20 }
 0x16e   : > { %v1870_v39 = vpop.f32.mrf.mxu0  ;;  %v2254_v40 = vpop.f32.mrf.mxu1 }
 0x170   : > { %v4238_v47 = vpop.f32.mrf.mxu0  ;;  %v4240_v48 = vpop.f32.mrf.mxu1 }
 0x171   : > { %4907 = vst [vmem:[#allocation10_spill] sm:$0xff] %v4240_v48  ;;  %v3763_v48 = vld [vmem:[%s3880_s28 + $0x390] ss:$12 sps:$4 sm:$0xff]  }
 0x172   : > { %v1873_v15 = vpop.f32.mrf.mxu0  ;;  %v2257_v23 = vpop.f32.mrf.mxu1 }
 0x173   : > { %v3767_v15 = vld [vmem:[%s3880_s28 + $0x440] ss:$12 sps:$4 sm:$0xff]  }
 0x174   : > { %v4246_v16 = vpop.f32.mrf.mxu0  ;;  %2067 = vmatmul.mubr.bf16.gmra.mxu0 %v3758_v51  ;;  %v4248_v19 = vpop.f32.mrf.mxu1  ;;  %3454 = vmatmul.mubr.msk.bf16.gmra.mxu1 %vm1545_vm0, %v3762_v52  ;;  %v3770_v23 = vld [vmem:[%s3880_s28 + $0x3ac] ss:$12 sps:$4 sm:$0xff]  }
 0x175   : > { %4908 = vst [vmem:[#allocation11_spill] sm:$0xff] %v4248_v19  ;;  %2074 = vmatprep.mubr.bf16.mxu0 %v3765_v63  ;;  %3457 = vmatprep.mubr.msk.bf16.mxu1 %vm1545_vm0, %v3766_v0  ;;  %v3771_v51 = vld [vmem:[%s3880_s28 + $0x458] ss:$12 sps:$4 sm:$0xff]  }
 0x176   : > { %v1878_v20 = vpop.f32.mrf.mxu0  ;;  %v2262_v24 = vpop.f32.mrf.mxu1 }
 0x178   : > { %v4252_v39 = vpop.f32.mrf.mxu0  ;;  %v4254_v40 = vpop.f32.mrf.mxu1 }
 0x179   : > { %4909 = vst [vmem:[#allocation12_spill] sm:$0xff] %v4254_v40 }
 0x17a   : > { %v1881_v36 = vpop.f32.mrf.mxu0  ;;  %v2265_v19 = vpop.f32.mrf.mxu1 }
 0x17b   : > { %v3772_v36 = vld [vmem:[%s3880_s28 + $0x470] ss:$12 sps:$4 sm:$0xff]  }
 0x17c   : > { %v4260_v52 = vpop.f32.mrf.mxu0  ;;  %2075 = vmatmul.mubr.bf16.gmra.mxu0 %v3763_v48  ;;  %v4262_v63 = vpop.f32.mrf.mxu1  ;;  %3458 = vmatmul.mubr.msk.bf16.gmra.mxu1 %vm1545_vm0, %v3767_v15  ;;  %v3775_v19 = vld [vmem:[%s3880_s28 + $0x3c4] ss:$12 sps:$4 sm:$0xff]   ;;  %v3776_v48 = vld [vmem:[%s3880_s28 + $0x488] ss:$12 sps:$4 sm:$0xff]  }
 0x17d   : > { %4910 = vst [vmem:[#allocation13_spill] sm:$0xff] %v4262_v63  ;;  %2082 = vmatprep.mubr.bf16.mxu0 %v3770_v23  ;;  %3461 = vmatprep.mubr.msk.bf16.mxu1 %vm1545_vm0, %v3771_v51 }
 0x17e   : > { %v1886_v0 = vpop.f32.mrf.mxu0  ;;  %v2270_v20 = vpop.f32.mrf.mxu1 }
 0x180   : > { %v4266_v24 = vpop.f32.mrf.mxu0  ;;  %v4268_v40 = vpop.f32.mrf.mxu1 }
 0x181   : > { %4911 = vst [vmem:[#allocation14_spill] sm:$0xff] %v4268_v40 }
 0x182   : > { %v1889_v63 = vpop.f32.mrf.mxu0  ;;  %v2273_v15 = vpop.f32.mrf.mxu1 }
 0x183   : > { %v3777_v63 = vld [vmem:[%s3880_s28 + $0x4a0] ss:$12 sps:$4 sm:$0xff]   ;;  %v3780_v15 = vld [vmem:[%s3880_s28 + $0x3dc] ss:$12 sps:$4 sm:$0xff]  }
 0x184   : > { %v4274_v23 = vpop.f32.mrf.mxu0  ;;  %2083 = vmatmul.mubr.bf16.gmra.mxu0 %v3768_v38  ;;  %v4276_v51 = vpop.f32.mrf.mxu1  ;;  %3462 = vmatmul.mubr.msk.bf16.gmra.mxu1 %vm1545_vm0, %v3772_v36  ;;  %v4292_v38 = vld [vmem:[%s4897_s2] ss:$0 sm:$0xff] }
 0x185   : > { %4912 = vst [vmem:[#allocation15_spill] sm:$0xff] %v4276_v51  ;;  %2090 = vmatprep.mubr.bf16.mxu0 %v3775_v19  ;;  %3465 = vmatprep.mubr.msk.bf16.mxu1 %vm1545_vm0, %v3776_v48  ;;  %v1781_v48 = vadd.f32 %v4292_v38, %v4078_v5 }
 0x186   : > { %v1894_v0 = vpop.f32.mrf.mxu0  ;;  %v2278_v20 = vpop.f32.mrf.mxu1 }
 0x188   : > { %v4280_v40 = vpop.f32.mrf.mxu0  ;;  %v4282_v4 = vpop.f32.mrf.mxu1 }
 0x189   : > { %4913 = vst [vmem:[#allocation16_spill] sm:$0xff] %v4282_v4  ;;  %v1784_v4 = vadd.f32 %v4292_v38, %v4084_v9  ;;  %v1797_v9 = vadd.f32 %v4292_v38, %v4106_v29 }
 0x18a   : > { %v1897_v36 = vpop.f32.mrf.mxu0  ;;  %v2281_v19 = vpop.f32.mrf.mxu1 }
 0x18b   : > { %v1773_v36 = vadd.f32 %v4292_v38, %v4064_v57  ;;  %v3782_v57 = vld [vmem:[%s3880_s28 + $0x4d0] ss:$12 sps:$4 sm:$0xff]  }
 0x18c   : > { %v4296_v0 = vpop.f32.mrf.mxu0  ;;  %2091 = vmatmul.mubr.bf16.gmra.mxu0 %v3773_v28  ;;  %v3371_v20 = vpop.f32.mrf.mxu1  ;;  %3466 = vmatmul.mubr.msk.bf16.gmra.mxu1 %vm1545_vm0, %v3777_v63 }
 0x18d   : > { %v2326_v5 = vadd.f32 %v3371_v20, %v1781_v48  ;;  %2098 = vmatprep.mubr.bf16.mxu0 %v3780_v15  ;;  %3469 = vmatprep.mubr.msk.bf16.mxu1 %vm1545_vm0, %v3781_v56  ;;  %v1776_v15 = vadd.f32 %v4292_v38, %v4070_v61  ;;  %v3785_v48 = vld [vmem:[%s3880_s28 + $0x3f4] ss:$12 sps:$4 sm:$0xff]  }
 0x18e   : > { %v1902_v28 = vpop.f32.mrf.mxu0  ;;  %v2317_v19 = vpop.f32.mrf.mxu1  ;;  %v3786_v20 = vld [vmem:[%s3880_s28 + $0x4e8] ss:$12 sps:$4 sm:$0xff]  }
 0x18f   : > { %2831 = vst.msk [vmem:[%s4301_s16 + $0x10] sm:$0xff] %vm2828_vm1, %v2326_v5  ;;  %v2318_v51 = vadd.f32 %v2317_v19, %v1773_v36 }
 0x190   : > { %v4311_v50 = vpop.f32.mrf.mxu0  ;;  %v3372_v63 = vpop.f32.mrf.mxu1 }
 0x191   : > { %2829 = vst.msk [vmem:[%s4301_s16] sm:$0xff] %vm2828_vm1, %v2318_v51  ;;  %v2329_v56 = vadd.f32 %v3372_v63, %v1784_v4  ;;  %v1789_v4 = vadd.f32 %v4292_v38, %v4092_v17 }
 0x192   : > { %v1905_v28 = vpop.f32.mrf.mxu0  ;;  %v2320_v44 = vpop.f32.mrf.mxu1 }
 0x193   : > { %2832 = vst.msk [vmem:[%s4301_s16 + $0x18] sm:$0xff] %vm2828_vm1, %v2329_v56  ;;  %v2321_v36 = vadd.f32 %v2320_v44, %v1776_v15  ;;  %v3787_v15 = vld [vmem:[%s3880_s28 + $0x500] ss:$12 sps:$4 sm:$0xff]   ;;  %v1792_v56 = vadd.f32 %v4292_v38, %v4098_v21  ;;  %v3791_v28 = vld [vmem:[%s3880_s28 + $0x518] ss:$12 sps:$4 sm:$0xff]  }
 0x194   : > { %v4325_v5 = vpop.f32.mrf.mxu0  ;;  %2099 = vmatmul.mubr.bf16.gmra.mxu0 %v3778_v12  ;;  %v3375_v61 = vpop.f32.mrf.mxu1  ;;  %3470 = vmatmul.mubr.msk.bf16.gmra.mxu1 %vm1545_vm0, %v3782_v57  ;;  %v1800_v12 = vadd.f32 %v4292_v38, %v4112_v33  ;;  %v3783_v57 = vld [vmem:[%s3880_s28 + $0x3f0] ss:$12 sps:$4 sm:$0xff]   ;;  %v1813_v33 = vadd.f32 %v4292_v38, %v4134_v53 }
 0x195   : > { %2830 = vst.msk [vmem:[%s4301_s16 + $0x8] sm:$0xff] %vm2828_vm1, %v2321_v36  ;;  %v2342_v51 = vadd.f32 %v3375_v61, %v1797_v9  ;;  %2106 = vmatprep.mubr.bf16.mxu0 %v3785_v48  ;;  %3473 = vmatprep.mubr.msk.bf16.mxu1 %vm1545_vm0, %v3786_v20  ;;  %v3790_v20 = vld [vmem:[%s3880_s28 + $0x40c] ss:$12 sps:$4 sm:$0xff]  }
 0x196   : > { %v1910_v29 = vpop.f32.mrf.mxu0  ;;  %v2333_v44 = vpop.f32.mrf.mxu1 }
 0x197   : > { %2835 = vst.msk [vmem:[%s4301_s16 + $0x30] sm:$0xff] %vm2828_vm1, %v2342_v51  ;;  %v2334_v19 = vadd.f32 %v2333_v44, %v1789_v4  ;;  %v1805_v51 = vadd.f32 %v4292_v38, %v4120_v41 }
 0x198   : > { %v4337_v63 = vpop.f32.mrf.mxu0  ;;  %v3376_v17 = vpop.f32.mrf.mxu1 }
 0x199   : > { %2833 = vst.msk [vmem:[%s4301_s16 + $0x20] sm:$0xff] %vm2828_vm1, %v2334_v19  ;;  %v2345_v48 = vadd.f32 %v3376_v17, %v1800_v12  ;;  %v1816_v12 = vadd.f32 %v4292_v38, %v4140_v59  ;;  %v1829_v59 = vadd.f32 %v4292_v38, %v4162_v25 }
 0x19a   : > { %v1913_v9 = vpop.f32.mrf.mxu0  ;;  %v2336_v36 = vpop.f32.mrf.mxu1 }
 0x19b   : > { %2836 = vst.msk [vmem:[%s4301_s16 + $0x38] sm:$0xff] %vm2828_vm1, %v2345_v48  ;;  %v2337_v61 = vadd.f32 %v2336_v36, %v1792_v56  ;;  %v1808_v56 = vadd.f32 %v4292_v38, %v4126_v45 }
 0x19c   : > { %v4351_v4 = vpop.f32.mrf.mxu0  ;;  %2107 = vmatmul.mubr.bf16.gmra.mxu0 %v3783_v57  ;;  %v3379_v21 = vpop.f32.mrf.mxu1  ;;  %3474 = vmatmul.mubr.msk.bf16.gmra.mxu1 %vm1545_vm0, %v3787_v15  ;;  %v3788_v57 = vld [vmem:[%s3880_s28 + $0x408] ss:$12 sps:$4 sm:$0xff]   ;;  %v3792_v15 = vld [vmem:[%s3880_s28 + $0x530] ss:$12 sps:$4 sm:$0xff]  }
 0x19d   : > { %2834 = vst.msk [vmem:[%s4301_s16 + $0x28] sm:$0xff] %vm2828_vm1, %v2337_v61  ;;  %v2358_v29 = vadd.f32 %v3379_v21, %v1813_v33  ;;  %2114 = vmatprep.mubr.bf16.mxu0 %v3790_v20  ;;  %3477 = vmatprep.mubr.msk.bf16.mxu1 %vm1545_vm0, %v3791_v28  ;;  %v3795_v20 = vld [vmem:[%s3880_s28 + $0x424] ss:$12 sps:$4 sm:$0xff]   ;;  %v3796_v28 = vld [vmem:[%s3880_s28 + $0x548] ss:$12 sps:$4 sm:$0xff]   ;;  %v1821_v21 = vadd.f32 %v4292_v38, %v4148_v7 }
 0x19e   : > { %v1918_v53 = vpop.f32.mrf.mxu0  ;;  %v2349_v44 = vpop.f32.mrf.mxu1 }
 0x19f   : > { %2839 = vst.msk [vmem:[%s4301_s16 + $0x50] sm:$0xff] %vm2828_vm1, %v2358_v29  ;;  %v2350_v19 = vadd.f32 %v2349_v44, %v1805_v51  ;;  %v1832_v53 = vadd.f32 %v4292_v38, %v4168_v31  ;;  %v1845_v31 = vadd.f32 %v4292_v38, %v4190_v1 }
 0x1a0   : > { %v4363_v17 = vpop.f32.mrf.mxu0  ;;  %v3380_v41 = vpop.f32.mrf.mxu1 }
 0x1a1   : > { %2837 = vst.msk [vmem:[%s4301_s16 + $0x40] sm:$0xff] %vm2828_vm1, %v2350_v19  ;;  %v2361_v48 = vadd.f32 %v3380_v41, %v1816_v12  ;;  %v3793_v19 = vld [vmem:[%s3880_s28 + $0x420] ss:$12 sps:$4 sm:$0xff]  }
 0x1a2   : > { %v1921_v9 = vpop.f32.mrf.mxu0  ;;  %v2352_v36 = vpop.f32.mrf.mxu1  ;;  %v3797_v41 = vld [vmem:[%s3880_s28 + $0x560] ss:$12 sps:$4 sm:$0xff]  }
 0x1a3   : > { %2840 = vst.msk [vmem:[%s4301_s16 + $0x58] sm:$0xff] %vm2828_vm1, %v2361_v48  ;;  %v2353_v33 = vadd.f32 %v2352_v36, %v1808_v56  ;;  %v3800_v56 = vld [vmem:[%s3880_s28 + $0x43c] ss:$12 sps:$4 sm:$0xff]   ;;  %v3801_v48 = vld [vmem:[%s3880_s28 + $0x578] ss:$12 sps:$4 sm:$0xff]  }
 0x1a4   : > { %v4377_v61 = vpop.f32.mrf.mxu0  ;;  %2115 = vmatmul.mubr.bf16.gmra.mxu0 %v3788_v57  ;;  %v3383_v45 = vpop.f32.mrf.mxu1  ;;  %3478 = vmatmul.mubr.msk.bf16.gmra.mxu1 %vm1545_vm0, %v3792_v15  ;;  %v1824_v57 = vadd.f32 %v4292_v38, %v4154_v13 }
 0x1a5   : > { %2838 = vst.msk [vmem:[%s4301_s16 + $0x48] sm:$0xff] %vm2828_vm1, %v2353_v33  ;;  %v2374_v51 = vadd.f32 %v3383_v45, %v1829_v59  ;;  %2122 = vmatprep.mubr.bf16.mxu0 %v3795_v20  ;;  %3481 = vmatprep.mubr.msk.bf16.mxu1 %vm1545_vm0, %v3796_v28  ;;  %v1837_v59 = vadd.f32 %v4292_v38, %v4176_v43 }
 0x1a6   : > { %v1926_v25 = vpop.f32.mrf.mxu0  ;;  %v2365_v29 = vpop.f32.mrf.mxu1 }
 0x1a7   : > { %2843 = vst.msk [vmem:[%s4301_s16 + $0x70] sm:$0xff] %vm2828_vm1, %v2374_v51  ;;  %v2366_v44 = vadd.f32 %v2365_v29, %v1821_v21  ;;  %v1848_v21 = vadd.f32 %v4292_v38, %v4196_v11  ;;  %v3798_v29 = vld [vmem:[%s3880_s28 + $0x438] ss:$12 sps:$4 sm:$0xff]   ;;  %v1861_v11 = vadd.f32 %v4292_v38, %v4218_v55 }
 0x1a8   : > { %v4389_v12 = vpop.f32.mrf.mxu0  ;;  %v3384_v7 = vpop.f32.mrf.mxu1 }
 0x1a9   : > { %2841 = vst.msk [vmem:[%s4301_s16 + $0x60] sm:$0xff] %vm2828_vm1, %v2366_v44  ;;  %v2377_v15 = vadd.f32 %v3384_v7, %v1832_v53  ;;  %v3802_v53 = vld [vmem:[%s3880_s28 + $0x590] ss:$12 sps:$4 sm:$0xff]   ;;  %v1840_v44 = vadd.f32 %v4292_v38, %v4182_v49 }
 0x1aa   : > { %v1929_v20 = vpop.f32.mrf.mxu0  ;;  %v2368_v28 = vpop.f32.mrf.mxu1 }
 0x1ab   : > { %2844 = vst.msk [vmem:[%s4301_s16 + $0x78] sm:$0xff] %vm2828_vm1, %v2377_v15  ;;  %v2369_v9 = vadd.f32 %v2368_v28, %v1824_v57  ;;  %v1853_v20 = vadd.f32 %v4292_v38, %v4204_v27 }
 0x1ac   : > { %v4403_v36 = vpop.f32.mrf.mxu0  ;;  %2123 = vmatmul.mubr.bf16.gmra.mxu0 %v3793_v19  ;;  %v3387_v13 = vpop.f32.mrf.mxu1  ;;  %3482 = vmatmul.mubr.msk.bf16.gmra.mxu1 %vm1545_vm0, %v3797_v41  ;;  %v3805_v19 = vld [vmem:[%s3880_s28 + $0x454] ss:$12 sps:$4 sm:$0xff]  }
 0x1ad   : > { %2842 = vst.msk [vmem:[%s4301_s16 + $0x68] sm:$0xff] %vm2828_vm1, %v2369_v9  ;;  %v2390_v33 = vadd.f32 %v3387_v13, %v1845_v31  ;;  %2130 = vmatprep.mubr.bf16.mxu0 %v3800_v56  ;;  %3485 = vmatprep.mubr.msk.bf16.mxu1 %vm1545_vm0, %v3801_v48  ;;  %v3806_v41 = vld [vmem:[%s3880_s28 + $0x5a8] ss:$12 sps:$4 sm:$0xff]   ;;  %v1864_v9 = vadd.f32 %v4292_v38, %v4224_v3 }
 0x1ae   : > { %v1934_v1 = vpop.f32.mrf.mxu0  ;;  %v2381_v45 = vpop.f32.mrf.mxu1  ;;  %v1877_v3 = vadd.f32 %v4292_v38, %v4246_v16 }
 0x1af   : > { %2847 = vst.msk [vmem:[%s4301_s16 + $0x90] sm:$0xff] %vm2828_vm1, %v2390_v33  ;;  %v2382_v51 = vadd.f32 %v2381_v45, %v1837_v59  ;;  %v3803_v33 = vld [vmem:[%s3880_s28 + $0x450] ss:$12 sps:$4 sm:$0xff]   ;;  %v3807_v1 = vld [vmem:[%s3880_s28 + $0x5c0] ss:$12 sps:$4 sm:$0xff]   ;;  %v1856_v45 = vadd.f32 %v4292_v38, %v4210_v37 }
 0x1b0   : > { %v4415_v25 = vpop.f32.mrf.mxu0  ;;  %v3388_v43 = vpop.f32.mrf.mxu1 }
 0x1b1   : > { %2845 = vst.msk [vmem:[%s4301_s16 + $0x80] sm:$0xff] %vm2828_vm1, %v2382_v51  ;;  %v2393_v7 = vadd.f32 %v3388_v43, %v1848_v21  ;;  %v3810_v51 = vld [vmem:[%s3880_s28 + $0x46c] ss:$12 sps:$4 sm:$0xff]  }
 0x1b2   : > { %v1937_v57 = vpop.f32.mrf.mxu0  ;;  %v2384_v15 = vpop.f32.mrf.mxu1  ;;  %v3811_v43 = vld [vmem:[%s3880_s28 + $0x5d8] ss:$12 sps:$4 sm:$0xff]  }
 0x1b3   : > { %2848 = vst.msk [vmem:[%s4301_s16 + $0x98] sm:$0xff] %vm2828_vm1, %v2393_v7  ;;  %v2385_v56 = vadd.f32 %v2384_v15, %v1840_v44  ;;  %v1880_v15 = vadd.f32 %v4292_v38, %v4252_v39  ;;  %v1893_v39 = vadd.f32 %v4292_v38, %v4274_v23  ;;  %v1896_v23 = vadd.f32 %v4292_v38, %v4280_v40 }
 0x1b4   : > { %v4429_v48 = vpop.f32.mrf.mxu0  ;;  %2131 = vmatmul.mubr.bf16.gmra.mxu0 %v3798_v29  ;;  %v3391_v49 = vpop.f32.mrf.mxu1  ;;  %3486 = vmatmul.mubr.msk.bf16.gmra.mxu1 %vm1545_vm0, %v3802_v53 }
 0x1b5   : > { %2846 = vst.msk [vmem:[%s4301_s16 + $0x88] sm:$0xff] %vm2828_vm1, %v2385_v56  ;;  %v2406_v28 = vadd.f32 %v3391_v49, %v1861_v11  ;;  %2138 = vmatprep.mubr.bf16.mxu0 %v3805_v19  ;;  %3489 = vmatprep.mubr.msk.bf16.mxu1 %vm1545_vm0, %v3806_v41  ;;  %v1869_v19 = vadd.f32 %v4292_v38, %v4232_v35  ;;  %v3808_v35 = vld [vmem:[%s3880_s28 + $0x468] ss:$12 sps:$4 sm:$0xff]  }
 0x1b6   : > { %v1942_v55 = vpop.f32.mrf.mxu0  ;;  %v2397_v31 = vpop.f32.mrf.mxu1 }
 0x1b7   : > { %2851 = vst.msk [vmem:[%s4301_s16 + $0xb0] sm:$0xff] %vm2828_vm1, %v2406_v28  ;;  %v2398_v13 = vadd.f32 %v2397_v31, %v1853_v20  ;;  %v3812_v20 = vld [vmem:[%s3880_s28 + $0x5f0] ss:$12 sps:$4 sm:$0xff]   ;;  %v1872_v28 = vadd.f32 %v4292_v38, %v4238_v47  ;;  %v1885_v47 = vadd.f32 %v4292_v38, %v4260_v52 }
 0x1b8   : > { %v4441_v59 = vpop.f32.mrf.mxu0  ;;  %v3392_v27 = vpop.f32.mrf.mxu1 }
 0x1b9   : > { %2849 = vst.msk [vmem:[%s4301_s16 + $0xa0] sm:$0xff] %vm2828_vm1, %v2398_v13  ;;  %v2409_v21 = vadd.f32 %v3392_v27, %v1864_v9 }
 0x1ba   : > { %v1945_v29 = vpop.f32.mrf.mxu0  ;;  %v2400_v53 = vpop.f32.mrf.mxu1 }
 0x1bb   : > { %2852 = vst.msk [vmem:[%s4301_s16 + $0xb8] sm:$0xff] %vm2828_vm1, %v2409_v21  ;;  %v2401_v44 = vadd.f32 %v2400_v53, %v1856_v45  ;;  %v1888_v53 = vadd.f32 %v4292_v38, %v4266_v24 }
 0x1bc   : > { %v4455_v7 = vpop.f32.mrf.mxu0  ;;  %2139 = vmatmul.mubr.bf16.gmra.mxu0 %v3803_v33  ;;  %v3395_v37 = vpop.f32.mrf.mxu1  ;;  %3490 = vmatmul.mubr.msk.bf16.gmra.mxu1 %vm1545_vm0, %v3807_v1 }
 0x1bd   : > { %2850 = vst.msk [vmem:[%s4301_s16 + $0xa8] sm:$0xff] %vm2828_vm1, %v2401_v44  ;;  %v2422_v41 = vadd.f32 %v3395_v37, %v1877_v3  ;;  %2146 = vmatprep.mubr.bf16.mxu0 %v3810_v51  ;;  %3493 = vmatprep.mubr.msk.bf16.mxu1 %vm1545_vm0, %v3811_v43  ;;  %v1909_v37 = vadd.f32 %v4292_v38, %v4325_v5 }
 0x1be   : > { %v1950_v16 = vpop.f32.mrf.mxu0  ;;  %v2413_v57 = vpop.f32.mrf.mxu1 }
 0x1bf   : > { %2855 = vst.msk [vmem:[%s4301_s16 + $0xd0] sm:$0xff] %vm2828_vm1, %v2422_v41  ;;  %v2414_v11 = vadd.f32 %v2413_v57, %v1869_v19  ;;  %v1901_v16 = vadd.f32 %v4292_v38, %v4296_v0 }
 0x1c0   : > { %v4467_v56 = vpop.f32.mrf.mxu0  ;;  %v3396_v49 = vpop.f32.mrf.mxu1 }
 0x1c1   : > { %2853 = vst.msk [vmem:[%s4301_s16 + $0xc0] sm:$0xff] %vm2828_vm1, %v2414_v11  ;;  %v2425_v55 = vadd.f32 %v3396_v49, %v1880_v15  ;;  %v1912_v11 = vadd.f32 %v4292_v38, %v4337_v63 }
 0x1c2   : > { %v1953_v31 = vpop.f32.mrf.mxu0  ;;  %v2416_v9 = vpop.f32.mrf.mxu1 }
 0x1c3   : > { %2856 = vst.msk [vmem:[%s4301_s16 + $0xd8] sm:$0xff] %vm2828_vm1, %v2425_v55  ;;  %v2417_v13 = vadd.f32 %v2416_v9, %v1872_v28  ;;  %v1925_v31 = vadd.f32 %v4292_v38, %v4377_v61 }
 0x1c4   : > { %v4479_v27 = vpop.f32.mrf.mxu0  ;;  %2147 = vmatmul.mubr.bf16.gmra.mxu0 %v3808_v35  ;;  %v3399_v33 = vpop.f32.mrf.mxu1  ;;  %3494 = vmatmul.mubr.msk.bf16.gmra.mxu1 %vm1545_vm0, %v3812_v20  ;;  %v1904_v20 = vadd.f32 %v4292_v38, %v4311_v50 }
 0x1c5   : > { %2854 = vst.msk [vmem:[%s4301_s16 + $0xc8] sm:$0xff] %vm2828_vm1, %v2417_v13  ;;  %v2438_v1 = vadd.f32 %v3399_v33, %v1893_v39  ;;  %v1917_v13 = vadd.f32 %v4292_v38, %v4351_v4 }
 0x1c6   : > { %v1958_v45 = vpop.f32.mrf.mxu0  ;;  %v2429_v21 = vpop.f32.mrf.mxu1 }
 0x1c7   : > { %2859 = vst.msk [vmem:[%s4301_s16 + $0xf0] sm:$0xff] %vm2828_vm1, %v2438_v1  ;;  %v2430_v51 = vadd.f32 %v2429_v21, %v1885_v47  ;;  %v1928_v1 = vadd.f32 %v4292_v38, %v4389_v12 }
 0x1c8   : > { %v4490_v43 = vpop.f32.mrf.mxu0  ;;  %v3400_v29 = vpop.f32.mrf.mxu1 }
 0x1c9   : > { %2857 = vst.msk [vmem:[%s4301_s16 + $0xe0] sm:$0xff] %vm2828_vm1, %v2430_v51  ;;  %v2441_v52 = vadd.f32 %v3400_v29, %v1896_v23  ;;  %v1920_v23 = vadd.f32 %v4292_v38, %v4363_v17 }
 0x1ca   : > { %v1961_v3 = vpop.f32.mrf.mxu0  ;;  %v2432_v44 = vpop.f32.mrf.mxu1 }
 0x1cb   : > { %2860 = vst.msk [vmem:[%s4301_s16 + $0xf8] sm:$0xff] %vm2828_vm1, %v2441_v52  ;;  %v2433_v40 = vadd.f32 %v2432_v44, %v1888_v53  ;;  %v1941_v53 = vadd.f32 %v4292_v38, %v4429_v48  ;;  %v1933_v44 = vadd.f32 %v4292_v38, %v4403_v36 }
 0x1cc   : > { %v4500_v19 = vpop.f32.mrf.mxu0  ;;  %v3403_v41 = vpop.f32.mrf.mxu1 }
 0x1cd   : > { %2858 = vst.msk [vmem:[%s4301_s16 + $0xe8] sm:$0xff] %vm2828_vm1, %v2433_v40  ;;  %v2454_v24 = vadd.f32 %v3403_v41, %v1909_v37  ;;  %v1944_v41 = vadd.f32 %v4292_v38, %v4441_v59 }
 0x1ce   : > { %v1966_v57 = vpop.f32.mrf.mxu0  ;;  %v2445_v15 = vpop.f32.mrf.mxu1 }
 0x1cf   : > { %2863 = vst.msk [vmem:[%s4301_s16 + $0x110] sm:$0xff] %vm2828_vm1, %v2454_v24  ;;  %v2446_v5 = vadd.f32 %v2445_v15, %v1901_v16  ;;  %v1936_v57 = vadd.f32 %v4292_v38, %v4415_v25 }
 0x1d0   : > { %v4510_v49 = vpop.f32.mrf.mxu0  ;;  %v3404_v35 = vpop.f32.mrf.mxu1 }
 0x1d1   : > { %2861 = vst.msk [vmem:[%s4301_s16 + $0x100] sm:$0xff] %vm2828_vm1, %v2446_v5  ;;  %v2457_v0 = vadd.f32 %v3404_v35, %v1912_v11  ;;  %v1957_v5 = vadd.f32 %v4292_v38, %v4479_v27 }
 0x1d2   : > { %v1969_v28 = vpop.f32.mrf.mxu0  ;;  %v2448_v55 = vpop.f32.mrf.mxu1 }
 0x1d3   : > { %2864 = vst.msk [vmem:[%s4301_s16 + $0x118] sm:$0xff] %vm2828_vm1, %v2457_v0  ;;  %v2449_v63 = vadd.f32 %v2448_v55, %v1904_v20  ;;  %v1949_v0 = vadd.f32 %v4292_v38, %v4455_v7 }
 0x1d4   : > { %v1972_v9 = vpop.f32.mrf.mxu0  ;;  %v3407_v39 = vpop.f32.mrf.mxu1 }
 0x1d5   : > { %2862 = vst.msk [vmem:[%s4301_s16 + $0x108] sm:$0xff] %vm2828_vm1, %v2449_v63  ;;  %v2470_v50 = vadd.f32 %v3407_v39, %v1925_v31  ;;  %v1960_v31 = vadd.f32 %v4292_v38, %v4490_v43 }
 0x1d6   : > { %v1974_v33 = vpop.f32.mrf.mxu0  ;;  %v2461_v47 = vpop.f32.mrf.mxu1 }
 0x1d7   : > { %2867 = vst.msk [vmem:[%s4301_s16 + $0x130] sm:$0xff] %vm2828_vm1, %v2470_v50  ;;  %v2462_v61 = vadd.f32 %v2461_v47, %v1917_v13  ;;  %v1952_v13 = vadd.f32 %v4292_v38, %v4467_v56  ;;  %v1973_v47 = vadd.f32 %v4292_v38, %v1972_v9 }
 0x1d8   : > { %v1975_v45 = vpop.f32.mrf.mxu0  ;;  %v3408_v21 = vpop.f32.mrf.mxu1 }
 0x1d9   : > { %2865 = vst.msk [vmem:[%s4301_s16 + $0x120] sm:$0xff] %vm2828_vm1, %v2462_v61  ;;  %v2473_v4 = vadd.f32 %v3408_v21, %v1928_v1  ;;  %v1965_v21 = vadd.f32 %v4292_v38, %v4500_v19 }
 0x1da   : > { %v1977_v51 = vpop.f32.mrf.mxu0  ;;  %v2464_v29 = vpop.f32.mrf.mxu1 }
 0x1db   : > { %2868 = vst.msk [vmem:[%s4301_s16 + $0x138] sm:$0xff] %vm2828_vm1, %v2473_v4  ;;  %v2465_v12 = vadd.f32 %v2464_v29, %v1920_v23  ;;  %v1976_v51 = vadd.f32 %v4292_v38, %v1975_v45 }
 0x1dc   : > { %v1980_v52 = vpop.f32.mrf.mxu0  ;;  %v3411_v3 = vpop.f32.mrf.mxu1 }
 0x1dd   : > { %2866 = vst.msk [vmem:[%s4301_s16 + $0x128] sm:$0xff] %vm2828_vm1, %v2465_v12  ;;  %v2486_v17 = vadd.f32 %v3411_v3, %v1941_v53  ;;  %v1968_v12 = vadd.f32 %v4292_v38, %v4510_v49 }
 0x1de   : > { %v1982_v37 = vpop.f32.mrf.mxu0  ;;  %v2477_v40 = vpop.f32.mrf.mxu1 }
 0x1df   : > { %2871 = vst.msk [vmem:[%s4301_s16 + $0x150] sm:$0xff] %vm2828_vm1, %v2486_v17  ;;  %v2478_v48 = vadd.f32 %v2477_v40, %v1933_v44 }
 0x1e0   : > { %v1983_v16 = vpop.f32.mrf.mxu0  ;;  %v3412_v24 = vpop.f32.mrf.mxu1 }
 0x1e1   : > { %2869 = vst.msk [vmem:[%s4301_s16 + $0x140] sm:$0xff] %vm2828_vm1, %v2478_v48  ;;  %v2489_v36 = vadd.f32 %v3412_v24, %v1944_v41  ;;  %v1981_v41 = vadd.f32 %v4292_v38, %v1980_v52 }
 0x1e2   : > { %v1985_v15 = vpop.f32.mrf.mxu0  ;;  %v2480_v11 = vpop.f32.mrf.mxu1 }
 0x1e3   : > { %2872 = vst.msk [vmem:[%s4301_s16 + $0x158] sm:$0xff] %vm2828_vm1, %v2489_v36  ;;  %v2481_v59 = vadd.f32 %v2480_v11, %v1936_v57 }
 0x1e4   : > { %v1988_v35 = vpop.f32.mrf.mxu0  ;;  %v3415_v20 = vpop.f32.mrf.mxu1 }
 0x1e5   : > { %2870 = vst.msk [vmem:[%s4301_s16 + $0x148] sm:$0xff] %vm2828_vm1, %v2481_v59  ;;  %v2502_v25 = vadd.f32 %v3415_v20, %v1957_v5  ;;  %v1989_v17 = vadd.f32 %v4292_v38, %v1988_v35  ;;  %v1984_v5 = vadd.f32 %v4292_v38, %v1983_v16 }
 0x1e6   : > { %v1990_v28 = vpop.f32.mrf.mxu0  ;;  %v2493_v55 = vpop.f32.mrf.mxu1 }
 0x1e7   : > { %2875 = vst.msk [vmem:[%s4301_s16 + $0x170] sm:$0xff] %vm2828_vm1, %v2502_v25  ;;  %v2494_v27 = vadd.f32 %v2493_v55, %v1949_v0 }
 0x1e8   : > { %v1991_v63 = vpop.f32.mrf.mxu0  ;;  %v3416_v39 = vpop.f32.mrf.mxu1 }
 0x1e9   : > { %2873 = vst.msk [vmem:[%s4301_s16 + $0x160] sm:$0xff] %vm2828_vm1, %v2494_v27  ;;  %v2505_v7 = vadd.f32 %v3416_v39, %v1960_v31  ;;  %v1992_v57 = vadd.f32 %v4292_v38, %v1991_v63 }
 0x1ea   : > { %v1993_v50 = vpop.f32.mrf.mxu0  ;;  %v2496_v33 = vpop.f32.mrf.mxu1 }
 0x1eb   : > { %2876 = vst.msk [vmem:[%s4301_s16 + $0x178] sm:$0xff] %vm2828_vm1, %v2505_v7  ;;  %v2497_v43 = vadd.f32 %v2496_v33, %v1952_v13 }
 0x1ec   : > { %v1996_v1 = vpop.f32.mrf.mxu0  ;;  %v3419_v61 = vpop.f32.mrf.mxu1 }
 0x1ed   : > { %2874 = vst.msk [vmem:[%s4301_s16 + $0x168] sm:$0xff] %vm2828_vm1, %v2497_v43  ;;  %v2518_v56 = vadd.f32 %v3419_v61, %v1973_v47  ;;  %v1997_v55 = vadd.f32 %v4292_v38, %v1996_v1 }
 0x1ee   : > { %v1998_v23 = vpop.f32.mrf.mxu0  ;;  %v2509_v4 = vpop.f32.mrf.mxu1 }
 0x1ef   : > { %2879 = vst.msk [vmem:[%s4301_s16 + $0x190] sm:$0xff] %vm2828_vm1, %v2518_v56  ;;  %v2510_v9 = vadd.f32 %v2509_v4, %v1965_v21 }
 0x1f0   : > { %v1999_v29 = vpop.f32.mrf.mxu0  ;;  %v3420_v53 = vpop.f32.mrf.mxu1 }
 0x1f1   : > { %2877 = vst.msk [vmem:[%s4301_s16 + $0x180] sm:$0xff] %vm2828_vm1, %v2510_v9  ;;  %v2521_v19 = vadd.f32 %v3420_v53, %v1976_v51  ;;  %v2000_v50 = vadd.f32 %v4292_v38, %v1999_v29 }
 0x1f2   : > { %v2001_v3 = vpop.f32.mrf.mxu0  ;;  %v2512_v44 = vpop.f32.mrf.mxu1 }
 0x1f3   : > { %2880 = vst.msk [vmem:[%s4301_s16 + $0x198] sm:$0xff] %vm2828_vm1, %v2521_v19  ;;  %v2513_v45 = vadd.f32 %v2512_v44, %v1968_v12 }
 0x1f4   : > { %v2004_v37 = vpop.f32.mrf.mxu0  ;;  %v3423_v40 = vpop.f32.mrf.mxu1 }
 0x1f5   : > { %2878 = vst.msk [vmem:[%s4301_s16 + $0x188] sm:$0xff] %vm2828_vm1, %v2513_v45  ;;  %v2534_v49 = vadd.f32 %v3423_v40, %v1989_v17  ;;  %v2005_v20 = vadd.f32 %v4292_v38, %v2004_v37 }
 0x1f6   : > { %v2006_v48 = vpop.f32.mrf.mxu0  ;;  %v2525_v24 = vpop.f32.mrf.mxu1 }
 0x1f7   : > { %2883 = vst.msk [vmem:[%s4301_s16 + $0x1b0] sm:$0xff] %vm2828_vm1, %v2534_v49  ;;  %v2526_v36 = vadd.f32 %v2525_v24, %v1981_v41 }
 0x1f8   : > { %v2007_v15 = vpop.f32.mrf.mxu0  ;;  %v3424_v11 = vpop.f32.mrf.mxu1 }
 0x1f9   : > { %2881 = vst.msk [vmem:[%s4301_s16 + $0x1a0] sm:$0xff] %vm2828_vm1, %v2526_v36  ;;  %v2537_v52 = vadd.f32 %v3424_v11, %v1992_v57  ;;  %v2008_v63 = vadd.f32 %v4292_v38, %v2007_v15 }
 0x1fa   : > { %v2009_v59 = vpop.f32.mrf.mxu0  ;;  %v2528_v35 = vpop.f32.mrf.mxu1 }
 0x1fb   : > { %2884 = vst.msk [vmem:[%s4301_s16 + $0x1b8] sm:$0xff] %vm2828_vm1, %v2537_v52  ;;  %v2529_v0 = vadd.f32 %v2528_v35, %v1984_v5 }
 0x1fc   : > { %v2012_v25 = vpop.f32.mrf.mxu0  ;;  %v3427_v28 = vpop.f32.mrf.mxu1 }
 0x1fd   : > { %2882 = vst.msk [vmem:[%s4301_s16 + $0x1a8] sm:$0xff] %vm2828_vm1, %v2529_v0  ;;  %v2550_v16 = vadd.f32 %v3427_v28, %v2005_v20  ;;  %v2013_v56 = vadd.f32 %v4292_v38, %v2012_v25 }
 0x1fe   : > { %v2014_v31 = vpop.f32.mrf.mxu0  ;;  %v2541_v27 = vpop.f32.mrf.mxu1 }
 0x1ff   : > { %2887 = vst.msk [vmem:[%s4301_s16 + $0x1d0] sm:$0xff] %vm2828_vm1, %v2550_v16  ;;  %v2542_v39 = vadd.f32 %v2541_v27, %v1997_v55 }
 0x200   : > { %v2015_v13 = vpop.f32.mrf.mxu0  ;;  %v3428_v7 = vpop.f32.mrf.mxu1 }
 0x201   : > { %2885 = vst.msk [vmem:[%s4301_s16 + $0x1c0] sm:$0xff] %vm2828_vm1, %v2542_v39  ;;  %v2553_v33 = vadd.f32 %v3428_v7, %v2008_v63  ;;  %v2016_v19 = vadd.f32 %v4292_v38, %v2015_v13 }
 0x202   : > { %v2017_v47 = vpop.f32.mrf.mxu0  ;;  %v2544_v43 = vpop.f32.mrf.mxu1 }
 0x203   : > { %2888 = vst.msk [vmem:[%s4301_s16 + $0x1d8] sm:$0xff] %vm2828_vm1, %v2553_v33  ;;  %v2545_v1 = vadd.f32 %v2544_v43, %v2000_v50 }
 0x204   : > { %v2020_v61 = vpop.f32.mrf.mxu0  ;;  %v3431_v21 = vpop.f32.mrf.mxu1 }
 0x205   : > { %2886 = vst.msk [vmem:[%s4301_s16 + $0x1c8] sm:$0xff] %vm2828_vm1, %v2545_v1  ;;  %v2021_v23 = vadd.f32 %v4292_v38, %v2020_v61 }
 0x206   : > { %v2022_v4 = vpop.f32.mrf.mxu0  ;;  %v2557_v51 = vpop.f32.mrf.mxu1 }
 0x207   : > { %v2566_v9 = vadd.f32 %v3431_v21, %v2021_v23  ;;  %v2558_v29 = vadd.f32 %v2557_v51, %v2013_v56 }
 0x208   : > { %v2023_v53 = vpop.f32.mrf.mxu0  ;;  %v3432_v12 = vpop.f32.mrf.mxu1 }
 0x209   : > { %2891 = vst.msk [vmem:[%s4301_s16 + $0x1f0] sm:$0xff] %vm2828_vm1, %v2566_v9  ;;  %2889 = vst.msk [vmem:[%s4301_s16 + $0x1e0] sm:$0xff] %vm2828_vm1, %v2558_v29  ;;  %v2024_v3 = vadd.f32 %v4292_v38, %v2023_v53 }
 0x20a   : > { %v2025_v44 = vpop.f32.mrf.mxu0  ;;  %v2560_v17 = vpop.f32.mrf.mxu1 }
 0x20b   : > { %v2569_v45 = vadd.f32 %v3432_v12, %v2024_v3  ;;  %v2561_v37 = vadd.f32 %v2560_v17, %v2016_v19 }
 0x20c   : > { %v2028_v40 = vpop.f32.mrf.mxu0  ;;  %v3435_v41 = vpop.f32.mrf.mxu1 }
 0x20d   : > { %2892 = vst.msk [vmem:[%s4301_s16 + $0x1f8] sm:$0xff] %vm2828_vm1, %v2569_v45  ;;  %2890 = vst.msk [vmem:[%s4301_s16 + $0x1e8] sm:$0xff] %vm2828_vm1, %v2561_v37  ;;  %v2029_v49 = vadd.f32 %v4292_v38, %v2028_v40 }
 0x20e   : > { %v2030_v48 = vpop.f32.mrf.mxu0  ;;  %v2573_v24 = vpop.f32.mrf.mxu1 }
 0x20f   : > { %v2574_v57 = vadd.f32 %v2573_v24, %v2029_v49 }
 0x210   : > { %v2031_v36 = vpop.f32.mrf.mxu0  ;;  %v3436_v15 = vpop.f32.mrf.mxu1 }
 0x211   : > { %2893 = vst.msk [vmem:[%s4301_s16 + $0x200] sm:$0xff] %vm2828_vm1, %v2574_v57  ;;  %v2032_v11 = vadd.f32 %v4292_v38, %v2031_v36 }
 0x212   : > { %v2033_v5 = vpop.f32.mrf.mxu0  ;;  %v2576_v52 = vpop.f32.mrf.mxu1 }
 0x213   : > { %v2577_v59 = vadd.f32 %v2576_v52, %v2032_v11 }
 0x214   : > { %v2036_v35 = vpop.f32.mrf.mxu0  ;;  %v3439_v20 = vpop.f32.mrf.mxu1 }
 0x215   : > { %2894 = vst.msk [vmem:[%s4301_s16 + $0x208] sm:$0xff] %vm2828_vm1, %v2577_v59  ;;  %v2037_v0 = vadd.f32 %v4292_v38, %v2036_v35 }
 0x216   : > { %v2038_v25 = vpop.f32.mrf.mxu0  ;;  %v2589_v28 = vpop.f32.mrf.mxu1 }
 0x217   : > { %v2582_v55 = vadd.f32 %v3435_v41, %v2037_v0 }
 0x218   : > { %v2039_v16 = vpop.f32.mrf.mxu0  ;;  %v3440_v31 = vpop.f32.mrf.mxu1 }
 0x219   : > { %2895 = vst.msk [vmem:[%s4301_s16 + $0x210] sm:$0xff] %vm2828_vm1, %v2582_v55  ;;  %v2040_v27 = vadd.f32 %v4292_v38, %v2039_v16 }
 0x21a   : > { %v2041_v63 = vpop.f32.mrf.mxu0  ;;  %v2592_v39 = vpop.f32.mrf.mxu1 }
 0x21b   : > { %v2585_v13 = vadd.f32 %v3436_v15, %v2040_v27 }
 0x21c   : > { %v2044_v7 = vpop.f32.mrf.mxu0  ;;  %v3443_v50 = vpop.f32.mrf.mxu1 }
 0x21d   : > { %2896 = vst.msk [vmem:[%s4301_s16 + $0x218] sm:$0xff] %vm2828_vm1, %v2585_v13  ;;  %v2045_v33 = vadd.f32 %v4292_v38, %v2044_v7 }
 0x21e   : > { %v2046_v47 = vpop.f32.mrf.mxu0  ;;  %v2605_v43 = vpop.f32.mrf.mxu1 }
 0x21f   : > { %v2590_v1 = vadd.f32 %v2589_v28, %v2045_v33 }
 0x220   : > { %v2047_v61 = vpop.f32.mrf.mxu0  ;;  %v3444_v21 = vpop.f32.mrf.mxu1 }
 0x221   : > { %2897 = vst.msk [vmem:[%s4301_s16 + $0x220] sm:$0xff] %vm2828_vm1, %v2590_v1  ;;  %v2048_v56 = vadd.f32 %v4292_v38, %v2047_v61 }
 0x222   : > { %v2049_v23 = vpop.f32.mrf.mxu0  ;;  %v2608_v4 = vpop.f32.mrf.mxu1 }
 0x223   : > { %v2593_v51 = vadd.f32 %v2592_v39, %v2048_v56 }
 0x224   : > { %v2052_v9 = vpop.f32.mrf.mxu0  ;;  %v3447_v29 = vpop.f32.mrf.mxu1 }
 0x225   : > { %2898 = vst.msk [vmem:[%s4301_s16 + $0x228] sm:$0xff] %vm2828_vm1, %v2593_v51  ;;  %v2053_v53 = vadd.f32 %v4292_v38, %v2052_v9 }
 0x226   : > { %v2054_v12 = vpop.f32.mrf.mxu0  ;;  %v2621_v19 = vpop.f32.mrf.mxu1 }
 0x227   : > { %v2598_v3 = vadd.f32 %v3439_v20, %v2053_v53 }
 0x228   : > { %v2055_v44 = vpop.f32.mrf.mxu0  ;;  %v3448_v17 = vpop.f32.mrf.mxu1 }
 0x229   : > { %2899 = vst.msk [vmem:[%s4301_s16 + $0x230] sm:$0xff] %vm2828_vm1, %v2598_v3  ;;  %v2056_v45 = vadd.f32 %v4292_v38, %v2055_v44 }
 0x22a   : > { %v2057_v37 = vpop.f32.mrf.mxu0  ;;  %v2624_v40 = vpop.f32.mrf.mxu1 }
 0x22b   : > { %v2601_v41 = vadd.f32 %v3440_v31, %v2056_v45 }
 0x22c   : > { %v2060_v49 = vpop.f32.mrf.mxu0  ;;  %v4640_v48 = vpop.f32.mrf.mxu1 }
 0x22d   : > { %2900 = vst.msk [vmem:[%s4301_s16 + $0x238] sm:$0xff] %vm2828_vm1, %v2601_v41  ;;  %v2061_v24 = vadd.f32 %v4292_v38, %v2060_v49 }
 0x22e   : > { %v2062_v57 = vpop.f32.mrf.mxu0  ;;  %v2637_v36 = vpop.f32.mrf.mxu1 }
 0x22f   : > { %v2606_v15 = vadd.f32 %v2605_v43, %v2061_v24 }
 0x230   : > { %v2063_v11 = vpop.f32.mrf.mxu0  ;;  %v4645_v5 = vpop.f32.mrf.mxu1 }
 0x231   : > { %2901 = vst.msk [vmem:[%s4301_s16 + $0x240] sm:$0xff] %vm2828_vm1, %v2606_v15  ;;  %v2064_v52 = vadd.f32 %v4292_v38, %v2063_v11  ;;  %v2165_v15 = vadd.f32 %v4292_v38, %v4080_v6 }
 0x232   : > { %v2065_v59 = vpop.f32.mrf.mxu0  ;;  %v4650_v35 = vpop.f32.mrf.mxu1 }
 0x233   : > { %v2609_v20 = vadd.f32 %v2608_v4, %v2064_v52 }
 0x234   : > { %v2068_v0 = vpop.f32.mrf.mxu0  ;;  %v4652_v25 = vpop.f32.mrf.mxu1 }
 0x235   : > { %2902 = vst.msk [vmem:[%s4301_s16 + $0x248] sm:$0xff] %vm2828_vm1, %v2609_v20  ;;  %v2069_v28 = vadd.f32 %v4292_v38, %v2068_v0 }
 0x236   : > { %v2070_v55 = vpop.f32.mrf.mxu0  ;;  %v4657_v16 = vpop.f32.mrf.mxu1 }
 0x237   : > { %v2614_v31 = vadd.f32 %v3443_v50, %v2069_v28 }
 0x238   : > { %v2071_v27 = vpop.f32.mrf.mxu0  ;;  %v4659_v63 = vpop.f32.mrf.mxu1 }
 0x239   : > { %2903 = vst.msk [vmem:[%s4301_s16 + $0x250] sm:$0xff] %vm2828_vm1, %v2614_v31  ;;  %v2072_v39 = vadd.f32 %v4292_v38, %v2071_v27  ;;  %v2168_v31 = vadd.f32 %v4292_v38, %v4086_v10 }
 0x23a   : > { %v2073_v13 = vpop.f32.mrf.mxu0  ;;  %v4664_v7 = vpop.f32.mrf.mxu1 }
 0x23b   : > { %v2617_v33 = vadd.f32 %v3444_v21, %v2072_v39 }
 0x23c   : > { %v2076_v47 = vpop.f32.mrf.mxu0  ;;  %v4666_v43 = vpop.f32.mrf.mxu1 }
 0x23d   : > { %2904 = vst.msk [vmem:[%s4301_s16 + $0x258] sm:$0xff] %vm2828_vm1, %v2617_v33  ;;  %v2077_v50 = vadd.f32 %v4292_v38, %v2076_v47 }
 0x23e   : > { %v2078_v1 = vpop.f32.mrf.mxu0  ;;  %v4671_v61 = vpop.f32.mrf.mxu1 }
 0x23f   : > { %v2622_v56 = vadd.f32 %v2621_v19, %v2077_v50 }
 0x240   : > { %v2079_v23 = vpop.f32.mrf.mxu0  ;;  %v4673_v4 = vpop.f32.mrf.mxu1 }
 0x241   : > { %2905 = vst.msk [vmem:[%s4301_s16 + $0x260] sm:$0xff] %vm2828_vm1, %v2622_v56  ;;  %v2080_v21 = vadd.f32 %v4292_v38, %v2079_v23 }
 0x242   : > { %v2081_v51 = vpop.f32.mrf.mxu0  ;;  %v4678_v9 = vpop.f32.mrf.mxu1 }
 0x243   : > { %v2625_v53 = vadd.f32 %v2624_v40, %v2080_v21 }
 0x244   : > { %v2084_v12 = vpop.f32.mrf.mxu0  ;;  %v4680_v3 = vpop.f32.mrf.mxu1 }
 0x245   : > { %2906 = vst.msk [vmem:[%s4301_s16 + $0x268] sm:$0xff] %vm2828_vm1, %v2625_v53  ;;  %v2085_v19 = vadd.f32 %v4292_v38, %v2084_v12 }
 0x246   : > { %v2086_v44 = vpop.f32.mrf.mxu0  ;;  %v4685_v45 = vpop.f32.mrf.mxu1 }
 0x247   : > { %v2630_v37 = vadd.f32 %v3447_v29, %v2085_v19  ;;  %v2157_v29 = vadd.f32 %v4292_v38, %v4066_v58  ;;  %v2160_v58 = vadd.f32 %v4292_v38, %v4072_v62 }
 0x248   : > { %v2087_v41 = vpop.f32.mrf.mxu0  ;;  %v4687_v49 = vpop.f32.mrf.mxu1 }
 0x249   : > { %2907 = vst.msk [vmem:[%s4301_s16 + $0x270] sm:$0xff] %vm2828_vm1, %v2630_v37  ;;  %v2088_v40 = vadd.f32 %v4292_v38, %v2087_v41 }
 0x24a   : > { %v2089_v24 = vpop.f32.mrf.mxu0  ;;  %v4692_v57 = vpop.f32.mrf.mxu1 }
 0x24b   : > { %v2633_v11 = vadd.f32 %v3448_v17, %v2088_v40 }
 0x24c   : > { %v2092_v52 = vpop.f32.mrf.mxu0  ;;  %v3467_v59 = vpop.f32.mrf.mxu1 }
 0x24d   : > { %2908 = vst.msk [vmem:[%s4301_s16 + $0x278] sm:$0xff] %vm2828_vm1, %v2633_v11  ;;  %v2093_v20 = vadd.f32 %v4292_v38, %v2092_v52  ;;  %v2710_v0 = vadd.f32 %v3467_v59, %v2165_v15 }
 0x24e   : > { %v2094_v28 = vpop.f32.mrf.mxu0  ;;  %v2701_v55 = vpop.f32.mrf.mxu1 }
 0x24f   : > { %v2638_v6 = vadd.f32 %v2637_v36, %v2093_v20  ;;  %2927 = vst.msk [vmem:[%s4301_s16 + $0x310] sm:$0xff] %vm2828_vm1, %v2710_v0  ;;  %v2702_v17 = vadd.f32 %v2701_v55, %v2157_v29  ;;  %v4715_v36 = vld [vmem:[%s4897_s2] ss:$0 sm:$0xff] }
 0x250   : > { %v2095_v27 = vpop.f32.mrf.mxu0  ;;  %v3468_v39 = vpop.f32.mrf.mxu1  ;;  %v2181_v50 = vadd.f32 %v4715_v36, %v4108_v30  ;;  %v2173_v23 = vadd.f32 %v4715_v36, %v4094_v18  ;;  %v2176_v37 = vadd.f32 %v4715_v36, %v4100_v22  ;;  %v2189_v59 = vadd.f32 %v4715_v36, %v4122_v42 }
 0x251   : > { %2909 = vst.msk [vmem:[%s4301_s16 + $0x280] sm:$0xff] %vm2828_vm1, %v2638_v6  ;;  %2925 = vst.msk [vmem:[%s4301_s16 + $0x300] sm:$0xff] %vm2828_vm1, %v2702_v17  ;;  %v2096_v13 = vadd.f32 %v4292_v38, %v2095_v27  ;;  %v2713_v33 = vadd.f32 %v3468_v39, %v2168_v31  ;;  %v2192_v6 = vadd.f32 %v4715_v36, %v4128_v46 }
 0x252   : > { %v2097_v10 = vpop.f32.mrf.mxu0  ;;  %v2704_v47 = vpop.f32.mrf.mxu1 }
 0x253   : > { %v2641_v62 = vadd.f32 %v4650_v35, %v2096_v13  ;;  %2928 = vst.msk [vmem:[%s4301_s16 + $0x318] sm:$0xff] %vm2828_vm1, %v2713_v33  ;;  %v2705_v1 = vadd.f32 %v2704_v47, %v2160_v58  ;;  %v2184_v35 = vadd.f32 %v4715_v36, %v4114_v34  ;;  %v2205_v10 = vadd.f32 %v4715_v36, %v4150_v8 }
 0x254   : > { %v2100_v56 = vpop.f32.mrf.mxu0  ;;  %v3471_v38 = vpop.f32.mrf.mxu1 }
 0x255   : > { %2910 = vst.msk [vmem:[%s4301_s16 + $0x288] sm:$0xff] %vm2828_vm1, %v2641_v62  ;;  %2926 = vst.msk [vmem:[%s4301_s16 + $0x308] sm:$0xff] %vm2828_vm1, %v2705_v1  ;;  %v2101_v21 = vadd.f32 %v4715_v36, %v2100_v56  ;;  %v2726_v51 = vadd.f32 %v3471_v38, %v2181_v50 }
 0x256   : > { %v2102_v30 = vpop.f32.mrf.mxu0  ;;  %v2717_v53 = vpop.f32.mrf.mxu1 }
 0x257   : > { %v2646_v12 = vadd.f32 %v4640_v48, %v2101_v21  ;;  %2931 = vst.msk [vmem:[%s4301_s16 + $0x330] sm:$0xff] %vm2828_vm1, %v2726_v51  ;;  %v2718_v19 = vadd.f32 %v2717_v53, %v2173_v23  ;;  %v2197_v48 = vadd.f32 %v4715_v36, %v4136_v54  ;;  %v2208_v23 = vadd.f32 %v4715_v36, %v4156_v14 }
 0x258   : > { %v2103_v44 = vpop.f32.mrf.mxu0  ;;  %v3472_v18 = vpop.f32.mrf.mxu1 }
 0x259   : > { %2911 = vst.msk [vmem:[%s4301_s16 + $0x290] sm:$0xff] %vm2828_vm1, %v2646_v12  ;;  %2929 = vst.msk [vmem:[%s4301_s16 + $0x320] sm:$0xff] %vm2828_vm1, %v2718_v19  ;;  %v2104_v41 = vadd.f32 %v4715_v36, %v2103_v44  ;;  %v2729_v40 = vadd.f32 %v3472_v18, %v2184_v35  ;;  %v4914_v19 = vld [vmem:[#allocation2_spill] sm:$0xff] }
 0x25a   : > { %v2105_v34 = vpop.f32.mrf.mxu0  ;;  %v2720_v24 = vpop.f32.mrf.mxu1  ;;  %v2221_v44 = vadd.f32 %v4715_v36, %v4914_v19 }
 0x25b   : > { %v2649_v15 = vadd.f32 %v4645_v5, %v2104_v41  ;;  %2932 = vst.msk [vmem:[%s4301_s16 + $0x338] sm:$0xff] %vm2828_vm1, %v2729_v40  ;;  %v2721_v11 = vadd.f32 %v2720_v24, %v2176_v37  ;;  %v2200_v5 = vadd.f32 %v4715_v36, %v4142_v60 }
 0x25c   : > { %v2108_v52 = vpop.f32.mrf.mxu0  ;;  %v3475_v22 = vpop.f32.mrf.mxu1 }
 0x25d   : > { %2912 = vst.msk [vmem:[%s4301_s16 + $0x298] sm:$0xff] %vm2828_vm1, %v2649_v15  ;;  %2930 = vst.msk [vmem:[%s4301_s16 + $0x328] sm:$0xff] %vm2828_vm1, %v2721_v11  ;;  %v2109_v29 = vadd.f32 %v4715_v36, %v2108_v52  ;;  %v2742_v20 = vadd.f32 %v3475_v22, %v2197_v48  ;;  %v4916_v11 = vld [vmem:[#allocation3_spill] sm:$0xff] }
 0x25e   : > { %v2110_v54 = vpop.f32.mrf.mxu0  ;;  %v2733_v0 = vpop.f32.mrf.mxu1  ;;  %v2224_v52 = vadd.f32 %v4715_v36, %v4916_v11  ;;  %v4926_v11 = vld [vmem:[#allocation13_spill] sm:$0xff] }
 0x25f   : > { %v2654_v28 = vadd.f32 %v4657_v16, %v2109_v29  ;;  %2935 = vst.msk [vmem:[%s4301_s16 + $0x350] sm:$0xff] %vm2828_vm1, %v2742_v20  ;;  %v2734_v55 = vadd.f32 %v2733_v0, %v2189_v59  ;;  %v2213_v16 = vadd.f32 %v4715_v36, %v4164_v26 }
 0x260   : > { %v2111_v31 = vpop.f32.mrf.mxu0  ;;  %v3476_v42 = vpop.f32.mrf.mxu1 }
 0x261   : > { %2913 = vst.msk [vmem:[%s4301_s16 + $0x2a0] sm:$0xff] %vm2828_vm1, %v2654_v28  ;;  %2933 = vst.msk [vmem:[%s4301_s16 + $0x340] sm:$0xff] %vm2828_vm1, %v2734_v55  ;;  %v2112_v17 = vadd.f32 %v4715_v36, %v2111_v31  ;;  %v2745_v27 = vadd.f32 %v3476_v42, %v2200_v5  ;;  %v4918_v31 = vld [vmem:[#allocation5_spill] sm:$0xff] }
 0x262   : > { %v2113_v60 = vpop.f32.mrf.mxu0  ;;  %v2736_v39 = vpop.f32.mrf.mxu1  ;;  %v2237_v42 = vadd.f32 %v4715_v36, %v4918_v31 }
 0x263   : > { %v2657_v58 = vadd.f32 %v4664_v7, %v2112_v17  ;;  %2936 = vst.msk [vmem:[%s4301_s16 + $0x358] sm:$0xff] %vm2828_vm1, %v2745_v27  ;;  %v2737_v13 = vadd.f32 %v2736_v39, %v2192_v6  ;;  %v2216_v7 = vadd.f32 %v4715_v36, %v4170_v32 }
 0x264   : > { %v2116_v33 = vpop.f32.mrf.mxu0  ;;  %v3479_v46 = vpop.f32.mrf.mxu1 }
 0x265   : > { %2914 = vst.msk [vmem:[%s4301_s16 + $0x2a8] sm:$0xff] %vm2828_vm1, %v2657_v58  ;;  %2934 = vst.msk [vmem:[%s4301_s16 + $0x348] sm:$0xff] %vm2828_vm1, %v2737_v13  ;;  %v2117_v47 = vadd.f32 %v4715_v36, %v2116_v33  ;;  %v2758_v50 = vadd.f32 %v3479_v46, %v2213_v16  ;;  %v4920_v46 = vld [vmem:[#allocation6_spill] sm:$0xff] }
 0x266   : > { %v2118_v26 = vpop.f32.mrf.mxu0  ;;  %v2749_v62 = vpop.f32.mrf.mxu1 }
 0x267   : > { %v2662_v1 = vadd.f32 %v4652_v25, %v2117_v47  ;;  %2939 = vst.msk [vmem:[%s4301_s16 + $0x370] sm:$0xff] %vm2828_vm1, %v2758_v50  ;;  %v2750_v56 = vadd.f32 %v2749_v62, %v2205_v10  ;;  %v2229_v25 = vadd.f32 %v4715_v36, %v4192_v2  ;;  %v2240_v10 = vadd.f32 %v4715_v36, %v4920_v46 }
 0x268   : > { %v2119_v38 = vpop.f32.mrf.mxu0  ;;  %v3480_v8 = vpop.f32.mrf.mxu1 }
 0x269   : > { %2915 = vst.msk [vmem:[%s4301_s16 + $0x2b0] sm:$0xff] %vm2828_vm1, %v2662_v1  ;;  %2937 = vst.msk [vmem:[%s4301_s16 + $0x360] sm:$0xff] %vm2828_vm1, %v2750_v56  ;;  %v2120_v21 = vadd.f32 %v4715_v36, %v2119_v38  ;;  %v2761_v51 = vadd.f32 %v3480_v8, %v2216_v7 }
 0x26a   : > { %v2121_v32 = vpop.f32.mrf.mxu0  ;;  %v2752_v30 = vpop.f32.mrf.mxu1 }
 0x26b   : > { %v2665_v53 = vadd.f32 %v4659_v63, %v2120_v21  ;;  %2940 = vst.msk [vmem:[%s4301_s16 + $0x378] sm:$0xff] %vm2828_vm1, %v2761_v51  ;;  %v2753_v35 = vadd.f32 %v2752_v30, %v2208_v23  ;;  %v4915_v63 = vld [vmem:[#allocation4_spill] sm:$0xff]  ;;  %v4922_v23 = vld [vmem:[#allocation9_spill] sm:$0xff] }
 0x26c   : > { %v2124_v12 = vpop.f32.mrf.mxu0  ;;  %v3483_v14 = vpop.f32.mrf.mxu1  ;;  %v2232_v40 = vadd.f32 %v4715_v36, %v4915_v63  ;;  %v2253_v21 = vadd.f32 %v4715_v36, %v4922_v23 }
 0x26d   : > { %2916 = vst.msk [vmem:[%s4301_s16 + $0x2b8] sm:$0xff] %vm2828_vm1, %v2665_v53  ;;  %2938 = vst.msk [vmem:[%s4301_s16 + $0x368] sm:$0xff] %vm2828_vm1, %v2753_v35  ;;  %v2125_v18 = vadd.f32 %v4715_v36, %v2124_v12  ;;  %v2774_v37 = vadd.f32 %v3483_v14, %v2229_v25 }
 0x26e   : > { %v2126_v2 = vpop.f32.mrf.mxu0  ;;  %v2765_v41 = vpop.f32.mrf.mxu1 }
 0x26f   : > { %v2670_v34 = vadd.f32 %v4671_v61, %v2125_v18  ;;  %2943 = vst.msk [vmem:[%s4301_s16 + $0x390] sm:$0xff] %vm2828_vm1, %v2774_v37  ;;  %v2766_v24 = vadd.f32 %v2765_v41, %v2221_v44  ;;  %v4917_v61 = vld [vmem:[#allocation7_spill] sm:$0xff]  ;;  %v4924_v44 = vld [vmem:[#allocation10_spill] sm:$0xff] }
 0x270   : > { %v2127_v48 = vpop.f32.mrf.mxu0  ;;  %v3484_v15 = vpop.f32.mrf.mxu1  ;;  %v2245_v54 = vadd.f32 %v4715_v36, %v4917_v61  ;;  %v2256_v18 = vadd.f32 %v4715_v36, %v4924_v44 }
 0x271   : > { %2917 = vst.msk [vmem:[%s4301_s16 + $0x2c0] sm:$0xff] %vm2828_vm1, %v2670_v34  ;;  %2941 = vst.msk [vmem:[%s4301_s16 + $0x380] sm:$0xff] %vm2828_vm1, %v2766_v24  ;;  %v2128_v22 = vadd.f32 %v4715_v36, %v2127_v48  ;;  %v2777_v59 = vadd.f32 %v3484_v15, %v2232_v40 }
 0x272   : > { %v2129_v29 = vpop.f32.mrf.mxu0  ;;  %v2768_v20 = vpop.f32.mrf.mxu1 }
 0x273   : > { %v2673_v0 = vadd.f32 %v4678_v9, %v2128_v22  ;;  %2944 = vst.msk [vmem:[%s4301_s16 + $0x398] sm:$0xff] %vm2828_vm1, %v2777_v59  ;;  %v2769_v5 = vadd.f32 %v2768_v20, %v2224_v52  ;;  %v4919_v9 = vld [vmem:[#allocation8_spill] sm:$0xff]  ;;  %v2269_v52 = vadd.f32 %v4715_v36, %v4926_v11 }
 0x274   : > { %v2132_v28 = vpop.f32.mrf.mxu0  ;;  %v3487_v55 = vpop.f32.mrf.mxu1  ;;  %v2248_v39 = vadd.f32 %v4715_v36, %v4919_v9  ;;  %v4927_v20 = vld [vmem:[#allocation16_spill] sm:$0xff] }
 0x275   : > { %2918 = vst.msk [vmem:[%s4301_s16 + $0x2c8] sm:$0xff] %vm2828_vm1, %v2673_v0  ;;  %2942 = vst.msk [vmem:[%s4301_s16 + $0x388] sm:$0xff] %vm2828_vm1, %v2769_v5  ;;  %v2133_v6 = vadd.f32 %v4715_v36, %v2132_v28  ;;  %v2790_v17 = vadd.f32 %v3487_v55, %v2245_v54  ;;  %v2280_v61 = vadd.f32 %v4715_v36, %v4927_v20  ;;  %v4928_v55 = vld [vmem:[#allocation14_spill] sm:$0xff] }
 0x276   : > { %v2134_v27 = vpop.f32.mrf.mxu0  ;;  %v2781_v60 = vpop.f32.mrf.mxu1  ;;  %v2272_v31 = vadd.f32 %v4715_v36, %v4928_v55 }
 0x277   : > { %v2678_v16 = vadd.f32 %v4666_v43, %v2133_v6  ;;  %2947 = vst.msk [vmem:[%s4301_s16 + $0x3b0] sm:$0xff] %vm2828_vm1, %v2790_v17  ;;  %v2782_v58 = vadd.f32 %v2781_v60, %v2237_v42  ;;  %v4921_v43 = vld [vmem:[#allocation11_spill] sm:$0xff] }
 0x278   : > { %v2135_v13 = vpop.f32.mrf.mxu0  ;;  %v3488_v33 = vpop.f32.mrf.mxu1  ;;  %v2261_v7 = vadd.f32 %v4715_v36, %v4921_v43 }
 0x279   : > { %2919 = vst.msk [vmem:[%s4301_s16 + $0x2d0] sm:$0xff] %vm2828_vm1, %v2678_v16  ;;  %2945 = vst.msk [vmem:[%s4301_s16 + $0x3a0] sm:$0xff] %vm2828_vm1, %v2782_v58  ;;  %v2136_v47 = vadd.f32 %v4715_v36, %v2135_v13  ;;  %v2793_v50 = vadd.f32 %v3488_v33, %v2248_v39 }
 0x27a   : > { %v2137_v26 = vpop.f32.mrf.mxu0  ;;  %v2784_v62 = vpop.f32.mrf.mxu1 }
 0x27b   : > { %v2681_v1 = vadd.f32 %v4673_v4, %v2136_v47  ;;  %2948 = vst.msk [vmem:[%s4301_s16 + $0x3b8] sm:$0xff] %vm2828_vm1, %v2793_v50  ;;  %v2785_v56 = vadd.f32 %v2784_v62, %v2240_v10  ;;  %v4923_v4 = vld [vmem:[#allocation12_spill] sm:$0xff] }
 0x27c   : > { %v2140_v38 = vpop.f32.mrf.mxu0  ;;  %v3491_v8 = vpop.f32.mrf.mxu1  ;;  %v2264_v53 = vadd.f32 %v4715_v36, %v4923_v4 }
 0x27d   : > { %2920 = vst.msk [vmem:[%s4301_s16 + $0x2d8] sm:$0xff] %vm2828_vm1, %v2681_v1  ;;  %2946 = vst.msk [vmem:[%s4301_s16 + $0x3a8] sm:$0xff] %vm2828_vm1, %v2785_v56  ;;  %v2141_v51 = vadd.f32 %v4715_v36, %v2140_v38  ;;  %v2806_v32 = vadd.f32 %v3491_v8, %v2261_v7 }
 0x27e   : > { %v2142_v30 = vpop.f32.mrf.mxu0  ;;  %v2797_v25 = vpop.f32.mrf.mxu1 }
 0x27f   : > { %v2686_v35 = vadd.f32 %v4685_v45, %v2141_v51  ;;  %2951 = vst.msk [vmem:[%s4301_s16 + $0x3d0] sm:$0xff] %vm2828_vm1, %v2806_v32  ;;  %v2798_v12 = vadd.f32 %v2797_v25, %v2253_v21  ;;  %v4925_v45 = vld [vmem:[#allocation15_spill] sm:$0xff] }
 0x280   : > { %v2143_v14 = vpop.f32.mrf.mxu0  ;;  %v3492_v19 = vpop.f32.mrf.mxu1  ;;  %v2277_v40 = vadd.f32 %v4715_v36, %v4925_v45 }
 0x281   : > { %2921 = vst.msk [vmem:[%s4301_s16 + $0x2e0] sm:$0xff] %vm2828_vm1, %v2686_v35  ;;  %2949 = vst.msk [vmem:[%s4301_s16 + $0x3c0] sm:$0xff] %vm2828_vm1, %v2798_v12  ;;  %v2144_v37 = vadd.f32 %v4715_v36, %v2143_v14  ;;  %v2809_v2 = vadd.f32 %v3492_v19, %v2264_v53 }
 0x282   : > { %v2145_v41 = vpop.f32.mrf.mxu0  ;;  %v2800_v63 = vpop.f32.mrf.mxu1 }
 0x283   : > { %v2689_v34 = vadd.f32 %v4692_v57, %v2144_v37  ;;  %2952 = vst.msk [vmem:[%s4301_s16 + $0x3d8] sm:$0xff] %vm2828_vm1, %v2809_v2  ;;  %v2801_v24 = vadd.f32 %v2800_v63, %v2256_v18 }
 0x284   : > { %v2148_v48 = vpop.f32.mrf.mxu0  ;;  %v3495_v15 = vpop.f32.mrf.mxu1 }
 0x285   : > { %2922 = vst.msk [vmem:[%s4301_s16 + $0x2e8] sm:$0xff] %vm2828_vm1, %v2689_v34  ;;  %2950 = vst.msk [vmem:[%s4301_s16 + $0x3c8] sm:$0xff] %vm2828_vm1, %v2801_v24  ;;  %v2149_v22 = vadd.f32 %v4715_v36, %v2148_v48  ;;  %v2822_v59 = vadd.f32 %v3495_v15, %v2277_v40 }
 0x286   : > { %v2150_v29 = vpop.f32.mrf.mxu0  ;;  %v2813_v57 = vpop.f32.mrf.mxu1 }
 0x287   : > { %v2694_v54 = vadd.f32 %v4680_v3, %v2149_v22  ;;  %2955 = vst.msk [vmem:[%s4301_s16 + $0x3f0] sm:$0xff] %vm2828_vm1, %v2822_v59  ;;  %v2814_v0 = vadd.f32 %v2813_v57, %v2269_v52 }
 0x288   : > { %v2151_v5 = vpop.f32.mrf.mxu0  ;;  %v3496_v28 = vpop.f32.mrf.mxu1 }
 0x289   : > { %2923 = vst.msk [vmem:[%s4301_s16 + $0x2f0] sm:$0xff] %vm2828_vm1, %v2694_v54  ;;  %2953 = vst.msk [vmem:[%s4301_s16 + $0x3e0] sm:$0xff] %vm2828_vm1, %v2814_v0  ;;  %v2152_v42 = vadd.f32 %v4715_v36, %v2151_v5  ;;  %v2825_v6 = vadd.f32 %v3496_v28, %v2280_v61 }
 0x28a   : > { %v2153_v17 = vpop.f32.mrf.mxu0  ;;  %v2816_v27 = vpop.f32.mrf.mxu1 }
 0x28b   : > { %v2697_v3 = vadd.f32 %v4687_v49, %v2152_v42  ;;  %2956 = vst.msk [vmem:[%s4301_s16 + $0x3f8] sm:$0xff] %vm2828_vm1, %v2825_v6  ;;  %v2817_v60 = vadd.f32 %v2816_v27, %v2272_v31 }
 0x28d   : > { %2924 = vst.msk [vmem:[%s4301_s16 + $0x2f8] sm:$0xff] %vm2828_vm1, %v2697_v3  ;;  %2954 = vst.msk [vmem:[%s4301_s16 + $0x3e8] sm:$0xff] %vm2828_vm1, %v2817_v60 }
 0x28e PF: > { %s13_s12 = sadd.s32 1, %s3820_s12  }
 0x28f   : > { %p10_p4 = scmp.ge.s32.totalorder %s13_s12, 4  }
 0x291   :  { %12 = sbr.rel (!%p10_p4) target bundleno = 1 (0x1), region = 62 }

</bundles_post_ra>
